<compile_context>
chip_gen: v7x
topology: tpu7x:2x2x1
jax: 0.10.0
libtpu: 0.0.40
codegen_flags: <defaults>
</compile_context>

<pallas_src>
import jax
import jax.numpy as jnp
from jax.experimental import pallas as pl
from jax.experimental.pallas import tpu as pltpu

EPS = 1e-5

# Spatial pipeline implied by the module's `x.view(-1, 192)`:
H0, W0 = 30, 45
H1, W1 = 14, 22          # conv1 out (stride 2)
H1P, W1P = 7, 11         # conv1 out, per stride-phase grid (2x2 phases)
H2, W2 = 6, 10           # conv2 out (stride 2)
H3, W3 = 4, 8            # conv3 out (stride 1)
H4, W4 = 2, 6            # conv4 out (stride 1)
C1, C2, C3, C4 = 8, 8, 8, 16
FEAT = C4 * H4 * W4      # 192


def _full_spec(shape):
    """BlockSpec covering the whole (small) array; grid=(1,)."""
    nd = len(shape)
    return pl.BlockSpec(shape, lambda i: (0,) * nd)


# ------------------------------ fused kernel -------------------------------

def duelq_fused_kernel(p1_ref, w1_ref, s1_ref, w2_ref, s2_ref, w3_ref, s3_ref,
                       w4_ref, s4_ref, wh1_ref, bh1_ref, wh2_ref, bh2_ref,
                       o_ref,
                       a1, p2, a2, p3, a3, p4, a4, feat):
    """Whole DuelQNet forward in one kernel; every intermediate stays in VMEM."""
    B = o_ref.shape[0]
    f32 = jnp.float32

    def mm_bn_relu(p, w_ref, shift_ref):
        # conv-as-matmul; BN scale is pre-folded into w, shift is the bias.
        y = jnp.dot(p, w_ref[...], preferred_element_type=f32)
        return jnp.maximum(y + shift_ref[...], 0.0)

    # ---- conv1 (stride 2): one matmul per stride phase.  The phase split makes
    # conv2's stride-2 window reads below *contiguous* row slices of a1.
    # a1[ph, (b*7+ii)*11+jj, :] == conv1_out[b, 2*ii + ph//2, 2*jj + ph%2, :]
    for ph in range(4):
        a1[ph, :, :] = mm_bn_relu(p1_ref[ph, :, :], w1_ref, s1_ref)

    # ---- conv2 (stride 2): gather im2col patches from the phase-decomposed
    # conv1 activation (contiguous slices only), then one (B*60, 72) matmul.
    for b in range(B):
        for ho in range(H2):
            r0 = (b * H2 + ho) * W2
            for dy in range(3):
                for dx in range(3):
                    ph = (dy % 2) * 2 + (dx % 2)
                    src = (b * H1P + ho + dy // 2) * W1P + dx // 2
                    t = dy * 3 + dx
                    p2[r0:r0 + W2, t * C1:(t + 1) * C1] = a1[ph, src:src + W2, :]
    a2[...] = mm_bn_relu(p2[...], w2_ref, s2_ref)          # rows: (b, h, w), W=10

    # ---- conv3 (stride 1)
    for b in range(B):
        for ho in range(H3):
            r0 = (b * H3 + ho) * W3
            for dy in range(3):
                for dx in range(3):
                    src = (b * H2 + ho + dy) * W2 + dx
                    t = dy * 3 + dx
                    p3[r0:r0 + W3, t * C2:(t + 1) * C2] = a2[src:src + W3, :]
    a3[...] = mm_bn_relu(p3[...], w3_ref, s3_ref)          # rows: (b, h, w), W=8

    # ---- conv4 (stride 1)
    for b in range(B):
        for ho in range(H4):
            r0 = (b * H4 + ho) * W4
            for dy in range(3):
                for dx in range(3):
                    src = (b * H3 + ho + dy) * W3 + dx
                    t = dy * 3 + dx
                    p4[r0:r0 + W4, t * C3:(t + 1) * C3] = a3[src:src + W4, :]
    a4[...] = mm_bn_relu(p4[...], w4_ref, s4_ref)          # (B*12, 16), rows (b,h,w)

    # ---- dueling head.  a4 is NHWC-flattened; the head weights were row-
    # permuted at pack time to this order and the state/advantage branches were
    # merged into block-diagonal weights (192x128 and 128x(1+A)).
    HW4 = H4 * W4
    for b in range(B):
        for r in range(HW4):
            feat[b:b + 1, r * C4:(r + 1) * C4] = a4[b * HW4 + r:b * HW4 + r + 1, :]

    h = jnp.maximum(
        jnp.dot(feat[...], wh1_ref[...], preferred_element_type=f32) + bh1_ref[...],
        0.0)                                                            # (B, 128)
    out = jnp.dot(h, wh2_ref[...], preferred_element_type=f32) + bh2_ref[...]  # (B, 1+A)
    sv = out[:, 0:1]                      # state value
    adv = out[:, 1:]                      # advantage values
    inv_a = 1.0 / float(adv.shape[1])
    q = sv + (adv - jnp.sum(adv, axis=1, keepdims=True) * inv_a)
    o_ref[...] = q.astype(o_ref.dtype)


# ------------------------------ host wrapper -------------------------------

def duel_qnet_forward(packed, x_nchw):
    """NCHW (B,1,30,45) -> Q-values (B, n_actions); one fused pallas_call."""
    B = x_nchw.shape[0]
    x = jnp.transpose(x_nchw, (0, 2, 3, 1)).astype(jnp.float32)   # NCHW -> NHWC

    # conv1 im2col, ordered by stride-2 output phase.  Kept in plain JAX: Cin=1
    # so the 9x patch duplication is ~100 KB and the raw input comes from HBM
    # anyway; all later layers gather their patches inside the kernel.
    # TODO(synk): conv1's strided patch window has no clean in-kernel Pallas
    # equivalent (strided VMEM slices), so this step stays as host-side glue.
    taps = []
    for dy in range(3):
        for dx in range(3):
            taps.append(x[:, dy:dy + 2 * H1 - 1:2, dx:dx + 2 * W1 - 1:2, 0])
    p1 = jnp.stack(taps, axis=-1)                                  # (B, 14, 22, 9)
    p1 = p1.reshape(B, H1P, 2, W1P, 2, 9)
    p1 = jnp.transpose(p1, (2, 4, 0, 1, 3, 5)).reshape(4, B * H1P * W1P, 9)

    n_actions = packed["wh2"].shape[1] - 1
    args = (p1, packed["w1"], packed["s1"], packed["w2"], packed["s2"],
            packed["w3"], packed["s3"], packed["w4"], packed["s4"],
            packed["wh1"], packed["bh1"], packed["wh2"], packed["bh2"])

    scratch = [
        pltpu.VMEM((4, B * H1P * W1P, C1), jnp.float32),   # a1: phase-split conv1 out
        pltpu.VMEM((B * H2 * W2, 9 * C1), jnp.float32),    # p2: conv2 patches
        pltpu.VMEM((B * H2 * W2, C2), jnp.float32),        # a2
        pltpu.VMEM((B * H3 * W3, 9 * C2), jnp.float32),    # p3
        pltpu.VMEM((B * H3 * W3, C3), jnp.float32),        # a3
        pltpu.VMEM((B * H4 * W4, 9 * C3), jnp.float32),    # p4
        pltpu.VMEM((B * H4 * W4, C4), jnp.float32),        # a4
        pltpu.VMEM((B, FEAT), jnp.float32),                # feat (NHWC-flattened)
    ]

    return pl.pallas_call(
        duelq_fused_kernel,
        grid=(1,),
        in_specs=[_full_spec(a.shape) for a in args],
        out_specs=_full_spec((B, n_actions)),
        out_shape=jax.ShapeDtypeStruct((B, n_actions), jnp.float32),
        scratch_shapes=scratch,
        compiler_params=pltpu.CompilerParams(
            dimension_semantics=("arbitrary",)),
    )(*args)


# --------------------------- deterministic params ---------------------------

def init_params(key, n_actions):
    """Deterministic synthetic parameters matching the PyTorch module layout."""
    keys = jax.random.split(key, 12)

    def conv_w(k, cin, cout, ksize=3):
        # HWIO weight flattened to (kh*kw*cin, cout), matching the (dy, dx, cin)
        # patch column order used by the kernel.
        fan_in = cin * ksize * ksize
        w = jax.random.normal(k, (ksize, ksize, cin, cout), jnp.float32)
        w = w * (2.0 / fan_in) ** 0.5
        return w.reshape(ksize * ksize * cin, cout)

    def bn(k, c):
        kg, kb = jax.random.split(k)
        gamma = 1.0 + 0.1 * jax.random.normal(kg, (1, c), jnp.float32)
        beta = 0.1 * jax.random.normal(kb, (1, c), jnp.float32)
        running_mean = jnp.zeros((1, c), jnp.float32)
        running_var = jnp.ones((1, c), jnp.float32)
        scale = gamma / jnp.sqrt(running_var + EPS)
        shift = beta - running_mean * scale
        return scale, shift

    def lin(k, cin, cout):
        kw, kb = jax.random.split(k)
        bound = 1.0 / (cin ** 0.5)
        w = jax.random.uniform(kw, (cin, cout), jnp.float32, -bound, bound)
        b = jax.random.uniform(kb, (1, cout), jnp.float32, -bound, bound)
        return w, b

    return dict(
        conv1=(conv_w(keys[0], 1, C1), *bn(keys[1], C1)),
        conv2=(conv_w(keys[2], C1, C2), *bn(keys[3], C2)),
        conv3=(conv_w(keys[4], C2, C3), *bn(keys[5], C3)),
        conv4=(conv_w(keys[6], C3, C4), *bn(keys[7], C4)),
        state_fc=(*lin(keys[8], 96, 64), *lin(keys[9], 64, 1)),
        advantage_fc=(*lin(keys[10], 96, 64), *lin(keys[11], 64, n_actions)),
    )


def pack_params(params):
    """One-time repacking of module parameters into the fused-kernel layout.

    * BatchNorm (inference) is folded: the scale multiplies the conv weight,
      the shift stays as a per-channel bias added in-kernel.
    * The two head branches are merged into block-diagonal weights so the head
      is two dense matmuls: (B,192)@(192,128) and (B,128)@(128,1+A).
    * The first head matmul's rows are permuted from the NCHW order implied by
      torch's `x.view(-1, 192)` (c*12 + h*6 + w) to the NHWC order the kernel
      produces ((h*6 + w)*16 + c), so no transpose is needed before the head.
    """
    def fold(name):
        w, scale, shift = params[name]
        return w * scale, shift          # scale (1,C) broadcasts over (K,C)

    w1, s1 = fold("conv1")
    w2, s2 = fold("conv2")
    w3, s3 = fold("conv3")
    w4, s4 = fold("conv4")

    w1s, b1s, w2s, b2s = params["state_fc"]
    w1a, b1a, w2a, b2a = params["advantage_fc"]
    n_actions = w2a.shape[1]

    wh1 = jnp.zeros((FEAT, 128), jnp.float32)
    wh1 = wh1.at[:96, :64].set(w1s).at[96:, 64:].set(w1a)
    bh1 = jnp.concatenate([b1s, b1a], axis=1)                       # (1, 128)
    wh2 = jnp.zeros((128, 1 + n_actions), jnp.float32)
    wh2 = wh2.at[:64, 0:1].set(w2s).at[64:, 1:].set(w2a)
    bh2 = jnp.concatenate([b2s, b2a], axis=1)                       # (1, 1+A)

    # NCHW (c*H4*W4 + h*W4 + w) -> NHWC ((h*W4 + w)*C4 + c) row permutation.
    wh1 = jnp.transpose(wh1.reshape(C4, H4, W4, 128), (1, 2, 0, 3)).reshape(FEAT, 128)

    return dict(w1=w1, s1=s1, w2=w2, s2=s2, w3=w3, s3=s3, w4=w4, s4=s4,
                wh1=wh1, bh1=bh1, wh2=wh2, bh2=bh2)


# ----------------------------------- main -----------------------------------

if __name__ == "__main__":
    n_actions = 8
    key = jax.random.PRNGKey(0)
    k_params, k_x = jax.random.split(key)

    params = init_params(k_params, n_actions)
    packed = pack_params(params)          # one-time, outside the jitted forward
    # NCHW input, 1 channel, 30x45 (the resolution implied by view(-1, 192)).
    x = jax.random.normal(k_x, (2, 1, 30, 45), jnp.float32)

    fwd = jax.jit(duel_qnet_forward)
    q = fwd(packed, x)
    q = jax.block_until_ready(q)

    assert q.shape == (2, n_actions), q.shape
    assert bool(jnp.all(jnp.isfinite(q)))
    print("KERNEL_OK")
</pallas_src>

<mosaic_0001>
module attributes {stable_mosaic.version = 11 : i64} {
  func.func @duelq_fused_kernel(%arg0: i32, %arg1: memref<4x154x9xf32, #tpu.memory_space<vmem>>, %arg2: memref<9x8xf32, #tpu.memory_space<vmem>>, %arg3: memref<1x8xf32, #tpu.memory_space<vmem>>, %arg4: memref<72x8xf32, #tpu.memory_space<vmem>>, %arg5: memref<1x8xf32, #tpu.memory_space<vmem>>, %arg6: memref<72x8xf32, #tpu.memory_space<vmem>>, %arg7: memref<1x8xf32, #tpu.memory_space<vmem>>, %arg8: memref<72x16xf32, #tpu.memory_space<vmem>>, %arg9: memref<1x16xf32, #tpu.memory_space<vmem>>, %arg10: memref<192x128xf32, #tpu.memory_space<vmem>>, %arg11: memref<1x128xf32, #tpu.memory_space<vmem>>, %arg12: memref<128x9xf32, #tpu.memory_space<vmem>>, %arg13: memref<1x9xf32, #tpu.memory_space<vmem>>, %arg14: memref<2x8xf32, #tpu.memory_space<vmem>>, %arg15: memref<4x154x8xf32, #tpu.memory_space<vmem>>, %arg16: memref<120x72xf32, #tpu.memory_space<vmem>>, %arg17: memref<120x8xf32, #tpu.memory_space<vmem>>, %arg18: memref<64x72xf32, #tpu.memory_space<vmem>>, %arg19: memref<64x8xf32, #tpu.memory_space<vmem>>, %arg20: memref<24x72xf32, #tpu.memory_space<vmem>>, %arg21: memref<24x16xf32, #tpu.memory_space<vmem>>, %arg22: memref<2x192xf32, #tpu.memory_space<vmem>>) attributes {dimension_semantics = [#tpu.dimension_semantics<arbitrary>], iteration_bounds = array<i64: 1>, scalar_prefetch = 0 : i64, scratch_operands = 8 : i64, tpu.core_type = #tpu.core_type<tc>, window_params = [{pipeline_mode = #tpu.pipeline_mode<synchronous>, transform_indices = @transform_0, window_bounds = array<i64: 4, 154, 9>}, {pipeline_mode = #tpu.pipeline_mode<synchronous>, transform_indices = @transform_1, window_bounds = array<i64: 9, 8>}, {pipeline_mode = #tpu.pipeline_mode<synchronous>, transform_indices = @transform_2, window_bounds = array<i64: 1, 8>}, {pipeline_mode = #tpu.pipeline_mode<synchronous>, transform_indices = @transform_3, window_bounds = array<i64: 72, 8>}, {pipeline_mode = #tpu.pipeline_mode<synchronous>, transform_indices = @transform_4, window_bounds = array<i64: 1, 8>}, {pipeline_mode = #tpu.pipeline_mode<synchronous>, transform_indices = @transform_5, window_bounds = array<i64: 72, 8>}, {pipeline_mode = #tpu.pipeline_mode<synchronous>, transform_indices = @transform_6, window_bounds = array<i64: 1, 8>}, {pipeline_mode = #tpu.pipeline_mode<synchronous>, transform_indices = @transform_7, window_bounds = array<i64: 72, 16>}, {pipeline_mode = #tpu.pipeline_mode<synchronous>, transform_indices = @transform_8, window_bounds = array<i64: 1, 16>}, {pipeline_mode = #tpu.pipeline_mode<synchronous>, transform_indices = @transform_9, window_bounds = array<i64: 192, 128>}, {pipeline_mode = #tpu.pipeline_mode<synchronous>, transform_indices = @transform_10, window_bounds = array<i64: 1, 128>}, {pipeline_mode = #tpu.pipeline_mode<synchronous>, transform_indices = @transform_11, window_bounds = array<i64: 128, 9>}, {pipeline_mode = #tpu.pipeline_mode<synchronous>, transform_indices = @transform_12, window_bounds = array<i64: 1, 9>}, {pipeline_mode = #tpu.pipeline_mode<synchronous>, transform_indices = @transform_13, window_bounds = array<i64: 2, 8>}]} {
    %c0 = arith.constant 0 : index
    %c0_0 = arith.constant 0 : index
    %c0_1 = arith.constant 0 : index
    %0 = vector.load %arg1[%c0, %c0_0, %c0_1] : memref<4x154x9xf32, #tpu.memory_space<vmem>>, vector<1x154x9xf32>
    %1 = vector.shape_cast %0 : vector<1x154x9xf32> to vector<154x9xf32>
    %c0_2 = arith.constant 0 : index
    %c0_3 = arith.constant 0 : index
    %2 = vector.load %arg2[%c0_2, %c0_3] : memref<9x8xf32, #tpu.memory_space<vmem>>, vector<9x8xf32>
    %cst = arith.constant dense<0.000000e+00> : vector<154x8xf32>
    %3 = tpu.matmul %1, %2, %cst {dimension_numbers = #tpu.dot_dimension_numbers<[1], [0], [0], [1], [0, 0, 1, 1], [], []>} : vector<154x9xf32>, vector<9x8xf32>, vector<154x8xf32> -> vector<154x8xf32>
    %c0_4 = arith.constant 0 : index
    %c0_5 = arith.constant 0 : index
    %4 = vector.load %arg3[%c0_4, %c0_5] : memref<1x8xf32, #tpu.memory_space<vmem>>, vector<1x8xf32>
    %5 = vector.broadcast %4 : vector<1x8xf32> to vector<154x8xf32>
    %6 = arith.addf %3, %5 : vector<154x8xf32>
    %cst_6 = arith.constant 0.000000e+00 : f32
    %7 = vector.broadcast %cst_6 : f32 to vector<154x8xf32>
    %8 = arith.maximumf %6, %7 : vector<154x8xf32>
    %c0_7 = arith.constant 0 : index
    %c0_8 = arith.constant 0 : index
    %c0_9 = arith.constant 0 : index
    %9 = vector.load %arg15[%c0_7, %c0_8, %c0_9] : memref<4x154x8xf32, #tpu.memory_space<vmem>>, vector<1x154x8xf32>
    %10 = vector.shape_cast %9 : vector<1x154x8xf32> to vector<154x8xf32>
    %11 = vector.shape_cast %8 : vector<154x8xf32> to vector<1x154x8xf32>
    tpu.vector_store %arg15[%c0_7, %c0_8, %c0_9], %11 {strides = array<i32>} : memref<4x154x8xf32, #tpu.memory_space<vmem>>, vector<1x154x8xf32>,
    %c1 = arith.constant 1 : index
    %c0_10 = arith.constant 0 : index
    %c0_11 = arith.constant 0 : index
    %12 = vector.load %arg1[%c1, %c0_10, %c0_11] : memref<4x154x9xf32, #tpu.memory_space<vmem>>, vector<1x154x9xf32>
    %13 = vector.shape_cast %12 : vector<1x154x9xf32> to vector<154x9xf32>
    %c0_12 = arith.constant 0 : index
    %c0_13 = arith.constant 0 : index
    %14 = vector.load %arg2[%c0_12, %c0_13] : memref<9x8xf32, #tpu.memory_space<vmem>>, vector<9x8xf32>
    %cst_14 = arith.constant dense<0.000000e+00> : vector<154x8xf32>
    %15 = tpu.matmul %13, %14, %cst_14 {dimension_numbers = #tpu.dot_dimension_numbers<[1], [0], [0], [1], [0, 0, 1, 1], [], []>} : vector<154x9xf32>, vector<9x8xf32>, vector<154x8xf32> -> vector<154x8xf32>
    %c0_15 = arith.constant 0 : index
    %c0_16 = arith.constant 0 : index
    %16 = vector.load %arg3[%c0_15, %c0_16] : memref<1x8xf32, #tpu.memory_space<vmem>>, vector<1x8xf32>
    %17 = vector.broadcast %16 : vector<1x8xf32> to vector<154x8xf32>
    %18 = arith.addf %15, %17 : vector<154x8xf32>
    %cst_17 = arith.constant 0.000000e+00 : f32
    %19 = vector.broadcast %cst_17 : f32 to vector<154x8xf32>
    %20 = arith.maximumf %18, %19 : vector<154x8xf32>
    %c1_18 = arith.constant 1 : index
    %c0_19 = arith.constant 0 : index
    %c0_20 = arith.constant 0 : index
    %21 = vector.load %arg15[%c1_18, %c0_19, %c0_20] : memref<4x154x8xf32, #tpu.memory_space<vmem>>, vector<1x154x8xf32>
    %22 = vector.shape_cast %21 : vector<1x154x8xf32> to vector<154x8xf32>
    %23 = vector.shape_cast %20 : vector<154x8xf32> to vector<1x154x8xf32>
    tpu.vector_store %arg15[%c1_18, %c0_19, %c0_20], %23 {strides = array<i32>} : memref<4x154x8xf32, #tpu.memory_space<vmem>>, vector<1x154x8xf32>,
    %c2 = arith.constant 2 : index
    %c0_21 = arith.constant 0 : index
    %c0_22 = arith.constant 0 : index
    %24 = vector.load %arg1[%c2, %c0_21, %c0_22] : memref<4x154x9xf32, #tpu.memory_space<vmem>>, vector<1x154x9xf32>
    %25 = vector.shape_cast %24 : vector<1x154x9xf32> to vector<154x9xf32>
    %c0_23 = arith.constant 0 : index
    %c0_24 = arith.constant 0 : index
    %26 = vector.load %arg2[%c0_23, %c0_24] : memref<9x8xf32, #tpu.memory_space<vmem>>, vector<9x8xf32>
    %cst_25 = arith.constant dense<0.000000e+00> : vector<154x8xf32>
    %27 = tpu.matmul %25, %26, %cst_25 {dimension_numbers = #tpu.dot_dimension_numbers<[1], [0], [0], [1], [0, 0, 1, 1], [], []>} : vector<154x9xf32>, vector<9x8xf32>, vector<154x8xf32> -> vector<154x8xf32>
    %c0_26 = arith.constant 0 : index
    %c0_27 = arith.constant 0 : index
    %28 = vector.load %arg3[%c0_26, %c0_27] : memref<1x8xf32, #tpu.memory_space<vmem>>, vector<1x8xf32>
    %29 = vector.broadcast %28 : vector<1x8xf32> to vector<154x8xf32>
    %30 = arith.addf %27, %29 : vector<154x8xf32>
    %cst_28 = arith.constant 0.000000e+00 : f32
    %31 = vector.broadcast %cst_28 : f32 to vector<154x8xf32>
    %32 = arith.maximumf %30, %31 : vector<154x8xf32>
    %c2_29 = arith.constant 2 : index
    %c0_30 = arith.constant 0 : index
    %c0_31 = arith.constant 0 : index
    %33 = vector.load %arg15[%c2_29, %c0_30, %c0_31] : memref<4x154x8xf32, #tpu.memory_space<vmem>>, vector<1x154x8xf32>
    %34 = vector.shape_cast %33 : vector<1x154x8xf32> to vector<154x8xf32>
    %35 = vector.shape_cast %32 : vector<154x8xf32> to vector<1x154x8xf32>
    tpu.vector_store %arg15[%c2_29, %c0_30, %c0_31], %35 {strides = array<i32>} : memref<4x154x8xf32, #tpu.memory_space<vmem>>, vector<1x154x8xf32>,
    %c3 = arith.constant 3 : index
    %c0_32 = arith.constant 0 : index
    %c0_33 = arith.constant 0 : index
    %36 = vector.load %arg1[%c3, %c0_32, %c0_33] : memref<4x154x9xf32, #tpu.memory_space<vmem>>, vector<1x154x9xf32>
    %37 = vector.shape_cast %36 : vector<1x154x9xf32> to vector<154x9xf32>
    %c0_34 = arith.constant 0 : index
    %c0_35 = arith.constant 0 : index
    %38 = vector.load %arg2[%c0_34, %c0_35] : memref<9x8xf32, #tpu.memory_space<vmem>>, vector<9x8xf32>
    %cst_36 = arith.constant dense<0.000000e+00> : vector<154x8xf32>
    %39 = tpu.matmul %37, %38, %cst_36 {dimension_numbers = #tpu.dot_dimension_numbers<[1], [0], [0], [1], [0, 0, 1, 1], [], []>} : vector<154x9xf32>, vector<9x8xf32>, vector<154x8xf32> -> vector<154x8xf32>
    %c0_37 = arith.constant 0 : index
    %c0_38 = arith.constant 0 : index
    %40 = vector.load %arg3[%c0_37, %c0_38] : memref<1x8xf32, #tpu.memory_space<vmem>>, vector<1x8xf32>
    %41 = vector.broadcast %40 : vector<1x8xf32> to vector<154x8xf32>
    %42 = arith.addf %39, %41 : vector<154x8xf32>
    %cst_39 = arith.constant 0.000000e+00 : f32
    %43 = vector.broadcast %cst_39 : f32 to vector<154x8xf32>
    %44 = arith.maximumf %42, %43 : vector<154x8xf32>
    %c3_40 = arith.constant 3 : index
    %c0_41 = arith.constant 0 : index
    %c0_42 = arith.constant 0 : index
    %45 = vector.load %arg15[%c3_40, %c0_41, %c0_42] : memref<4x154x8xf32, #tpu.memory_space<vmem>>, vector<1x154x8xf32>
    %46 = vector.shape_cast %45 : vector<1x154x8xf32> to vector<154x8xf32>
    %47 = vector.shape_cast %44 : vector<154x8xf32> to vector<1x154x8xf32>
    tpu.vector_store %arg15[%c3_40, %c0_41, %c0_42], %47 {strides = array<i32>} : memref<4x154x8xf32, #tpu.memory_space<vmem>>, vector<1x154x8xf32>,
    %c0_43 = arith.constant 0 : index
    %c0_44 = arith.constant 0 : index
    %c0_45 = arith.constant 0 : index
    %48 = vector.load %arg15[%c0_43, %c0_44, %c0_45] : memref<4x154x8xf32, #tpu.memory_space<vmem>>, vector<1x10x8xf32>
    %49 = vector.shape_cast %48 : vector<1x10x8xf32> to vector<10x8xf32>
    %c0_46 = arith.constant 0 : index
    %c0_47 = arith.constant 0 : index
    %50 = vector.load %arg16[%c0_46, %c0_47] : memref<120x72xf32, #tpu.memory_space<vmem>>, vector<10x8xf32>
    tpu.vector_store %arg16[%c0_46, %c0_47], %49 {strides = array<i32>} : memref<120x72xf32, #tpu.memory_space<vmem>>, vector<10x8xf32>,
    %c1_48 = arith.constant 1 : index
    %c0_49 = arith.constant 0 : index
    %c0_50 = arith.constant 0 : index
    %51 = vector.load %arg15[%c1_48, %c0_49, %c0_50] : memref<4x154x8xf32, #tpu.memory_space<vmem>>, vector<1x10x8xf32>
    %52 = vector.shape_cast %51 : vector<1x10x8xf32> to vector<10x8xf32>
    %c0_51 = arith.constant 0 : index
    %c8 = arith.constant 8 : index
    %53 = vector.load %arg16[%c0_51, %c8] : memref<120x72xf32, #tpu.memory_space<vmem>>, vector<10x8xf32>
    tpu.vector_store %arg16[%c0_51, %c8], %52 {strides = array<i32>} : memref<120x72xf32, #tpu.memory_space<vmem>>, vector<10x8xf32>,
    %c0_52 = arith.constant 0 : index
    %c1_53 = arith.constant 1 : index
    %c0_54 = arith.constant 0 : index
    %54 = vector.load %arg15[%c0_52, %c1_53, %c0_54] : memref<4x154x8xf32, #tpu.memory_space<vmem>>, vector<1x10x8xf32>
    %55 = vector.shape_cast %54 : vector<1x10x8xf32> to vector<10x8xf32>
    %c0_55 = arith.constant 0 : index
    %c16 = arith.constant 16 : index
    %56 = vector.load %arg16[%c0_55, %c16] : memref<120x72xf32, #tpu.memory_space<vmem>>, vector<10x8xf32>
    tpu.vector_store %arg16[%c0_55, %c16], %55 {strides = array<i32>} : memref<120x72xf32, #tpu.memory_space<vmem>>, vector<10x8xf32>,
    %c2_56 = arith.constant 2 : index
    %c0_57 = arith.constant 0 : index
    %c0_58 = arith.constant 0 : index
    %57 = vector.load %arg15[%c2_56, %c0_57, %c0_58] : memref<4x154x8xf32, #tpu.memory_space<vmem>>, vector<1x10x8xf32>
    %58 = vector.shape_cast %57 : vector<1x10x8xf32> to vector<10x8xf32>
    %c0_59 = arith.constant 0 : index
    %c24 = arith.constant 24 : index
    %59 = vector.load %arg16[%c0_59, %c24] : memref<120x72xf32, #tpu.memory_space<vmem>>, vector<10x8xf32>
    tpu.vector_store %arg16[%c0_59, %c24], %58 {strides = array<i32>} : memref<120x72xf32, #tpu.memory_space<vmem>>, vector<10x8xf32>,
    %c3_60 = arith.constant 3 : index
    %c0_61 = arith.constant 0 : index
    %c0_62 = arith.constant 0 : index
    %60 = vector.load %arg15[%c3_60, %c0_61, %c0_62] : memref<4x154x8xf32, #tpu.memory_space<vmem>>, vector<1x10x8xf32>
    %61 = vector.shape_cast %60 : vector<1x10x8xf32> to vector<10x8xf32>
    %c0_63 = arith.constant 0 : index
    %c32 = arith.constant 32 : index
    %62 = vector.load %arg16[%c0_63, %c32] : memref<120x72xf32, #tpu.memory_space<vmem>>, vector<10x8xf32>
    tpu.vector_store %arg16[%c0_63, %c32], %61 {strides = array<i32>} : memref<120x72xf32, #tpu.memory_space<vmem>>, vector<10x8xf32>,
    %c2_64 = arith.constant 2 : index
    %c1_65 = arith.constant 1 : index
    %c0_66 = arith.constant 0 : index
    %63 = vector.load %arg15[%c2_64, %c1_65, %c0_66] : memref<4x154x8xf32, #tpu.memory_space<vmem>>, vector<1x10x8xf32>
    %64 = vector.shape_cast %63 : vector<1x10x8xf32> to vector<10x8xf32>
    %c0_67 = arith.constant 0 : index
    %c40 = arith.constant 40 : index
    %65 = vector.load %arg16[%c0_67, %c40] : memref<120x72xf32, #tpu.memory_space<vmem>>, vector<10x8xf32>
    tpu.vector_store %arg16[%c0_67, %c40], %64 {strides = array<i32>} : memref<120x72xf32, #tpu.memory_space<vmem>>, vector<10x8xf32>,
    %c0_68 = arith.constant 0 : index
    %c11 = arith.constant 11 : index
    %c0_69 = arith.constant 0 : index
    %66 = vector.load %arg15[%c0_68, %c11, %c0_69] : memref<4x154x8xf32, #tpu.memory_space<vmem>>, vector<1x10x8xf32>
    %67 = vector.shape_cast %66 : vector<1x10x8xf32> to vector<10x8xf32>
    %c0_70 = arith.constant 0 : index
    %c48 = arith.constant 48 : index
    %68 = vector.load %arg16[%c0_70, %c48] : memref<120x72xf32, #tpu.memory_space<vmem>>, vector<10x8xf32>
    tpu.vector_store %arg16[%c0_70, %c48], %67 {strides = array<i32>} : memref<120x72xf32, #tpu.memory_space<vmem>>, vector<10x8xf32>,
    %c1_71 = arith.constant 1 : index
    %c11_72 = arith.constant 11 : index
    %c0_73 = arith.constant 0 : index
    %69 = vector.load %arg15[%c1_71, %c11_72, %c0_73] : memref<4x154x8xf32, #tpu.memory_space<vmem>>, vector<1x10x8xf32>
    %70 = vector.shape_cast %69 : vector<1x10x8xf32> to vector<10x8xf32>
    %c0_74 = arith.constant 0 : index
    %c56 = arith.constant 56 : index
    %71 = vector.load %arg16[%c0_74, %c56] : memref<120x72xf32, #tpu.memory_space<vmem>>, vector<10x8xf32>
    tpu.vector_store %arg16[%c0_74, %c56], %70 {strides = array<i32>} : memref<120x72xf32, #tpu.memory_space<vmem>>, vector<10x8xf32>,
    %c0_75 = arith.constant 0 : index
    %c12 = arith.constant 12 : index
    %c0_76 = arith.constant 0 : index
    %72 = vector.load %arg15[%c0_75, %c12, %c0_76] : memref<4x154x8xf32, #tpu.memory_space<vmem>>, vector<1x10x8xf32>
    %73 = vector.shape_cast %72 : vector<1x10x8xf32> to vector<10x8xf32>
    %c0_77 = arith.constant 0 : index
    %c64 = arith.constant 64 : index
    %74 = vector.load %arg16[%c0_77, %c64] : memref<120x72xf32, #tpu.memory_space<vmem>>, vector<10x8xf32>
    tpu.vector_store %arg16[%c0_77, %c64], %73 {strides = array<i32>} : memref<120x72xf32, #tpu.memory_space<vmem>>, vector<10x8xf32>,
    %c0_78 = arith.constant 0 : index
    %c11_79 = arith.constant 11 : index
    %c0_80 = arith.constant 0 : index
    %75 = vector.load %arg15[%c0_78, %c11_79, %c0_80] : memref<4x154x8xf32, #tpu.memory_space<vmem>>, vector<1x10x8xf32>
    %76 = vector.shape_cast %75 : vector<1x10x8xf32> to vector<10x8xf32>
    %c10 = arith.constant 10 : index
    %c0_81 = arith.constant 0 : index
    %77 = vector.load %arg16[%c10, %c0_81] : memref<120x72xf32, #tpu.memory_space<vmem>>, vector<10x8xf32>
    tpu.vector_store %arg16[%c10, %c0_81], %76 {strides = array<i32>} : memref<120x72xf32, #tpu.memory_space<vmem>>, vector<10x8xf32>,
    %c1_82 = arith.constant 1 : index
    %c11_83 = arith.constant 11 : index
    %c0_84 = arith.constant 0 : index
    %78 = vector.load %arg15[%c1_82, %c11_83, %c0_84] : memref<4x154x8xf32, #tpu.memory_space<vmem>>, vector<1x10x8xf32>
    %79 = vector.shape_cast %78 : vector<1x10x8xf32> to vector<10x8xf32>
    %c10_85 = arith.constant 10 : index
    %c8_86 = arith.constant 8 : index
    %80 = vector.load %arg16[%c10_85, %c8_86] : memref<120x72xf32, #tpu.memory_space<vmem>>, vector<10x8xf32>
    tpu.vector_store %arg16[%c10_85, %c8_86], %79 {strides = array<i32>} : memref<120x72xf32, #tpu.memory_space<vmem>>, vector<10x8xf32>,
    %c0_87 = arith.constant 0 : index
    %c12_88 = arith.constant 12 : index
    %c0_89 = arith.constant 0 : index
    %81 = vector.load %arg15[%c0_87, %c12_88, %c0_89] : memref<4x154x8xf32, #tpu.memory_space<vmem>>, vector<1x10x8xf32>
    %82 = vector.shape_cast %81 : vector<1x10x8xf32> to vector<10x8xf32>
    %c10_90 = arith.constant 10 : index
    %c16_91 = arith.constant 16 : index
    %83 = vector.load %arg16[%c10_90, %c16_91] : memref<120x72xf32, #tpu.memory_space<vmem>>, vector<10x8xf32>
    tpu.vector_store %arg16[%c10_90, %c16_91], %82 {strides = array<i32>} : memref<120x72xf32, #tpu.memory_space<vmem>>, vector<10x8xf32>,
    %c2_92 = arith.constant 2 : index
    %c11_93 = arith.constant 11 : index
    %c0_94 = arith.constant 0 : index
    %84 = vector.load %arg15[%c2_92, %c11_93, %c0_94] : memref<4x154x8xf32, #tpu.memory_space<vmem>>, vector<1x10x8xf32>
    %85 = vector.shape_cast %84 : vector<1x10x8xf32> to vector<10x8xf32>
    %c10_95 = arith.constant 10 : index
    %c24_96 = arith.constant 24 : index
    %86 = vector.load %arg16[%c10_95, %c24_96] : memref<120x72xf32, #tpu.memory_space<vmem>>, vector<10x8xf32>
    tpu.vector_store %arg16[%c10_95, %c24_96], %85 {strides = array<i32>} : memref<120x72xf32, #tpu.memory_space<vmem>>, vector<10x8xf32>,
    %c3_97 = arith.constant 3 : index
    %c11_98 = arith.constant 11 : index
    %c0_99 = arith.constant 0 : index
    %87 = vector.load %arg15[%c3_97, %c11_98, %c0_99] : memref<4x154x8xf32, #tpu.memory_space<vmem>>, vector<1x10x8xf32>
    %88 = vector.shape_cast %87 : vector<1x10x8xf32> to vector<10x8xf32>
    %c10_100 = arith.constant 10 : index
    %c32_101 = arith.constant 32 : index
    %89 = vector.load %arg16[%c10_100, %c32_101] : memref<120x72xf32, #tpu.memory_space<vmem>>, vector<10x8xf32>
    tpu.vector_store %arg16[%c10_100, %c32_101], %88 {strides = array<i32>} : memref<120x72xf32, #tpu.memory_space<vmem>>, vector<10x8xf32>,
    %c2_102 = arith.constant 2 : index
    %c12_103 = arith.constant 12 : index
    %c0_104 = arith.constant 0 : index
    %90 = vector.load %arg15[%c2_102, %c12_103, %c0_104] : memref<4x154x8xf32, #tpu.memory_space<vmem>>, vector<1x10x8xf32>
    %91 = vector.shape_cast %90 : vector<1x10x8xf32> to vector<10x8xf32>
    %c10_105 = arith.constant 10 : index
    %c40_106 = arith.constant 40 : index
    %92 = vector.load %arg16[%c10_105, %c40_106] : memref<120x72xf32, #tpu.memory_space<vmem>>, vector<10x8xf32>
    tpu.vector_store %arg16[%c10_105, %c40_106], %91 {strides = array<i32>} : memref<120x72xf32, #tpu.memory_space<vmem>>, vector<10x8xf32>,
    %c0_107 = arith.constant 0 : index
    %c22 = arith.constant 22 : index
    %c0_108 = arith.constant 0 : index
    %93 = vector.load %arg15[%c0_107, %c22, %c0_108] : memref<4x154x8xf32, #tpu.memory_space<vmem>>, vector<1x10x8xf32>
    %94 = vector.shape_cast %93 : vector<1x10x8xf32> to vector<10x8xf32>
    %c10_109 = arith.constant 10 : index
    %c48_110 = arith.constant 48 : index
    %95 = vector.load %arg16[%c10_109, %c48_110] : memref<120x72xf32, #tpu.memory_space<vmem>>, vector<10x8xf32>
    tpu.vector_store %arg16[%c10_109, %c48_110], %94 {strides = array<i32>} : memref<120x72xf32, #tpu.memory_space<vmem>>, vector<10x8xf32>,
    %c1_111 = arith.constant 1 : index
    %c22_112 = arith.constant 22 : index
    %c0_113 = arith.constant 0 : index
    %96 = vector.load %arg15[%c1_111, %c22_112, %c0_113] : memref<4x154x8xf32, #tpu.memory_space<vmem>>, vector<1x10x8xf32>
    %97 = vector.shape_cast %96 : vector<1x10x8xf32> to vector<10x8xf32>
    %c10_114 = arith.constant 10 : index
    %c56_115 = arith.constant 56 : index
    %98 = vector.load %arg16[%c10_114, %c56_115] : memref<120x72xf32, #tpu.memory_space<vmem>>, vector<10x8xf32>
    tpu.vector_store %arg16[%c10_114, %c56_115], %97 {strides = array<i32>} : memref<120x72xf32, #tpu.memory_space<vmem>>, vector<10x8xf32>,
    %c0_116 = arith.constant 0 : index
    %c23 = arith.constant 23 : index
    %c0_117 = arith.constant 0 : index
    %99 = vector.load %arg15[%c0_116, %c23, %c0_117] : memref<4x154x8xf32, #tpu.memory_space<vmem>>, vector<1x10x8xf32>
    %100 = vector.shape_cast %99 : vector<1x10x8xf32> to vector<10x8xf32>
    %c10_118 = arith.constant 10 : index
    %c64_119 = arith.constant 64 : index
    %101 = vector.load %arg16[%c10_118, %c64_119] : memref<120x72xf32, #tpu.memory_space<vmem>>, vector<10x8xf32>
    tpu.vector_store %arg16[%c10_118, %c64_119], %100 {strides = array<i32>} : memref<120x72xf32, #tpu.memory_space<vmem>>, vector<10x8xf32>,
    %c0_120 = arith.constant 0 : index
    %c22_121 = arith.constant 22 : index
    %c0_122 = arith.constant 0 : index
    %102 = vector.load %arg15[%c0_120, %c22_121, %c0_122] : memref<4x154x8xf32, #tpu.memory_space<vmem>>, vector<1x10x8xf32>
    %103 = vector.shape_cast %102 : vector<1x10x8xf32> to vector<10x8xf32>
    %c20 = arith.constant 20 : index
    %c0_123 = arith.constant 0 : index
    %104 = vector.load %arg16[%c20, %c0_123] : memref<120x72xf32, #tpu.memory_space<vmem>>, vector<10x8xf32>
    tpu.vector_store %arg16[%c20, %c0_123], %103 {strides = array<i32>} : memref<120x72xf32, #tpu.memory_space<vmem>>, vector<10x8xf32>,
    %c1_124 = arith.constant 1 : index
    %c22_125 = arith.constant 22 : index
    %c0_126 = arith.constant 0 : index
    %105 = vector.load %arg15[%c1_124, %c22_125, %c0_126] : memref<4x154x8xf32, #tpu.memory_space<vmem>>, vector<1x10x8xf32>
    %106 = vector.shape_cast %105 : vector<1x10x8xf32> to vector<10x8xf32>
    %c20_127 = arith.constant 20 : index
    %c8_128 = arith.constant 8 : index
    %107 = vector.load %arg16[%c20_127, %c8_128] : memref<120x72xf32, #tpu.memory_space<vmem>>, vector<10x8xf32>
    tpu.vector_store %arg16[%c20_127, %c8_128], %106 {strides = array<i32>} : memref<120x72xf32, #tpu.memory_space<vmem>>, vector<10x8xf32>,
    %c0_129 = arith.constant 0 : index
    %c23_130 = arith.constant 23 : index
    %c0_131 = arith.constant 0 : index
    %108 = vector.load %arg15[%c0_129, %c23_130, %c0_131] : memref<4x154x8xf32, #tpu.memory_space<vmem>>, vector<1x10x8xf32>
    %109 = vector.shape_cast %108 : vector<1x10x8xf32> to vector<10x8xf32>
    %c20_132 = arith.constant 20 : index
    %c16_133 = arith.constant 16 : index
    %110 = vector.load %arg16[%c20_132, %c16_133] : memref<120x72xf32, #tpu.memory_space<vmem>>, vector<10x8xf32>
    tpu.vector_store %arg16[%c20_132, %c16_133], %109 {strides = array<i32>} : memref<120x72xf32, #tpu.memory_space<vmem>>, vector<10x8xf32>,
    %c2_134 = arith.constant 2 : index
    %c22_135 = arith.constant 22 : index
    %c0_136 = arith.constant 0 : index
    %111 = vector.load %arg15[%c2_134, %c22_135, %c0_136] : memref<4x154x8xf32, #tpu.memory_space<vmem>>, vector<1x10x8xf32>
    %112 = vector.shape_cast %111 : vector<1x10x8xf32> to vector<10x8xf32>
    %c20_137 = arith.constant 20 : index
    %c24_138 = arith.constant 24 : index
    %113 = vector.load %arg16[%c20_137, %c24_138] : memref<120x72xf32, #tpu.memory_space<vmem>>, vector<10x8xf32>
    tpu.vector_store %arg16[%c20_137, %c24_138], %112 {strides = array<i32>} : memref<120x72xf32, #tpu.memory_space<vmem>>, vector<10x8xf32>,
    %c3_139 = arith.constant 3 : index
    %c22_140 = arith.constant 22 : index
    %c0_141 = arith.constant 0 : index
    %114 = vector.load %arg15[%c3_139, %c22_140, %c0_141] : memref<4x154x8xf32, #tpu.memory_space<vmem>>, vector<1x10x8xf32>
    %115 = vector.shape_cast %114 : vector<1x10x8xf32> to vector<10x8xf32>
    %c20_142 = arith.constant 20 : index
    %c32_143 = arith.constant 32 : index
    %116 = vector.load %arg16[%c20_142, %c32_143] : memref<120x72xf32, #tpu.memory_space<vmem>>, vector<10x8xf32>
    tpu.vector_store %arg16[%c20_142, %c32_143], %115 {strides = array<i32>} : memref<120x72xf32, #tpu.memory_space<vmem>>, vector<10x8xf32>,
    %c2_144 = arith.constant 2 : index
    %c23_145 = arith.constant 23 : index
    %c0_146 = arith.constant 0 : index
    %117 = vector.load %arg15[%c2_144, %c23_145, %c0_146] : memref<4x154x8xf32, #tpu.memory_space<vmem>>, vector<1x10x8xf32>
    %118 = vector.shape_cast %117 : vector<1x10x8xf32> to vector<10x8xf32>
    %c20_147 = arith.constant 20 : index
    %c40_148 = arith.constant 40 : index
    %119 = vector.load %arg16[%c20_147, %c40_148] : memref<120x72xf32, #tpu.memory_space<vmem>>, vector<10x8xf32>
    tpu.vector_store %arg16[%c20_147, %c40_148], %118 {strides = array<i32>} : memref<120x72xf32, #tpu.memory_space<vmem>>, vector<10x8xf32>,
    %c0_149 = arith.constant 0 : index
    %c33 = arith.constant 33 : index
    %c0_150 = arith.constant 0 : index
    %120 = vector.load %arg15[%c0_149, %c33, %c0_150] : memref<4x154x8xf32, #tpu.memory_space<vmem>>, vector<1x10x8xf32>
    %121 = vector.shape_cast %120 : vector<1x10x8xf32> to vector<10x8xf32>
    %c20_151 = arith.constant 20 : index
    %c48_152 = arith.constant 48 : index
    %122 = vector.load %arg16[%c20_151, %c48_152] : memref<120x72xf32, #tpu.memory_space<vmem>>, vector<10x8xf32>
    tpu.vector_store %arg16[%c20_151, %c48_152], %121 {strides = array<i32>} : memref<120x72xf32, #tpu.memory_space<vmem>>, vector<10x8xf32>,
    %c1_153 = arith.constant 1 : index
    %c33_154 = arith.constant 33 : index
    %c0_155 = arith.constant 0 : index
    %123 = vector.load %arg15[%c1_153, %c33_154, %c0_155] : memref<4x154x8xf32, #tpu.memory_space<vmem>>, vector<1x10x8xf32>
    %124 = vector.shape_cast %123 : vector<1x10x8xf32> to vector<10x8xf32>
    %c20_156 = arith.constant 20 : index
    %c56_157 = arith.constant 56 : index
    %125 = vector.load %arg16[%c20_156, %c56_157] : memref<120x72xf32, #tpu.memory_space<vmem>>, vector<10x8xf32>
    tpu.vector_store %arg16[%c20_156, %c56_157], %124 {strides = array<i32>} : memref<120x72xf32, #tpu.memory_space<vmem>>, vector<10x8xf32>,
    %c0_158 = arith.constant 0 : index
    %c34 = arith.constant 34 : index
    %c0_159 = arith.constant 0 : index
    %126 = vector.load %arg15[%c0_158, %c34, %c0_159] : memref<4x154x8xf32, #tpu.memory_space<vmem>>, vector<1x10x8xf32>
    %127 = vector.shape_cast %126 : vector<1x10x8xf32> to vector<10x8xf32>
    %c20_160 = arith.constant 20 : index
    %c64_161 = arith.constant 64 : index
    %128 = vector.load %arg16[%c20_160, %c64_161] : memref<120x72xf32, #tpu.memory_space<vmem>>, vector<10x8xf32>
    tpu.vector_store %arg16[%c20_160, %c64_161], %127 {strides = array<i32>} : memref<120x72xf32, #tpu.memory_space<vmem>>, vector<10x8xf32>,
    %c0_162 = arith.constant 0 : index
    %c33_163 = arith.constant 33 : index
    %c0_164 = arith.constant 0 : index
    %129 = vector.load %arg15[%c0_162, %c33_163, %c0_164] : memref<4x154x8xf32, #tpu.memory_space<vmem>>, vector<1x10x8xf32>
    %130 = vector.shape_cast %129 : vector<1x10x8xf32> to vector<10x8xf32>
    %c30 = arith.constant 30 : index
    %c0_165 = arith.constant 0 : index
    %131 = vector.load %arg16[%c30, %c0_165] : memref<120x72xf32, #tpu.memory_space<vmem>>, vector<10x8xf32>
    tpu.vector_store %arg16[%c30, %c0_165], %130 {strides = array<i32>} : memref<120x72xf32, #tpu.memory_space<vmem>>, vector<10x8xf32>,
    %c1_166 = arith.constant 1 : index
    %c33_167 = arith.constant 33 : index
    %c0_168 = arith.constant 0 : index
    %132 = vector.load %arg15[%c1_166, %c33_167, %c0_168] : memref<4x154x8xf32, #tpu.memory_space<vmem>>, vector<1x10x8xf32>
    %133 = vector.shape_cast %132 : vector<1x10x8xf32> to vector<10x8xf32>
    %c30_169 = arith.constant 30 : index
    %c8_170 = arith.constant 8 : index
    %134 = vector.load %arg16[%c30_169, %c8_170] : memref<120x72xf32, #tpu.memory_space<vmem>>, vector<10x8xf32>
    tpu.vector_store %arg16[%c30_169, %c8_170], %133 {strides = array<i32>} : memref<120x72xf32, #tpu.memory_space<vmem>>, vector<10x8xf32>,
    %c0_171 = arith.constant 0 : index
    %c34_172 = arith.constant 34 : index
    %c0_173 = arith.constant 0 : index
    %135 = vector.load %arg15[%c0_171, %c34_172, %c0_173] : memref<4x154x8xf32, #tpu.memory_space<vmem>>, vector<1x10x8xf32>
    %136 = vector.shape_cast %135 : vector<1x10x8xf32> to vector<10x8xf32>
    %c30_174 = arith.constant 30 : index
    %c16_175 = arith.constant 16 : index
    %137 = vector.load %arg16[%c30_174, %c16_175] : memref<120x72xf32, #tpu.memory_space<vmem>>, vector<10x8xf32>
    tpu.vector_store %arg16[%c30_174, %c16_175], %136 {strides = array<i32>} : memref<120x72xf32, #tpu.memory_space<vmem>>, vector<10x8xf32>,
    %c2_176 = arith.constant 2 : index
    %c33_177 = arith.constant 33 : index
    %c0_178 = arith.constant 0 : index
    %138 = vector.load %arg15[%c2_176, %c33_177, %c0_178] : memref<4x154x8xf32, #tpu.memory_space<vmem>>, vector<1x10x8xf32>
    %139 = vector.shape_cast %138 : vector<1x10x8xf32> to vector<10x8xf32>
    %c30_179 = arith.constant 30 : index
    %c24_180 = arith.constant 24 : index
    %140 = vector.load %arg16[%c30_179, %c24_180] : memref<120x72xf32, #tpu.memory_space<vmem>>, vector<10x8xf32>
    tpu.vector_store %arg16[%c30_179, %c24_180], %139 {strides = array<i32>} : memref<120x72xf32, #tpu.memory_space<vmem>>, vector<10x8xf32>,
    %c3_181 = arith.constant 3 : index
    %c33_182 = arith.constant 33 : index
    %c0_183 = arith.constant 0 : index
    %141 = vector.load %arg15[%c3_181, %c33_182, %c0_183] : memref<4x154x8xf32, #tpu.memory_space<vmem>>, vector<1x10x8xf32>
    %142 = vector.shape_cast %141 : vector<1x10x8xf32> to vector<10x8xf32>
    %c30_184 = arith.constant 30 : index
    %c32_185 = arith.constant 32 : index
    %143 = vector.load %arg16[%c30_184, %c32_185] : memref<120x72xf32, #tpu.memory_space<vmem>>, vector<10x8xf32>
    tpu.vector_store %arg16[%c30_184, %c32_185], %142 {strides = array<i32>} : memref<120x72xf32, #tpu.memory_space<vmem>>, vector<10x8xf32>,
    %c2_186 = arith.constant 2 : index
    %c34_187 = arith.constant 34 : index
    %c0_188 = arith.constant 0 : index
    %144 = vector.load %arg15[%c2_186, %c34_187, %c0_188] : memref<4x154x8xf32, #tpu.memory_space<vmem>>, vector<1x10x8xf32>
    %145 = vector.shape_cast %144 : vector<1x10x8xf32> to vector<10x8xf32>
    %c30_189 = arith.constant 30 : index
    %c40_190 = arith.constant 40 : index
    %146 = vector.load %arg16[%c30_189, %c40_190] : memref<120x72xf32, #tpu.memory_space<vmem>>, vector<10x8xf32>
    tpu.vector_store %arg16[%c30_189, %c40_190], %145 {strides = array<i32>} : memref<120x72xf32, #tpu.memory_space<vmem>>, vector<10x8xf32>,
    %c0_191 = arith.constant 0 : index
    %c44 = arith.constant 44 : index
    %c0_192 = arith.constant 0 : index
    %147 = vector.load %arg15[%c0_191, %c44, %c0_192] : memref<4x154x8xf32, #tpu.memory_space<vmem>>, vector<1x10x8xf32>
    %148 = vector.shape_cast %147 : vector<1x10x8xf32> to vector<10x8xf32>
    %c30_193 = arith.constant 30 : index
    %c48_194 = arith.constant 48 : index
    %149 = vector.load %arg16[%c30_193, %c48_194] : memref<120x72xf32, #tpu.memory_space<vmem>>, vector<10x8xf32>
    tpu.vector_store %arg16[%c30_193, %c48_194], %148 {strides = array<i32>} : memref<120x72xf32, #tpu.memory_space<vmem>>, vector<10x8xf32>,
    %c1_195 = arith.constant 1 : index
    %c44_196 = arith.constant 44 : index
    %c0_197 = arith.constant 0 : index
    %150 = vector.load %arg15[%c1_195, %c44_196, %c0_197] : memref<4x154x8xf32, #tpu.memory_space<vmem>>, vector<1x10x8xf32>
    %151 = vector.shape_cast %150 : vector<1x10x8xf32> to vector<10x8xf32>
    %c30_198 = arith.constant 30 : index
    %c56_199 = arith.constant 56 : index
    %152 = vector.load %arg16[%c30_198, %c56_199] : memref<120x72xf32, #tpu.memory_space<vmem>>, vector<10x8xf32>
    tpu.vector_store %arg16[%c30_198, %c56_199], %151 {strides = array<i32>} : memref<120x72xf32, #tpu.memory_space<vmem>>, vector<10x8xf32>,
    %c0_200 = arith.constant 0 : index
    %c45 = arith.constant 45 : index
    %c0_201 = arith.constant 0 : index
    %153 = vector.load %arg15[%c0_200, %c45, %c0_201] : memref<4x154x8xf32, #tpu.memory_space<vmem>>, vector<1x10x8xf32>
    %154 = vector.shape_cast %153 : vector<1x10x8xf32> to vector<10x8xf32>
    %c30_202 = arith.constant 30 : index
    %c64_203 = arith.constant 64 : index
    %155 = vector.load %arg16[%c30_202, %c64_203] : memref<120x72xf32, #tpu.memory_space<vmem>>, vector<10x8xf32>
    tpu.vector_store %arg16[%c30_202, %c64_203], %154 {strides = array<i32>} : memref<120x72xf32, #tpu.memory_space<vmem>>, vector<10x8xf32>,
    %c0_204 = arith.constant 0 : index
    %c44_205 = arith.constant 44 : index
    %c0_206 = arith.constant 0 : index
    %156 = vector.load %arg15[%c0_204, %c44_205, %c0_206] : memref<4x154x8xf32, #tpu.memory_space<vmem>>, vector<1x10x8xf32>
    %157 = vector.shape_cast %156 : vector<1x10x8xf32> to vector<10x8xf32>
    %c40_207 = arith.constant 40 : index
    %c0_208 = arith.constant 0 : index
    %158 = vector.load %arg16[%c40_207, %c0_208] : memref<120x72xf32, #tpu.memory_space<vmem>>, vector<10x8xf32>
    tpu.vector_store %arg16[%c40_207, %c0_208], %157 {strides = array<i32>} : memref<120x72xf32, #tpu.memory_space<vmem>>, vector<10x8xf32>,
    %c1_209 = arith.constant 1 : index
    %c44_210 = arith.constant 44 : index
    %c0_211 = arith.constant 0 : index
    %159 = vector.load %arg15[%c1_209, %c44_210, %c0_211] : memref<4x154x8xf32, #tpu.memory_space<vmem>>, vector<1x10x8xf32>
    %160 = vector.shape_cast %159 : vector<1x10x8xf32> to vector<10x8xf32>
    %c40_212 = arith.constant 40 : index
    %c8_213 = arith.constant 8 : index
    %161 = vector.load %arg16[%c40_212, %c8_213] : memref<120x72xf32, #tpu.memory_space<vmem>>, vector<10x8xf32>
    tpu.vector_store %arg16[%c40_212, %c8_213], %160 {strides = array<i32>} : memref<120x72xf32, #tpu.memory_space<vmem>>, vector<10x8xf32>,
    %c0_214 = arith.constant 0 : index
    %c45_215 = arith.constant 45 : index
    %c0_216 = arith.constant 0 : index
    %162 = vector.load %arg15[%c0_214, %c45_215, %c0_216] : memref<4x154x8xf32, #tpu.memory_space<vmem>>, vector<1x10x8xf32>
    %163 = vector.shape_cast %162 : vector<1x10x8xf32> to vector<10x8xf32>
    %c40_217 = arith.constant 40 : index
    %c16_218 = arith.constant 16 : index
    %164 = vector.load %arg16[%c40_217, %c16_218] : memref<120x72xf32, #tpu.memory_space<vmem>>, vector<10x8xf32>
    tpu.vector_store %arg16[%c40_217, %c16_218], %163 {strides = array<i32>} : memref<120x72xf32, #tpu.memory_space<vmem>>, vector<10x8xf32>,
    %c2_219 = arith.constant 2 : index
    %c44_220 = arith.constant 44 : index
    %c0_221 = arith.constant 0 : index
    %165 = vector.load %arg15[%c2_219, %c44_220, %c0_221] : memref<4x154x8xf32, #tpu.memory_space<vmem>>, vector<1x10x8xf32>
    %166 = vector.shape_cast %165 : vector<1x10x8xf32> to vector<10x8xf32>
    %c40_222 = arith.constant 40 : index
    %c24_223 = arith.constant 24 : index
    %167 = vector.load %arg16[%c40_222, %c24_223] : memref<120x72xf32, #tpu.memory_space<vmem>>, vector<10x8xf32>
    tpu.vector_store %arg16[%c40_222, %c24_223], %166 {strides = array<i32>} : memref<120x72xf32, #tpu.memory_space<vmem>>, vector<10x8xf32>,
    %c3_224 = arith.constant 3 : index
    %c44_225 = arith.constant 44 : index
    %c0_226 = arith.constant 0 : index
    %168 = vector.load %arg15[%c3_224, %c44_225, %c0_226] : memref<4x154x8xf32, #tpu.memory_space<vmem>>, vector<1x10x8xf32>
    %169 = vector.shape_cast %168 : vector<1x10x8xf32> to vector<10x8xf32>
    %c40_227 = arith.constant 40 : index
    %c32_228 = arith.constant 32 : index
    %170 = vector.load %arg16[%c40_227, %c32_228] : memref<120x72xf32, #tpu.memory_space<vmem>>, vector<10x8xf32>
    tpu.vector_store %arg16[%c40_227, %c32_228], %169 {strides = array<i32>} : memref<120x72xf32, #tpu.memory_space<vmem>>, vector<10x8xf32>,
    %c2_229 = arith.constant 2 : index
    %c45_230 = arith.constant 45 : index
    %c0_231 = arith.constant 0 : index
    %171 = vector.load %arg15[%c2_229, %c45_230, %c0_231] : memref<4x154x8xf32, #tpu.memory_space<vmem>>, vector<1x10x8xf32>
    %172 = vector.shape_cast %171 : vector<1x10x8xf32> to vector<10x8xf32>
    %c40_232 = arith.constant 40 : index
    %c40_233 = arith.constant 40 : index
    %173 = vector.load %arg16[%c40_232, %c40_233] : memref<120x72xf32, #tpu.memory_space<vmem>>, vector<10x8xf32>
    tpu.vector_store %arg16[%c40_232, %c40_233], %172 {strides = array<i32>} : memref<120x72xf32, #tpu.memory_space<vmem>>, vector<10x8xf32>,
    %c0_234 = arith.constant 0 : index
    %c55 = arith.constant 55 : index
    %c0_235 = arith.constant 0 : index
    %174 = vector.load %arg15[%c0_234, %c55, %c0_235] : memref<4x154x8xf32, #tpu.memory_space<vmem>>, vector<1x10x8xf32>
    %175 = vector.shape_cast %174 : vector<1x10x8xf32> to vector<10x8xf32>
    %c40_236 = arith.constant 40 : index
    %c48_237 = arith.constant 48 : index
    %176 = vector.load %arg16[%c40_236, %c48_237] : memref<120x72xf32, #tpu.memory_space<vmem>>, vector<10x8xf32>
    tpu.vector_store %arg16[%c40_236, %c48_237], %175 {strides = array<i32>} : memref<120x72xf32, #tpu.memory_space<vmem>>, vector<10x8xf32>,
    %c1_238 = arith.constant 1 : index
    %c55_239 = arith.constant 55 : index
    %c0_240 = arith.constant 0 : index
    %177 = vector.load %arg15[%c1_238, %c55_239, %c0_240] : memref<4x154x8xf32, #tpu.memory_space<vmem>>, vector<1x10x8xf32>
    %178 = vector.shape_cast %177 : vector<1x10x8xf32> to vector<10x8xf32>
    %c40_241 = arith.constant 40 : index
    %c56_242 = arith.constant 56 : index
    %179 = vector.load %arg16[%c40_241, %c56_242] : memref<120x72xf32, #tpu.memory_space<vmem>>, vector<10x8xf32>
    tpu.vector_store %arg16[%c40_241, %c56_242], %178 {strides = array<i32>} : memref<120x72xf32, #tpu.memory_space<vmem>>, vector<10x8xf32>,
    %c0_243 = arith.constant 0 : index
    %c56_244 = arith.constant 56 : index
    %c0_245 = arith.constant 0 : index
    %180 = vector.load %arg15[%c0_243, %c56_244, %c0_245] : memref<4x154x8xf32, #tpu.memory_space<vmem>>, vector<1x10x8xf32>
    %181 = vector.shape_cast %180 : vector<1x10x8xf32> to vector<10x8xf32>
    %c40_246 = arith.constant 40 : index
    %c64_247 = arith.constant 64 : index
    %182 = vector.load %arg16[%c40_246, %c64_247] : memref<120x72xf32, #tpu.memory_space<vmem>>, vector<10x8xf32>
    tpu.vector_store %arg16[%c40_246, %c64_247], %181 {strides = array<i32>} : memref<120x72xf32, #tpu.memory_space<vmem>>, vector<10x8xf32>,
    %c0_248 = arith.constant 0 : index
    %c55_249 = arith.constant 55 : index
    %c0_250 = arith.constant 0 : index
    %183 = vector.load %arg15[%c0_248, %c55_249, %c0_250] : memref<4x154x8xf32, #tpu.memory_space<vmem>>, vector<1x10x8xf32>
    %184 = vector.shape_cast %183 : vector<1x10x8xf32> to vector<10x8xf32>
    %c50 = arith.constant 50 : index
    %c0_251 = arith.constant 0 : index
    %185 = vector.load %arg16[%c50, %c0_251] : memref<120x72xf32, #tpu.memory_space<vmem>>, vector<10x8xf32>
    tpu.vector_store %arg16[%c50, %c0_251], %184 {strides = array<i32>} : memref<120x72xf32, #tpu.memory_space<vmem>>, vector<10x8xf32>,
    %c1_252 = arith.constant 1 : index
    %c55_253 = arith.constant 55 : index
    %c0_254 = arith.constant 0 : index
    %186 = vector.load %arg15[%c1_252, %c55_253, %c0_254] : memref<4x154x8xf32, #tpu.memory_space<vmem>>, vector<1x10x8xf32>
    %187 = vector.shape_cast %186 : vector<1x10x8xf32> to vector<10x8xf32>
    %c50_255 = arith.constant 50 : index
    %c8_256 = arith.constant 8 : index
    %188 = vector.load %arg16[%c50_255, %c8_256] : memref<120x72xf32, #tpu.memory_space<vmem>>, vector<10x8xf32>
    tpu.vector_store %arg16[%c50_255, %c8_256], %187 {strides = array<i32>} : memref<120x72xf32, #tpu.memory_space<vmem>>, vector<10x8xf32>,
    %c0_257 = arith.constant 0 : index
    %c56_258 = arith.constant 56 : index
    %c0_259 = arith.constant 0 : index
    %189 = vector.load %arg15[%c0_257, %c56_258, %c0_259] : memref<4x154x8xf32, #tpu.memory_space<vmem>>, vector<1x10x8xf32>
    %190 = vector.shape_cast %189 : vector<1x10x8xf32> to vector<10x8xf32>
    %c50_260 = arith.constant 50 : index
    %c16_261 = arith.constant 16 : index
    %191 = vector.load %arg16[%c50_260, %c16_261] : memref<120x72xf32, #tpu.memory_space<vmem>>, vector<10x8xf32>
    tpu.vector_store %arg16[%c50_260, %c16_261], %190 {strides = array<i32>} : memref<120x72xf32, #tpu.memory_space<vmem>>, vector<10x8xf32>,
    %c2_262 = arith.constant 2 : index
    %c55_263 = arith.constant 55 : index
    %c0_264 = arith.constant 0 : index
    %192 = vector.load %arg15[%c2_262, %c55_263, %c0_264] : memref<4x154x8xf32, #tpu.memory_space<vmem>>, vector<1x10x8xf32>
    %193 = vector.shape_cast %192 : vector<1x10x8xf32> to vector<10x8xf32>
    %c50_265 = arith.constant 50 : index
    %c24_266 = arith.constant 24 : index
    %194 = vector.load %arg16[%c50_265, %c24_266] : memref<120x72xf32, #tpu.memory_space<vmem>>, vector<10x8xf32>
    tpu.vector_store %arg16[%c50_265, %c24_266], %193 {strides = array<i32>} : memref<120x72xf32, #tpu.memory_space<vmem>>, vector<10x8xf32>,
    %c3_267 = arith.constant 3 : index
    %c55_268 = arith.constant 55 : index
    %c0_269 = arith.constant 0 : index
    %195 = vector.load %arg15[%c3_267, %c55_268, %c0_269] : memref<4x154x8xf32, #tpu.memory_space<vmem>>, vector<1x10x8xf32>
    %196 = vector.shape_cast %195 : vector<1x10x8xf32> to vector<10x8xf32>
    %c50_270 = arith.constant 50 : index
    %c32_271 = arith.constant 32 : index
    %197 = vector.load %arg16[%c50_270, %c32_271] : memref<120x72xf32, #tpu.memory_space<vmem>>, vector<10x8xf32>
    tpu.vector_store %arg16[%c50_270, %c32_271], %196 {strides = array<i32>} : memref<120x72xf32, #tpu.memory_space<vmem>>, vector<10x8xf32>,
    %c2_272 = arith.constant 2 : index
    %c56_273 = arith.constant 56 : index
    %c0_274 = arith.constant 0 : index
    %198 = vector.load %arg15[%c2_272, %c56_273, %c0_274] : memref<4x154x8xf32, #tpu.memory_space<vmem>>, vector<1x10x8xf32>
    %199 = vector.shape_cast %198 : vector<1x10x8xf32> to vector<10x8xf32>
    %c50_275 = arith.constant 50 : index
    %c40_276 = arith.constant 40 : index
    %200 = vector.load %arg16[%c50_275, %c40_276] : memref<120x72xf32, #tpu.memory_space<vmem>>, vector<10x8xf32>
    tpu.vector_store %arg16[%c50_275, %c40_276], %199 {strides = array<i32>} : memref<120x72xf32, #tpu.memory_space<vmem>>, vector<10x8xf32>,
    %c0_277 = arith.constant 0 : index
    %c66 = arith.constant 66 : index
    %c0_278 = arith.constant 0 : index
    %201 = vector.load %arg15[%c0_277, %c66, %c0_278] : memref<4x154x8xf32, #tpu.memory_space<vmem>>, vector<1x10x8xf32>
    %202 = vector.shape_cast %201 : vector<1x10x8xf32> to vector<10x8xf32>
    %c50_279 = arith.constant 50 : index
    %c48_280 = arith.constant 48 : index
    %203 = vector.load %arg16[%c50_279, %c48_280] : memref<120x72xf32, #tpu.memory_space<vmem>>, vector<10x8xf32>
    tpu.vector_store %arg16[%c50_279, %c48_280], %202 {strides = array<i32>} : memref<120x72xf32, #tpu.memory_space<vmem>>, vector<10x8xf32>,
    %c1_281 = arith.constant 1 : index
    %c66_282 = arith.constant 66 : index
    %c0_283 = arith.constant 0 : index
    %204 = vector.load %arg15[%c1_281, %c66_282, %c0_283] : memref<4x154x8xf32, #tpu.memory_space<vmem>>, vector<1x10x8xf32>
    %205 = vector.shape_cast %204 : vector<1x10x8xf32> to vector<10x8xf32>
    %c50_284 = arith.constant 50 : index
    %c56_285 = arith.constant 56 : index
    %206 = vector.load %arg16[%c50_284, %c56_285] : memref<120x72xf32, #tpu.memory_space<vmem>>, vector<10x8xf32>
    tpu.vector_store %arg16[%c50_284, %c56_285], %205 {strides = array<i32>} : memref<120x72xf32, #tpu.memory_space<vmem>>, vector<10x8xf32>,
    %c0_286 = arith.constant 0 : index
    %c67 = arith.constant 67 : index
    %c0_287 = arith.constant 0 : index
    %207 = vector.load %arg15[%c0_286, %c67, %c0_287] : memref<4x154x8xf32, #tpu.memory_space<vmem>>, vector<1x10x8xf32>
    %208 = vector.shape_cast %207 : vector<1x10x8xf32> to vector<10x8xf32>
    %c50_288 = arith.constant 50 : index
    %c64_289 = arith.constant 64 : index
    %209 = vector.load %arg16[%c50_288, %c64_289] : memref<120x72xf32, #tpu.memory_space<vmem>>, vector<10x8xf32>
    tpu.vector_store %arg16[%c50_288, %c64_289], %208 {strides = array<i32>} : memref<120x72xf32, #tpu.memory_space<vmem>>, vector<10x8xf32>,
    %c0_290 = arith.constant 0 : index
    %c77 = arith.constant 77 : index
    %c0_291 = arith.constant 0 : index
    %210 = vector.load %arg15[%c0_290, %c77, %c0_291] : memref<4x154x8xf32, #tpu.memory_space<vmem>>, vector<1x10x8xf32>
    %211 = vector.shape_cast %210 : vector<1x10x8xf32> to vector<10x8xf32>
    %c60 = arith.constant 60 : index
    %c0_292 = arith.constant 0 : index
    %212 = vector.load %arg16[%c60, %c0_292] : memref<120x72xf32, #tpu.memory_space<vmem>>, vector<10x8xf32>
    tpu.vector_store %arg16[%c60, %c0_292], %211 {strides = array<i32>} : memref<120x72xf32, #tpu.memory_space<vmem>>, vector<10x8xf32>,
    %c1_293 = arith.constant 1 : index
    %c77_294 = arith.constant 77 : index
    %c0_295 = arith.constant 0 : index
    %213 = vector.load %arg15[%c1_293, %c77_294, %c0_295] : memref<4x154x8xf32, #tpu.memory_space<vmem>>, vector<1x10x8xf32>
    %214 = vector.shape_cast %213 : vector<1x10x8xf32> to vector<10x8xf32>
    %c60_296 = arith.constant 60 : index
    %c8_297 = arith.constant 8 : index
    %215 = vector.load %arg16[%c60_296, %c8_297] : memref<120x72xf32, #tpu.memory_space<vmem>>, vector<10x8xf32>
    tpu.vector_store %arg16[%c60_296, %c8_297], %214 {strides = array<i32>} : memref<120x72xf32, #tpu.memory_space<vmem>>, vector<10x8xf32>,
    %c0_298 = arith.constant 0 : index
    %c78 = arith.constant 78 : index
    %c0_299 = arith.constant 0 : index
    %216 = vector.load %arg15[%c0_298, %c78, %c0_299] : memref<4x154x8xf32, #tpu.memory_space<vmem>>, vector<1x10x8xf32>
    %217 = vector.shape_cast %216 : vector<1x10x8xf32> to vector<10x8xf32>
    %c60_300 = arith.constant 60 : index
    %c16_301 = arith.constant 16 : index
    %218 = vector.load %arg16[%c60_300, %c16_301] : memref<120x72xf32, #tpu.memory_space<vmem>>, vector<10x8xf32>
    tpu.vector_store %arg16[%c60_300, %c16_301], %217 {strides = array<i32>} : memref<120x72xf32, #tpu.memory_space<vmem>>, vector<10x8xf32>,
    %c2_302 = arith.constant 2 : index
    %c77_303 = arith.constant 77 : index
    %c0_304 = arith.constant 0 : index
    %219 = vector.load %arg15[%c2_302, %c77_303, %c0_304] : memref<4x154x8xf32, #tpu.memory_space<vmem>>, vector<1x10x8xf32>
    %220 = vector.shape_cast %219 : vector<1x10x8xf32> to vector<10x8xf32>
    %c60_305 = arith.constant 60 : index
    %c24_306 = arith.constant 24 : index
    %221 = vector.load %arg16[%c60_305, %c24_306] : memref<120x72xf32, #tpu.memory_space<vmem>>, vector<10x8xf32>
    tpu.vector_store %arg16[%c60_305, %c24_306], %220 {strides = array<i32>} : memref<120x72xf32, #tpu.memory_space<vmem>>, vector<10x8xf32>,
    %c3_307 = arith.constant 3 : index
    %c77_308 = arith.constant 77 : index
    %c0_309 = arith.constant 0 : index
    %222 = vector.load %arg15[%c3_307, %c77_308, %c0_309] : memref<4x154x8xf32, #tpu.memory_space<vmem>>, vector<1x10x8xf32>
    %223 = vector.shape_cast %222 : vector<1x10x8xf32> to vector<10x8xf32>
    %c60_310 = arith.constant 60 : index
    %c32_311 = arith.constant 32 : index
    %224 = vector.load %arg16[%c60_310, %c32_311] : memref<120x72xf32, #tpu.memory_space<vmem>>, vector<10x8xf32>
    tpu.vector_store %arg16[%c60_310, %c32_311], %223 {strides = array<i32>} : memref<120x72xf32, #tpu.memory_space<vmem>>, vector<10x8xf32>,
    %c2_312 = arith.constant 2 : index
    %c78_313 = arith.constant 78 : index
    %c0_314 = arith.constant 0 : index
    %225 = vector.load %arg15[%c2_312, %c78_313, %c0_314] : memref<4x154x8xf32, #tpu.memory_space<vmem>>, vector<1x10x8xf32>
    %226 = vector.shape_cast %225 : vector<1x10x8xf32> to vector<10x8xf32>
    %c60_315 = arith.constant 60 : index
    %c40_316 = arith.constant 40 : index
    %227 = vector.load %arg16[%c60_315, %c40_316] : memref<120x72xf32, #tpu.memory_space<vmem>>, vector<10x8xf32>
    tpu.vector_store %arg16[%c60_315, %c40_316], %226 {strides = array<i32>} : memref<120x72xf32, #tpu.memory_space<vmem>>, vector<10x8xf32>,
    %c0_317 = arith.constant 0 : index
    %c88 = arith.constant 88 : index
    %c0_318 = arith.constant 0 : index
    %228 = vector.load %arg15[%c0_317, %c88, %c0_318] : memref<4x154x8xf32, #tpu.memory_space<vmem>>, vector<1x10x8xf32>
    %229 = vector.shape_cast %228 : vector<1x10x8xf32> to vector<10x8xf32>
    %c60_319 = arith.constant 60 : index
    %c48_320 = arith.constant 48 : index
    %230 = vector.load %arg16[%c60_319, %c48_320] : memref<120x72xf32, #tpu.memory_space<vmem>>, vector<10x8xf32>
    tpu.vector_store %arg16[%c60_319, %c48_320], %229 {strides = array<i32>} : memref<120x72xf32, #tpu.memory_space<vmem>>, vector<10x8xf32>,
    %c1_321 = arith.constant 1 : index
    %c88_322 = arith.constant 88 : index
    %c0_323 = arith.constant 0 : index
    %231 = vector.load %arg15[%c1_321, %c88_322, %c0_323] : memref<4x154x8xf32, #tpu.memory_space<vmem>>, vector<1x10x8xf32>
    %232 = vector.shape_cast %231 : vector<1x10x8xf32> to vector<10x8xf32>
    %c60_324 = arith.constant 60 : index
    %c56_325 = arith.constant 56 : index
    %233 = vector.load %arg16[%c60_324, %c56_325] : memref<120x72xf32, #tpu.memory_space<vmem>>, vector<10x8xf32>
    tpu.vector_store %arg16[%c60_324, %c56_325], %232 {strides = array<i32>} : memref<120x72xf32, #tpu.memory_space<vmem>>, vector<10x8xf32>,
    %c0_326 = arith.constant 0 : index
    %c89 = arith.constant 89 : index
    %c0_327 = arith.constant 0 : index
    %234 = vector.load %arg15[%c0_326, %c89, %c0_327] : memref<4x154x8xf32, #tpu.memory_space<vmem>>, vector<1x10x8xf32>
    %235 = vector.shape_cast %234 : vector<1x10x8xf32> to vector<10x8xf32>
    %c60_328 = arith.constant 60 : index
    %c64_329 = arith.constant 64 : index
    %236 = vector.load %arg16[%c60_328, %c64_329] : memref<120x72xf32, #tpu.memory_space<vmem>>, vector<10x8xf32>
    tpu.vector_store %arg16[%c60_328, %c64_329], %235 {strides = array<i32>} : memref<120x72xf32, #tpu.memory_space<vmem>>, vector<10x8xf32>,
    %c0_330 = arith.constant 0 : index
    %c88_331 = arith.constant 88 : index
    %c0_332 = arith.constant 0 : index
    %237 = vector.load %arg15[%c0_330, %c88_331, %c0_332] : memref<4x154x8xf32, #tpu.memory_space<vmem>>, vector<1x10x8xf32>
    %238 = vector.shape_cast %237 : vector<1x10x8xf32> to vector<10x8xf32>
    %c70 = arith.constant 70 : index
    %c0_333 = arith.constant 0 : index
    %239 = vector.load %arg16[%c70, %c0_333] : memref<120x72xf32, #tpu.memory_space<vmem>>, vector<10x8xf32>
    tpu.vector_store %arg16[%c70, %c0_333], %238 {strides = array<i32>} : memref<120x72xf32, #tpu.memory_space<vmem>>, vector<10x8xf32>,
    %c1_334 = arith.constant 1 : index
    %c88_335 = arith.constant 88 : index
    %c0_336 = arith.constant 0 : index
    %240 = vector.load %arg15[%c1_334, %c88_335, %c0_336] : memref<4x154x8xf32, #tpu.memory_space<vmem>>, vector<1x10x8xf32>
    %241 = vector.shape_cast %240 : vector<1x10x8xf32> to vector<10x8xf32>
    %c70_337 = arith.constant 70 : index
    %c8_338 = arith.constant 8 : index
    %242 = vector.load %arg16[%c70_337, %c8_338] : memref<120x72xf32, #tpu.memory_space<vmem>>, vector<10x8xf32>
    tpu.vector_store %arg16[%c70_337, %c8_338], %241 {strides = array<i32>} : memref<120x72xf32, #tpu.memory_space<vmem>>, vector<10x8xf32>,
    %c0_339 = arith.constant 0 : index
    %c89_340 = arith.constant 89 : index
    %c0_341 = arith.constant 0 : index
    %243 = vector.load %arg15[%c0_339, %c89_340, %c0_341] : memref<4x154x8xf32, #tpu.memory_space<vmem>>, vector<1x10x8xf32>
    %244 = vector.shape_cast %243 : vector<1x10x8xf32> to vector<10x8xf32>
    %c70_342 = arith.constant 70 : index
    %c16_343 = arith.constant 16 : index
    %245 = vector.load %arg16[%c70_342, %c16_343] : memref<120x72xf32, #tpu.memory_space<vmem>>, vector<10x8xf32>
    tpu.vector_store %arg16[%c70_342, %c16_343], %244 {strides = array<i32>} : memref<120x72xf32, #tpu.memory_space<vmem>>, vector<10x8xf32>,
    %c2_344 = arith.constant 2 : index
    %c88_345 = arith.constant 88 : index
    %c0_346 = arith.constant 0 : index
    %246 = vector.load %arg15[%c2_344, %c88_345, %c0_346] : memref<4x154x8xf32, #tpu.memory_space<vmem>>, vector<1x10x8xf32>
    %247 = vector.shape_cast %246 : vector<1x10x8xf32> to vector<10x8xf32>
    %c70_347 = arith.constant 70 : index
    %c24_348 = arith.constant 24 : index
    %248 = vector.load %arg16[%c70_347, %c24_348] : memref<120x72xf32, #tpu.memory_space<vmem>>, vector<10x8xf32>
    tpu.vector_store %arg16[%c70_347, %c24_348], %247 {strides = array<i32>} : memref<120x72xf32, #tpu.memory_space<vmem>>, vector<10x8xf32>,
    %c3_349 = arith.constant 3 : index
    %c88_350 = arith.constant 88 : index
    %c0_351 = arith.constant 0 : index
    %249 = vector.load %arg15[%c3_349, %c88_350, %c0_351] : memref<4x154x8xf32, #tpu.memory_space<vmem>>, vector<1x10x8xf32>
    %250 = vector.shape_cast %249 : vector<1x10x8xf32> to vector<10x8xf32>
    %c70_352 = arith.constant 70 : index
    %c32_353 = arith.constant 32 : index
    %251 = vector.load %arg16[%c70_352, %c32_353] : memref<120x72xf32, #tpu.memory_space<vmem>>, vector<10x8xf32>
    tpu.vector_store %arg16[%c70_352, %c32_353], %250 {strides = array<i32>} : memref<120x72xf32, #tpu.memory_space<vmem>>, vector<10x8xf32>,
    %c2_354 = arith.constant 2 : index
    %c89_355 = arith.constant 89 : index
    %c0_356 = arith.constant 0 : index
    %252 = vector.load %arg15[%c2_354, %c89_355, %c0_356] : memref<4x154x8xf32, #tpu.memory_space<vmem>>, vector<1x10x8xf32>
    %253 = vector.shape_cast %252 : vector<1x10x8xf32> to vector<10x8xf32>
    %c70_357 = arith.constant 70 : index
    %c40_358 = arith.constant 40 : index
    %254 = vector.load %arg16[%c70_357, %c40_358] : memref<120x72xf32, #tpu.memory_space<vmem>>, vector<10x8xf32>
    tpu.vector_store %arg16[%c70_357, %c40_358], %253 {strides = array<i32>} : memref<120x72xf32, #tpu.memory_space<vmem>>, vector<10x8xf32>,
    %c0_359 = arith.constant 0 : index
    %c99 = arith.constant 99 : index
    %c0_360 = arith.constant 0 : index
    %255 = vector.load %arg15[%c0_359, %c99, %c0_360] : memref<4x154x8xf32, #tpu.memory_space<vmem>>, vector<1x10x8xf32>
    %256 = vector.shape_cast %255 : vector<1x10x8xf32> to vector<10x8xf32>
    %c70_361 = arith.constant 70 : index
    %c48_362 = arith.constant 48 : index
    %257 = vector.load %arg16[%c70_361, %c48_362] : memref<120x72xf32, #tpu.memory_space<vmem>>, vector<10x8xf32>
    tpu.vector_store %arg16[%c70_361, %c48_362], %256 {strides = array<i32>} : memref<120x72xf32, #tpu.memory_space<vmem>>, vector<10x8xf32>,
    %c1_363 = arith.constant 1 : index
    %c99_364 = arith.constant 99 : index
    %c0_365 = arith.constant 0 : index
    %258 = vector.load %arg15[%c1_363, %c99_364, %c0_365] : memref<4x154x8xf32, #tpu.memory_space<vmem>>, vector<1x10x8xf32>
    %259 = vector.shape_cast %258 : vector<1x10x8xf32> to vector<10x8xf32>
    %c70_366 = arith.constant 70 : index
    %c56_367 = arith.constant 56 : index
    %260 = vector.load %arg16[%c70_366, %c56_367] : memref<120x72xf32, #tpu.memory_space<vmem>>, vector<10x8xf32>
    tpu.vector_store %arg16[%c70_366, %c56_367], %259 {strides = array<i32>} : memref<120x72xf32, #tpu.memory_space<vmem>>, vector<10x8xf32>,
    %c0_368 = arith.constant 0 : index
    %c100 = arith.constant 100 : index
    %c0_369 = arith.constant 0 : index
    %261 = vector.load %arg15[%c0_368, %c100, %c0_369] : memref<4x154x8xf32, #tpu.memory_space<vmem>>, vector<1x10x8xf32>
    %262 = vector.shape_cast %261 : vector<1x10x8xf32> to vector<10x8xf32>
    %c70_370 = arith.constant 70 : index
    %c64_371 = arith.constant 64 : index
    %263 = vector.load %arg16[%c70_370, %c64_371] : memref<120x72xf32, #tpu.memory_space<vmem>>, vector<10x8xf32>
    tpu.vector_store %arg16[%c70_370, %c64_371], %262 {strides = array<i32>} : memref<120x72xf32, #tpu.memory_space<vmem>>, vector<10x8xf32>,
    %c0_372 = arith.constant 0 : index
    %c99_373 = arith.constant 99 : index
    %c0_374 = arith.constant 0 : index
    %264 = vector.load %arg15[%c0_372, %c99_373, %c0_374] : memref<4x154x8xf32, #tpu.memory_space<vmem>>, vector<1x10x8xf32>
    %265 = vector.shape_cast %264 : vector<1x10x8xf32> to vector<10x8xf32>
    %c80 = arith.constant 80 : index
    %c0_375 = arith.constant 0 : index
    %266 = vector.load %arg16[%c80, %c0_375] : memref<120x72xf32, #tpu.memory_space<vmem>>, vector<10x8xf32>
    tpu.vector_store %arg16[%c80, %c0_375], %265 {strides = array<i32>} : memref<120x72xf32, #tpu.memory_space<vmem>>, vector<10x8xf32>,
    %c1_376 = arith.constant 1 : index
    %c99_377 = arith.constant 99 : index
    %c0_378 = arith.constant 0 : index
    %267 = vector.load %arg15[%c1_376, %c99_377, %c0_378] : memref<4x154x8xf32, #tpu.memory_space<vmem>>, vector<1x10x8xf32>
    %268 = vector.shape_cast %267 : vector<1x10x8xf32> to vector<10x8xf32>
    %c80_379 = arith.constant 80 : index
    %c8_380 = arith.constant 8 : index
    %269 = vector.load %arg16[%c80_379, %c8_380] : memref<120x72xf32, #tpu.memory_space<vmem>>, vector<10x8xf32>
    tpu.vector_store %arg16[%c80_379, %c8_380], %268 {strides = array<i32>} : memref<120x72xf32, #tpu.memory_space<vmem>>, vector<10x8xf32>,
    %c0_381 = arith.constant 0 : index
    %c100_382 = arith.constant 100 : index
    %c0_383 = arith.constant 0 : index
    %270 = vector.load %arg15[%c0_381, %c100_382, %c0_383] : memref<4x154x8xf32, #tpu.memory_space<vmem>>, vector<1x10x8xf32>
    %271 = vector.shape_cast %270 : vector<1x10x8xf32> to vector<10x8xf32>
    %c80_384 = arith.constant 80 : index
    %c16_385 = arith.constant 16 : index
    %272 = vector.load %arg16[%c80_384, %c16_385] : memref<120x72xf32, #tpu.memory_space<vmem>>, vector<10x8xf32>
    tpu.vector_store %arg16[%c80_384, %c16_385], %271 {strides = array<i32>} : memref<120x72xf32, #tpu.memory_space<vmem>>, vector<10x8xf32>,
    %c2_386 = arith.constant 2 : index
    %c99_387 = arith.constant 99 : index
    %c0_388 = arith.constant 0 : index
    %273 = vector.load %arg15[%c2_386, %c99_387, %c0_388] : memref<4x154x8xf32, #tpu.memory_space<vmem>>, vector<1x10x8xf32>
    %274 = vector.shape_cast %273 : vector<1x10x8xf32> to vector<10x8xf32>
    %c80_389 = arith.constant 80 : index
    %c24_390 = arith.constant 24 : index
    %275 = vector.load %arg16[%c80_389, %c24_390] : memref<120x72xf32, #tpu.memory_space<vmem>>, vector<10x8xf32>
    tpu.vector_store %arg16[%c80_389, %c24_390], %274 {strides = array<i32>} : memref<120x72xf32, #tpu.memory_space<vmem>>, vector<10x8xf32>,
    %c3_391 = arith.constant 3 : index
    %c99_392 = arith.constant 99 : index
    %c0_393 = arith.constant 0 : index
    %276 = vector.load %arg15[%c3_391, %c99_392, %c0_393] : memref<4x154x8xf32, #tpu.memory_space<vmem>>, vector<1x10x8xf32>
    %277 = vector.shape_cast %276 : vector<1x10x8xf32> to vector<10x8xf32>
    %c80_394 = arith.constant 80 : index
    %c32_395 = arith.constant 32 : index
    %278 = vector.load %arg16[%c80_394, %c32_395] : memref<120x72xf32, #tpu.memory_space<vmem>>, vector<10x8xf32>
    tpu.vector_store %arg16[%c80_394, %c32_395], %277 {strides = array<i32>} : memref<120x72xf32, #tpu.memory_space<vmem>>, vector<10x8xf32>,
    %c2_396 = arith.constant 2 : index
    %c100_397 = arith.constant 100 : index
    %c0_398 = arith.constant 0 : index
    %279 = vector.load %arg15[%c2_396, %c100_397, %c0_398] : memref<4x154x8xf32, #tpu.memory_space<vmem>>, vector<1x10x8xf32>
    %280 = vector.shape_cast %279 : vector<1x10x8xf32> to vector<10x8xf32>
    %c80_399 = arith.constant 80 : index
    %c40_400 = arith.constant 40 : index
    %281 = vector.load %arg16[%c80_399, %c40_400] : memref<120x72xf32, #tpu.memory_space<vmem>>, vector<10x8xf32>
    tpu.vector_store %arg16[%c80_399, %c40_400], %280 {strides = array<i32>} : memref<120x72xf32, #tpu.memory_space<vmem>>, vector<10x8xf32>,
    %c0_401 = arith.constant 0 : index
    %c110 = arith.constant 110 : index
    %c0_402 = arith.constant 0 : index
    %282 = vector.load %arg15[%c0_401, %c110, %c0_402] : memref<4x154x8xf32, #tpu.memory_space<vmem>>, vector<1x10x8xf32>
    %283 = vector.shape_cast %282 : vector<1x10x8xf32> to vector<10x8xf32>
    %c80_403 = arith.constant 80 : index
    %c48_404 = arith.constant 48 : index
    %284 = vector.load %arg16[%c80_403, %c48_404] : memref<120x72xf32, #tpu.memory_space<vmem>>, vector<10x8xf32>
    tpu.vector_store %arg16[%c80_403, %c48_404], %283 {strides = array<i32>} : memref<120x72xf32, #tpu.memory_space<vmem>>, vector<10x8xf32>,
    %c1_405 = arith.constant 1 : index
    %c110_406 = arith.constant 110 : index
    %c0_407 = arith.constant 0 : index
    %285 = vector.load %arg15[%c1_405, %c110_406, %c0_407] : memref<4x154x8xf32, #tpu.memory_space<vmem>>, vector<1x10x8xf32>
    %286 = vector.shape_cast %285 : vector<1x10x8xf32> to vector<10x8xf32>
    %c80_408 = arith.constant 80 : index
    %c56_409 = arith.constant 56 : index
    %287 = vector.load %arg16[%c80_408, %c56_409] : memref<120x72xf32, #tpu.memory_space<vmem>>, vector<10x8xf32>
    tpu.vector_store %arg16[%c80_408, %c56_409], %286 {strides = array<i32>} : memref<120x72xf32, #tpu.memory_space<vmem>>, vector<10x8xf32>,
    %c0_410 = arith.constant 0 : index
    %c111 = arith.constant 111 : index
    %c0_411 = arith.constant 0 : index
    %288 = vector.load %arg15[%c0_410, %c111, %c0_411] : memref<4x154x8xf32, #tpu.memory_space<vmem>>, vector<1x10x8xf32>
    %289 = vector.shape_cast %288 : vector<1x10x8xf32> to vector<10x8xf32>
    %c80_412 = arith.constant 80 : index
    %c64_413 = arith.constant 64 : index
    %290 = vector.load %arg16[%c80_412, %c64_413] : memref<120x72xf32, #tpu.memory_space<vmem>>, vector<10x8xf32>
    tpu.vector_store %arg16[%c80_412, %c64_413], %289 {strides = array<i32>} : memref<120x72xf32, #tpu.memory_space<vmem>>, vector<10x8xf32>,
    %c0_414 = arith.constant 0 : index
    %c110_415 = arith.constant 110 : index
    %c0_416 = arith.constant 0 : index
    %291 = vector.load %arg15[%c0_414, %c110_415, %c0_416] : memref<4x154x8xf32, #tpu.memory_space<vmem>>, vector<1x10x8xf32>
    %292 = vector.shape_cast %291 : vector<1x10x8xf32> to vector<10x8xf32>
    %c90 = arith.constant 90 : index
    %c0_417 = arith.constant 0 : index
    %293 = vector.load %arg16[%c90, %c0_417] : memref<120x72xf32, #tpu.memory_space<vmem>>, vector<10x8xf32>
    tpu.vector_store %arg16[%c90, %c0_417], %292 {strides = array<i32>} : memref<120x72xf32, #tpu.memory_space<vmem>>, vector<10x8xf32>,
    %c1_418 = arith.constant 1 : index
    %c110_419 = arith.constant 110 : index
    %c0_420 = arith.constant 0 : index
    %294 = vector.load %arg15[%c1_418, %c110_419, %c0_420] : memref<4x154x8xf32, #tpu.memory_space<vmem>>, vector<1x10x8xf32>
    %295 = vector.shape_cast %294 : vector<1x10x8xf32> to vector<10x8xf32>
    %c90_421 = arith.constant 90 : index
    %c8_422 = arith.constant 8 : index
    %296 = vector.load %arg16[%c90_421, %c8_422] : memref<120x72xf32, #tpu.memory_space<vmem>>, vector<10x8xf32>
    tpu.vector_store %arg16[%c90_421, %c8_422], %295 {strides = array<i32>} : memref<120x72xf32, #tpu.memory_space<vmem>>, vector<10x8xf32>,
    %c0_423 = arith.constant 0 : index
    %c111_424 = arith.constant 111 : index
    %c0_425 = arith.constant 0 : index
    %297 = vector.load %arg15[%c0_423, %c111_424, %c0_425] : memref<4x154x8xf32, #tpu.memory_space<vmem>>, vector<1x10x8xf32>
    %298 = vector.shape_cast %297 : vector<1x10x8xf32> to vector<10x8xf32>
    %c90_426 = arith.constant 90 : index
    %c16_427 = arith.constant 16 : index
    %299 = vector.load %arg16[%c90_426, %c16_427] : memref<120x72xf32, #tpu.memory_space<vmem>>, vector<10x8xf32>
    tpu.vector_store %arg16[%c90_426, %c16_427], %298 {strides = array<i32>} : memref<120x72xf32, #tpu.memory_space<vmem>>, vector<10x8xf32>,
    %c2_428 = arith.constant 2 : index
    %c110_429 = arith.constant 110 : index
    %c0_430 = arith.constant 0 : index
    %300 = vector.load %arg15[%c2_428, %c110_429, %c0_430] : memref<4x154x8xf32, #tpu.memory_space<vmem>>, vector<1x10x8xf32>
    %301 = vector.shape_cast %300 : vector<1x10x8xf32> to vector<10x8xf32>
    %c90_431 = arith.constant 90 : index
    %c24_432 = arith.constant 24 : index
    %302 = vector.load %arg16[%c90_431, %c24_432] : memref<120x72xf32, #tpu.memory_space<vmem>>, vector<10x8xf32>
    tpu.vector_store %arg16[%c90_431, %c24_432], %301 {strides = array<i32>} : memref<120x72xf32, #tpu.memory_space<vmem>>, vector<10x8xf32>,
    %c3_433 = arith.constant 3 : index
    %c110_434 = arith.constant 110 : index
    %c0_435 = arith.constant 0 : index
    %303 = vector.load %arg15[%c3_433, %c110_434, %c0_435] : memref<4x154x8xf32, #tpu.memory_space<vmem>>, vector<1x10x8xf32>
    %304 = vector.shape_cast %303 : vector<1x10x8xf32> to vector<10x8xf32>
    %c90_436 = arith.constant 90 : index
    %c32_437 = arith.constant 32 : index
    %305 = vector.load %arg16[%c90_436, %c32_437] : memref<120x72xf32, #tpu.memory_space<vmem>>, vector<10x8xf32>
    tpu.vector_store %arg16[%c90_436, %c32_437], %304 {strides = array<i32>} : memref<120x72xf32, #tpu.memory_space<vmem>>, vector<10x8xf32>,
    %c2_438 = arith.constant 2 : index
    %c111_439 = arith.constant 111 : index
    %c0_440 = arith.constant 0 : index
    %306 = vector.load %arg15[%c2_438, %c111_439, %c0_440] : memref<4x154x8xf32, #tpu.memory_space<vmem>>, vector<1x10x8xf32>
    %307 = vector.shape_cast %306 : vector<1x10x8xf32> to vector<10x8xf32>
    %c90_441 = arith.constant 90 : index
    %c40_442 = arith.constant 40 : index
    %308 = vector.load %arg16[%c90_441, %c40_442] : memref<120x72xf32, #tpu.memory_space<vmem>>, vector<10x8xf32>
    tpu.vector_store %arg16[%c90_441, %c40_442], %307 {strides = array<i32>} : memref<120x72xf32, #tpu.memory_space<vmem>>, vector<10x8xf32>,
    %c0_443 = arith.constant 0 : index
    %c121 = arith.constant 121 : index
    %c0_444 = arith.constant 0 : index
    %309 = vector.load %arg15[%c0_443, %c121, %c0_444] : memref<4x154x8xf32, #tpu.memory_space<vmem>>, vector<1x10x8xf32>
    %310 = vector.shape_cast %309 : vector<1x10x8xf32> to vector<10x8xf32>
    %c90_445 = arith.constant 90 : index
    %c48_446 = arith.constant 48 : index
    %311 = vector.load %arg16[%c90_445, %c48_446] : memref<120x72xf32, #tpu.memory_space<vmem>>, vector<10x8xf32>
    tpu.vector_store %arg16[%c90_445, %c48_446], %310 {strides = array<i32>} : memref<120x72xf32, #tpu.memory_space<vmem>>, vector<10x8xf32>,
    %c1_447 = arith.constant 1 : index
    %c121_448 = arith.constant 121 : index
    %c0_449 = arith.constant 0 : index
    %312 = vector.load %arg15[%c1_447, %c121_448, %c0_449] : memref<4x154x8xf32, #tpu.memory_space<vmem>>, vector<1x10x8xf32>
    %313 = vector.shape_cast %312 : vector<1x10x8xf32> to vector<10x8xf32>
    %c90_450 = arith.constant 90 : index
    %c56_451 = arith.constant 56 : index
    %314 = vector.load %arg16[%c90_450, %c56_451] : memref<120x72xf32, #tpu.memory_space<vmem>>, vector<10x8xf32>
    tpu.vector_store %arg16[%c90_450, %c56_451], %313 {strides = array<i32>} : memref<120x72xf32, #tpu.memory_space<vmem>>, vector<10x8xf32>,
    %c0_452 = arith.constant 0 : index
    %c122 = arith.constant 122 : index
    %c0_453 = arith.constant 0 : index
    %315 = vector.load %arg15[%c0_452, %c122, %c0_453] : memref<4x154x8xf32, #tpu.memory_space<vmem>>, vector<1x10x8xf32>
    %316 = vector.shape_cast %315 : vector<1x10x8xf32> to vector<10x8xf32>
    %c90_454 = arith.constant 90 : index
    %c64_455 = arith.constant 64 : index
    %317 = vector.load %arg16[%c90_454, %c64_455] : memref<120x72xf32, #tpu.memory_space<vmem>>, vector<10x8xf32>
    tpu.vector_store %arg16[%c90_454, %c64_455], %316 {strides = array<i32>} : memref<120x72xf32, #tpu.memory_space<vmem>>, vector<10x8xf32>,
    %c0_456 = arith.constant 0 : index
    %c121_457 = arith.constant 121 : index
    %c0_458 = arith.constant 0 : index
    %318 = vector.load %arg15[%c0_456, %c121_457, %c0_458] : memref<4x154x8xf32, #tpu.memory_space<vmem>>, vector<1x10x8xf32>
    %319 = vector.shape_cast %318 : vector<1x10x8xf32> to vector<10x8xf32>
    %c100_459 = arith.constant 100 : index
    %c0_460 = arith.constant 0 : index
    %320 = vector.load %arg16[%c100_459, %c0_460] : memref<120x72xf32, #tpu.memory_space<vmem>>, vector<10x8xf32>
    tpu.vector_store %arg16[%c100_459, %c0_460], %319 {strides = array<i32>} : memref<120x72xf32, #tpu.memory_space<vmem>>, vector<10x8xf32>,
    %c1_461 = arith.constant 1 : index
    %c121_462 = arith.constant 121 : index
    %c0_463 = arith.constant 0 : index
    %321 = vector.load %arg15[%c1_461, %c121_462, %c0_463] : memref<4x154x8xf32, #tpu.memory_space<vmem>>, vector<1x10x8xf32>
    %322 = vector.shape_cast %321 : vector<1x10x8xf32> to vector<10x8xf32>
    %c100_464 = arith.constant 100 : index
    %c8_465 = arith.constant 8 : index
    %323 = vector.load %arg16[%c100_464, %c8_465] : memref<120x72xf32, #tpu.memory_space<vmem>>, vector<10x8xf32>
    tpu.vector_store %arg16[%c100_464, %c8_465], %322 {strides = array<i32>} : memref<120x72xf32, #tpu.memory_space<vmem>>, vector<10x8xf32>,
    %c0_466 = arith.constant 0 : index
    %c122_467 = arith.constant 122 : index
    %c0_468 = arith.constant 0 : index
    %324 = vector.load %arg15[%c0_466, %c122_467, %c0_468] : memref<4x154x8xf32, #tpu.memory_space<vmem>>, vector<1x10x8xf32>
    %325 = vector.shape_cast %324 : vector<1x10x8xf32> to vector<10x8xf32>
    %c100_469 = arith.constant 100 : index
    %c16_470 = arith.constant 16 : index
    %326 = vector.load %arg16[%c100_469, %c16_470] : memref<120x72xf32, #tpu.memory_space<vmem>>, vector<10x8xf32>
    tpu.vector_store %arg16[%c100_469, %c16_470], %325 {strides = array<i32>} : memref<120x72xf32, #tpu.memory_space<vmem>>, vector<10x8xf32>,
    %c2_471 = arith.constant 2 : index
    %c121_472 = arith.constant 121 : index
    %c0_473 = arith.constant 0 : index
    %327 = vector.load %arg15[%c2_471, %c121_472, %c0_473] : memref<4x154x8xf32, #tpu.memory_space<vmem>>, vector<1x10x8xf32>
    %328 = vector.shape_cast %327 : vector<1x10x8xf32> to vector<10x8xf32>
    %c100_474 = arith.constant 100 : index
    %c24_475 = arith.constant 24 : index
    %329 = vector.load %arg16[%c100_474, %c24_475] : memref<120x72xf32, #tpu.memory_space<vmem>>, vector<10x8xf32>
    tpu.vector_store %arg16[%c100_474, %c24_475], %328 {strides = array<i32>} : memref<120x72xf32, #tpu.memory_space<vmem>>, vector<10x8xf32>,
    %c3_476 = arith.constant 3 : index
    %c121_477 = arith.constant 121 : index
    %c0_478 = arith.constant 0 : index
    %330 = vector.load %arg15[%c3_476, %c121_477, %c0_478] : memref<4x154x8xf32, #tpu.memory_space<vmem>>, vector<1x10x8xf32>
    %331 = vector.shape_cast %330 : vector<1x10x8xf32> to vector<10x8xf32>
    %c100_479 = arith.constant 100 : index
    %c32_480 = arith.constant 32 : index
    %332 = vector.load %arg16[%c100_479, %c32_480] : memref<120x72xf32, #tpu.memory_space<vmem>>, vector<10x8xf32>
    tpu.vector_store %arg16[%c100_479, %c32_480], %331 {strides = array<i32>} : memref<120x72xf32, #tpu.memory_space<vmem>>, vector<10x8xf32>,
    %c2_481 = arith.constant 2 : index
    %c122_482 = arith.constant 122 : index
    %c0_483 = arith.constant 0 : index
    %333 = vector.load %arg15[%c2_481, %c122_482, %c0_483] : memref<4x154x8xf32, #tpu.memory_space<vmem>>, vector<1x10x8xf32>
    %334 = vector.shape_cast %333 : vector<1x10x8xf32> to vector<10x8xf32>
    %c100_484 = arith.constant 100 : index
    %c40_485 = arith.constant 40 : index
    %335 = vector.load %arg16[%c100_484, %c40_485] : memref<120x72xf32, #tpu.memory_space<vmem>>, vector<10x8xf32>
    tpu.vector_store %arg16[%c100_484, %c40_485], %334 {strides = array<i32>} : memref<120x72xf32, #tpu.memory_space<vmem>>, vector<10x8xf32>,
    %c0_486 = arith.constant 0 : index
    %c132 = arith.constant 132 : index
    %c0_487 = arith.constant 0 : index
    %336 = vector.load %arg15[%c0_486, %c132, %c0_487] : memref<4x154x8xf32, #tpu.memory_space<vmem>>, vector<1x10x8xf32>
    %337 = vector.shape_cast %336 : vector<1x10x8xf32> to vector<10x8xf32>
    %c100_488 = arith.constant 100 : index
    %c48_489 = arith.constant 48 : index
    %338 = vector.load %arg16[%c100_488, %c48_489] : memref<120x72xf32, #tpu.memory_space<vmem>>, vector<10x8xf32>
    tpu.vector_store %arg16[%c100_488, %c48_489], %337 {strides = array<i32>} : memref<120x72xf32, #tpu.memory_space<vmem>>, vector<10x8xf32>,
    %c1_490 = arith.constant 1 : index
    %c132_491 = arith.constant 132 : index
    %c0_492 = arith.constant 0 : index
    %339 = vector.load %arg15[%c1_490, %c132_491, %c0_492] : memref<4x154x8xf32, #tpu.memory_space<vmem>>, vector<1x10x8xf32>
    %340 = vector.shape_cast %339 : vector<1x10x8xf32> to vector<10x8xf32>
    %c100_493 = arith.constant 100 : index
    %c56_494 = arith.constant 56 : index
    %341 = vector.load %arg16[%c100_493, %c56_494] : memref<120x72xf32, #tpu.memory_space<vmem>>, vector<10x8xf32>
    tpu.vector_store %arg16[%c100_493, %c56_494], %340 {strides = array<i32>} : memref<120x72xf32, #tpu.memory_space<vmem>>, vector<10x8xf32>,
    %c0_495 = arith.constant 0 : index
    %c133 = arith.constant 133 : index
    %c0_496 = arith.constant 0 : index
    %342 = vector.load %arg15[%c0_495, %c133, %c0_496] : memref<4x154x8xf32, #tpu.memory_space<vmem>>, vector<1x10x8xf32>
    %343 = vector.shape_cast %342 : vector<1x10x8xf32> to vector<10x8xf32>
    %c100_497 = arith.constant 100 : index
    %c64_498 = arith.constant 64 : index
    %344 = vector.load %arg16[%c100_497, %c64_498] : memref<120x72xf32, #tpu.memory_space<vmem>>, vector<10x8xf32>
    tpu.vector_store %arg16[%c100_497, %c64_498], %343 {strides = array<i32>} : memref<120x72xf32, #tpu.memory_space<vmem>>, vector<10x8xf32>,
    %c0_499 = arith.constant 0 : index
    %c132_500 = arith.constant 132 : index
    %c0_501 = arith.constant 0 : index
    %345 = vector.load %arg15[%c0_499, %c132_500, %c0_501] : memref<4x154x8xf32, #tpu.memory_space<vmem>>, vector<1x10x8xf32>
    %346 = vector.shape_cast %345 : vector<1x10x8xf32> to vector<10x8xf32>
    %c110_502 = arith.constant 110 : index
    %c0_503 = arith.constant 0 : index
    %347 = vector.load %arg16[%c110_502, %c0_503] : memref<120x72xf32, #tpu.memory_space<vmem>>, vector<10x8xf32>
    tpu.vector_store %arg16[%c110_502, %c0_503], %346 {strides = array<i32>} : memref<120x72xf32, #tpu.memory_space<vmem>>, vector<10x8xf32>,
    %c1_504 = arith.constant 1 : index
    %c132_505 = arith.constant 132 : index
    %c0_506 = arith.constant 0 : index
    %348 = vector.load %arg15[%c1_504, %c132_505, %c0_506] : memref<4x154x8xf32, #tpu.memory_space<vmem>>, vector<1x10x8xf32>
    %349 = vector.shape_cast %348 : vector<1x10x8xf32> to vector<10x8xf32>
    %c110_507 = arith.constant 110 : index
    %c8_508 = arith.constant 8 : index
    %350 = vector.load %arg16[%c110_507, %c8_508] : memref<120x72xf32, #tpu.memory_space<vmem>>, vector<10x8xf32>
    tpu.vector_store %arg16[%c110_507, %c8_508], %349 {strides = array<i32>} : memref<120x72xf32, #tpu.memory_space<vmem>>, vector<10x8xf32>,
    %c0_509 = arith.constant 0 : index
    %c133_510 = arith.constant 133 : index
    %c0_511 = arith.constant 0 : index
    %351 = vector.load %arg15[%c0_509, %c133_510, %c0_511] : memref<4x154x8xf32, #tpu.memory_space<vmem>>, vector<1x10x8xf32>
    %352 = vector.shape_cast %351 : vector<1x10x8xf32> to vector<10x8xf32>
    %c110_512 = arith.constant 110 : index
    %c16_513 = arith.constant 16 : index
    %353 = vector.load %arg16[%c110_512, %c16_513] : memref<120x72xf32, #tpu.memory_space<vmem>>, vector<10x8xf32>
    tpu.vector_store %arg16[%c110_512, %c16_513], %352 {strides = array<i32>} : memref<120x72xf32, #tpu.memory_space<vmem>>, vector<10x8xf32>,
    %c2_514 = arith.constant 2 : index
    %c132_515 = arith.constant 132 : index
    %c0_516 = arith.constant 0 : index
    %354 = vector.load %arg15[%c2_514, %c132_515, %c0_516] : memref<4x154x8xf32, #tpu.memory_space<vmem>>, vector<1x10x8xf32>
    %355 = vector.shape_cast %354 : vector<1x10x8xf32> to vector<10x8xf32>
    %c110_517 = arith.constant 110 : index
    %c24_518 = arith.constant 24 : index
    %356 = vector.load %arg16[%c110_517, %c24_518] : memref<120x72xf32, #tpu.memory_space<vmem>>, vector<10x8xf32>
    tpu.vector_store %arg16[%c110_517, %c24_518], %355 {strides = array<i32>} : memref<120x72xf32, #tpu.memory_space<vmem>>, vector<10x8xf32>,
    %c3_519 = arith.constant 3 : index
    %c132_520 = arith.constant 132 : index
    %c0_521 = arith.constant 0 : index
    %357 = vector.load %arg15[%c3_519, %c132_520, %c0_521] : memref<4x154x8xf32, #tpu.memory_space<vmem>>, vector<1x10x8xf32>
    %358 = vector.shape_cast %357 : vector<1x10x8xf32> to vector<10x8xf32>
    %c110_522 = arith.constant 110 : index
    %c32_523 = arith.constant 32 : index
    %359 = vector.load %arg16[%c110_522, %c32_523] : memref<120x72xf32, #tpu.memory_space<vmem>>, vector<10x8xf32>
    tpu.vector_store %arg16[%c110_522, %c32_523], %358 {strides = array<i32>} : memref<120x72xf32, #tpu.memory_space<vmem>>, vector<10x8xf32>,
    %c2_524 = arith.constant 2 : index
    %c133_525 = arith.constant 133 : index
    %c0_526 = arith.constant 0 : index
    %360 = vector.load %arg15[%c2_524, %c133_525, %c0_526] : memref<4x154x8xf32, #tpu.memory_space<vmem>>, vector<1x10x8xf32>
    %361 = vector.shape_cast %360 : vector<1x10x8xf32> to vector<10x8xf32>
    %c110_527 = arith.constant 110 : index
    %c40_528 = arith.constant 40 : index
    %362 = vector.load %arg16[%c110_527, %c40_528] : memref<120x72xf32, #tpu.memory_space<vmem>>, vector<10x8xf32>
    tpu.vector_store %arg16[%c110_527, %c40_528], %361 {strides = array<i32>} : memref<120x72xf32, #tpu.memory_space<vmem>>, vector<10x8xf32>,
    %c0_529 = arith.constant 0 : index
    %c143 = arith.constant 143 : index
    %c0_530 = arith.constant 0 : index
    %363 = vector.load %arg15[%c0_529, %c143, %c0_530] : memref<4x154x8xf32, #tpu.memory_space<vmem>>, vector<1x10x8xf32>
    %364 = vector.shape_cast %363 : vector<1x10x8xf32> to vector<10x8xf32>
    %c110_531 = arith.constant 110 : index
    %c48_532 = arith.constant 48 : index
    %365 = vector.load %arg16[%c110_531, %c48_532] : memref<120x72xf32, #tpu.memory_space<vmem>>, vector<10x8xf32>
    tpu.vector_store %arg16[%c110_531, %c48_532], %364 {strides = array<i32>} : memref<120x72xf32, #tpu.memory_space<vmem>>, vector<10x8xf32>,
    %c1_533 = arith.constant 1 : index
    %c143_534 = arith.constant 143 : index
    %c0_535 = arith.constant 0 : index
    %366 = vector.load %arg15[%c1_533, %c143_534, %c0_535] : memref<4x154x8xf32, #tpu.memory_space<vmem>>, vector<1x10x8xf32>
    %367 = vector.shape_cast %366 : vector<1x10x8xf32> to vector<10x8xf32>
    %c110_536 = arith.constant 110 : index
    %c56_537 = arith.constant 56 : index
    %368 = vector.load %arg16[%c110_536, %c56_537] : memref<120x72xf32, #tpu.memory_space<vmem>>, vector<10x8xf32>
    tpu.vector_store %arg16[%c110_536, %c56_537], %367 {strides = array<i32>} : memref<120x72xf32, #tpu.memory_space<vmem>>, vector<10x8xf32>,
    %c0_538 = arith.constant 0 : index
    %c144 = arith.constant 144 : index
    %c0_539 = arith.constant 0 : index
    %369 = vector.load %arg15[%c0_538, %c144, %c0_539] : memref<4x154x8xf32, #tpu.memory_space<vmem>>, vector<1x10x8xf32>
    %370 = vector.shape_cast %369 : vector<1x10x8xf32> to vector<10x8xf32>
    %c110_540 = arith.constant 110 : index
    %c64_541 = arith.constant 64 : index
    %371 = vector.load %arg16[%c110_540, %c64_541] : memref<120x72xf32, #tpu.memory_space<vmem>>, vector<10x8xf32>
    tpu.vector_store %arg16[%c110_540, %c64_541], %370 {strides = array<i32>} : memref<120x72xf32, #tpu.memory_space<vmem>>, vector<10x8xf32>,
    %c0_542 = arith.constant 0 : index
    %c0_543 = arith.constant 0 : index
    %372 = vector.load %arg16[%c0_542, %c0_543] : memref<120x72xf32, #tpu.memory_space<vmem>>, vector<120x72xf32>
    %c0_544 = arith.constant 0 : index
    %c0_545 = arith.constant 0 : index
    %373 = vector.load %arg4[%c0_544, %c0_545] : memref<72x8xf32, #tpu.memory_space<vmem>>, vector<72x8xf32>
    %cst_546 = arith.constant dense<0.000000e+00> : vector<120x8xf32>
    %374 = tpu.matmul %372, %373, %cst_546 {dimension_numbers = #tpu.dot_dimension_numbers<[1], [0], [0], [1], [0, 0, 1, 1], [], []>} : vector<120x72xf32>, vector<72x8xf32>, vector<120x8xf32> -> vector<120x8xf32>
    %c0_547 = arith.constant 0 : index
    %c0_548 = arith.constant 0 : index
    %375 = vector.load %arg5[%c0_547, %c0_548] : memref<1x8xf32, #tpu.memory_space<vmem>>, vector<1x8xf32>
    %376 = vector.broadcast %375 : vector<1x8xf32> to vector<120x8xf32>
    %377 = arith.addf %374, %376 : vector<120x8xf32>
    %cst_549 = arith.constant 0.000000e+00 : f32
    %378 = vector.broadcast %cst_549 : f32 to vector<120x8xf32>
    %379 = arith.maximumf %377, %378 : vector<120x8xf32>
    %c0_550 = arith.constant 0 : index
    %c0_551 = arith.constant 0 : index
    %380 = vector.load %arg17[%c0_550, %c0_551] : memref<120x8xf32, #tpu.memory_space<vmem>>, vector<120x8xf32>
    tpu.vector_store %arg17[%c0_550, %c0_551], %379 {strides = array<i32>} : memref<120x8xf32, #tpu.memory_space<vmem>>, vector<120x8xf32>,
    %c0_552 = arith.constant 0 : index
    %c0_553 = arith.constant 0 : index
    %381 = vector.load %arg17[%c0_552, %c0_553] : memref<120x8xf32, #tpu.memory_space<vmem>>, vector<8x8xf32>
    %c0_554 = arith.constant 0 : index
    %c0_555 = arith.constant 0 : index
    %382 = vector.load %arg18[%c0_554, %c0_555] : memref<64x72xf32, #tpu.memory_space<vmem>>, vector<8x8xf32>
    tpu.vector_store %arg18[%c0_554, %c0_555], %381 {strides = array<i32>} : memref<64x72xf32, #tpu.memory_space<vmem>>, vector<8x8xf32>,
    %c1_556 = arith.constant 1 : index
    %c0_557 = arith.constant 0 : index
    %383 = vector.load %arg17[%c1_556, %c0_557] : memref<120x8xf32, #tpu.memory_space<vmem>>, vector<8x8xf32>
    %c0_558 = arith.constant 0 : index
    %c8_559 = arith.constant 8 : index
    %384 = vector.load %arg18[%c0_558, %c8_559] : memref<64x72xf32, #tpu.memory_space<vmem>>, vector<8x8xf32>
    tpu.vector_store %arg18[%c0_558, %c8_559], %383 {strides = array<i32>} : memref<64x72xf32, #tpu.memory_space<vmem>>, vector<8x8xf32>,
    %c2_560 = arith.constant 2 : index
    %c0_561 = arith.constant 0 : index
    %385 = vector.load %arg17[%c2_560, %c0_561] : memref<120x8xf32, #tpu.memory_space<vmem>>, vector<8x8xf32>
    %c0_562 = arith.constant 0 : index
    %c16_563 = arith.constant 16 : index
    %386 = vector.load %arg18[%c0_562, %c16_563] : memref<64x72xf32, #tpu.memory_space<vmem>>, vector<8x8xf32>
    tpu.vector_store %arg18[%c0_562, %c16_563], %385 {strides = array<i32>} : memref<64x72xf32, #tpu.memory_space<vmem>>, vector<8x8xf32>,
    %c10_564 = arith.constant 10 : index
    %c0_565 = arith.constant 0 : index
    %387 = vector.load %arg17[%c10_564, %c0_565] : memref<120x8xf32, #tpu.memory_space<vmem>>, vector<8x8xf32>
    %c0_566 = arith.constant 0 : index
    %c24_567 = arith.constant 24 : index
    %388 = vector.load %arg18[%c0_566, %c24_567] : memref<64x72xf32, #tpu.memory_space<vmem>>, vector<8x8xf32>
    tpu.vector_store %arg18[%c0_566, %c24_567], %387 {strides = array<i32>} : memref<64x72xf32, #tpu.memory_space<vmem>>, vector<8x8xf32>,
    %c11_568 = arith.constant 11 : index
    %c0_569 = arith.constant 0 : index
    %389 = vector.load %arg17[%c11_568, %c0_569] : memref<120x8xf32, #tpu.memory_space<vmem>>, vector<8x8xf32>
    %c0_570 = arith.constant 0 : index
    %c32_571 = arith.constant 32 : index
    %390 = vector.load %arg18[%c0_570, %c32_571] : memref<64x72xf32, #tpu.memory_space<vmem>>, vector<8x8xf32>
    tpu.vector_store %arg18[%c0_570, %c32_571], %389 {strides = array<i32>} : memref<64x72xf32, #tpu.memory_space<vmem>>, vector<8x8xf32>,
    %c12_572 = arith.constant 12 : index
    %c0_573 = arith.constant 0 : index
    %391 = vector.load %arg17[%c12_572, %c0_573] : memref<120x8xf32, #tpu.memory_space<vmem>>, vector<8x8xf32>
    %c0_574 = arith.constant 0 : index
    %c40_575 = arith.constant 40 : index
    %392 = vector.load %arg18[%c0_574, %c40_575] : memref<64x72xf32, #tpu.memory_space<vmem>>, vector<8x8xf32>
    tpu.vector_store %arg18[%c0_574, %c40_575], %391 {strides = array<i32>} : memref<64x72xf32, #tpu.memory_space<vmem>>, vector<8x8xf32>,
    %c20_576 = arith.constant 20 : index
    %c0_577 = arith.constant 0 : index
    %393 = vector.load %arg17[%c20_576, %c0_577] : memref<120x8xf32, #tpu.memory_space<vmem>>, vector<8x8xf32>
    %c0_578 = arith.constant 0 : index
    %c48_579 = arith.constant 48 : index
    %394 = vector.load %arg18[%c0_578, %c48_579] : memref<64x72xf32, #tpu.memory_space<vmem>>, vector<8x8xf32>
    tpu.vector_store %arg18[%c0_578, %c48_579], %393 {strides = array<i32>} : memref<64x72xf32, #tpu.memory_space<vmem>>, vector<8x8xf32>,
    %c21 = arith.constant 21 : index
    %c0_580 = arith.constant 0 : index
    %395 = vector.load %arg17[%c21, %c0_580] : memref<120x8xf32, #tpu.memory_space<vmem>>, vector<8x8xf32>
    %c0_581 = arith.constant 0 : index
    %c56_582 = arith.constant 56 : index
    %396 = vector.load %arg18[%c0_581, %c56_582] : memref<64x72xf32, #tpu.memory_space<vmem>>, vector<8x8xf32>
    tpu.vector_store %arg18[%c0_581, %c56_582], %395 {strides = array<i32>} : memref<64x72xf32, #tpu.memory_space<vmem>>, vector<8x8xf32>,
    %c22_583 = arith.constant 22 : index
    %c0_584 = arith.constant 0 : index
    %397 = vector.load %arg17[%c22_583, %c0_584] : memref<120x8xf32, #tpu.memory_space<vmem>>, vector<8x8xf32>
    %c0_585 = arith.constant 0 : index
    %c64_586 = arith.constant 64 : index
    %398 = vector.load %arg18[%c0_585, %c64_586] : memref<64x72xf32, #tpu.memory_space<vmem>>, vector<8x8xf32>
    tpu.vector_store %arg18[%c0_585, %c64_586], %397 {strides = array<i32>} : memref<64x72xf32, #tpu.memory_space<vmem>>, vector<8x8xf32>,
    %c10_587 = arith.constant 10 : index
    %c0_588 = arith.constant 0 : index
    %399 = vector.load %arg17[%c10_587, %c0_588] : memref<120x8xf32, #tpu.memory_space<vmem>>, vector<8x8xf32>
    %c8_589 = arith.constant 8 : index
    %c0_590 = arith.constant 0 : index
    %400 = vector.load %arg18[%c8_589, %c0_590] : memref<64x72xf32, #tpu.memory_space<vmem>>, vector<8x8xf32>
    tpu.vector_store %arg18[%c8_589, %c0_590], %399 {strides = array<i32>} : memref<64x72xf32, #tpu.memory_space<vmem>>, vector<8x8xf32>,
    %c11_591 = arith.constant 11 : index
    %c0_592 = arith.constant 0 : index
    %401 = vector.load %arg17[%c11_591, %c0_592] : memref<120x8xf32, #tpu.memory_space<vmem>>, vector<8x8xf32>
    %c8_593 = arith.constant 8 : index
    %c8_594 = arith.constant 8 : index
    %402 = vector.load %arg18[%c8_593, %c8_594] : memref<64x72xf32, #tpu.memory_space<vmem>>, vector<8x8xf32>
    tpu.vector_store %arg18[%c8_593, %c8_594], %401 {strides = array<i32>} : memref<64x72xf32, #tpu.memory_space<vmem>>, vector<8x8xf32>,
    %c12_595 = arith.constant 12 : index
    %c0_596 = arith.constant 0 : index
    %403 = vector.load %arg17[%c12_595, %c0_596] : memref<120x8xf32, #tpu.memory_space<vmem>>, vector<8x8xf32>
    %c8_597 = arith.constant 8 : index
    %c16_598 = arith.constant 16 : index
    %404 = vector.load %arg18[%c8_597, %c16_598] : memref<64x72xf32, #tpu.memory_space<vmem>>, vector<8x8xf32>
    tpu.vector_store %arg18[%c8_597, %c16_598], %403 {strides = array<i32>} : memref<64x72xf32, #tpu.memory_space<vmem>>, vector<8x8xf32>,
    %c20_599 = arith.constant 20 : index
    %c0_600 = arith.constant 0 : index
    %405 = vector.load %arg17[%c20_599, %c0_600] : memref<120x8xf32, #tpu.memory_space<vmem>>, vector<8x8xf32>
    %c8_601 = arith.constant 8 : index
    %c24_602 = arith.constant 24 : index
    %406 = vector.load %arg18[%c8_601, %c24_602] : memref<64x72xf32, #tpu.memory_space<vmem>>, vector<8x8xf32>
    tpu.vector_store %arg18[%c8_601, %c24_602], %405 {strides = array<i32>} : memref<64x72xf32, #tpu.memory_space<vmem>>, vector<8x8xf32>,
    %c21_603 = arith.constant 21 : index
    %c0_604 = arith.constant 0 : index
    %407 = vector.load %arg17[%c21_603, %c0_604] : memref<120x8xf32, #tpu.memory_space<vmem>>, vector<8x8xf32>
    %c8_605 = arith.constant 8 : index
    %c32_606 = arith.constant 32 : index
    %408 = vector.load %arg18[%c8_605, %c32_606] : memref<64x72xf32, #tpu.memory_space<vmem>>, vector<8x8xf32>
    tpu.vector_store %arg18[%c8_605, %c32_606], %407 {strides = array<i32>} : memref<64x72xf32, #tpu.memory_space<vmem>>, vector<8x8xf32>,
    %c22_607 = arith.constant 22 : index
    %c0_608 = arith.constant 0 : index
    %409 = vector.load %arg17[%c22_607, %c0_608] : memref<120x8xf32, #tpu.memory_space<vmem>>, vector<8x8xf32>
    %c8_609 = arith.constant 8 : index
    %c40_610 = arith.constant 40 : index
    %410 = vector.load %arg18[%c8_609, %c40_610] : memref<64x72xf32, #tpu.memory_space<vmem>>, vector<8x8xf32>
    tpu.vector_store %arg18[%c8_609, %c40_610], %409 {strides = array<i32>} : memref<64x72xf32, #tpu.memory_space<vmem>>, vector<8x8xf32>,
    %c30_611 = arith.constant 30 : index
    %c0_612 = arith.constant 0 : index
    %411 = vector.load %arg17[%c30_611, %c0_612] : memref<120x8xf32, #tpu.memory_space<vmem>>, vector<8x8xf32>
    %c8_613 = arith.constant 8 : index
    %c48_614 = arith.constant 48 : index
    %412 = vector.load %arg18[%c8_613, %c48_614] : memref<64x72xf32, #tpu.memory_space<vmem>>, vector<8x8xf32>
    tpu.vector_store %arg18[%c8_613, %c48_614], %411 {strides = array<i32>} : memref<64x72xf32, #tpu.memory_space<vmem>>, vector<8x8xf32>,
    %c31 = arith.constant 31 : index
    %c0_615 = arith.constant 0 : index
    %413 = vector.load %arg17[%c31, %c0_615] : memref<120x8xf32, #tpu.memory_space<vmem>>, vector<8x8xf32>
    %c8_616 = arith.constant 8 : index
    %c56_617 = arith.constant 56 : index
    %414 = vector.load %arg18[%c8_616, %c56_617] : memref<64x72xf32, #tpu.memory_space<vmem>>, vector<8x8xf32>
    tpu.vector_store %arg18[%c8_616, %c56_617], %413 {strides = array<i32>} : memref<64x72xf32, #tpu.memory_space<vmem>>, vector<8x8xf32>,
    %c32_618 = arith.constant 32 : index
    %c0_619 = arith.constant 0 : index
    %415 = vector.load %arg17[%c32_618, %c0_619] : memref<120x8xf32, #tpu.memory_space<vmem>>, vector<8x8xf32>
    %c8_620 = arith.constant 8 : index
    %c64_621 = arith.constant 64 : index
    %416 = vector.load %arg18[%c8_620, %c64_621] : memref<64x72xf32, #tpu.memory_space<vmem>>, vector<8x8xf32>
    tpu.vector_store %arg18[%c8_620, %c64_621], %415 {strides = array<i32>} : memref<64x72xf32, #tpu.memory_space<vmem>>, vector<8x8xf32>,
    %c20_622 = arith.constant 20 : index
    %c0_623 = arith.constant 0 : index
    %417 = vector.load %arg17[%c20_622, %c0_623] : memref<120x8xf32, #tpu.memory_space<vmem>>, vector<8x8xf32>
    %c16_624 = arith.constant 16 : index
    %c0_625 = arith.constant 0 : index
    %418 = vector.load %arg18[%c16_624, %c0_625] : memref<64x72xf32, #tpu.memory_space<vmem>>, vector<8x8xf32>
    tpu.vector_store %arg18[%c16_624, %c0_625], %417 {strides = array<i32>} : memref<64x72xf32, #tpu.memory_space<vmem>>, vector<8x8xf32>,
    %c21_626 = arith.constant 21 : index
    %c0_627 = arith.constant 0 : index
    %419 = vector.load %arg17[%c21_626, %c0_627] : memref<120x8xf32, #tpu.memory_space<vmem>>, vector<8x8xf32>
    %c16_628 = arith.constant 16 : index
    %c8_629 = arith.constant 8 : index
    %420 = vector.load %arg18[%c16_628, %c8_629] : memref<64x72xf32, #tpu.memory_space<vmem>>, vector<8x8xf32>
    tpu.vector_store %arg18[%c16_628, %c8_629], %419 {strides = array<i32>} : memref<64x72xf32, #tpu.memory_space<vmem>>, vector<8x8xf32>,
    %c22_630 = arith.constant 22 : index
    %c0_631 = arith.constant 0 : index
    %421 = vector.load %arg17[%c22_630, %c0_631] : memref<120x8xf32, #tpu.memory_space<vmem>>, vector<8x8xf32>
    %c16_632 = arith.constant 16 : index
    %c16_633 = arith.constant 16 : index
    %422 = vector.load %arg18[%c16_632, %c16_633] : memref<64x72xf32, #tpu.memory_space<vmem>>, vector<8x8xf32>
    tpu.vector_store %arg18[%c16_632, %c16_633], %421 {strides = array<i32>} : memref<64x72xf32, #tpu.memory_space<vmem>>, vector<8x8xf32>,
    %c30_634 = arith.constant 30 : index
    %c0_635 = arith.constant 0 : index
    %423 = vector.load %arg17[%c30_634, %c0_635] : memref<120x8xf32, #tpu.memory_space<vmem>>, vector<8x8xf32>
    %c16_636 = arith.constant 16 : index
    %c24_637 = arith.constant 24 : index
    %424 = vector.load %arg18[%c16_636, %c24_637] : memref<64x72xf32, #tpu.memory_space<vmem>>, vector<8x8xf32>
    tpu.vector_store %arg18[%c16_636, %c24_637], %423 {strides = array<i32>} : memref<64x72xf32, #tpu.memory_space<vmem>>, vector<8x8xf32>,
    %c31_638 = arith.constant 31 : index
    %c0_639 = arith.constant 0 : index
    %425 = vector.load %arg17[%c31_638, %c0_639] : memref<120x8xf32, #tpu.memory_space<vmem>>, vector<8x8xf32>
    %c16_640 = arith.constant 16 : index
    %c32_641 = arith.constant 32 : index
    %426 = vector.load %arg18[%c16_640, %c32_641] : memref<64x72xf32, #tpu.memory_space<vmem>>, vector<8x8xf32>
    tpu.vector_store %arg18[%c16_640, %c32_641], %425 {strides = array<i32>} : memref<64x72xf32, #tpu.memory_space<vmem>>, vector<8x8xf32>,
    %c32_642 = arith.constant 32 : index
    %c0_643 = arith.constant 0 : index
    %427 = vector.load %arg17[%c32_642, %c0_643] : memref<120x8xf32, #tpu.memory_space<vmem>>, vector<8x8xf32>
    %c16_644 = arith.constant 16 : index
    %c40_645 = arith.constant 40 : index
    %428 = vector.load %arg18[%c16_644, %c40_645] : memref<64x72xf32, #tpu.memory_space<vmem>>, vector<8x8xf32>
    tpu.vector_store %arg18[%c16_644, %c40_645], %427 {strides = array<i32>} : memref<64x72xf32, #tpu.memory_space<vmem>>, vector<8x8xf32>,
    %c40_646 = arith.constant 40 : index
    %c0_647 = arith.constant 0 : index
    %429 = vector.load %arg17[%c40_646, %c0_647] : memref<120x8xf32, #tpu.memory_space<vmem>>, vector<8x8xf32>
    %c16_648 = arith.constant 16 : index
    %c48_649 = arith.constant 48 : index
    %430 = vector.load %arg18[%c16_648, %c48_649] : memref<64x72xf32, #tpu.memory_space<vmem>>, vector<8x8xf32>
    tpu.vector_store %arg18[%c16_648, %c48_649], %429 {strides = array<i32>} : memref<64x72xf32, #tpu.memory_space<vmem>>, vector<8x8xf32>,
    %c41 = arith.constant 41 : index
    %c0_650 = arith.constant 0 : index
    %431 = vector.load %arg17[%c41, %c0_650] : memref<120x8xf32, #tpu.memory_space<vmem>>, vector<8x8xf32>
    %c16_651 = arith.constant 16 : index
    %c56_652 = arith.constant 56 : index
    %432 = vector.load %arg18[%c16_651, %c56_652] : memref<64x72xf32, #tpu.memory_space<vmem>>, vector<8x8xf32>
    tpu.vector_store %arg18[%c16_651, %c56_652], %431 {strides = array<i32>} : memref<64x72xf32, #tpu.memory_space<vmem>>, vector<8x8xf32>,
    %c42 = arith.constant 42 : index
    %c0_653 = arith.constant 0 : index
    %433 = vector.load %arg17[%c42, %c0_653] : memref<120x8xf32, #tpu.memory_space<vmem>>, vector<8x8xf32>
    %c16_654 = arith.constant 16 : index
    %c64_655 = arith.constant 64 : index
    %434 = vector.load %arg18[%c16_654, %c64_655] : memref<64x72xf32, #tpu.memory_space<vmem>>, vector<8x8xf32>
    tpu.vector_store %arg18[%c16_654, %c64_655], %433 {strides = array<i32>} : memref<64x72xf32, #tpu.memory_space<vmem>>, vector<8x8xf32>,
    %c30_656 = arith.constant 30 : index
    %c0_657 = arith.constant 0 : index
    %435 = vector.load %arg17[%c30_656, %c0_657] : memref<120x8xf32, #tpu.memory_space<vmem>>, vector<8x8xf32>
    %c24_658 = arith.constant 24 : index
    %c0_659 = arith.constant 0 : index
    %436 = vector.load %arg18[%c24_658, %c0_659] : memref<64x72xf32, #tpu.memory_space<vmem>>, vector<8x8xf32>
    tpu.vector_store %arg18[%c24_658, %c0_659], %435 {strides = array<i32>} : memref<64x72xf32, #tpu.memory_space<vmem>>, vector<8x8xf32>,
    %c31_660 = arith.constant 31 : index
    %c0_661 = arith.constant 0 : index
    %437 = vector.load %arg17[%c31_660, %c0_661] : memref<120x8xf32, #tpu.memory_space<vmem>>, vector<8x8xf32>
    %c24_662 = arith.constant 24 : index
    %c8_663 = arith.constant 8 : index
    %438 = vector.load %arg18[%c24_662, %c8_663] : memref<64x72xf32, #tpu.memory_space<vmem>>, vector<8x8xf32>
    tpu.vector_store %arg18[%c24_662, %c8_663], %437 {strides = array<i32>} : memref<64x72xf32, #tpu.memory_space<vmem>>, vector<8x8xf32>,
    %c32_664 = arith.constant 32 : index
    %c0_665 = arith.constant 0 : index
    %439 = vector.load %arg17[%c32_664, %c0_665] : memref<120x8xf32, #tpu.memory_space<vmem>>, vector<8x8xf32>
    %c24_666 = arith.constant 24 : index
    %c16_667 = arith.constant 16 : index
    %440 = vector.load %arg18[%c24_666, %c16_667] : memref<64x72xf32, #tpu.memory_space<vmem>>, vector<8x8xf32>
    tpu.vector_store %arg18[%c24_666, %c16_667], %439 {strides = array<i32>} : memref<64x72xf32, #tpu.memory_space<vmem>>, vector<8x8xf32>,
    %c40_668 = arith.constant 40 : index
    %c0_669 = arith.constant 0 : index
    %441 = vector.load %arg17[%c40_668, %c0_669] : memref<120x8xf32, #tpu.memory_space<vmem>>, vector<8x8xf32>
    %c24_670 = arith.constant 24 : index
    %c24_671 = arith.constant 24 : index
    %442 = vector.load %arg18[%c24_670, %c24_671] : memref<64x72xf32, #tpu.memory_space<vmem>>, vector<8x8xf32>
    tpu.vector_store %arg18[%c24_670, %c24_671], %441 {strides = array<i32>} : memref<64x72xf32, #tpu.memory_space<vmem>>, vector<8x8xf32>,
    %c41_672 = arith.constant 41 : index
    %c0_673 = arith.constant 0 : index
    %443 = vector.load %arg17[%c41_672, %c0_673] : memref<120x8xf32, #tpu.memory_space<vmem>>, vector<8x8xf32>
    %c24_674 = arith.constant 24 : index
    %c32_675 = arith.constant 32 : index
    %444 = vector.load %arg18[%c24_674, %c32_675] : memref<64x72xf32, #tpu.memory_space<vmem>>, vector<8x8xf32>
    tpu.vector_store %arg18[%c24_674, %c32_675], %443 {strides = array<i32>} : memref<64x72xf32, #tpu.memory_space<vmem>>, vector<8x8xf32>,
    %c42_676 = arith.constant 42 : index
    %c0_677 = arith.constant 0 : index
    %445 = vector.load %arg17[%c42_676, %c0_677] : memref<120x8xf32, #tpu.memory_space<vmem>>, vector<8x8xf32>
    %c24_678 = arith.constant 24 : index
    %c40_679 = arith.constant 40 : index
    %446 = vector.load %arg18[%c24_678, %c40_679] : memref<64x72xf32, #tpu.memory_space<vmem>>, vector<8x8xf32>
    tpu.vector_store %arg18[%c24_678, %c40_679], %445 {strides = array<i32>} : memref<64x72xf32, #tpu.memory_space<vmem>>, vector<8x8xf32>,
    %c50_680 = arith.constant 50 : index
    %c0_681 = arith.constant 0 : index
    %447 = vector.load %arg17[%c50_680, %c0_681] : memref<120x8xf32, #tpu.memory_space<vmem>>, vector<8x8xf32>
    %c24_682 = arith.constant 24 : index
    %c48_683 = arith.constant 48 : index
    %448 = vector.load %arg18[%c24_682, %c48_683] : memref<64x72xf32, #tpu.memory_space<vmem>>, vector<8x8xf32>
    tpu.vector_store %arg18[%c24_682, %c48_683], %447 {strides = array<i32>} : memref<64x72xf32, #tpu.memory_space<vmem>>, vector<8x8xf32>,
    %c51 = arith.constant 51 : index
    %c0_684 = arith.constant 0 : index
    %449 = vector.load %arg17[%c51, %c0_684] : memref<120x8xf32, #tpu.memory_space<vmem>>, vector<8x8xf32>
    %c24_685 = arith.constant 24 : index
    %c56_686 = arith.constant 56 : index
    %450 = vector.load %arg18[%c24_685, %c56_686] : memref<64x72xf32, #tpu.memory_space<vmem>>, vector<8x8xf32>
    tpu.vector_store %arg18[%c24_685, %c56_686], %449 {strides = array<i32>} : memref<64x72xf32, #tpu.memory_space<vmem>>, vector<8x8xf32>,
    %c52 = arith.constant 52 : index
    %c0_687 = arith.constant 0 : index
    %451 = vector.load %arg17[%c52, %c0_687] : memref<120x8xf32, #tpu.memory_space<vmem>>, vector<8x8xf32>
    %c24_688 = arith.constant 24 : index
    %c64_689 = arith.constant 64 : index
    %452 = vector.load %arg18[%c24_688, %c64_689] : memref<64x72xf32, #tpu.memory_space<vmem>>, vector<8x8xf32>
    tpu.vector_store %arg18[%c24_688, %c64_689], %451 {strides = array<i32>} : memref<64x72xf32, #tpu.memory_space<vmem>>, vector<8x8xf32>,
    %c60_690 = arith.constant 60 : index
    %c0_691 = arith.constant 0 : index
    %453 = vector.load %arg17[%c60_690, %c0_691] : memref<120x8xf32, #tpu.memory_space<vmem>>, vector<8x8xf32>
    %c32_692 = arith.constant 32 : index
    %c0_693 = arith.constant 0 : index
    %454 = vector.load %arg18[%c32_692, %c0_693] : memref<64x72xf32, #tpu.memory_space<vmem>>, vector<8x8xf32>
    tpu.vector_store %arg18[%c32_692, %c0_693], %453 {strides = array<i32>} : memref<64x72xf32, #tpu.memory_space<vmem>>, vector<8x8xf32>,
    %c61 = arith.constant 61 : index
    %c0_694 = arith.constant 0 : index
    %455 = vector.load %arg17[%c61, %c0_694] : memref<120x8xf32, #tpu.memory_space<vmem>>, vector<8x8xf32>
    %c32_695 = arith.constant 32 : index
    %c8_696 = arith.constant 8 : index
    %456 = vector.load %arg18[%c32_695, %c8_696] : memref<64x72xf32, #tpu.memory_space<vmem>>, vector<8x8xf32>
    tpu.vector_store %arg18[%c32_695, %c8_696], %455 {strides = array<i32>} : memref<64x72xf32, #tpu.memory_space<vmem>>, vector<8x8xf32>,
    %c62 = arith.constant 62 : index
    %c0_697 = arith.constant 0 : index
    %457 = vector.load %arg17[%c62, %c0_697] : memref<120x8xf32, #tpu.memory_space<vmem>>, vector<8x8xf32>
    %c32_698 = arith.constant 32 : index
    %c16_699 = arith.constant 16 : index
    %458 = vector.load %arg18[%c32_698, %c16_699] : memref<64x72xf32, #tpu.memory_space<vmem>>, vector<8x8xf32>
    tpu.vector_store %arg18[%c32_698, %c16_699], %457 {strides = array<i32>} : memref<64x72xf32, #tpu.memory_space<vmem>>, vector<8x8xf32>,
    %c70_700 = arith.constant 70 : index
    %c0_701 = arith.constant 0 : index
    %459 = vector.load %arg17[%c70_700, %c0_701] : memref<120x8xf32, #tpu.memory_space<vmem>>, vector<8x8xf32>
    %c32_702 = arith.constant 32 : index
    %c24_703 = arith.constant 24 : index
    %460 = vector.load %arg18[%c32_702, %c24_703] : memref<64x72xf32, #tpu.memory_space<vmem>>, vector<8x8xf32>
    tpu.vector_store %arg18[%c32_702, %c24_703], %459 {strides = array<i32>} : memref<64x72xf32, #tpu.memory_space<vmem>>, vector<8x8xf32>,
    %c71 = arith.constant 71 : index
    %c0_704 = arith.constant 0 : index
    %461 = vector.load %arg17[%c71, %c0_704] : memref<120x8xf32, #tpu.memory_space<vmem>>, vector<8x8xf32>
    %c32_705 = arith.constant 32 : index
    %c32_706 = arith.constant 32 : index
    %462 = vector.load %arg18[%c32_705, %c32_706] : memref<64x72xf32, #tpu.memory_space<vmem>>, vector<8x8xf32>
    tpu.vector_store %arg18[%c32_705, %c32_706], %461 {strides = array<i32>} : memref<64x72xf32, #tpu.memory_space<vmem>>, vector<8x8xf32>,
    %c72 = arith.constant 72 : index
    %c0_707 = arith.constant 0 : index
    %463 = vector.load %arg17[%c72, %c0_707] : memref<120x8xf32, #tpu.memory_space<vmem>>, vector<8x8xf32>
    %c32_708 = arith.constant 32 : index
    %c40_709 = arith.constant 40 : index
    %464 = vector.load %arg18[%c32_708, %c40_709] : memref<64x72xf32, #tpu.memory_space<vmem>>, vector<8x8xf32>
    tpu.vector_store %arg18[%c32_708, %c40_709], %463 {strides = array<i32>} : memref<64x72xf32, #tpu.memory_space<vmem>>, vector<8x8xf32>,
    %c80_710 = arith.constant 80 : index
    %c0_711 = arith.constant 0 : index
    %465 = vector.load %arg17[%c80_710, %c0_711] : memref<120x8xf32, #tpu.memory_space<vmem>>, vector<8x8xf32>
    %c32_712 = arith.constant 32 : index
    %c48_713 = arith.constant 48 : index
    %466 = vector.load %arg18[%c32_712, %c48_713] : memref<64x72xf32, #tpu.memory_space<vmem>>, vector<8x8xf32>
    tpu.vector_store %arg18[%c32_712, %c48_713], %465 {strides = array<i32>} : memref<64x72xf32, #tpu.memory_space<vmem>>, vector<8x8xf32>,
    %c81 = arith.constant 81 : index
    %c0_714 = arith.constant 0 : index
    %467 = vector.load %arg17[%c81, %c0_714] : memref<120x8xf32, #tpu.memory_space<vmem>>, vector<8x8xf32>
    %c32_715 = arith.constant 32 : index
    %c56_716 = arith.constant 56 : index
    %468 = vector.load %arg18[%c32_715, %c56_716] : memref<64x72xf32, #tpu.memory_space<vmem>>, vector<8x8xf32>
    tpu.vector_store %arg18[%c32_715, %c56_716], %467 {strides = array<i32>} : memref<64x72xf32, #tpu.memory_space<vmem>>, vector<8x8xf32>,
    %c82 = arith.constant 82 : index
    %c0_717 = arith.constant 0 : index
    %469 = vector.load %arg17[%c82, %c0_717] : memref<120x8xf32, #tpu.memory_space<vmem>>, vector<8x8xf32>
    %c32_718 = arith.constant 32 : index
    %c64_719 = arith.constant 64 : index
    %470 = vector.load %arg18[%c32_718, %c64_719] : memref<64x72xf32, #tpu.memory_space<vmem>>, vector<8x8xf32>
    tpu.vector_store %arg18[%c32_718, %c64_719], %469 {strides = array<i32>} : memref<64x72xf32, #tpu.memory_space<vmem>>, vector<8x8xf32>,
    %c70_720 = arith.constant 70 : index
    %c0_721 = arith.constant 0 : index
    %471 = vector.load %arg17[%c70_720, %c0_721] : memref<120x8xf32, #tpu.memory_space<vmem>>, vector<8x8xf32>
    %c40_722 = arith.constant 40 : index
    %c0_723 = arith.constant 0 : index
    %472 = vector.load %arg18[%c40_722, %c0_723] : memref<64x72xf32, #tpu.memory_space<vmem>>, vector<8x8xf32>
    tpu.vector_store %arg18[%c40_722, %c0_723], %471 {strides = array<i32>} : memref<64x72xf32, #tpu.memory_space<vmem>>, vector<8x8xf32>,
    %c71_724 = arith.constant 71 : index
    %c0_725 = arith.constant 0 : index
    %473 = vector.load %arg17[%c71_724, %c0_725] : memref<120x8xf32, #tpu.memory_space<vmem>>, vector<8x8xf32>
    %c40_726 = arith.constant 40 : index
    %c8_727 = arith.constant 8 : index
    %474 = vector.load %arg18[%c40_726, %c8_727] : memref<64x72xf32, #tpu.memory_space<vmem>>, vector<8x8xf32>
    tpu.vector_store %arg18[%c40_726, %c8_727], %473 {strides = array<i32>} : memref<64x72xf32, #tpu.memory_space<vmem>>, vector<8x8xf32>,
    %c72_728 = arith.constant 72 : index
    %c0_729 = arith.constant 0 : index
    %475 = vector.load %arg17[%c72_728, %c0_729] : memref<120x8xf32, #tpu.memory_space<vmem>>, vector<8x8xf32>
    %c40_730 = arith.constant 40 : index
    %c16_731 = arith.constant 16 : index
    %476 = vector.load %arg18[%c40_730, %c16_731] : memref<64x72xf32, #tpu.memory_space<vmem>>, vector<8x8xf32>
    tpu.vector_store %arg18[%c40_730, %c16_731], %475 {strides = array<i32>} : memref<64x72xf32, #tpu.memory_space<vmem>>, vector<8x8xf32>,
    %c80_732 = arith.constant 80 : index
    %c0_733 = arith.constant 0 : index
    %477 = vector.load %arg17[%c80_732, %c0_733] : memref<120x8xf32, #tpu.memory_space<vmem>>, vector<8x8xf32>
    %c40_734 = arith.constant 40 : index
    %c24_735 = arith.constant 24 : index
    %478 = vector.load %arg18[%c40_734, %c24_735] : memref<64x72xf32, #tpu.memory_space<vmem>>, vector<8x8xf32>
    tpu.vector_store %arg18[%c40_734, %c24_735], %477 {strides = array<i32>} : memref<64x72xf32, #tpu.memory_space<vmem>>, vector<8x8xf32>,
    %c81_736 = arith.constant 81 : index
    %c0_737 = arith.constant 0 : index
    %479 = vector.load %arg17[%c81_736, %c0_737] : memref<120x8xf32, #tpu.memory_space<vmem>>, vector<8x8xf32>
    %c40_738 = arith.constant 40 : index
    %c32_739 = arith.constant 32 : index
    %480 = vector.load %arg18[%c40_738, %c32_739] : memref<64x72xf32, #tpu.memory_space<vmem>>, vector<8x8xf32>
    tpu.vector_store %arg18[%c40_738, %c32_739], %479 {strides = array<i32>} : memref<64x72xf32, #tpu.memory_space<vmem>>, vector<8x8xf32>,
    %c82_740 = arith.constant 82 : index
    %c0_741 = arith.constant 0 : index
    %481 = vector.load %arg17[%c82_740, %c0_741] : memref<120x8xf32, #tpu.memory_space<vmem>>, vector<8x8xf32>
    %c40_742 = arith.constant 40 : index
    %c40_743 = arith.constant 40 : index
    %482 = vector.load %arg18[%c40_742, %c40_743] : memref<64x72xf32, #tpu.memory_space<vmem>>, vector<8x8xf32>
    tpu.vector_store %arg18[%c40_742, %c40_743], %481 {strides = array<i32>} : memref<64x72xf32, #tpu.memory_space<vmem>>, vector<8x8xf32>,
    %c90_744 = arith.constant 90 : index
    %c0_745 = arith.constant 0 : index
    %483 = vector.load %arg17[%c90_744, %c0_745] : memref<120x8xf32, #tpu.memory_space<vmem>>, vector<8x8xf32>
    %c40_746 = arith.constant 40 : index
    %c48_747 = arith.constant 48 : index
    %484 = vector.load %arg18[%c40_746, %c48_747] : memref<64x72xf32, #tpu.memory_space<vmem>>, vector<8x8xf32>
    tpu.vector_store %arg18[%c40_746, %c48_747], %483 {strides = array<i32>} : memref<64x72xf32, #tpu.memory_space<vmem>>, vector<8x8xf32>,
    %c91 = arith.constant 91 : index
    %c0_748 = arith.constant 0 : index
    %485 = vector.load %arg17[%c91, %c0_748] : memref<120x8xf32, #tpu.memory_space<vmem>>, vector<8x8xf32>
    %c40_749 = arith.constant 40 : index
    %c56_750 = arith.constant 56 : index
    %486 = vector.load %arg18[%c40_749, %c56_750] : memref<64x72xf32, #tpu.memory_space<vmem>>, vector<8x8xf32>
    tpu.vector_store %arg18[%c40_749, %c56_750], %485 {strides = array<i32>} : memref<64x72xf32, #tpu.memory_space<vmem>>, vector<8x8xf32>,
    %c92 = arith.constant 92 : index
    %c0_751 = arith.constant 0 : index
    %487 = vector.load %arg17[%c92, %c0_751] : memref<120x8xf32, #tpu.memory_space<vmem>>, vector<8x8xf32>
    %c40_752 = arith.constant 40 : index
    %c64_753 = arith.constant 64 : index
    %488 = vector.load %arg18[%c40_752, %c64_753] : memref<64x72xf32, #tpu.memory_space<vmem>>, vector<8x8xf32>
    tpu.vector_store %arg18[%c40_752, %c64_753], %487 {strides = array<i32>} : memref<64x72xf32, #tpu.memory_space<vmem>>, vector<8x8xf32>,
    %c80_754 = arith.constant 80 : index
    %c0_755 = arith.constant 0 : index
    %489 = vector.load %arg17[%c80_754, %c0_755] : memref<120x8xf32, #tpu.memory_space<vmem>>, vector<8x8xf32>
    %c48_756 = arith.constant 48 : index
    %c0_757 = arith.constant 0 : index
    %490 = vector.load %arg18[%c48_756, %c0_757] : memref<64x72xf32, #tpu.memory_space<vmem>>, vector<8x8xf32>
    tpu.vector_store %arg18[%c48_756, %c0_757], %489 {strides = array<i32>} : memref<64x72xf32, #tpu.memory_space<vmem>>, vector<8x8xf32>,
    %c81_758 = arith.constant 81 : index
    %c0_759 = arith.constant 0 : index
    %491 = vector.load %arg17[%c81_758, %c0_759] : memref<120x8xf32, #tpu.memory_space<vmem>>, vector<8x8xf32>
    %c48_760 = arith.constant 48 : index
    %c8_761 = arith.constant 8 : index
    %492 = vector.load %arg18[%c48_760, %c8_761] : memref<64x72xf32, #tpu.memory_space<vmem>>, vector<8x8xf32>
    tpu.vector_store %arg18[%c48_760, %c8_761], %491 {strides = array<i32>} : memref<64x72xf32, #tpu.memory_space<vmem>>, vector<8x8xf32>,
    %c82_762 = arith.constant 82 : index
    %c0_763 = arith.constant 0 : index
    %493 = vector.load %arg17[%c82_762, %c0_763] : memref<120x8xf32, #tpu.memory_space<vmem>>, vector<8x8xf32>
    %c48_764 = arith.constant 48 : index
    %c16_765 = arith.constant 16 : index
    %494 = vector.load %arg18[%c48_764, %c16_765] : memref<64x72xf32, #tpu.memory_space<vmem>>, vector<8x8xf32>
    tpu.vector_store %arg18[%c48_764, %c16_765], %493 {strides = array<i32>} : memref<64x72xf32, #tpu.memory_space<vmem>>, vector<8x8xf32>,
    %c90_766 = arith.constant 90 : index
    %c0_767 = arith.constant 0 : index
    %495 = vector.load %arg17[%c90_766, %c0_767] : memref<120x8xf32, #tpu.memory_space<vmem>>, vector<8x8xf32>
    %c48_768 = arith.constant 48 : index
    %c24_769 = arith.constant 24 : index
    %496 = vector.load %arg18[%c48_768, %c24_769] : memref<64x72xf32, #tpu.memory_space<vmem>>, vector<8x8xf32>
    tpu.vector_store %arg18[%c48_768, %c24_769], %495 {strides = array<i32>} : memref<64x72xf32, #tpu.memory_space<vmem>>, vector<8x8xf32>,
    %c91_770 = arith.constant 91 : index
    %c0_771 = arith.constant 0 : index
    %497 = vector.load %arg17[%c91_770, %c0_771] : memref<120x8xf32, #tpu.memory_space<vmem>>, vector<8x8xf32>
    %c48_772 = arith.constant 48 : index
    %c32_773 = arith.constant 32 : index
    %498 = vector.load %arg18[%c48_772, %c32_773] : memref<64x72xf32, #tpu.memory_space<vmem>>, vector<8x8xf32>
    tpu.vector_store %arg18[%c48_772, %c32_773], %497 {strides = array<i32>} : memref<64x72xf32, #tpu.memory_space<vmem>>, vector<8x8xf32>,
    %c92_774 = arith.constant 92 : index
    %c0_775 = arith.constant 0 : index
    %499 = vector.load %arg17[%c92_774, %c0_775] : memref<120x8xf32, #tpu.memory_space<vmem>>, vector<8x8xf32>
    %c48_776 = arith.constant 48 : index
    %c40_777 = arith.constant 40 : index
    %500 = vector.load %arg18[%c48_776, %c40_777] : memref<64x72xf32, #tpu.memory_space<vmem>>, vector<8x8xf32>
    tpu.vector_store %arg18[%c48_776, %c40_777], %499 {strides = array<i32>} : memref<64x72xf32, #tpu.memory_space<vmem>>, vector<8x8xf32>,
    %c100_778 = arith.constant 100 : index
    %c0_779 = arith.constant 0 : index
    %501 = vector.load %arg17[%c100_778, %c0_779] : memref<120x8xf32, #tpu.memory_space<vmem>>, vector<8x8xf32>
    %c48_780 = arith.constant 48 : index
    %c48_781 = arith.constant 48 : index
    %502 = vector.load %arg18[%c48_780, %c48_781] : memref<64x72xf32, #tpu.memory_space<vmem>>, vector<8x8xf32>
    tpu.vector_store %arg18[%c48_780, %c48_781], %501 {strides = array<i32>} : memref<64x72xf32, #tpu.memory_space<vmem>>, vector<8x8xf32>,
    %c101 = arith.constant 101 : index
    %c0_782 = arith.constant 0 : index
    %503 = vector.load %arg17[%c101, %c0_782] : memref<120x8xf32, #tpu.memory_space<vmem>>, vector<8x8xf32>
    %c48_783 = arith.constant 48 : index
    %c56_784 = arith.constant 56 : index
    %504 = vector.load %arg18[%c48_783, %c56_784] : memref<64x72xf32, #tpu.memory_space<vmem>>, vector<8x8xf32>
    tpu.vector_store %arg18[%c48_783, %c56_784], %503 {strides = array<i32>} : memref<64x72xf32, #tpu.memory_space<vmem>>, vector<8x8xf32>,
    %c102 = arith.constant 102 : index
    %c0_785 = arith.constant 0 : index
    %505 = vector.load %arg17[%c102, %c0_785] : memref<120x8xf32, #tpu.memory_space<vmem>>, vector<8x8xf32>
    %c48_786 = arith.constant 48 : index
    %c64_787 = arith.constant 64 : index
    %506 = vector.load %arg18[%c48_786, %c64_787] : memref<64x72xf32, #tpu.memory_space<vmem>>, vector<8x8xf32>
    tpu.vector_store %arg18[%c48_786, %c64_787], %505 {strides = array<i32>} : memref<64x72xf32, #tpu.memory_space<vmem>>, vector<8x8xf32>,
    %c90_788 = arith.constant 90 : index
    %c0_789 = arith.constant 0 : index
    %507 = vector.load %arg17[%c90_788, %c0_789] : memref<120x8xf32, #tpu.memory_space<vmem>>, vector<8x8xf32>
    %c56_790 = arith.constant 56 : index
    %c0_791 = arith.constant 0 : index
    %508 = vector.load %arg18[%c56_790, %c0_791] : memref<64x72xf32, #tpu.memory_space<vmem>>, vector<8x8xf32>
    tpu.vector_store %arg18[%c56_790, %c0_791], %507 {strides = array<i32>} : memref<64x72xf32, #tpu.memory_space<vmem>>, vector<8x8xf32>,
    %c91_792 = arith.constant 91 : index
    %c0_793 = arith.constant 0 : index
    %509 = vector.load %arg17[%c91_792, %c0_793] : memref<120x8xf32, #tpu.memory_space<vmem>>, vector<8x8xf32>
    %c56_794 = arith.constant 56 : index
    %c8_795 = arith.constant 8 : index
    %510 = vector.load %arg18[%c56_794, %c8_795] : memref<64x72xf32, #tpu.memory_space<vmem>>, vector<8x8xf32>
    tpu.vector_store %arg18[%c56_794, %c8_795], %509 {strides = array<i32>} : memref<64x72xf32, #tpu.memory_space<vmem>>, vector<8x8xf32>,
    %c92_796 = arith.constant 92 : index
    %c0_797 = arith.constant 0 : index
    %511 = vector.load %arg17[%c92_796, %c0_797] : memref<120x8xf32, #tpu.memory_space<vmem>>, vector<8x8xf32>
    %c56_798 = arith.constant 56 : index
    %c16_799 = arith.constant 16 : index
    %512 = vector.load %arg18[%c56_798, %c16_799] : memref<64x72xf32, #tpu.memory_space<vmem>>, vector<8x8xf32>
    tpu.vector_store %arg18[%c56_798, %c16_799], %511 {strides = array<i32>} : memref<64x72xf32, #tpu.memory_space<vmem>>, vector<8x8xf32>,
    %c100_800 = arith.constant 100 : index
    %c0_801 = arith.constant 0 : index
    %513 = vector.load %arg17[%c100_800, %c0_801] : memref<120x8xf32, #tpu.memory_space<vmem>>, vector<8x8xf32>
    %c56_802 = arith.constant 56 : index
    %c24_803 = arith.constant 24 : index
    %514 = vector.load %arg18[%c56_802, %c24_803] : memref<64x72xf32, #tpu.memory_space<vmem>>, vector<8x8xf32>
    tpu.vector_store %arg18[%c56_802, %c24_803], %513 {strides = array<i32>} : memref<64x72xf32, #tpu.memory_space<vmem>>, vector<8x8xf32>,
    %c101_804 = arith.constant 101 : index
    %c0_805 = arith.constant 0 : index
    %515 = vector.load %arg17[%c101_804, %c0_805] : memref<120x8xf32, #tpu.memory_space<vmem>>, vector<8x8xf32>
    %c56_806 = arith.constant 56 : index
    %c32_807 = arith.constant 32 : index
    %516 = vector.load %arg18[%c56_806, %c32_807] : memref<64x72xf32, #tpu.memory_space<vmem>>, vector<8x8xf32>
    tpu.vector_store %arg18[%c56_806, %c32_807], %515 {strides = array<i32>} : memref<64x72xf32, #tpu.memory_space<vmem>>, vector<8x8xf32>,
    %c102_808 = arith.constant 102 : index
    %c0_809 = arith.constant 0 : index
    %517 = vector.load %arg17[%c102_808, %c0_809] : memref<120x8xf32, #tpu.memory_space<vmem>>, vector<8x8xf32>
    %c56_810 = arith.constant 56 : index
    %c40_811 = arith.constant 40 : index
    %518 = vector.load %arg18[%c56_810, %c40_811] : memref<64x72xf32, #tpu.memory_space<vmem>>, vector<8x8xf32>
    tpu.vector_store %arg18[%c56_810, %c40_811], %517 {strides = array<i32>} : memref<64x72xf32, #tpu.memory_space<vmem>>, vector<8x8xf32>,
    %c110_812 = arith.constant 110 : index
    %c0_813 = arith.constant 0 : index
    %519 = vector.load %arg17[%c110_812, %c0_813] : memref<120x8xf32, #tpu.memory_space<vmem>>, vector<8x8xf32>
    %c56_814 = arith.constant 56 : index
    %c48_815 = arith.constant 48 : index
    %520 = vector.load %arg18[%c56_814, %c48_815] : memref<64x72xf32, #tpu.memory_space<vmem>>, vector<8x8xf32>
    tpu.vector_store %arg18[%c56_814, %c48_815], %519 {strides = array<i32>} : memref<64x72xf32, #tpu.memory_space<vmem>>, vector<8x8xf32>,
    %c111_816 = arith.constant 111 : index
    %c0_817 = arith.constant 0 : index
    %521 = vector.load %arg17[%c111_816, %c0_817] : memref<120x8xf32, #tpu.memory_space<vmem>>, vector<8x8xf32>
    %c56_818 = arith.constant 56 : index
    %c56_819 = arith.constant 56 : index
    %522 = vector.load %arg18[%c56_818, %c56_819] : memref<64x72xf32, #tpu.memory_space<vmem>>, vector<8x8xf32>
    tpu.vector_store %arg18[%c56_818, %c56_819], %521 {strides = array<i32>} : memref<64x72xf32, #tpu.memory_space<vmem>>, vector<8x8xf32>,
    %c112 = arith.constant 112 : index
    %c0_820 = arith.constant 0 : index
    %523 = vector.load %arg17[%c112, %c0_820] : memref<120x8xf32, #tpu.memory_space<vmem>>, vector<8x8xf32>
    %c56_821 = arith.constant 56 : index
    %c64_822 = arith.constant 64 : index
    %524 = vector.load %arg18[%c56_821, %c64_822] : memref<64x72xf32, #tpu.memory_space<vmem>>, vector<8x8xf32>
    tpu.vector_store %arg18[%c56_821, %c64_822], %523 {strides = array<i32>} : memref<64x72xf32, #tpu.memory_space<vmem>>, vector<8x8xf32>,
    %c0_823 = arith.constant 0 : index
    %c0_824 = arith.constant 0 : index
    %525 = vector.load %arg18[%c0_823, %c0_824] : memref<64x72xf32, #tpu.memory_space<vmem>>, vector<64x72xf32>
    %c0_825 = arith.constant 0 : index
    %c0_826 = arith.constant 0 : index
    %526 = vector.load %arg6[%c0_825, %c0_826] : memref<72x8xf32, #tpu.memory_space<vmem>>, vector<72x8xf32>
    %cst_827 = arith.constant dense<0.000000e+00> : vector<64x8xf32>
    %527 = tpu.matmul %525, %526, %cst_827 {dimension_numbers = #tpu.dot_dimension_numbers<[1], [0], [0], [1], [0, 0, 1, 1], [], []>} : vector<64x72xf32>, vector<72x8xf32>, vector<64x8xf32> -> vector<64x8xf32>
    %c0_828 = arith.constant 0 : index
    %c0_829 = arith.constant 0 : index
    %528 = vector.load %arg7[%c0_828, %c0_829] : memref<1x8xf32, #tpu.memory_space<vmem>>, vector<1x8xf32>
    %529 = vector.broadcast %528 : vector<1x8xf32> to vector<64x8xf32>
    %530 = arith.addf %527, %529 : vector<64x8xf32>
    %cst_830 = arith.constant 0.000000e+00 : f32
    %531 = vector.broadcast %cst_830 : f32 to vector<64x8xf32>
    %532 = arith.maximumf %530, %531 : vector<64x8xf32>
    %c0_831 = arith.constant 0 : index
    %c0_832 = arith.constant 0 : index
    %533 = vector.load %arg19[%c0_831, %c0_832] : memref<64x8xf32, #tpu.memory_space<vmem>>, vector<64x8xf32>
    tpu.vector_store %arg19[%c0_831, %c0_832], %532 {strides = array<i32>} : memref<64x8xf32, #tpu.memory_space<vmem>>, vector<64x8xf32>,
    %c0_833 = arith.constant 0 : index
    %c0_834 = arith.constant 0 : index
    %534 = vector.load %arg19[%c0_833, %c0_834] : memref<64x8xf32, #tpu.memory_space<vmem>>, vector<6x8xf32>
    %c0_835 = arith.constant 0 : index
    %c0_836 = arith.constant 0 : index
    %535 = vector.load %arg20[%c0_835, %c0_836] : memref<24x72xf32, #tpu.memory_space<vmem>>, vector<6x8xf32>
    tpu.vector_store %arg20[%c0_835, %c0_836], %534 {strides = array<i32>} : memref<24x72xf32, #tpu.memory_space<vmem>>, vector<6x8xf32>,
    %c1_837 = arith.constant 1 : index
    %c0_838 = arith.constant 0 : index
    %536 = vector.load %arg19[%c1_837, %c0_838] : memref<64x8xf32, #tpu.memory_space<vmem>>, vector<6x8xf32>
    %c0_839 = arith.constant 0 : index
    %c8_840 = arith.constant 8 : index
    %537 = vector.load %arg20[%c0_839, %c8_840] : memref<24x72xf32, #tpu.memory_space<vmem>>, vector<6x8xf32>
    tpu.vector_store %arg20[%c0_839, %c8_840], %536 {strides = array<i32>} : memref<24x72xf32, #tpu.memory_space<vmem>>, vector<6x8xf32>,
    %c2_841 = arith.constant 2 : index
    %c0_842 = arith.constant 0 : index
    %538 = vector.load %arg19[%c2_841, %c0_842] : memref<64x8xf32, #tpu.memory_space<vmem>>, vector<6x8xf32>
    %c0_843 = arith.constant 0 : index
    %c16_844 = arith.constant 16 : index
    %539 = vector.load %arg20[%c0_843, %c16_844] : memref<24x72xf32, #tpu.memory_space<vmem>>, vector<6x8xf32>
    tpu.vector_store %arg20[%c0_843, %c16_844], %538 {strides = array<i32>} : memref<24x72xf32, #tpu.memory_space<vmem>>, vector<6x8xf32>,
    %c8_845 = arith.constant 8 : index
    %c0_846 = arith.constant 0 : index
    %540 = vector.load %arg19[%c8_845, %c0_846] : memref<64x8xf32, #tpu.memory_space<vmem>>, vector<6x8xf32>
    %c0_847 = arith.constant 0 : index
    %c24_848 = arith.constant 24 : index
    %541 = vector.load %arg20[%c0_847, %c24_848] : memref<24x72xf32, #tpu.memory_space<vmem>>, vector<6x8xf32>
    tpu.vector_store %arg20[%c0_847, %c24_848], %540 {strides = array<i32>} : memref<24x72xf32, #tpu.memory_space<vmem>>, vector<6x8xf32>,
    %c9 = arith.constant 9 : index
    %c0_849 = arith.constant 0 : index
    %542 = vector.load %arg19[%c9, %c0_849] : memref<64x8xf32, #tpu.memory_space<vmem>>, vector<6x8xf32>
    %c0_850 = arith.constant 0 : index
    %c32_851 = arith.constant 32 : index
    %543 = vector.load %arg20[%c0_850, %c32_851] : memref<24x72xf32, #tpu.memory_space<vmem>>, vector<6x8xf32>
    tpu.vector_store %arg20[%c0_850, %c32_851], %542 {strides = array<i32>} : memref<24x72xf32, #tpu.memory_space<vmem>>, vector<6x8xf32>,
    %c10_852 = arith.constant 10 : index
    %c0_853 = arith.constant 0 : index
    %544 = vector.load %arg19[%c10_852, %c0_853] : memref<64x8xf32, #tpu.memory_space<vmem>>, vector<6x8xf32>
    %c0_854 = arith.constant 0 : index
    %c40_855 = arith.constant 40 : index
    %545 = vector.load %arg20[%c0_854, %c40_855] : memref<24x72xf32, #tpu.memory_space<vmem>>, vector<6x8xf32>
    tpu.vector_store %arg20[%c0_854, %c40_855], %544 {strides = array<i32>} : memref<24x72xf32, #tpu.memory_space<vmem>>, vector<6x8xf32>,
    %c16_856 = arith.constant 16 : index
    %c0_857 = arith.constant 0 : index
    %546 = vector.load %arg19[%c16_856, %c0_857] : memref<64x8xf32, #tpu.memory_space<vmem>>, vector<6x8xf32>
    %c0_858 = arith.constant 0 : index
    %c48_859 = arith.constant 48 : index
    %547 = vector.load %arg20[%c0_858, %c48_859] : memref<24x72xf32, #tpu.memory_space<vmem>>, vector<6x8xf32>
    tpu.vector_store %arg20[%c0_858, %c48_859], %546 {strides = array<i32>} : memref<24x72xf32, #tpu.memory_space<vmem>>, vector<6x8xf32>,
    %c17 = arith.constant 17 : index
    %c0_860 = arith.constant 0 : index
    %548 = vector.load %arg19[%c17, %c0_860] : memref<64x8xf32, #tpu.memory_space<vmem>>, vector<6x8xf32>
    %c0_861 = arith.constant 0 : index
    %c56_862 = arith.constant 56 : index
    %549 = vector.load %arg20[%c0_861, %c56_862] : memref<24x72xf32, #tpu.memory_space<vmem>>, vector<6x8xf32>
    tpu.vector_store %arg20[%c0_861, %c56_862], %548 {strides = array<i32>} : memref<24x72xf32, #tpu.memory_space<vmem>>, vector<6x8xf32>,
    %c18 = arith.constant 18 : index
    %c0_863 = arith.constant 0 : index
    %550 = vector.load %arg19[%c18, %c0_863] : memref<64x8xf32, #tpu.memory_space<vmem>>, vector<6x8xf32>
    %c0_864 = arith.constant 0 : index
    %c64_865 = arith.constant 64 : index
    %551 = vector.load %arg20[%c0_864, %c64_865] : memref<24x72xf32, #tpu.memory_space<vmem>>, vector<6x8xf32>
    tpu.vector_store %arg20[%c0_864, %c64_865], %550 {strides = array<i32>} : memref<24x72xf32, #tpu.memory_space<vmem>>, vector<6x8xf32>,
    %c8_866 = arith.constant 8 : index
    %c0_867 = arith.constant 0 : index
    %552 = vector.load %arg19[%c8_866, %c0_867] : memref<64x8xf32, #tpu.memory_space<vmem>>, vector<6x8xf32>
    %c6 = arith.constant 6 : index
    %c0_868 = arith.constant 0 : index
    %553 = vector.load %arg20[%c6, %c0_868] : memref<24x72xf32, #tpu.memory_space<vmem>>, vector<6x8xf32>
    tpu.vector_store %arg20[%c6, %c0_868], %552 {strides = array<i32>} : memref<24x72xf32, #tpu.memory_space<vmem>>, vector<6x8xf32>,
    %c9_869 = arith.constant 9 : index
    %c0_870 = arith.constant 0 : index
    %554 = vector.load %arg19[%c9_869, %c0_870] : memref<64x8xf32, #tpu.memory_space<vmem>>, vector<6x8xf32>
    %c6_871 = arith.constant 6 : index
    %c8_872 = arith.constant 8 : index
    %555 = vector.load %arg20[%c6_871, %c8_872] : memref<24x72xf32, #tpu.memory_space<vmem>>, vector<6x8xf32>
    tpu.vector_store %arg20[%c6_871, %c8_872], %554 {strides = array<i32>} : memref<24x72xf32, #tpu.memory_space<vmem>>, vector<6x8xf32>,
    %c10_873 = arith.constant 10 : index
    %c0_874 = arith.constant 0 : index
    %556 = vector.load %arg19[%c10_873, %c0_874] : memref<64x8xf32, #tpu.memory_space<vmem>>, vector<6x8xf32>
    %c6_875 = arith.constant 6 : index
    %c16_876 = arith.constant 16 : index
    %557 = vector.load %arg20[%c6_875, %c16_876] : memref<24x72xf32, #tpu.memory_space<vmem>>, vector<6x8xf32>
    tpu.vector_store %arg20[%c6_875, %c16_876], %556 {strides = array<i32>} : memref<24x72xf32, #tpu.memory_space<vmem>>, vector<6x8xf32>,
    %c16_877 = arith.constant 16 : index
    %c0_878 = arith.constant 0 : index
    %558 = vector.load %arg19[%c16_877, %c0_878] : memref<64x8xf32, #tpu.memory_space<vmem>>, vector<6x8xf32>
    %c6_879 = arith.constant 6 : index
    %c24_880 = arith.constant 24 : index
    %559 = vector.load %arg20[%c6_879, %c24_880] : memref<24x72xf32, #tpu.memory_space<vmem>>, vector<6x8xf32>
    tpu.vector_store %arg20[%c6_879, %c24_880], %558 {strides = array<i32>} : memref<24x72xf32, #tpu.memory_space<vmem>>, vector<6x8xf32>,
    %c17_881 = arith.constant 17 : index
    %c0_882 = arith.constant 0 : index
    %560 = vector.load %arg19[%c17_881, %c0_882] : memref<64x8xf32, #tpu.memory_space<vmem>>, vector<6x8xf32>
    %c6_883 = arith.constant 6 : index
    %c32_884 = arith.constant 32 : index
    %561 = vector.load %arg20[%c6_883, %c32_884] : memref<24x72xf32, #tpu.memory_space<vmem>>, vector<6x8xf32>
    tpu.vector_store %arg20[%c6_883, %c32_884], %560 {strides = array<i32>} : memref<24x72xf32, #tpu.memory_space<vmem>>, vector<6x8xf32>,
    %c18_885 = arith.constant 18 : index
    %c0_886 = arith.constant 0 : index
    %562 = vector.load %arg19[%c18_885, %c0_886] : memref<64x8xf32, #tpu.memory_space<vmem>>, vector<6x8xf32>
    %c6_887 = arith.constant 6 : index
    %c40_888 = arith.constant 40 : index
    %563 = vector.load %arg20[%c6_887, %c40_888] : memref<24x72xf32, #tpu.memory_space<vmem>>, vector<6x8xf32>
    tpu.vector_store %arg20[%c6_887, %c40_888], %562 {strides = array<i32>} : memref<24x72xf32, #tpu.memory_space<vmem>>, vector<6x8xf32>,
    %c24_889 = arith.constant 24 : index
    %c0_890 = arith.constant 0 : index
    %564 = vector.load %arg19[%c24_889, %c0_890] : memref<64x8xf32, #tpu.memory_space<vmem>>, vector<6x8xf32>
    %c6_891 = arith.constant 6 : index
    %c48_892 = arith.constant 48 : index
    %565 = vector.load %arg20[%c6_891, %c48_892] : memref<24x72xf32, #tpu.memory_space<vmem>>, vector<6x8xf32>
    tpu.vector_store %arg20[%c6_891, %c48_892], %564 {strides = array<i32>} : memref<24x72xf32, #tpu.memory_space<vmem>>, vector<6x8xf32>,
    %c25 = arith.constant 25 : index
    %c0_893 = arith.constant 0 : index
    %566 = vector.load %arg19[%c25, %c0_893] : memref<64x8xf32, #tpu.memory_space<vmem>>, vector<6x8xf32>
    %c6_894 = arith.constant 6 : index
    %c56_895 = arith.constant 56 : index
    %567 = vector.load %arg20[%c6_894, %c56_895] : memref<24x72xf32, #tpu.memory_space<vmem>>, vector<6x8xf32>
    tpu.vector_store %arg20[%c6_894, %c56_895], %566 {strides = array<i32>} : memref<24x72xf32, #tpu.memory_space<vmem>>, vector<6x8xf32>,
    %c26 = arith.constant 26 : index
    %c0_896 = arith.constant 0 : index
    %568 = vector.load %arg19[%c26, %c0_896] : memref<64x8xf32, #tpu.memory_space<vmem>>, vector<6x8xf32>
    %c6_897 = arith.constant 6 : index
    %c64_898 = arith.constant 64 : index
    %569 = vector.load %arg20[%c6_897, %c64_898] : memref<24x72xf32, #tpu.memory_space<vmem>>, vector<6x8xf32>
    tpu.vector_store %arg20[%c6_897, %c64_898], %568 {strides = array<i32>} : memref<24x72xf32, #tpu.memory_space<vmem>>, vector<6x8xf32>,
    %c32_899 = arith.constant 32 : index
    %c0_900 = arith.constant 0 : index
    %570 = vector.load %arg19[%c32_899, %c0_900] : memref<64x8xf32, #tpu.memory_space<vmem>>, vector<6x8xf32>
    %c12_901 = arith.constant 12 : index
    %c0_902 = arith.constant 0 : index
    %571 = vector.load %arg20[%c12_901, %c0_902] : memref<24x72xf32, #tpu.memory_space<vmem>>, vector<6x8xf32>
    tpu.vector_store %arg20[%c12_901, %c0_902], %570 {strides = array<i32>} : memref<24x72xf32, #tpu.memory_space<vmem>>, vector<6x8xf32>,
    %c33_903 = arith.constant 33 : index
    %c0_904 = arith.constant 0 : index
    %572 = vector.load %arg19[%c33_903, %c0_904] : memref<64x8xf32, #tpu.memory_space<vmem>>, vector<6x8xf32>
    %c12_905 = arith.constant 12 : index
    %c8_906 = arith.constant 8 : index
    %573 = vector.load %arg20[%c12_905, %c8_906] : memref<24x72xf32, #tpu.memory_space<vmem>>, vector<6x8xf32>
    tpu.vector_store %arg20[%c12_905, %c8_906], %572 {strides = array<i32>} : memref<24x72xf32, #tpu.memory_space<vmem>>, vector<6x8xf32>,
    %c34_907 = arith.constant 34 : index
    %c0_908 = arith.constant 0 : index
    %574 = vector.load %arg19[%c34_907, %c0_908] : memref<64x8xf32, #tpu.memory_space<vmem>>, vector<6x8xf32>
    %c12_909 = arith.constant 12 : index
    %c16_910 = arith.constant 16 : index
    %575 = vector.load %arg20[%c12_909, %c16_910] : memref<24x72xf32, #tpu.memory_space<vmem>>, vector<6x8xf32>
    tpu.vector_store %arg20[%c12_909, %c16_910], %574 {strides = array<i32>} : memref<24x72xf32, #tpu.memory_space<vmem>>, vector<6x8xf32>,
    %c40_911 = arith.constant 40 : index
    %c0_912 = arith.constant 0 : index
    %576 = vector.load %arg19[%c40_911, %c0_912] : memref<64x8xf32, #tpu.memory_space<vmem>>, vector<6x8xf32>
    %c12_913 = arith.constant 12 : index
    %c24_914 = arith.constant 24 : index
    %577 = vector.load %arg20[%c12_913, %c24_914] : memref<24x72xf32, #tpu.memory_space<vmem>>, vector<6x8xf32>
    tpu.vector_store %arg20[%c12_913, %c24_914], %576 {strides = array<i32>} : memref<24x72xf32, #tpu.memory_space<vmem>>, vector<6x8xf32>,
    %c41_915 = arith.constant 41 : index
    %c0_916 = arith.constant 0 : index
    %578 = vector.load %arg19[%c41_915, %c0_916] : memref<64x8xf32, #tpu.memory_space<vmem>>, vector<6x8xf32>
    %c12_917 = arith.constant 12 : index
    %c32_918 = arith.constant 32 : index
    %579 = vector.load %arg20[%c12_917, %c32_918] : memref<24x72xf32, #tpu.memory_space<vmem>>, vector<6x8xf32>
    tpu.vector_store %arg20[%c12_917, %c32_918], %578 {strides = array<i32>} : memref<24x72xf32, #tpu.memory_space<vmem>>, vector<6x8xf32>,
    %c42_919 = arith.constant 42 : index
    %c0_920 = arith.constant 0 : index
    %580 = vector.load %arg19[%c42_919, %c0_920] : memref<64x8xf32, #tpu.memory_space<vmem>>, vector<6x8xf32>
    %c12_921 = arith.constant 12 : index
    %c40_922 = arith.constant 40 : index
    %581 = vector.load %arg20[%c12_921, %c40_922] : memref<24x72xf32, #tpu.memory_space<vmem>>, vector<6x8xf32>
    tpu.vector_store %arg20[%c12_921, %c40_922], %580 {strides = array<i32>} : memref<24x72xf32, #tpu.memory_space<vmem>>, vector<6x8xf32>,
    %c48_923 = arith.constant 48 : index
    %c0_924 = arith.constant 0 : index
    %582 = vector.load %arg19[%c48_923, %c0_924] : memref<64x8xf32, #tpu.memory_space<vmem>>, vector<6x8xf32>
    %c12_925 = arith.constant 12 : index
    %c48_926 = arith.constant 48 : index
    %583 = vector.load %arg20[%c12_925, %c48_926] : memref<24x72xf32, #tpu.memory_space<vmem>>, vector<6x8xf32>
    tpu.vector_store %arg20[%c12_925, %c48_926], %582 {strides = array<i32>} : memref<24x72xf32, #tpu.memory_space<vmem>>, vector<6x8xf32>,
    %c49 = arith.constant 49 : index
    %c0_927 = arith.constant 0 : index
    %584 = vector.load %arg19[%c49, %c0_927] : memref<64x8xf32, #tpu.memory_space<vmem>>, vector<6x8xf32>
    %c12_928 = arith.constant 12 : index
    %c56_929 = arith.constant 56 : index
    %585 = vector.load %arg20[%c12_928, %c56_929] : memref<24x72xf32, #tpu.memory_space<vmem>>, vector<6x8xf32>
    tpu.vector_store %arg20[%c12_928, %c56_929], %584 {strides = array<i32>} : memref<24x72xf32, #tpu.memory_space<vmem>>, vector<6x8xf32>,
    %c50_930 = arith.constant 50 : index
    %c0_931 = arith.constant 0 : index
    %586 = vector.load %arg19[%c50_930, %c0_931] : memref<64x8xf32, #tpu.memory_space<vmem>>, vector<6x8xf32>
    %c12_932 = arith.constant 12 : index
    %c64_933 = arith.constant 64 : index
    %587 = vector.load %arg20[%c12_932, %c64_933] : memref<24x72xf32, #tpu.memory_space<vmem>>, vector<6x8xf32>
    tpu.vector_store %arg20[%c12_932, %c64_933], %586 {strides = array<i32>} : memref<24x72xf32, #tpu.memory_space<vmem>>, vector<6x8xf32>,
    %c40_934 = arith.constant 40 : index
    %c0_935 = arith.constant 0 : index
    %588 = vector.load %arg19[%c40_934, %c0_935] : memref<64x8xf32, #tpu.memory_space<vmem>>, vector<6x8xf32>
    %c18_936 = arith.constant 18 : index
    %c0_937 = arith.constant 0 : index
    %589 = vector.load %arg20[%c18_936, %c0_937] : memref<24x72xf32, #tpu.memory_space<vmem>>, vector<6x8xf32>
    tpu.vector_store %arg20[%c18_936, %c0_937], %588 {strides = array<i32>} : memref<24x72xf32, #tpu.memory_space<vmem>>, vector<6x8xf32>,
    %c41_938 = arith.constant 41 : index
    %c0_939 = arith.constant 0 : index
    %590 = vector.load %arg19[%c41_938, %c0_939] : memref<64x8xf32, #tpu.memory_space<vmem>>, vector<6x8xf32>
    %c18_940 = arith.constant 18 : index
    %c8_941 = arith.constant 8 : index
    %591 = vector.load %arg20[%c18_940, %c8_941] : memref<24x72xf32, #tpu.memory_space<vmem>>, vector<6x8xf32>
    tpu.vector_store %arg20[%c18_940, %c8_941], %590 {strides = array<i32>} : memref<24x72xf32, #tpu.memory_space<vmem>>, vector<6x8xf32>,
    %c42_942 = arith.constant 42 : index
    %c0_943 = arith.constant 0 : index
    %592 = vector.load %arg19[%c42_942, %c0_943] : memref<64x8xf32, #tpu.memory_space<vmem>>, vector<6x8xf32>
    %c18_944 = arith.constant 18 : index
    %c16_945 = arith.constant 16 : index
    %593 = vector.load %arg20[%c18_944, %c16_945] : memref<24x72xf32, #tpu.memory_space<vmem>>, vector<6x8xf32>
    tpu.vector_store %arg20[%c18_944, %c16_945], %592 {strides = array<i32>} : memref<24x72xf32, #tpu.memory_space<vmem>>, vector<6x8xf32>,
    %c48_946 = arith.constant 48 : index
    %c0_947 = arith.constant 0 : index
    %594 = vector.load %arg19[%c48_946, %c0_947] : memref<64x8xf32, #tpu.memory_space<vmem>>, vector<6x8xf32>
    %c18_948 = arith.constant 18 : index
    %c24_949 = arith.constant 24 : index
    %595 = vector.load %arg20[%c18_948, %c24_949] : memref<24x72xf32, #tpu.memory_space<vmem>>, vector<6x8xf32>
    tpu.vector_store %arg20[%c18_948, %c24_949], %594 {strides = array<i32>} : memref<24x72xf32, #tpu.memory_space<vmem>>, vector<6x8xf32>,
    %c49_950 = arith.constant 49 : index
    %c0_951 = arith.constant 0 : index
    %596 = vector.load %arg19[%c49_950, %c0_951] : memref<64x8xf32, #tpu.memory_space<vmem>>, vector<6x8xf32>
    %c18_952 = arith.constant 18 : index
    %c32_953 = arith.constant 32 : index
    %597 = vector.load %arg20[%c18_952, %c32_953] : memref<24x72xf32, #tpu.memory_space<vmem>>, vector<6x8xf32>
    tpu.vector_store %arg20[%c18_952, %c32_953], %596 {strides = array<i32>} : memref<24x72xf32, #tpu.memory_space<vmem>>, vector<6x8xf32>,
    %c50_954 = arith.constant 50 : index
    %c0_955 = arith.constant 0 : index
    %598 = vector.load %arg19[%c50_954, %c0_955] : memref<64x8xf32, #tpu.memory_space<vmem>>, vector<6x8xf32>
    %c18_956 = arith.constant 18 : index
    %c40_957 = arith.constant 40 : index
    %599 = vector.load %arg20[%c18_956, %c40_957] : memref<24x72xf32, #tpu.memory_space<vmem>>, vector<6x8xf32>
    tpu.vector_store %arg20[%c18_956, %c40_957], %598 {strides = array<i32>} : memref<24x72xf32, #tpu.memory_space<vmem>>, vector<6x8xf32>,
    %c56_958 = arith.constant 56 : index
    %c0_959 = arith.constant 0 : index
    %600 = vector.load %arg19[%c56_958, %c0_959] : memref<64x8xf32, #tpu.memory_space<vmem>>, vector<6x8xf32>
    %c18_960 = arith.constant 18 : index
    %c48_961 = arith.constant 48 : index
    %601 = vector.load %arg20[%c18_960, %c48_961] : memref<24x72xf32, #tpu.memory_space<vmem>>, vector<6x8xf32>
    tpu.vector_store %arg20[%c18_960, %c48_961], %600 {strides = array<i32>} : memref<24x72xf32, #tpu.memory_space<vmem>>, vector<6x8xf32>,
    %c57 = arith.constant 57 : index
    %c0_962 = arith.constant 0 : index
    %602 = vector.load %arg19[%c57, %c0_962] : memref<64x8xf32, #tpu.memory_space<vmem>>, vector<6x8xf32>
    %c18_963 = arith.constant 18 : index
    %c56_964 = arith.constant 56 : index
    %603 = vector.load %arg20[%c18_963, %c56_964] : memref<24x72xf32, #tpu.memory_space<vmem>>, vector<6x8xf32>
    tpu.vector_store %arg20[%c18_963, %c56_964], %602 {strides = array<i32>} : memref<24x72xf32, #tpu.memory_space<vmem>>, vector<6x8xf32>,
    %c58 = arith.constant 58 : index
    %c0_965 = arith.constant 0 : index
    %604 = vector.load %arg19[%c58, %c0_965] : memref<64x8xf32, #tpu.memory_space<vmem>>, vector<6x8xf32>
    %c18_966 = arith.constant 18 : index
    %c64_967 = arith.constant 64 : index
    %605 = vector.load %arg20[%c18_966, %c64_967] : memref<24x72xf32, #tpu.memory_space<vmem>>, vector<6x8xf32>
    tpu.vector_store %arg20[%c18_966, %c64_967], %604 {strides = array<i32>} : memref<24x72xf32, #tpu.memory_space<vmem>>, vector<6x8xf32>,
    %c0_968 = arith.constant 0 : index
    %c0_969 = arith.constant 0 : index
    %606 = vector.load %arg20[%c0_968, %c0_969] : memref<24x72xf32, #tpu.memory_space<vmem>>, vector<24x72xf32>
    %c0_970 = arith.constant 0 : index
    %c0_971 = arith.constant 0 : index
    %607 = vector.load %arg8[%c0_970, %c0_971] : memref<72x16xf32, #tpu.memory_space<vmem>>, vector<72x16xf32>
    %cst_972 = arith.constant dense<0.000000e+00> : vector<24x16xf32>
    %608 = tpu.matmul %606, %607, %cst_972 {dimension_numbers = #tpu.dot_dimension_numbers<[1], [0], [0], [1], [0, 0, 1, 1], [], []>} : vector<24x72xf32>, vector<72x16xf32>, vector<24x16xf32> -> vector<24x16xf32>
    %c0_973 = arith.constant 0 : index
    %c0_974 = arith.constant 0 : index
    %609 = vector.load %arg9[%c0_973, %c0_974] : memref<1x16xf32, #tpu.memory_space<vmem>>, vector<1x16xf32>
    %610 = vector.broadcast %609 : vector<1x16xf32> to vector<24x16xf32>
    %611 = arith.addf %608, %610 : vector<24x16xf32>
    %cst_975 = arith.constant 0.000000e+00 : f32
    %612 = vector.broadcast %cst_975 : f32 to vector<24x16xf32>
    %613 = arith.maximumf %611, %612 : vector<24x16xf32>
    %c0_976 = arith.constant 0 : index
    %c0_977 = arith.constant 0 : index
    %614 = vector.load %arg21[%c0_976, %c0_977] : memref<24x16xf32, #tpu.memory_space<vmem>>, vector<24x16xf32>
    tpu.vector_store %arg21[%c0_976, %c0_977], %613 {strides = array<i32>} : memref<24x16xf32, #tpu.memory_space<vmem>>, vector<24x16xf32>,
    %c0_978 = arith.constant 0 : index
    %c0_979 = arith.constant 0 : index
    %615 = vector.load %arg21[%c0_978, %c0_979] : memref<24x16xf32, #tpu.memory_space<vmem>>, vector<1x16xf32>
    %c0_980 = arith.constant 0 : index
    %c0_981 = arith.constant 0 : index
    %616 = vector.load %arg22[%c0_980, %c0_981] : memref<2x192xf32, #tpu.memory_space<vmem>>, vector<1x16xf32>
    tpu.vector_store %arg22[%c0_980, %c0_981], %615 {strides = array<i32>} : memref<2x192xf32, #tpu.memory_space<vmem>>, vector<1x16xf32>,
    %c1_982 = arith.constant 1 : index
    %c0_983 = arith.constant 0 : index
    %617 = vector.load %arg21[%c1_982, %c0_983] : memref<24x16xf32, #tpu.memory_space<vmem>>, vector<1x16xf32>
    %c0_984 = arith.constant 0 : index
    %c16_985 = arith.constant 16 : index
    %618 = vector.load %arg22[%c0_984, %c16_985] : memref<2x192xf32, #tpu.memory_space<vmem>>, vector<1x16xf32>
    tpu.vector_store %arg22[%c0_984, %c16_985], %617 {strides = array<i32>} : memref<2x192xf32, #tpu.memory_space<vmem>>, vector<1x16xf32>,
    %c2_986 = arith.constant 2 : index
    %c0_987 = arith.constant 0 : index
    %619 = vector.load %arg21[%c2_986, %c0_987] : memref<24x16xf32, #tpu.memory_space<vmem>>, vector<1x16xf32>
    %c0_988 = arith.constant 0 : index
    %c32_989 = arith.constant 32 : index
    %620 = vector.load %arg22[%c0_988, %c32_989] : memref<2x192xf32, #tpu.memory_space<vmem>>, vector<1x16xf32>
    tpu.vector_store %arg22[%c0_988, %c32_989], %619 {strides = array<i32>} : memref<2x192xf32, #tpu.memory_space<vmem>>, vector<1x16xf32>,
    %c3_990 = arith.constant 3 : index
    %c0_991 = arith.constant 0 : index
    %621 = vector.load %arg21[%c3_990, %c0_991] : memref<24x16xf32, #tpu.memory_space<vmem>>, vector<1x16xf32>
    %c0_992 = arith.constant 0 : index
    %c48_993 = arith.constant 48 : index
    %622 = vector.load %arg22[%c0_992, %c48_993] : memref<2x192xf32, #tpu.memory_space<vmem>>, vector<1x16xf32>
    tpu.vector_store %arg22[%c0_992, %c48_993], %621 {strides = array<i32>} : memref<2x192xf32, #tpu.memory_space<vmem>>, vector<1x16xf32>,
    %c4 = arith.constant 4 : index
    %c0_994 = arith.constant 0 : index
    %623 = vector.load %arg21[%c4, %c0_994] : memref<24x16xf32, #tpu.memory_space<vmem>>, vector<1x16xf32>
    %c0_995 = arith.constant 0 : index
    %c64_996 = arith.constant 64 : index
    %624 = vector.load %arg22[%c0_995, %c64_996] : memref<2x192xf32, #tpu.memory_space<vmem>>, vector<1x16xf32>
    tpu.vector_store %arg22[%c0_995, %c64_996], %623 {strides = array<i32>} : memref<2x192xf32, #tpu.memory_space<vmem>>, vector<1x16xf32>,
    %c5 = arith.constant 5 : index
    %c0_997 = arith.constant 0 : index
    %625 = vector.load %arg21[%c5, %c0_997] : memref<24x16xf32, #tpu.memory_space<vmem>>, vector<1x16xf32>
    %c0_998 = arith.constant 0 : index
    %c80_999 = arith.constant 80 : index
    %626 = vector.load %arg22[%c0_998, %c80_999] : memref<2x192xf32, #tpu.memory_space<vmem>>, vector<1x16xf32>
    tpu.vector_store %arg22[%c0_998, %c80_999], %625 {strides = array<i32>} : memref<2x192xf32, #tpu.memory_space<vmem>>, vector<1x16xf32>,
    %c6_1000 = arith.constant 6 : index
    %c0_1001 = arith.constant 0 : index
    %627 = vector.load %arg21[%c6_1000, %c0_1001] : memref<24x16xf32, #tpu.memory_space<vmem>>, vector<1x16xf32>
    %c0_1002 = arith.constant 0 : index
    %c96 = arith.constant 96 : index
    %628 = vector.load %arg22[%c0_1002, %c96] : memref<2x192xf32, #tpu.memory_space<vmem>>, vector<1x16xf32>
    tpu.vector_store %arg22[%c0_1002, %c96], %627 {strides = array<i32>} : memref<2x192xf32, #tpu.memory_space<vmem>>, vector<1x16xf32>,
    %c7 = arith.constant 7 : index
    %c0_1003 = arith.constant 0 : index
    %629 = vector.load %arg21[%c7, %c0_1003] : memref<24x16xf32, #tpu.memory_space<vmem>>, vector<1x16xf32>
    %c0_1004 = arith.constant 0 : index
    %c112_1005 = arith.constant 112 : index
    %630 = vector.load %arg22[%c0_1004, %c112_1005] : memref<2x192xf32, #tpu.memory_space<vmem>>, vector<1x16xf32>
    tpu.vector_store %arg22[%c0_1004, %c112_1005], %629 {strides = array<i32>} : memref<2x192xf32, #tpu.memory_space<vmem>>, vector<1x16xf32>,
    %c8_1006 = arith.constant 8 : index
    %c0_1007 = arith.constant 0 : index
    %631 = vector.load %arg21[%c8_1006, %c0_1007] : memref<24x16xf32, #tpu.memory_space<vmem>>, vector<1x16xf32>
    %c0_1008 = arith.constant 0 : index
    %c128 = arith.constant 128 : index
    %632 = vector.load %arg22[%c0_1008, %c128] : memref<2x192xf32, #tpu.memory_space<vmem>>, vector<1x16xf32>
    tpu.vector_store %arg22[%c0_1008, %c128], %631 {strides = array<i32>} : memref<2x192xf32, #tpu.memory_space<vmem>>, vector<1x16xf32>,
    %c9_1009 = arith.constant 9 : index
    %c0_1010 = arith.constant 0 : index
    %633 = vector.load %arg21[%c9_1009, %c0_1010] : memref<24x16xf32, #tpu.memory_space<vmem>>, vector<1x16xf32>
    %c0_1011 = arith.constant 0 : index
    %c144_1012 = arith.constant 144 : index
    %634 = vector.load %arg22[%c0_1011, %c144_1012] : memref<2x192xf32, #tpu.memory_space<vmem>>, vector<1x16xf32>
    tpu.vector_store %arg22[%c0_1011, %c144_1012], %633 {strides = array<i32>} : memref<2x192xf32, #tpu.memory_space<vmem>>, vector<1x16xf32>,
    %c10_1013 = arith.constant 10 : index
    %c0_1014 = arith.constant 0 : index
    %635 = vector.load %arg21[%c10_1013, %c0_1014] : memref<24x16xf32, #tpu.memory_space<vmem>>, vector<1x16xf32>
    %c0_1015 = arith.constant 0 : index
    %c160 = arith.constant 160 : index
    %636 = vector.load %arg22[%c0_1015, %c160] : memref<2x192xf32, #tpu.memory_space<vmem>>, vector<1x16xf32>
    tpu.vector_store %arg22[%c0_1015, %c160], %635 {strides = array<i32>} : memref<2x192xf32, #tpu.memory_space<vmem>>, vector<1x16xf32>,
    %c11_1016 = arith.constant 11 : index
    %c0_1017 = arith.constant 0 : index
    %637 = vector.load %arg21[%c11_1016, %c0_1017] : memref<24x16xf32, #tpu.memory_space<vmem>>, vector<1x16xf32>
    %c0_1018 = arith.constant 0 : index
    %c176 = arith.constant 176 : index
    %638 = vector.load %arg22[%c0_1018, %c176] : memref<2x192xf32, #tpu.memory_space<vmem>>, vector<1x16xf32>
    tpu.vector_store %arg22[%c0_1018, %c176], %637 {strides = array<i32>} : memref<2x192xf32, #tpu.memory_space<vmem>>, vector<1x16xf32>,
    %c12_1019 = arith.constant 12 : index
    %c0_1020 = arith.constant 0 : index
    %639 = vector.load %arg21[%c12_1019, %c0_1020] : memref<24x16xf32, #tpu.memory_space<vmem>>, vector<1x16xf32>
    %c1_1021 = arith.constant 1 : index
    %c0_1022 = arith.constant 0 : index
    %640 = vector.load %arg22[%c1_1021, %c0_1022] : memref<2x192xf32, #tpu.memory_space<vmem>>, vector<1x16xf32>
    tpu.vector_store %arg22[%c1_1021, %c0_1022], %639 {strides = array<i32>} : memref<2x192xf32, #tpu.memory_space<vmem>>, vector<1x16xf32>,
    %c13 = arith.constant 13 : index
    %c0_1023 = arith.constant 0 : index
    %641 = vector.load %arg21[%c13, %c0_1023] : memref<24x16xf32, #tpu.memory_space<vmem>>, vector<1x16xf32>
    %c1_1024 = arith.constant 1 : index
    %c16_1025 = arith.constant 16 : index
    %642 = vector.load %arg22[%c1_1024, %c16_1025] : memref<2x192xf32, #tpu.memory_space<vmem>>, vector<1x16xf32>
    tpu.vector_store %arg22[%c1_1024, %c16_1025], %641 {strides = array<i32>} : memref<2x192xf32, #tpu.memory_space<vmem>>, vector<1x16xf32>,
    %c14 = arith.constant 14 : index
    %c0_1026 = arith.constant 0 : index
    %643 = vector.load %arg21[%c14, %c0_1026] : memref<24x16xf32, #tpu.memory_space<vmem>>, vector<1x16xf32>
    %c1_1027 = arith.constant 1 : index
    %c32_1028 = arith.constant 32 : index
    %644 = vector.load %arg22[%c1_1027, %c32_1028] : memref<2x192xf32, #tpu.memory_space<vmem>>, vector<1x16xf32>
    tpu.vector_store %arg22[%c1_1027, %c32_1028], %643 {strides = array<i32>} : memref<2x192xf32, #tpu.memory_space<vmem>>, vector<1x16xf32>,
    %c15 = arith.constant 15 : index
    %c0_1029 = arith.constant 0 : index
    %645 = vector.load %arg21[%c15, %c0_1029] : memref<24x16xf32, #tpu.memory_space<vmem>>, vector<1x16xf32>
    %c1_1030 = arith.constant 1 : index
    %c48_1031 = arith.constant 48 : index
    %646 = vector.load %arg22[%c1_1030, %c48_1031] : memref<2x192xf32, #tpu.memory_space<vmem>>, vector<1x16xf32>
    tpu.vector_store %arg22[%c1_1030, %c48_1031], %645 {strides = array<i32>} : memref<2x192xf32, #tpu.memory_space<vmem>>, vector<1x16xf32>,
    %c16_1032 = arith.constant 16 : index
    %c0_1033 = arith.constant 0 : index
    %647 = vector.load %arg21[%c16_1032, %c0_1033] : memref<24x16xf32, #tpu.memory_space<vmem>>, vector<1x16xf32>
    %c1_1034 = arith.constant 1 : index
    %c64_1035 = arith.constant 64 : index
    %648 = vector.load %arg22[%c1_1034, %c64_1035] : memref<2x192xf32, #tpu.memory_space<vmem>>, vector<1x16xf32>
    tpu.vector_store %arg22[%c1_1034, %c64_1035], %647 {strides = array<i32>} : memref<2x192xf32, #tpu.memory_space<vmem>>, vector<1x16xf32>,
    %c17_1036 = arith.constant 17 : index
    %c0_1037 = arith.constant 0 : index
    %649 = vector.load %arg21[%c17_1036, %c0_1037] : memref<24x16xf32, #tpu.memory_space<vmem>>, vector<1x16xf32>
    %c1_1038 = arith.constant 1 : index
    %c80_1039 = arith.constant 80 : index
    %650 = vector.load %arg22[%c1_1038, %c80_1039] : memref<2x192xf32, #tpu.memory_space<vmem>>, vector<1x16xf32>
    tpu.vector_store %arg22[%c1_1038, %c80_1039], %649 {strides = array<i32>} : memref<2x192xf32, #tpu.memory_space<vmem>>, vector<1x16xf32>,
    %c18_1040 = arith.constant 18 : index
    %c0_1041 = arith.constant 0 : index
    %651 = vector.load %arg21[%c18_1040, %c0_1041] : memref<24x16xf32, #tpu.memory_space<vmem>>, vector<1x16xf32>
    %c1_1042 = arith.constant 1 : index
    %c96_1043 = arith.constant 96 : index
    %652 = vector.load %arg22[%c1_1042, %c96_1043] : memref<2x192xf32, #tpu.memory_space<vmem>>, vector<1x16xf32>
    tpu.vector_store %arg22[%c1_1042, %c96_1043], %651 {strides = array<i32>} : memref<2x192xf32, #tpu.memory_space<vmem>>, vector<1x16xf32>,
    %c19 = arith.constant 19 : index
    %c0_1044 = arith.constant 0 : index
    %653 = vector.load %arg21[%c19, %c0_1044] : memref<24x16xf32, #tpu.memory_space<vmem>>, vector<1x16xf32>
    %c1_1045 = arith.constant 1 : index
    %c112_1046 = arith.constant 112 : index
    %654 = vector.load %arg22[%c1_1045, %c112_1046] : memref<2x192xf32, #tpu.memory_space<vmem>>, vector<1x16xf32>
    tpu.vector_store %arg22[%c1_1045, %c112_1046], %653 {strides = array<i32>} : memref<2x192xf32, #tpu.memory_space<vmem>>, vector<1x16xf32>,
    %c20_1047 = arith.constant 20 : index
    %c0_1048 = arith.constant 0 : index
    %655 = vector.load %arg21[%c20_1047, %c0_1048] : memref<24x16xf32, #tpu.memory_space<vmem>>, vector<1x16xf32>
    %c1_1049 = arith.constant 1 : index
    %c128_1050 = arith.constant 128 : index
    %656 = vector.load %arg22[%c1_1049, %c128_1050] : memref<2x192xf32, #tpu.memory_space<vmem>>, vector<1x16xf32>
    tpu.vector_store %arg22[%c1_1049, %c128_1050], %655 {strides = array<i32>} : memref<2x192xf32, #tpu.memory_space<vmem>>, vector<1x16xf32>,
    %c21_1051 = arith.constant 21 : index
    %c0_1052 = arith.constant 0 : index
    %657 = vector.load %arg21[%c21_1051, %c0_1052] : memref<24x16xf32, #tpu.memory_space<vmem>>, vector<1x16xf32>
    %c1_1053 = arith.constant 1 : index
    %c144_1054 = arith.constant 144 : index
    %658 = vector.load %arg22[%c1_1053, %c144_1054] : memref<2x192xf32, #tpu.memory_space<vmem>>, vector<1x16xf32>
    tpu.vector_store %arg22[%c1_1053, %c144_1054], %657 {strides = array<i32>} : memref<2x192xf32, #tpu.memory_space<vmem>>, vector<1x16xf32>,
    %c22_1055 = arith.constant 22 : index
    %c0_1056 = arith.constant 0 : index
    %659 = vector.load %arg21[%c22_1055, %c0_1056] : memref<24x16xf32, #tpu.memory_space<vmem>>, vector<1x16xf32>
    %c1_1057 = arith.constant 1 : index
    %c160_1058 = arith.constant 160 : index
    %660 = vector.load %arg22[%c1_1057, %c160_1058] : memref<2x192xf32, #tpu.memory_space<vmem>>, vector<1x16xf32>
    tpu.vector_store %arg22[%c1_1057, %c160_1058], %659 {strides = array<i32>} : memref<2x192xf32, #tpu.memory_space<vmem>>, vector<1x16xf32>,
    %c23_1059 = arith.constant 23 : index
    %c0_1060 = arith.constant 0 : index
    %661 = vector.load %arg21[%c23_1059, %c0_1060] : memref<24x16xf32, #tpu.memory_space<vmem>>, vector<1x16xf32>
    %c1_1061 = arith.constant 1 : index
    %c176_1062 = arith.constant 176 : index
    %662 = vector.load %arg22[%c1_1061, %c176_1062] : memref<2x192xf32, #tpu.memory_space<vmem>>, vector<1x16xf32>
    tpu.vector_store %arg22[%c1_1061, %c176_1062], %661 {strides = array<i32>} : memref<2x192xf32, #tpu.memory_space<vmem>>, vector<1x16xf32>,
    %c0_1063 = arith.constant 0 : index
    %c0_1064 = arith.constant 0 : index
    %663 = vector.load %arg22[%c0_1063, %c0_1064] : memref<2x192xf32, #tpu.memory_space<vmem>>, vector<2x192xf32>
    %c0_1065 = arith.constant 0 : index
    %c0_1066 = arith.constant 0 : index
    %664 = vector.load %arg10[%c0_1065, %c0_1066] : memref<192x128xf32, #tpu.memory_space<vmem>>, vector<192x128xf32>
    %cst_1067 = arith.constant dense<0.000000e+00> : vector<2x128xf32>
    %665 = tpu.matmul %663, %664, %cst_1067 {dimension_numbers = #tpu.dot_dimension_numbers<[1], [0], [0], [1], [0, 0, 1, 1], [], []>} : vector<2x192xf32>, vector<192x128xf32>, vector<2x128xf32> -> vector<2x128xf32>
    %c0_1068 = arith.constant 0 : index
    %c0_1069 = arith.constant 0 : index
    %666 = vector.load %arg11[%c0_1068, %c0_1069] : memref<1x128xf32, #tpu.memory_space<vmem>>, vector<1x128xf32>
    %667 = vector.broadcast %666 : vector<1x128xf32> to vector<2x128xf32>
    %668 = arith.addf %665, %667 : vector<2x128xf32>
    %cst_1070 = arith.constant 0.000000e+00 : f32
    %669 = vector.broadcast %cst_1070 : f32 to vector<2x128xf32>
    %670 = arith.maximumf %668, %669 : vector<2x128xf32>
    %c0_1071 = arith.constant 0 : index
    %c0_1072 = arith.constant 0 : index
    %671 = vector.load %arg12[%c0_1071, %c0_1072] : memref<128x9xf32, #tpu.memory_space<vmem>>, vector<128x9xf32>
    %cst_1073 = arith.constant dense<0.000000e+00> : vector<2x9xf32>
    %672 = tpu.matmul %670, %671, %cst_1073 {dimension_numbers = #tpu.dot_dimension_numbers<[1], [0], [0], [1], [0, 0, 1, 1], [], []>} : vector<2x128xf32>, vector<128x9xf32>, vector<2x9xf32> -> vector<2x9xf32>
    %c0_1074 = arith.constant 0 : index
    %c0_1075 = arith.constant 0 : index
    %673 = vector.load %arg13[%c0_1074, %c0_1075] : memref<1x9xf32, #tpu.memory_space<vmem>>, vector<1x9xf32>
    %674 = vector.broadcast %673 : vector<1x9xf32> to vector<2x9xf32>
    %675 = arith.addf %672, %674 : vector<2x9xf32>
    %676 = vector.extract_strided_slice %675 {offsets = [0, 0], sizes = [2, 1], strides = [1, 1]} : vector<2x9xf32> to vector<2x1xf32>
    %677 = vector.extract_strided_slice %675 {offsets = [0, 1], sizes = [2, 8], strides = [1, 1]} : vector<2x9xf32> to vector<2x8xf32>
    %cst_1076 = arith.constant dense<0.000000e+00> : vector<2xf32>
    %678 = vector.multi_reduction <add>, %677, %cst_1076 [1] : vector<2x8xf32> to vector<2xf32>
    %679 = vector.shape_cast %678 : vector<2xf32> to vector<2x1xf32>
    %cst_1077 = arith.constant 1.250000e-01 : f32
    %680 = vector.broadcast %cst_1077 : f32 to vector<2x1xf32>
    %681 = arith.mulf %679, %680 : vector<2x1xf32>
    %682 = vector.broadcast %681 : vector<2x1xf32> to vector<2x8xf32>
    %683 = arith.subf %677, %682 : vector<2x8xf32>
    %684 = vector.broadcast %676 : vector<2x1xf32> to vector<2x8xf32>
    %685 = arith.addf %684, %683 : vector<2x8xf32>
    %c0_1078 = arith.constant 0 : index
    %c0_1079 = arith.constant 0 : index
    %686 = vector.load %arg14[%c0_1078, %c0_1079] : memref<2x8xf32, #tpu.memory_space<vmem>>, vector<2x8xf32>
    tpu.vector_store %arg14[%c0_1078, %c0_1079], %685 {strides = array<i32>} : memref<2x8xf32, #tpu.memory_space<vmem>>, vector<2x8xf32>,
    return
  }
  func.func @transform_0(%arg0: i32) -> (i32, i32, i32) {
    %c0_i32 = arith.constant 0 : i32
    %c0_i32_0 = arith.constant 0 : i32
    %c0_i32_1 = arith.constant 0 : i32
    %c0_i32_2 = arith.constant 0 : i32
    return %c0_i32, %c0_i32_0, %c0_i32_1 : i32, i32, i32
  }
  func.func @transform_1(%arg0: i32) -> (i32, i32) {
    %c0_i32 = arith.constant 0 : i32
    %c0_i32_0 = arith.constant 0 : i32
    %c0_i32_1 = arith.constant 0 : i32
    return %c0_i32, %c0_i32_0 : i32, i32
  }
  func.func @transform_2(%arg0: i32) -> (i32, i32) {
    %c0_i32 = arith.constant 0 : i32
    %c0_i32_0 = arith.constant 0 : i32
    %c0_i32_1 = arith.constant 0 : i32
    return %c0_i32, %c0_i32_0 : i32, i32
  }
  func.func @transform_3(%arg0: i32) -> (i32, i32) {
    %c0_i32 = arith.constant 0 : i32
    %c0_i32_0 = arith.constant 0 : i32
    %c0_i32_1 = arith.constant 0 : i32
    return %c0_i32, %c0_i32_0 : i32, i32
  }
  func.func @transform_4(%arg0: i32) -> (i32, i32) {
    %c0_i32 = arith.constant 0 : i32
    %c0_i32_0 = arith.constant 0 : i32
    %c0_i32_1 = arith.constant 0 : i32
    return %c0_i32, %c0_i32_0 : i32, i32
  }
  func.func @transform_5(%arg0: i32) -> (i32, i32) {
    %c0_i32 = arith.constant 0 : i32
    %c0_i32_0 = arith.constant 0 : i32
    %c0_i32_1 = arith.constant 0 : i32
    return %c0_i32, %c0_i32_0 : i32, i32
  }
  func.func @transform_6(%arg0: i32) -> (i32, i32) {
    %c0_i32 = arith.constant 0 : i32
    %c0_i32_0 = arith.constant 0 : i32
    %c0_i32_1 = arith.constant 0 : i32
    return %c0_i32, %c0_i32_0 : i32, i32
  }
  func.func @transform_7(%arg0: i32) -> (i32, i32) {
    %c0_i32 = arith.constant 0 : i32
    %c0_i32_0 = arith.constant 0 : i32
    %c0_i32_1 = arith.constant 0 : i32
    return %c0_i32, %c0_i32_0 : i32, i32
  }
  func.func @transform_8(%arg0: i32) -> (i32, i32) {
    %c0_i32 = arith.constant 0 : i32
    %c0_i32_0 = arith.constant 0 : i32
    %c0_i32_1 = arith.constant 0 : i32
    return %c0_i32, %c0_i32_0 : i32, i32
  }
  func.func @transform_9(%arg0: i32) -> (i32, i32) {
    %c0_i32 = arith.constant 0 : i32
    %c0_i32_0 = arith.constant 0 : i32
    %c0_i32_1 = arith.constant 0 : i32
    return %c0_i32, %c0_i32_0 : i32, i32
  }
  func.func @transform_10(%arg0: i32) -> (i32, i32) {
    %c0_i32 = arith.constant 0 : i32
    %c0_i32_0 = arith.constant 0 : i32
    %c0_i32_1 = arith.constant 0 : i32
    return %c0_i32, %c0_i32_0 : i32, i32
  }
  func.func @transform_11(%arg0: i32) -> (i32, i32) {
    %c0_i32 = arith.constant 0 : i32
    %c0_i32_0 = arith.constant 0 : i32
    %c0_i32_1 = arith.constant 0 : i32
    return %c0_i32, %c0_i32_0 : i32, i32
  }
  func.func @transform_12(%arg0: i32) -> (i32, i32) {
    %c0_i32 = arith.constant 0 : i32
    %c0_i32_0 = arith.constant 0 : i32
    %c0_i32_1 = arith.constant 0 : i32
    return %c0_i32, %c0_i32_0 : i32, i32
  }
  func.func @transform_13(%arg0: i32) -> (i32, i32) {
    %c0_i32 = arith.constant 0 : i32
    %c0_i32_0 = arith.constant 0 : i32
    %c0_i32_1 = arith.constant 0 : i32
    return %c0_i32, %c0_i32_0 : i32, i32
  }
}

</mosaic_0001>

<bundles_post_ra>
// kernel: duel_qnet_forward.1
= control target key start
LH: loop header
LB: loop body
LE: loop exit
PB: predicated region body
PF: predicated region fallthrough
CT: control target
= control target key end

     0   :  { %vm135_vm0 = vcmask 1040384   ;;  %vm4938_vm1 = vmmov 1   ;;  %vm6859_vm3 = vcmask 72704   ;;  %s6840_s0 = inlined_call_operand.vmem [shape: f32[4,154,9], index: 0, kind: input, shape index: {}]   ;;  %s6841_s1 = inlined_call_operand.vmem [shape: f32[9,8], index: 1, kind: input, shape index: {}]   ;;  %s6842_s2 = inlined_call_operand.vmem [shape: f32[1,8], index: 2, kind: input, shape index: {}]   ;;  %s6843_s3 = inlined_call_operand.vmem [shape: f32[72,8], index: 3, kind: input, shape index: {}]   ;;  %s6844_s4 = inlined_call_operand.vmem [shape: f32[1,8], index: 4, kind: input, shape index: {}]   ;;  %s6845_s5 = inlined_call_operand.vmem [shape: f32[72,8], index: 5, kind: input, shape index: {}]   ;;  %s6846_s6 = inlined_call_operand.vmem [shape: f32[1,8], index: 6, kind: input, shape index: {}]   ;;  %s6847_s7 = inlined_call_operand.vmem [shape: f32[72,16], index: 7, kind: input, shape index: {}]   ;;  %s6848_s8 = inlined_call_operand.vmem [shape: f32[1,16], index: 8, kind: input, shape index: {}]   ;;  %s6849_s9 = inlined_call_operand.vmem [shape: f32[192,128], index: 9, kind: input, shape index: {}]   ;;  %s6850_s10 = inlined_call_operand.vmem [shape: f32[1,128], index: 10, kind: input, shape index: {}]   ;;  %s6851_s11 = inlined_call_operand.vmem [shape: f32[128,9], index: 11, kind: input, shape index: {}]   ;;  %s6852_s12 = inlined_call_operand.vmem [shape: f32[1,9], index: 12, kind: input, shape index: {}]   ;;  %s6853_s13 = inlined_call_operand.hbm [shape: f32[2,8], index: 13, kind: output, shape index: {}]  }
   0x1   :  { %v65_v0 = vld [vmem:[%s6841_s1] sm:$0xff]  ;;  %v66_v1 = vld [vmem:[%s6841_s1 + $0x8] sm:$0x1]  ;;  %vm5035_vm2 = vmpackc.low %vm135_vm0, %vm4938_vm1 }
   0x2   :  { %v45_v2 = vld [vmem:[%s6840_s0] sm:$0xff]  ;;  %v4767_v3 = vpack.c.bf16 %v66_v1, %v65_v0  ;;  %v63_v5 = vld [vmem:[%s6840_s0 + $0x90] sm:$0xff]  ;;  %v368_v6 = vld [vmem:[%s6841_s1 + $0x8] sm:$0x1] }
   0x3   :  { %4480 = vmatprep.mubr.msk.f32.mxu0 %vm6859_vm3, %v45_v2  ;;  %4507 = vmatprep.mubr.msk.f32.mxu1 %vm6859_vm3, %v63_v5  ;;  %v4773_v7 = vpack.c.bf16 %v368_v6, %v65_v0  ;;  %v46_v8 = vld [vmem:[%s6840_s0 + $0x8] sm:$0xff]  ;;  %v64_v9 = vld [vmem:[%s6840_s0 + $0x98] sm:$0x3]  ;;  %v47_v10 = vld [vmem:[%s6840_s0 + $0x10] sm:$0xff] }
   0x4   :  { %4769 = vmatprep.subr.msk.bf16.mxu0 %vm5035_vm2, %v4767_v3  ;;  %4891 = vmatprep.subr.msk.bf16.mxu1 %vm5035_vm2, %v4767_v3  ;;  %v4139_v11 = vld [vmem:[%s6840_s0 + $0xa0] sm:$0xff]  ;;  %v48_v12 = vld [vmem:[%s6840_s0 + $0x18] sm:$0xff]  ;;  %v4140_v13 = vld [vmem:[%s6840_s0 + $0xa8] sm:$0xff] }
   0x5   :  { %4772 = vmatpush3.bf16.msk.msra.mxu0 %vm5035_vm2, %v4767_v3  ;;  %4892 = vmatpush3.bf16.msk.msra.mxu1 %vm5035_vm2, %v4767_v3  ;;  %v49_v14 = vld [vmem:[%s6840_s0 + $0x20] sm:$0xff]  ;;  %v4141_v15 = vld [vmem:[%s6840_s0 + $0xb0] sm:$0xff]  ;;  %v50_v16 = vld [vmem:[%s6840_s0 + $0x28] sm:$0xff] }
   0x6   :  { %4775 = vmatprep.subr.msk.bf16.mxu1 %vm5035_vm2, %v4773_v7  ;;  %v4142_v17 = vld [vmem:[%s6840_s0 + $0xb8] sm:$0xff]  ;;  %v667_v18 = vld [vmem:[%s6841_s1 + $0x8] sm:$0x1]  ;;  %v51_v19 = vld [vmem:[%s6840_s0 + $0x30] sm:$0xff] }
   0x7   :  { %v4143_v20 = vld [vmem:[%s6840_s0 + $0xc0] sm:$0xff]  ;;  %v4779_v21 = vpack.c.bf16 %v667_v18, %v65_v0  ;;  %v966_v22 = vld [vmem:[%s6841_s1 + $0x8] sm:$0x1]  ;;  %v52_v24 = vld [vmem:[%s6840_s0 + $0x38] sm:$0xff] }
   0x8   :  { %4481 = vmatmul.mubr.msk.f32.vlgmr.msra.gmra.mrb[0].mxu0 %vm6859_vm3, %v46_v8  ;;  %4508 = vmatmul.mubr.msk.f32.vlgmr.msra.gmra.mrb[0].mxu1 %vm6859_vm3, %v64_v9  ;;  %v4785_v23 = vpack.c.bf16 %v966_v22, %v65_v0  ;;  %v4144_v25 = vld [vmem:[%s6840_s0 + $0xc8] sm:$0xff]  ;;  %v53_v26 = vld [vmem:[%s6840_s0 + $0x40] sm:$0xff]  ;;  %v4145_v27 = vld [vmem:[%s6840_s0 + $0xd0] sm:$0xff] }
   0x9   :  { %4778 = vmatpush3.bf16.msk.msra.mxu1 %vm5035_vm2, %v4773_v7  ;;  %4483 = vmatprep.mubr.msk.f32.mxu0 %vm6859_vm3, %v47_v10 }
   0xa   :  { %4514 = vmatprep.mubr.msk.f32.mxu1 %vm6859_vm3, %v4139_v11  ;;  %4781 = vmatprep.subr.msk.bf16.mxu0 %vm5035_vm2, %v4779_v21 }
   0xb   :  { %4787 = vmatprep.subr.msk.bf16.mxu1 %vm5035_vm2, %v4785_v23  ;;  %4784 = vmatpush3.bf16.msk.msra.mxu0 %vm5035_vm2, %v4779_v21 }
   0xc   :  { %4484 = vmatmul.mubr.msk.f32.gmra.mrb[2].mxu0 %vm6859_vm3, %v48_v12  ;;  %4515 = vmatmul.mubr.msk.f32.vlgmr.msra.gmra.mrb[2].mxu1 %vm6859_vm3, %v4140_v13 }
   0xd   :  { %4486 = vmatprep.mubr.msk.f32.mxu0 %vm6859_vm3, %v49_v14  ;;  %4517 = vmatprep.mubr.msk.f32.mxu1 %vm6859_vm3, %v4141_v15 }
   0xe   :  { %4790 = vmatpush3.bf16.msk.msra.mxu1 %vm5035_vm2, %v4785_v23 }
  0x10   :  { %4487 = vmatmul.mubr.msk.f32.gmra.mrb[4].mxu0 %vm6859_vm3, %v50_v16  ;;  %4518 = vmatmul.mubr.msk.f32.gmra.mrb[4].mxu1 %vm6859_vm3, %v4142_v17 }
  0x11   :  { %4489 = vmatprep.mubr.msk.f32.mxu0 %vm6859_vm3, %v51_v19  ;;  %4520 = vmatprep.mubr.msk.f32.mxu1 %vm6859_vm3, %v4143_v20 }
  0x14   :  { %4490 = vmatmul.mubr.msk.f32.gmra.mrb[6].mxu0 %vm6859_vm3, %v52_v24  ;;  %4521 = vmatmul.mubr.msk.f32.gmra.mrb[6].mxu1 %vm6859_vm3, %v4144_v25 }
  0x15   :  { %18 = vsyncpa [#allocation11], 0  ;;  %4492 = vmatprep.mubr.msk.f32.mxu0 %vm6859_vm3, %v53_v26  ;;  %v54_v28 = vld [vmem:[%s6840_s0 + $0x48] sm:$0xff]  ;;  %4523 = vmatprep.mubr.msk.f32.mxu1 %vm6859_vm3, %v4145_v27  ;;  %v4146_v29 = vld [vmem:[%s6840_s0 + $0xd8] sm:$0xff]  ;;  %vm6860_vm4 = vcmask 64512   ;;  %vm6858_vm5 = vcmask 58368  }
  0x16   :  { %v55_v30 = vld [vmem:[%s6840_s0 + $0x50] sm:$0xff]  ;;  %v4147_v31 = vld [vmem:[%s6840_s0 + $0xe0] sm:$0xff]  ;;  %v56_v32 = vld [vmem:[%s6840_s0 + $0x58] sm:$0xff]  ;;  %s4939_s29 = smov 16   ;;  %s4940_s30 = smov 8   ;;  %vm1259_vm6 = vcmask 123968  }
  0x17   :  { %v4148_v33 = vld [vmem:[%s6840_s0 + $0xe8] sm:$0xff]  ;;  %v57_v34 = vld [vmem:[%s6840_s0 + $0x60] sm:$0xff]  ;;  %v4149_v35 = vld [vmem:[%s6840_s0 + $0xf0] sm:$0xff]  ;;  %s4941_s14 = smov 48   ;;  %s4942_s15 = smov 64   ;;  %vm6862_vm7 = vcmask 189568  }
  0x18   :  { %4493 = vmatmul.mubr.msk.f32.gmra.mrb[8].mxu0 %vm6859_vm3, %v54_v28  ;;  %4524 = vmatmul.mubr.msk.f32.gmra.mrb[8].mxu1 %vm6859_vm3, %v4146_v29  ;;  %v58_v36 = vld [vmem:[%s6840_s0 + $0x68] sm:$0xff]  ;;  %v4150_v37 = vld [vmem:[%s6840_s0 + $0xf8] sm:$0xff]  ;;  %v59_v38 = vld [vmem:[%s6840_s0 + $0x70] sm:$0xff]  ;;  %s4943_s16 = smov 56   ;;  %vm1257_vm8 = vcmask 130112   ;;  %vm6861_vm9 = vcmask 195712  }
  0x19   :  { %4495 = vmatprep.mubr.msk.f32.mxu0 %vm6859_vm3, %v55_v30  ;;  %4526 = vmatprep.mubr.msk.f32.mxu1 %vm6859_vm3, %v4147_v31  ;;  %v4151_v39 = vld [vmem:[%s6840_s0 + $0x100] sm:$0xff]  ;;  %v60_v40 = vld [vmem:[%s6840_s0 + $0x78] sm:$0xff]  ;;  %v4152_v41 = vld [vmem:[%s6840_s0 + $0x108] sm:$0xff]  ;;  %s4945_s18 = smov 40   ;;  %s4947_s19 = smov 32   ;;  %vm4948_vm10 = vmmov 0  }
  0x1a   :  { %v61_v42 = vld [vmem:[%s6840_s0 + $0x80] sm:$0xff]  ;;  %v4153_v43 = vld [vmem:[%s6840_s0 + $0x110] sm:$0xff]  ;;  %v62_v44 = vld [vmem:[%s6840_s0 + $0x88] sm:$0xff]  ;;  %vm1285_vm11 = vcmask 261312   ;;  %vm1287_vm12 = vcmask 255168   ;;  %vm1299_vm13 = vcmask 326912  }
  0x1b   :  { %v4154_v45 = vld [vmem:[%s6840_s0 + $0x118] sm:$0xff]  ;;  %v4155_v46 = vld [vmem:[%s6840_s0 + $0x120] sm:$0xff]  ;;  %v4156_v48 = vld [vmem:[%s6840_s0 + $0x128] sm:$0xff]  ;;  %vm1313_vm14 = vcmask 392512   ;;  %vm1327_vm15 = vcmask 458112   ;;  %vm1341_vm0 = vcmask 523712  }
  0x1c   :  { %4496 = vmatmul.mubr.msk.f32.gmra.mrb[10].mxu0 %vm6859_vm3, %v56_v32  ;;  %4527 = vmatmul.mubr.msk.f32.gmra.mrb[10].mxu1 %vm6859_vm3, %v4148_v33  ;;  %v4181_v47 = vld [vmem:[%s6840_s0 + $0x140] sm:$0xff]  ;;  %v4182_v49 = vld [vmem:[%s6840_s0 + $0x148] sm:$0xff]  ;;  %v4183_v50 = vld [vmem:[%s6840_s0 + $0x150] sm:$0xff]  ;;  %vm6863_vm1 = vcmask 589312   ;;  %vm1301_vm2 = vcmask 320768   ;;  %s4950_s23 = smov 80  }
  0x1d   :  { %4498 = vmatprep.mubr.msk.f32.mxu0 %vm6859_vm3, %v57_v34  ;;  %4529 = vmatprep.mubr.msk.f32.mxu1 %vm6859_vm3, %v4149_v35  ;;  %v4157_v51 = vld [vmem:[%s6840_s0 + $0x130] sm:$0xff]  ;;  %v4184_v52 = vld [vmem:[%s6840_s0 + $0x158] sm:$0xff]  ;;  %v4185_v54 = vld [vmem:[%s6840_s0 + $0x160] sm:$0xff]  ;;  %s4951_s24 = smov 96   ;;  %s4952_s25 = smov 112  }
  0x1e   :  { %v4158_v53 = vld [vmem:[%s6840_s0 + $0x138] sm:$0x3]  ;;  %v4223_v55 = vld [vmem:[%s6840_s0 + $0x1e0] sm:$0xff]  ;;  %v4186_v56 = vld [vmem:[%s6840_s0 + $0x168] sm:$0xff] }
  0x1f   :  { %v4224_v57 = vld [vmem:[%s6840_s0 + $0x1e8] sm:$0xff]  ;;  %v4225_v58 = vld [vmem:[%s6840_s0 + $0x1f0] sm:$0xff]  ;;  %v4226_v60 = vld [vmem:[%s6840_s0 + $0x1f8] sm:$0xff] }
  0x20   :  { %4499 = vmatmul.mubr.msk.f32.gmra.mrb[12].mxu0 %vm6859_vm3, %v58_v36  ;;  %4530 = vmatmul.mubr.msk.f32.gmra.mrb[12].mxu1 %vm6859_vm3, %v4150_v37  ;;  %v4187_v59 = vld [vmem:[%s6840_s0 + $0x170] sm:$0xff]  ;;  %v4188_v61 = vld [vmem:[%s6840_s0 + $0x178] sm:$0xff]  ;;  %v4189_v62 = vld [vmem:[%s6840_s0 + $0x180] sm:$0xff] }
  0x21   :  { %4501 = vmatprep.mubr.msk.f32.mxu0 %vm6859_vm3, %v59_v38  ;;  %4532 = vmatprep.mubr.msk.f32.mxu1 %vm6859_vm3, %v4151_v39  ;;  %v4190_v63 = vld [vmem:[%s6840_s0 + $0x188] sm:$0xff]  ;;  %v4227_v0 = vld [vmem:[%s6840_s0 + $0x200] sm:$0xff]  ;;  %v4229_v2 = vld [vmem:[%s6840_s0 + $0x210] sm:$0xff] }
  0x22   :  { %v4228_v1 = vld [vmem:[%s6840_s0 + $0x208] sm:$0xff]  ;;  %v4230_v3 = vld [vmem:[%s6840_s0 + $0x218] sm:$0xff]  ;;  %v4191_v4 = vld [vmem:[%s6840_s0 + $0x190] sm:$0xff] }
  0x23   :  { %v4192_v5 = vld [vmem:[%s6840_s0 + $0x198] sm:$0xff]  ;;  %v4193_v6 = vld [vmem:[%s6840_s0 + $0x1a0] sm:$0xff]  ;;  %v4194_v7 = vld [vmem:[%s6840_s0 + $0x1a8] sm:$0xff] }
  0x24   :  { %4502 = vmatmul.mubr.msk.f32.gmra.mrb[14].mxu0 %vm6859_vm3, %v60_v40  ;;  %4533 = vmatmul.mubr.msk.f32.gmra.mrb[14].mxu1 %vm6859_vm3, %v4152_v41  ;;  %v4231_v8 = vld [vmem:[%s6840_s0 + $0x220] sm:$0xff]  ;;  %v4232_v9 = vld [vmem:[%s6840_s0 + $0x228] sm:$0xff]  ;;  %v4233_v10 = vld [vmem:[%s6840_s0 + $0x230] sm:$0xff] }
  0x25   :  { %4504 = vmatprep.mubr.msk.f32.mxu0 %vm6859_vm3, %v61_v42  ;;  %4535 = vmatprep.mubr.msk.f32.mxu1 %vm6859_vm3, %v4153_v43  ;;  %v4234_v11 = vld [vmem:[%s6840_s0 + $0x238] sm:$0xff]  ;;  %v4195_v12 = vld [vmem:[%s6840_s0 + $0x1b0] sm:$0xff]  ;;  %v4235_v14 = vld [vmem:[%s6840_s0 + $0x240] sm:$0xff] }
  0x26   :  { %v4196_v13 = vld [vmem:[%s6840_s0 + $0x1b8] sm:$0xff]  ;;  %v4236_v15 = vld [vmem:[%s6840_s0 + $0x248] sm:$0xff]  ;;  %v4237_v16 = vld [vmem:[%s6840_s0 + $0x250] sm:$0xff] }
  0x27   :  { %v4238_v17 = vld [vmem:[%s6840_s0 + $0x258] sm:$0xff]  ;;  %v4197_v18 = vld [vmem:[%s6840_s0 + $0x1c0] sm:$0xff]  ;;  %v4198_v19 = vld [vmem:[%s6840_s0 + $0x1c8] sm:$0xff] }
  0x28   :  { %4505 = vmatmul.mubr.msk.f32.gmra.mrb[16].mxu0 %vm6859_vm3, %v62_v44  ;;  %4536 = vmatmul.mubr.msk.f32.gmra.mrb[16].mxu1 %vm6859_vm3, %v4154_v45  ;;  %v4239_v20 = vld [vmem:[%s6840_s0 + $0x260] sm:$0xff]  ;;  %v4240_v21 = vld [vmem:[%s6840_s0 + $0x268] sm:$0xff] }
  0x29   :  { %4538 = vmatprep.mubr.msk.f32.mxu1 %vm6859_vm3, %v4155_v46  ;;  %4548 = vmatprep.mubr.msk.f32.mxu0 %vm6859_vm3, %v4181_v47  ;;  %v5372_v22 = vld [vmem:[%s6842_s2] ss:$0 sm:$0xff] }
  0x2c   :  { %4539 = vmatmul.mubr.msk.f32.gmra.mrb[18].mxu1 %vm6859_vm3, %v4156_v48  ;;  %4549 = vmatmul.mubr.msk.f32.vlgmr.msra.gmra.mrb[18].mxu0 %vm6859_vm3, %v4182_v49 }
  0x2d   :  { %4551 = vmatprep.mubr.msk.f32.mxu0 %vm6859_vm3, %v4183_v50  ;;  %4541 = vmatprep.mubr.msk.f32.mxu1 %vm6859_vm3, %v4157_v51 }
  0x30   :  { %4552 = vmatmul.mubr.msk.f32.gmra.mrb[20].mxu0 %vm6859_vm3, %v4184_v52  ;;  %4542 = vmatmul.mubr.msk.f32.gmra.mrb[20].mxu1 %vm6859_vm3, %v4158_v53 }
  0x31   :  { %4554 = vmatprep.mubr.msk.f32.mxu0 %vm6859_vm3, %v4185_v54  ;;  %4582 = vmatprep.mubr.msk.f32.mxu1 %vm6859_vm3, %v4223_v55 }
  0x34   :  { %4555 = vmatmul.mubr.msk.f32.gmra.mrb[22].mxu0 %vm6859_vm3, %v4186_v56  ;;  %4583 = vmatmul.mubr.msk.f32.vlgmr.msra.gmra.mrb[22].mxu1 %vm6859_vm3, %v4224_v57 }
  0x35   :  { %4585 = vmatprep.mubr.msk.f32.mxu1 %vm6859_vm3, %v4225_v58  ;;  %4557 = vmatprep.mubr.msk.f32.mxu0 %vm6859_vm3, %v4187_v59 }
  0x38   :  { %4586 = vmatmul.mubr.msk.f32.gmra.mrb[24].mxu1 %vm6859_vm3, %v4226_v60  ;;  %4558 = vmatmul.mubr.msk.f32.gmra.mrb[24].mxu0 %vm6859_vm3, %v4188_v61 }
  0x39   :  { %4560 = vmatprep.mubr.msk.f32.mxu0 %vm6859_vm3, %v4189_v62  ;;  %4588 = vmatprep.mubr.msk.f32.mxu1 %vm6859_vm3, %v4227_v0 }
  0x3c   :  { %4561 = vmatmul.mubr.msk.f32.gmra.mrb[26].mxu0 %vm6859_vm3, %v4190_v63  ;;  %4589 = vmatmul.mubr.msk.f32.gmra.mrb[26].mxu1 %vm6859_vm3, %v4228_v1 }
  0x3d   :  { %4591 = vmatprep.mubr.msk.f32.mxu1 %vm6859_vm3, %v4229_v2  ;;  %4563 = vmatprep.mubr.msk.f32.mxu0 %vm6859_vm3, %v4191_v4 }
  0x40   :  { %4592 = vmatmul.mubr.msk.f32.gmra.mrb[28].mxu1 %vm6859_vm3, %v4230_v3  ;;  %4564 = vmatmul.mubr.msk.f32.gmra.mrb[28].mxu0 %vm6859_vm3, %v4192_v5 }
  0x41   :  { %4566 = vmatprep.mubr.msk.f32.mxu0 %vm6859_vm3, %v4193_v6  ;;  %4594 = vmatprep.mubr.msk.f32.mxu1 %vm6859_vm3, %v4231_v8 }
  0x44   :  { %4567 = vmatmul.mubr.msk.f32.gmra.mrb[30].mxu0 %vm6859_vm3, %v4194_v7  ;;  %4595 = vmatmul.mubr.msk.f32.gmra.mrb[30].mxu1 %vm6859_vm3, %v4232_v9 }
  0x45   :  { %4597 = vmatprep.mubr.msk.f32.mxu1 %vm6859_vm3, %v4233_v10  ;;  %4569 = vmatprep.mubr.msk.f32.mxu0 %vm6859_vm3, %v4195_v12 }
  0x48   :  { %4598 = vmatmul.mubr.msk.f32.gmra.mrb[32].mxu1 %vm6859_vm3, %v4234_v11  ;;  %4570 = vmatmul.mubr.msk.f32.gmra.mrb[32].mxu0 %vm6859_vm3, %v4196_v13 }
  0x49   :  { %4600 = vmatprep.mubr.msk.f32.mxu1 %vm6859_vm3, %v4235_v14  ;;  %4572 = vmatprep.mubr.msk.f32.mxu0 %vm6859_vm3, %v4197_v18 }
  0x4c   :  { %4601 = vmatmul.mubr.msk.f32.gmra.mrb[34].mxu1 %vm6859_vm3, %v4236_v15  ;;  %4573 = vmatmul.mubr.msk.f32.gmra.mrb[34].mxu0 %vm6859_vm3, %v4198_v19 }
  0x4d   :  { %4603 = vmatprep.mubr.msk.f32.mxu1 %vm6859_vm3, %v4237_v16 }
  0x50   :  { %4604 = vmatmul.mubr.msk.f32.gmra.mrb[36].mxu1 %vm6859_vm3, %v4238_v17 }
  0x51   :  { %4606 = vmatprep.mubr.msk.f32.mxu1 %vm6859_vm3, %v4239_v20 }
  0x54   :  { %4607 = vmatmul.mubr.msk.f32.gmra.mrb[38].mxu1 %vm6859_vm3, %v4240_v21 }
  0xdb   :  { %v4482_v23 = vpop.f32.mrb[0].mxu0  ;;  %v4509_v24 = vpop.f32.mrb[0].mxu1 }
  0xdc   :  { %v211_v25 = vadd.f32 %v4482_v23, %v5372_v22  ;;  %v205_v26 = vpop.f32.mrb[1].mxu0  ;;  %v301_v27 = vadd.f32 %v4509_v24, %v5372_v22  ;;  %v295_v28 = vpop.f32.mrb[1].mxu1 }
  0xdd   :  { %v206_v29 = vadd.f32 %v5372_v22, %v205_v26  ;;  %v296_v30 = vadd.f32 %v5372_v22, %v295_v28 }
  0xde   :  { %v305_v31 = vmax.f32 %v211_v25, 0.0  ;;  %v323_v32 = vmax.f32 %v301_v27, 0.0 }
  0xdf   :  { %v304_v33 = vmax.f32 %v206_v29, 0.0  ;;  %v4485_v34 = vpop.f32.mrb[2].mxu0  ;;  %v322_v35 = vmax.f32 %v296_v30, 0.0  ;;  %v4516_v36 = vpop.f32.mrb[2].mxu1 }
  0xe0   :  { %326 = vst.msk [vmem:[#allocation2 + $0x8] sm:$0xff] %vm6860_vm4, %v305_v31  ;;  %v221_v37 = vadd.f32 %v4485_v34, %v5372_v22  ;;  %v215_v38 = vpop.f32.mrb[3].mxu0  ;;  %v511_v39 = vadd.f32 %v4516_v36, %v5372_v22  ;;  %v505_v40 = vpop.f32.mrb[3].mxu1 }
  0xe1   :  { %345 = vst.msk [vmem:[#allocation2 + $0x98] sm:$0x3] %vm6858_vm5, %v323_v32  ;;  %v216_v41 = vadd.f32 %v5372_v22, %v215_v38  ;;  %v506_v42 = vadd.f32 %v5372_v22, %v505_v40 }
  0xe2   :  { %325 = vst.msk [vmem:[#allocation2] sm:$0xff] %vm6860_vm4, %v304_v33  ;;  %343 = vst.msk [vmem:[#allocation2 + $0x90] sm:$0xff] %vm6860_vm4, %v322_v35  ;;  %v307_v43 = vmax.f32 %v221_v37, 0.0  ;;  %v605_v44 = vmax.f32 %v511_v39, 0.0 }
  0xe3   :  { %v306_v45 = vmax.f32 %v216_v41, 0.0  ;;  %v604_v46 = vmax.f32 %v506_v42, 0.0  ;;  %v4488_v47 = vpop.f32.mrb[4].mxu0  ;;  %v4519_v48 = vpop.f32.mrb[4].mxu1 }
  0xe4   :  { %328 = vst.msk [vmem:[#allocation2 + $0x18] sm:$0xff] %vm6860_vm4, %v307_v43  ;;  %626 = vst.msk [vmem:[#allocation2 + $0xa8] sm:$0xff] %vm6860_vm4, %v605_v44  ;;  %v231_v49 = vadd.f32 %v4488_v47, %v5372_v22  ;;  %v521_v50 = vadd.f32 %v4519_v48, %v5372_v22  ;;  %v225_v51 = vpop.f32.mrb[5].mxu0  ;;  %v515_v52 = vpop.f32.mrb[5].mxu1 }
  0xe5   :  { %327 = vst.msk [vmem:[#allocation2 + $0x10] sm:$0xff] %vm6860_vm4, %v306_v45  ;;  %625 = vst.msk [vmem:[#allocation2 + $0xa0] sm:$0xff] %vm6860_vm4, %v604_v46  ;;  %v226_v53 = vadd.f32 %v5372_v22, %v225_v51  ;;  %v516_v54 = vadd.f32 %v5372_v22, %v515_v52 }
  0xe6   :  { %v309_v55 = vmax.f32 %v231_v49, 0.0  ;;  %v607_v56 = vmax.f32 %v521_v50, 0.0 }
  0xe7   :  { %v308_v57 = vmax.f32 %v226_v53, 0.0  ;;  %v606_v58 = vmax.f32 %v516_v54, 0.0  ;;  %v1262_v59 = vld [vmem:[#allocation2 + $0x9] sm:$0x3]  ;;  %v4491_v60 = vpop.f32.mrb[6].mxu0  ;;  %v4522_v61 = vpop.f32.mrb[6].mxu1 }
  0xe8   :  { %330 = vst.msk [vmem:[#allocation2 + $0x28] sm:$0xff] %vm6860_vm4, %v309_v55  ;;  %628 = vst.msk [vmem:[#allocation2 + $0xb8] sm:$0xff] %vm6860_vm4, %v607_v56  ;;  %1267 = vrot.lane.b32.xlu1 %v1262_v59, %s4939_s29  ;;  %v241_v63 = vadd.f32 %v4491_v60, %v5372_v22  ;;  %v235_v0 = vpop.f32.mrb[7].mxu0  ;;  %v531_v1 = vadd.f32 %v4522_v61, %v5372_v22  ;;  %v525_v2 = vpop.f32.mrb[7].mxu1  ;;  %v1244_v3 = vld [vmem:[#allocation2 + $0x8] sm:$0x3] }
  0xe9   :  { %v1261_v62 = vld [vmem:[#allocation2 + $0x1] sm:$0xff]  ;;  %329 = vst.msk [vmem:[#allocation2 + $0x20] sm:$0xff] %vm6860_vm4, %v308_v57  ;;  %627 = vst.msk [vmem:[#allocation2 + $0xb0] sm:$0xff] %vm6860_vm4, %v606_v58  ;;  %v236_v4 = vadd.f32 %v5372_v22, %v235_v0  ;;  %v526_v5 = vadd.f32 %v5372_v22, %v525_v2 }
  0xea   :  { %1265 = vrot.lane.b32.xlu0 %v1261_v62, %s4939_s29  ;;  %1246 = vst.msk [vmem:[#allocation3 + $0x8] sm:$0x3] %vm6858_vm5, %v1244_v3  ;;  %v1243_v6 = vld [vmem:[#allocation2] sm:$0xff]  ;;  %v311_v7 = vmax.f32 %v241_v63, 0.0  ;;  %v609_v8 = vmax.f32 %v531_v1, 0.0 }
  0xeb   :  { %1245 = vst.msk [vmem:[#allocation3] sm:$0xff] %vm6860_vm4, %v1243_v6  ;;  %v1248_v9 = vld [vmem:[#allocation2 + $0xa8] sm:$0x3]  ;;  %v310_v10 = vmax.f32 %v236_v4, 0.0  ;;  %v4494_v11 = vpop.f32.mrb[8].mxu0  ;;  %v608_v15 = vmax.f32 %v526_v5, 0.0 }
  0xec   :  { %v5406_v12 = vld [vmem:[#allocation2 + $0xc] sm:$0xff]  ;;  %332 = vst.msk [vmem:[#allocation2 + $0x38] sm:$0xff] %vm6860_vm4, %v311_v7  ;;  %v251_v13 = vadd.f32 %v4494_v11, %v5372_v22  ;;  %v245_v14 = vpop.f32.mrb[9].mxu0  ;;  %630 = vst.msk [vmem:[#allocation2 + $0xc8] sm:$0xff] %vm6860_vm4, %v609_v8  ;;  %v4525_v18 = vpop.f32.mrb[8].mxu1  ;;  %v5418_v20 = vld [vmem:[#allocation2 + $0x16] sm:$0xff] }
  0xed   :  { %1379 = vrot.lane.b32.xlu1 %v5406_v12, %s4939_s29  ;;  %331 = vst.msk [vmem:[#allocation2 + $0x30] sm:$0xff] %vm6860_vm4, %v310_v10  ;;  %v246_v16 = vadd.f32 %v5372_v22, %v245_v14  ;;  %v5416_v17 = vld [vmem:[#allocation2 + $0xb] sm:$0xff]  ;;  %629 = vst.msk [vmem:[#allocation2 + $0xc0] sm:$0xff] %vm6860_vm4, %v608_v15  ;;  %v541_v21 = vadd.f32 %v4525_v18, %v5372_v22  ;;  %v535_v23 = vpop.f32.mrb[9].mxu1  ;;  %v1376_v27 = vld [vmem:[#allocation2 + $0x14] sm:$0x3] }
  0xee   :  { %1253 = vrot.lane.b32.xlu0 %v1248_v9, %s4940_s30  ;;  %v313_v19 = vmax.f32 %v251_v13, 0.0  ;;  %1361 = vst.msk [vmem:[#allocation3 + $0xa] sm:$0xff] %vm6860_vm4, %v5416_v17  ;;  %v536_v26 = vadd.f32 %v5372_v22, %v535_v23  ;;  %1461 = vst.msk [vmem:[#allocation3 + $0x14] sm:$0xff] %vm6860_vm4, %v5418_v20  ;;  %v1424_v28 = vld [vmem:[#allocation2 + $0x1e] sm:$0x3]  ;;  %v1247_v40 = vld [vmem:[#allocation2 + $0xa0] sm:$0xff] }
  0xef   :  { %v312_v24 = vmax.f32 %v246_v16, 0.0  ;;  %v4497_v25 = vpop.f32.mrb[10].mxu0  ;;  %v611_v32 = vmax.f32 %v541_v21, 0.0  ;;  %v4528_v38 = vpop.f32.mrb[10].mxu1  ;;  %v5440_v39 = vld [vmem:[#allocation2 + $0x17] sm:$0xff] }
  0xf0   :  { %334 = vst.msk [vmem:[#allocation2 + $0x48] sm:$0xff] %vm6860_vm4, %v313_v19  ;;  %v261_v29 = vadd.f32 %v4497_v25, %v5372_v22  ;;  %v255_v30 = vpop.f32.mrb[11].mxu0  ;;  %v610_v33 = vmax.f32 %v536_v26, 0.0  ;;  %v5433_v35 = vld [vmem:[#allocation2 + $0x21] sm:$0xff]  ;;  %v551_v44 = vadd.f32 %v4528_v38, %v5372_v22  ;;  %v545_v45 = vpop.f32.mrb[11].mxu1  ;;  %v5503_v38 = vld [vmem:[#allocation2 + $0xab] sm:$0xff] }
  0xf1   :  { %1381 = vrot.lane.b32.xlu1 %v1376_v27, %s4939_s29  ;;  %333 = vst.msk [vmem:[#allocation2 + $0x40] sm:$0xff] %vm6860_vm4, %v312_v24  ;;  %v256_v31 = vadd.f32 %v5372_v22, %v255_v30  ;;  %632 = vst.msk [vmem:[#allocation2 + $0xd8] sm:$0xff] %vm6860_vm4, %v611_v32  ;;  %v546_v47 = vadd.f32 %v5372_v22, %v545_v45  ;;  %v1464_v50 = vld [vmem:[#allocation2 + $0xbe] sm:$0x3]  ;;  %v1524_v4 = vld [vmem:[#allocation2 + $0x29] sm:$0x3] }
  0xf2   :  { %1429 = vrot.lane.b32.xlu0 %v1424_v28, %s4941_s14  ;;  %v315_v34 = vmax.f32 %v261_v29, 0.0  ;;  %631 = vst.msk [vmem:[#allocation2 + $0xd0] sm:$0xff] %vm6860_vm4, %v610_v33  ;;  %1561 = vst.msk [vmem:[#allocation3 + $0x1e] sm:$0xff] %vm6860_vm4, %v5433_v35  ;;  %v613_v51 = vmax.f32 %v551_v44, 0.0  ;;  %v1460_v15 = vld [vmem:[#allocation2 + $0x1e] sm:$0x3] }
  0xf3   :  { %v314_v36 = vmax.f32 %v256_v31, 0.0  ;;  %v4500_v37 = vpop.f32.mrb[12].mxu0  ;;  %v4531_v48 = vpop.f32.mrb[12].mxu1  ;;  %v612_v57 = vmax.f32 %v546_v47, 0.0  ;;  %1462 = vst.msk [vmem:[#allocation3 + $0x1c] sm:$0x3] %vm6858_vm5, %v1460_v15 }
  0xf4   :  { %336 = vst.msk [vmem:[#allocation2 + $0x58] sm:$0xff] %vm6860_vm4, %v315_v34  ;;  %v271_v41 = vadd.f32 %v4500_v37, %v5372_v22  ;;  %v265_v42 = vpop.f32.mrb[13].mxu0  ;;  %v5443_v43 = vld [vmem:[#allocation2 + $0x2c] sm:$0xff]  ;;  %v561_v52 = vadd.f32 %v4531_v48, %v5372_v22  ;;  %v555_v53 = vpop.f32.mrb[13].mxu1  ;;  %v5455_v54 = vld [vmem:[#allocation2 + $0x37] sm:$0xff]  ;;  %634 = vst.msk [vmem:[#allocation2 + $0xe8] sm:$0xff] %vm6860_vm4, %v613_v51 }
  0xf5   :  { %1479 = vrot.lane.b32.xlu1 %v5440_v39, %s4939_s29  ;;  %335 = vst.msk [vmem:[#allocation2 + $0x50] sm:$0xff] %vm6860_vm4, %v314_v36  ;;  %v266_v46 = vadd.f32 %v5372_v22, %v265_v42  ;;  %1661 = vst.msk [vmem:[#allocation3 + $0x28] sm:$0xff] %vm6860_vm4, %v5443_v43  ;;  %v556_v58 = vadd.f32 %v5372_v22, %v555_v53  ;;  %v1360_v21 = vld [vmem:[#allocation2 + $0x13] sm:$0x3]  ;;  %v1560_v51 = vld [vmem:[#allocation2 + $0x29] sm:$0x3] }
  0xf6   :  { %1251 = vrot.lane.b32.xlu0 %v1247_v40, %s4940_s30  ;;  %v317_v49 = vmax.f32 %v271_v41, 0.0  ;;  %1761 = vst.msk [vmem:[#allocation3 + $0x32] sm:$0xff] %vm6860_vm4, %v5455_v54  ;;  %v615_v62 = vmax.f32 %v561_v52, 0.0  ;;  %633 = vst.msk [vmem:[#allocation2 + $0xe0] sm:$0xff] %vm6860_vm4, %v612_v57  ;;  %v1318_v26 = vld [vmem:[#allocation2 + $0x13] sm:$0x3] }
  0xf7   :  { %v316_v55 = vmax.f32 %v266_v46, 0.0  ;;  %v4503_v56 = vpop.f32.mrb[14].mxu0  ;;  %v4534_v59 = vpop.f32.mrb[14].mxu1  ;;  %v614_v1 = vmax.f32 %v556_v58, 0.0  ;;  %1362 = vst.msk [vmem:[#allocation3 + $0x12] sm:$0x3] %vm6858_vm5, %v1360_v21 }
  0xf8   :  { %338 = vst.msk [vmem:[#allocation2 + $0x68] sm:$0xff] %vm6860_vm4, %v317_v49  ;;  %v281_v60 = vadd.f32 %v4503_v56, %v5372_v22  ;;  %v275_v61 = vpop.f32.mrb[15].mxu0  ;;  %v571_v63 = vadd.f32 %v4534_v59, %v5372_v22  ;;  %v565_v2 = vpop.f32.mrb[15].mxu1  ;;  %636 = vst.msk [vmem:[#allocation2 + $0xf8] sm:$0xff] %vm6860_vm4, %v615_v62  ;;  %v1346_v53 = vld [vmem:[#allocation2 + $0x14] sm:$0x3] }
  0xf9   :  { %337 = vst.msk [vmem:[#allocation2 + $0x60] sm:$0xff] %vm6860_vm4, %v316_v55  ;;  %1469 = vrot.lane.b32.xlu1 %v1464_v50, %s4940_s30  ;;  %v276_v0 = vadd.f32 %v5372_v22, %v275_v61  ;;  %v566_v6 = vadd.f32 %v5372_v22, %v565_v2  ;;  %635 = vst.msk [vmem:[#allocation2 + $0xf0] sm:$0xff] %vm6860_vm4, %v614_v1  ;;  %v1760_v57 = vld [vmem:[#allocation2 + $0x3f] sm:$0x3]  ;;  %v1660_v61 = vld [vmem:[#allocation2 + $0x34] sm:$0x3] }
  0xfa   :  { %1321 = vrot.lane.b32.xlu0 %v5416_v17, %s4941_s14  ;;  %v319_v3 = vmax.f32 %v281_v60, 0.0  ;;  %v617_v5 = vmax.f32 %v571_v63, 0.0  ;;  %1562 = vst.msk [vmem:[#allocation3 + $0x26] sm:$0x3] %vm6858_vm5, %v1560_v51  ;;  %1762 = vst.msk [vmem:[#allocation3 + $0x3a] sm:$0x3] %vm6858_vm5, %v1760_v57 }
  0xfb   :  { %v318_v7 = vmax.f32 %v276_v0, 0.0  ;;  %v4506_v8 = vpop.f32.mrb[16].mxu0  ;;  %v616_v10 = vmax.f32 %v566_v6, 0.0  ;;  %v4537_v11 = vpop.f32.mrb[16].mxu1  ;;  %v5484_v19 = vld [vmem:[#allocation2 + $0x58] sm:$0xff] }
  0xfc   :  { %340 = vst.msk [vmem:[#allocation2 + $0x78] sm:$0xff] %vm6860_vm4, %v319_v3  ;;  %v291_v9 = vadd.f32 %v4506_v8, %v5372_v22  ;;  %638 = vst.msk [vmem:[#allocation2 + $0x108] sm:$0xff] %vm6860_vm4, %v617_v5  ;;  %v581_v13 = vadd.f32 %v4537_v11, %v5372_v22  ;;  %v575_v14 = vpop.f32.mrb[17].mxu1  ;;  %v285_v18 = vpop.f32.mrb[17].mxu0  ;;  %v1859_v48 = vld [vmem:[#allocation2 + $0x4d] sm:$0xff]  ;;  %v1463_v1 = vld [vmem:[#allocation2 + $0xb6] sm:$0xff] }
  0xfd   :  { %339 = vst.msk [vmem:[#allocation2 + $0x70] sm:$0xff] %vm6860_vm4, %v318_v7  ;;  %1529 = vrot.lane.b32.xlu1 %v1524_v4, %s4941_s14  ;;  %637 = vst.msk [vmem:[#allocation2 + $0x100] sm:$0xff] %vm6860_vm4, %v616_v10  ;;  %v576_v17 = vadd.f32 %v5372_v22, %v575_v14  ;;  %v286_v24 = vadd.f32 %v5372_v22, %v285_v18  ;;  %v1860_v60 = vld [vmem:[#allocation2 + $0x55] sm:$0x3]  ;;  %v1436_v10 = vld [vmem:[#allocation2 + $0xbe] sm:$0x3] }
  0xfe   :  { %1349 = vrot.lane.b32.xlu0 %v5406_v12, %s4942_s15  ;;  %v321_v16 = vmax.f32 %v291_v9, 0.0  ;;  %v619_v23 = vmax.f32 %v581_v13, 0.0  ;;  %1961 = vst.msk [vmem:[#allocation3 + $0x46] sm:$0xff] %vm6860_vm4, %v5484_v19  ;;  %v1548_v12 = vld [vmem:[#allocation2 + $0x2a] sm:$0x3]  ;;  %1861 = vst.msk [vmem:[#allocation3 + $0x3c] sm:$0xff] %vm6860_vm4, %v1859_v48 }
  0xff   :  { %v4540_v25 = vpop.f32.mrb[18].mxu1  ;;  %v618_v27 = vmax.f32 %v576_v17, 0.0  ;;  %v320_v30 = vmax.f32 %v286_v24, 0.0  ;;  %v4550_v34 = vpop.f32.mrb[18].mxu0  ;;  %1862 = vst.msk [vmem:[#allocation3 + $0x44] sm:$0x3] %vm6858_vm5, %v1860_v60 }
 0x100   :  { %342 = vst.msk [vmem:[#allocation2 + $0x88] sm:$0xff] %vm6860_vm4, %v321_v16  ;;  %v591_v28 = vadd.f32 %v4540_v25, %v5372_v22  ;;  %v5494_v29 = vld [vmem:[#allocation2 + $0x63] sm:$0xff]  ;;  %640 = vst.msk [vmem:[#allocation2 + $0x118] sm:$0xff] %vm6860_vm4, %v619_v23  ;;  %v585_v31 = vpop.f32.mrb[19].mxu1  ;;  %v810_v36 = vadd.f32 %v4550_v34, %v5372_v22  ;;  %v804_v37 = vpop.f32.mrb[19].mxu0  ;;  %v1775_v23 = vld [vmem:[#allocation2 + $0x38] sm:$0xff] }
 0x101   :  { %1553 = vrot.lane.b32.xlu1 %v1548_v12, %s4942_s15  ;;  %639 = vst.msk [vmem:[#allocation2 + $0x110] sm:$0xff] %vm6860_vm4, %v618_v27  ;;  %v586_v33 = vadd.f32 %v5372_v22, %v585_v31  ;;  %2061 = vst.msk [vmem:[#allocation3 + $0x50] sm:$0xff] %vm6860_vm4, %v5494_v29  ;;  %v805_v41 = vadd.f32 %v5372_v22, %v804_v37  ;;  %v1960_v63 = vld [vmem:[#allocation2 + $0x60] sm:$0x3]  ;;  %v2060_v0 = vld [vmem:[#allocation2 + $0x6b] sm:$0x3] }
 0x102   :  { %1323 = vrot.lane.b32.xlu0 %v1318_v26, %s4941_s14  ;;  %v621_v32 = vmax.f32 %v591_v28, 0.0  ;;  %341 = vst.msk [vmem:[#allocation2 + $0x80] sm:$0xff] %vm6860_vm4, %v320_v30  ;;  %v904_v45 = vmax.f32 %v810_v36, 0.0  ;;  %v1476_v9 = vld [vmem:[#allocation2 + $0x1f] sm:$0x3]  ;;  %v1575_v14 = vld [vmem:[#allocation2 + $0x22] sm:$0xff] }
 0x103   :  { %v620_v40 = vmax.f32 %v586_v33, 0.0  ;;  %v4553_v42 = vpop.f32.mrb[20].mxu0  ;;  %v903_v49 = vmax.f32 %v805_v41, 0.0  ;;  %v4543_v56 = vpop.f32.mrb[20].mxu1  ;;  %1662 = vst.msk [vmem:[#allocation3 + $0x30] sm:$0x3] %vm6858_vm5, %v1660_v61 }
 0x104   :  { %642 = vst.msk [vmem:[#allocation2 + $0x128] sm:$0xff] %vm6860_vm4, %v621_v32  ;;  %v5507_v44 = vld [vmem:[#allocation2 + $0x6e] sm:$0xff]  ;;  %v820_v46 = vadd.f32 %v4553_v42, %v5372_v22  ;;  %v814_v47 = vpop.f32.mrb[21].mxu0  ;;  %925 = vst.msk [vmem:[#allocation2 + $0x148] sm:$0xff] %vm6860_vm4, %v904_v45  ;;  %v601_v58 = vadd.f32 %v4543_v56, %v5372_v22  ;;  %v595_v59 = vpop.f32.mrb[21].mxu1 }
 0x105   :  { %1335 = vrot.lane.b32.xlu1 %v5503_v38, %s4943_s16  ;;  %2161 = vst.msk [vmem:[#allocation3 + $0x5a] sm:$0xff] %vm6860_vm4, %v5507_v44  ;;  %641 = vst.msk [vmem:[#allocation2 + $0x120] sm:$0xff] %vm6860_vm4, %v620_v40  ;;  %v815_v50 = vadd.f32 %v5372_v22, %v814_v47  ;;  %v596_v62 = vadd.f32 %v5372_v22, %v595_v59  ;;  %v2160_v7 = vld [vmem:[#allocation2 + $0x76] sm:$0x3]  ;;  %v1576_v15 = vld [vmem:[#allocation2 + $0x2a] sm:$0x3] }
 0x106   :  { %1427 = vrot.lane.b32.xlu0 %v5418_v20, %s4941_s14  ;;  %v906_v52 = vmax.f32 %v820_v46, 0.0  ;;  %v1364_v20 = vld [vmem:[#allocation2 + $0xb3] sm:$0x3]  ;;  %924 = vst.msk [vmem:[#allocation2 + $0x140] sm:$0xff] %vm6860_vm4, %v903_v49  ;;  %v623_v2 = vmax.f32 %v601_v58, 0.0  ;;  %v1563_v40 = vld [vmem:[#allocation2 + $0xc1] sm:$0xff] }
 0x107   :  { %v905_v55 = vmax.f32 %v815_v50, 0.0  ;;  %1962 = vst.msk [vmem:[#allocation3 + $0x4e] sm:$0x3] %vm6858_vm5, %v1960_v63  ;;  %2062 = vst.msk [vmem:[#allocation3 + $0x58] sm:$0x3] %vm6858_vm5, %v2060_v0  ;;  %v622_v3 = vmax.f32 %v596_v62, 0.0 }
 0x108   :  { %927 = vst.msk [vmem:[#allocation2 + $0x158] sm:$0xff] %vm6860_vm4, %v906_v52  ;;  %v4556_v4 = vpop.f32.mrb[22].mxu0  ;;  %v1564_v16 = vld [vmem:[#allocation2 + $0xc9] sm:$0x3]  ;;  %v4584_v17 = vpop.f32.mrb[22].mxu1  ;;  %v1647_v48 = vld [vmem:[#allocation2 + $0x2d] sm:$0xff] }
 0x109   :  { %1369 = vrot.lane.b32.xlu1 %v1364_v20, %s4940_s30  ;;  %926 = vst.msk [vmem:[#allocation2 + $0x150] sm:$0xff] %vm6860_vm4, %v905_v55  ;;  %v5536_v5 = vld [vmem:[#allocation2 + $0x79] sm:$0xff]  ;;  %v830_v6 = vadd.f32 %v4556_v4, %v5372_v22  ;;  %643 = vst.msk [vmem:[#allocation2 + $0x130] sm:$0xff] %vm6860_vm4, %v622_v3  ;;  %v824_v8 = vpop.f32.mrb[23].mxu0  ;;  %v1109_v18 = vadd.f32 %v4584_v17, %v5372_v22  ;;  %v1103_v21 = vpop.f32.mrb[23].mxu1  ;;  %v5563_v37 = vld [vmem:[#allocation2 + $0x84] sm:$0xff] }
 0x10a   :  { %1351 = vrot.lane.b32.xlu0 %v1346_v53, %s4942_s15  ;;  %644 = vst.msk [vmem:[#allocation2 + $0x138] sm:$0x3] %vm6858_vm5, %v623_v2  ;;  %2162 = vst.msk [vmem:[#allocation3 + $0x62] sm:$0x3] %vm6858_vm5, %v2160_v7  ;;  %v825_v11 = vadd.f32 %v5372_v22, %v824_v8  ;;  %v1104_v25 = vadd.f32 %v5372_v22, %v1103_v21  ;;  %v1332_v28 = vld [vmem:[#allocation2 + $0xb3] sm:$0x3] }
 0x10b   :  { %2261 = vst.msk [vmem:[#allocation3 + $0x64] sm:$0xff] %vm6860_vm4, %v5536_v5  ;;  %v1203_v24 = vmax.f32 %v1109_v18, 0.0  ;;  %v4587_v12 = vpop.f32.mrb[24].mxu1  ;;  %v4559_v33 = vpop.f32.mrb[24].mxu0  ;;  %2361 = vst.msk [vmem:[#allocation3 + $0x6e] sm:$0xff] %vm6860_vm4, %v5563_v37  ;;  %v1875_v7 = vld [vmem:[#allocation2 + $0x4e] sm:$0xff] }
 0x10c   :  { %v907_v13 = vmax.f32 %v825_v11, 0.0  ;;  %v1119_v26 = vadd.f32 %v4587_v12, %v5372_v22  ;;  %v1113_v27 = vpop.f32.mrb[25].mxu1  ;;  %v1202_v30 = vmax.f32 %v1104_v25, 0.0  ;;  %v840_v36 = vadd.f32 %v4559_v33, %v5372_v22  ;;  %v2260_v46 = vld [vmem:[#allocation2 + $0x81] sm:$0x3]  ;;  %v5619_v18 = vld [vmem:[#allocation2 + $0xf8] sm:$0xff] }
 0x10d   :  { %1467 = vrot.lane.b32.xlu1 %v1463_v1, %s4940_s30  ;;  %1224 = vst.msk [vmem:[#allocation2 + $0x1e8] sm:$0xff] %vm6860_vm4, %v1203_v24  ;;  %v1114_v31 = vadd.f32 %v5372_v22, %v1113_v27  ;;  %v2360_v47 = vld [vmem:[#allocation2 + $0x8c] sm:$0x3]  ;;  %v1448_v49 = vld [vmem:[#allocation2 + $0x1f] sm:$0x3] }
 0x10e   :  { %1451 = vrot.lane.b32.xlu0 %v5440_v39, %s4942_s15  ;;  %v908_v39 = vmax.f32 %v830_v6, 0.0  ;;  %928 = vst.msk [vmem:[#allocation2 + $0x160] sm:$0xff] %vm6860_vm4, %v907_v13  ;;  %v1205_v32 = vmax.f32 %v1119_v26, 0.0  ;;  %1223 = vst.msk [vmem:[#allocation2 + $0x1e0] sm:$0xff] %vm6860_vm4, %v1202_v30  ;;  %v910_v41 = vmax.f32 %v840_v36, 0.0 }
 0x10f   :  { %v1204_v34 = vmax.f32 %v1114_v31, 0.0  ;;  %2262 = vst.msk [vmem:[#allocation3 + $0x6c] sm:$0x3] %vm6858_vm5, %v2260_v46  ;;  %2362 = vst.msk [vmem:[#allocation3 + $0x76] sm:$0x3] %vm6858_vm5, %v2360_v47  ;;  %v4590_v62 = vpop.f32.mrb[26].mxu1 }
 0x110   :  { %929 = vst.msk [vmem:[#allocation2 + $0x168] sm:$0xff] %vm6860_vm4, %v908_v39  ;;  %1226 = vst.msk [vmem:[#allocation2 + $0x1f8] sm:$0xff] %vm6860_vm4, %v1205_v32  ;;  %v1676_v50 = vld [vmem:[#allocation2 + $0x35] sm:$0x3]  ;;  %v1536_v51 = vld [vmem:[#allocation2 + $0xc9] sm:$0x3]  ;;  %v1129_v63 = vadd.f32 %v4590_v62, %v5372_v22 }
 0x111   :  { %1481 = vrot.lane.b32.xlu1 %v1476_v9, %s4939_s29  ;;  %1225 = vst.msk [vmem:[#allocation2 + $0x1f0] sm:$0xff] %vm6860_vm4, %v1204_v34  ;;  %931 = vst.msk [vmem:[#allocation2 + $0x178] sm:$0xff] %vm6860_vm4, %v910_v41  ;;  %v1776_v52 = vld [vmem:[#allocation2 + $0x40] sm:$0x3]  ;;  %v1624_v56 = vld [vmem:[#allocation2 + $0x34] sm:$0x3] }
 0x112   :  { %1441 = vrot.lane.b32.xlu0 %v1436_v10, %s4943_s16  ;;  %v1764_v60 = vld [vmem:[#allocation2 + $0xdf] sm:$0x3]  ;;  %v1648_v61 = vld [vmem:[#allocation2 + $0x35] sm:$0x3]  ;;  %v1123_v0 = vpop.f32.mrb[27].mxu1  ;;  %v1207_v3 = vmax.f32 %v1129_v63, 0.0 }
 0x113   :  { %v4593_v2 = vpop.f32.mrb[28].mxu1  ;;  %v1848_v24 = vld [vmem:[#allocation2 + $0x4b] sm:$0x3]  ;;  %v1636_v41 = vld [vmem:[#allocation2 + $0xd4] sm:$0x3]  ;;  %vm6864_vm5 = vcmask 386368  }
 0x114   :  { %v1139_v4 = vadd.f32 %v4593_v2, %v5372_v22  ;;  %v1133_v6 = vpop.f32.mrb[29].mxu1  ;;  %1228 = vst.msk [vmem:[#allocation2 + $0x208] sm:$0xff] %vm6860_vm4, %v1207_v3  ;;  %v2076_v26 = vld [vmem:[#allocation2 + $0x6c] sm:$0x3] }
 0x115   :  { %1579 = vrot.lane.b32.xlu1 %v1575_v14, %s4939_s29  ;;  %v1134_v9 = vadd.f32 %v5372_v22, %v1133_v6 }
 0x116   :  { %1581 = vrot.lane.b32.xlu0 %v1576_v15, %s4939_s29  ;;  %v1209_v10 = vmax.f32 %v1139_v4, 0.0  ;;  %v1876_v15 = vld [vmem:[#allocation2 + $0x56] sm:$0x3] }
 0x117   :  { %v1208_v39 = vmax.f32 %v1134_v9, 0.0  ;;  %v4596_v30 = vpop.f32.mrb[30].mxu1  ;;  %v1847_v9 = vld [vmem:[#allocation2 + $0x43] sm:$0xff] }
 0x118   :  { %1230 = vst.msk [vmem:[#allocation2 + $0x218] sm:$0xff] %vm6860_vm4, %v1209_v10  ;;  %v1149_v32 = vadd.f32 %v4596_v30, %v5372_v22  ;;  %v1143_v33 = vpop.f32.mrb[31].mxu1 }
 0x119   :  { %1569 = vrot.lane.b32.xlu1 %v1564_v16, %s4940_s30  ;;  %v1824_v16 = vld [vmem:[#allocation2 + $0x4a] sm:$0x3]  ;;  %1229 = vst.msk [vmem:[#allocation2 + $0x210] sm:$0xff] %vm6860_vm4, %v1208_v39  ;;  %v1144_v34 = vadd.f32 %v5372_v22, %v1143_v33 }
 0x11a   :  { %1367 = vrot.lane.b32.xlu0 %v5503_v38, %s4940_s30  ;;  %v834_v38 = vpop.f32.mrb[25].mxu0  ;;  %v1211_v36 = vmax.f32 %v1149_v32, 0.0  ;;  %v2176_v32 = vld [vmem:[#allocation2 + $0x77] sm:$0x3] }
 0x11b   :  { %v835_v42 = vadd.f32 %v5372_v22, %v834_v38  ;;  %v4562_v20 = vpop.f32.mrb[26].mxu0  ;;  %v1210_v38 = vmax.f32 %v1144_v34, 0.0 }
 0x11c   :  { %v850_v53 = vadd.f32 %v4562_v20, %v5372_v22  ;;  %v844_v55 = vpop.f32.mrb[27].mxu0  ;;  %1232 = vst.msk [vmem:[#allocation2 + $0x228] sm:$0xff] %vm6860_vm4, %v1211_v36 }
 0x11d   :  { %1779 = vrot.lane.b32.xlu1 %v1775_v23, %s4939_s29  ;;  %v909_v45 = vmax.f32 %v835_v42, 0.0  ;;  %v845_v57 = vadd.f32 %v5372_v22, %v844_v55  ;;  %v4565_v11 = vpop.f32.mrb[28].mxu0  ;;  %1231 = vst.msk [vmem:[#allocation2 + $0x220] sm:$0xff] %vm6860_vm4, %v1210_v38  ;;  %v1864_v42 = vld [vmem:[#allocation2 + $0xf5] sm:$0x3]  ;;  %v1823_v55 = vld [vmem:[#allocation2 + $0x42] sm:$0xff] }
 0x11e   :  { %1337 = vrot.lane.b32.xlu0 %v1332_v28, %s4943_s16  ;;  %v912_v58 = vmax.f32 %v850_v53, 0.0  ;;  %v860_v13 = vadd.f32 %v4565_v11, %v5372_v22  ;;  %v1964_v11 = vld [vmem:[#allocation2 + $0x100] sm:$0x3] }
 0x11f   :  { %930 = vst.msk [vmem:[#allocation2 + $0x170] sm:$0xff] %vm6860_vm4, %v909_v45  ;;  %v911_v59 = vmax.f32 %v845_v57, 0.0  ;;  %v1664_v45 = vld [vmem:[#allocation2 + $0xd4] sm:$0x3] }
 0x120   :  { %933 = vst.msk [vmem:[#allocation2 + $0x188] sm:$0xff] %vm6860_vm4, %v912_v58 }
 0x121   :  { %1567 = vrot.lane.b32.xlu1 %v1563_v40, %s4940_s30  ;;  %932 = vst.msk [vmem:[#allocation2 + $0x180] sm:$0xff] %vm6860_vm4, %v911_v59 }
 0x122   :  { %1439 = vrot.lane.b32.xlu0 %v1463_v1, %s4943_s16  ;;  %v1124_v1 = vadd.f32 %v5372_v22, %v1123_v0  ;;  %v1948_v0 = vld [vmem:[#allocation2 + $0x61] sm:$0x3] }
 0x124   :  { %v1206_v8 = vmax.f32 %v1124_v1, 0.0  ;;  %v1748_v1 = vld [vmem:[#allocation2 + $0x40] sm:$0x3] }
 0x125   :  { %1627 = vrot.lane.b32.xlu1 %v5443_v43, %s4941_s14  ;;  %v5586_v43 = vld [vmem:[#allocation2 + $0xcc] sm:$0xff] }
 0x126   :  { %1527 = vrot.lane.b32.xlu0 %v5433_v35, %s4941_s14  ;;  %v5591_v35 = vld [vmem:[#allocation2 + $0xd7] sm:$0xff]  ;;  %1227 = vst.msk [vmem:[#allocation2 + $0x200] sm:$0xff] %vm6860_vm4, %v1206_v8  ;;  %v2047_v8 = vld [vmem:[#allocation2 + $0x64] sm:$0xff] }
 0x129   :  { %1651 = vrot.lane.b32.xlu1 %v1647_v48, %s4942_s15 }
 0x12a   :  { %1453 = vrot.lane.b32.xlu0 %v1448_v49, %s4942_s15 }
 0x12d   :  { %1679 = vrot.lane.b32.xlu1 %v1647_v48, %s4939_s29  ;;  %v5641_v48 = vld [vmem:[#allocation2 + $0x59] sm:$0xff] }
 0x12e   :  { %1551 = vrot.lane.b32.xlu0 %v1575_v14, %s4942_s15  ;;  %v854_v14 = vpop.f32.mrb[29].mxu0 }
 0x12f   :  { %v855_v17 = vadd.f32 %v5372_v22, %v854_v14 }
 0x131   :  { %1681 = vrot.lane.b32.xlu1 %v1676_v50, %s4939_s29  ;;  %v913_v21 = vmax.f32 %v855_v17, 0.0 }
 0x132   :  { %1541 = vrot.lane.b32.xlu0 %v1536_v51, %s4943_s16  ;;  %v1924_v51 = vld [vmem:[#allocation2 + $0x60] sm:$0x3] }
 0x133   :  { %934 = vst.msk [vmem:[#allocation2 + $0x190] sm:$0xff] %vm6860_vm4, %v913_v21  ;;  %v1736_v21 = vld [vmem:[#allocation2 + $0xdf] sm:$0x3] }
 0x135   :  { %1667 = vrot.lane.b32.xlu1 %v5586_v43, %s4940_s30 }
 0x136   :  { %1751 = vrot.lane.b32.xlu0 %v1775_v23, %s4942_s15  ;;  %v4568_v23 = vpop.f32.mrb[30].mxu0 }
 0x137   :  { %v870_v25 = vadd.f32 %v4568_v23, %v5372_v22  ;;  %v864_v12 = vpop.f32.mrb[31].mxu0 }
 0x138   :  { %v865_v28 = vadd.f32 %v5372_v22, %v864_v12  ;;  %v4571_v59 = vpop.f32.mrb[32].mxu0 }
 0x139   :  { %1739 = vrot.lane.b32.xlu1 %v5591_v35, %s4943_s16  ;;  %v916_v27 = vmax.f32 %v870_v25, 0.0  ;;  %v880_v63 = vadd.f32 %v4571_v59, %v5372_v22  ;;  %v1835_v25 = vld [vmem:[#allocation2 + $0xe2] sm:$0xff]  ;;  %v2048_v59 = vld [vmem:[#allocation2 + $0x6c] sm:$0x3] }
 0x13a   :  { %1539 = vrot.lane.b32.xlu0 %v1563_v40, %s4943_s16  ;;  %v915_v31 = vmax.f32 %v865_v28, 0.0  ;;  %v1863_v40 = vld [vmem:[#allocation2 + $0xed] sm:$0xff] }
 0x13b   :  { %937 = vst.msk [vmem:[#allocation2 + $0x1a8] sm:$0xff] %vm6860_vm4, %v916_v27  ;;  %v918_v2 = vmax.f32 %v880_v63, 0.0 }
 0x13c   :  { %936 = vst.msk [vmem:[#allocation2 + $0x1a0] sm:$0xff] %vm6860_vm4, %v915_v31 }
 0x13d   :  { %1781 = vrot.lane.b32.xlu1 %v1776_v52, %s4939_s29  ;;  %v4599_v52 = vpop.f32.mrb[32].mxu1  ;;  %939 = vst.msk [vmem:[#allocation2 + $0x1b8] sm:$0xff] %vm6860_vm4, %v918_v2 }
 0x13e   :  { %1629 = vrot.lane.b32.xlu0 %v1624_v56, %s4941_s14  ;;  %v1153_v56 = vpop.f32.mrb[33].mxu1 }
 0x13f   :  { %v1154_v58 = vadd.f32 %v5372_v22, %v1153_v56  ;;  %v4602_v12 = vpop.f32.mrb[34].mxu1 }
 0x140   :  { %v1163_v27 = vpop.f32.mrb[35].mxu1 }
 0x141   :  { %1769 = vrot.lane.b32.xlu1 %v1764_v60, %s4940_s30  ;;  %v1212_v62 = vmax.f32 %v1154_v58, 0.0  ;;  %v1164_v31 = vadd.f32 %v5372_v22, %v1163_v27  ;;  %v4605_v34 = vpop.f32.mrb[36].mxu1  ;;  %v2164_v58 = vld [vmem:[#allocation2 + $0x116] sm:$0x3] }
 0x142   :  { %1653 = vrot.lane.b32.xlu0 %v1648_v61, %s4942_s15  ;;  %v1179_v38 = vadd.f32 %v4605_v34, %v5372_v22  ;;  %v6854_v34 = vmov 0.0|0.0  }
 0x143   :  { %1233 = vst.msk [vmem:[#allocation2 + $0x230] sm:$0xff] %vm6860_vm4, %v1212_v62  ;;  %v1214_v36 = vmax.f32 %v1164_v31, 0.0  ;;  %v1936_v31 = vld [vmem:[#allocation2 + $0x100] sm:$0x3]  ;;  %4791 = vmatprep.subr.bf16.mxu0 %v6854_v34 }
 0x145   :  { %1879 = vrot.lane.b32.xlu1 %v1875_v7, %s4939_s29  ;;  %1235 = vst.msk [vmem:[#allocation2 + $0x240] sm:$0xff] %vm6860_vm4, %v1214_v36 }
 0x146   :  { %1727 = vrot.lane.b32.xlu0 %v5455_v54, %s4941_s14  ;;  %v914_v54 = vmax.f32 %v860_v13, 0.0 }
 0x148   :  { %935 = vst.msk [vmem:[#allocation2 + $0x198] sm:$0xff] %vm6860_vm4, %v914_v54  ;;  %v5692_v54 = vld [vmem:[#allocation2 + $0x103] sm:$0xff] }
 0x149   :  { %1881 = vrot.lane.b32.xlu1 %v1876_v15, %s4939_s29  ;;  %v1836_v15 = vld [vmem:[#allocation2 + $0xea] sm:$0x3] }
 0x14a   :  { %1829 = vrot.lane.b32.xlu0 %v1824_v16, %s4941_s14 }
 0x14d   :  { %1967 = vrot.lane.b32.xlu1 %v5619_v18, %s4940_s30 }
 0x14e   :  { %1853 = vrot.lane.b32.xlu0 %v1848_v24, %s4942_s15  ;;  %v5700_v24 = vld [vmem:[#allocation2 + $0x6f] sm:$0xff] }
 0x151   :  { %2081 = vrot.lane.b32.xlu1 %v2076_v26, %s4939_s29  ;;  %v1169_v26 = vadd.f32 %v4602_v12, %v5372_v22  ;;  %v2064_v12 = vld [vmem:[#allocation2 + $0x10b] sm:$0x3] }
 0x152   :  { %1639 = vrot.lane.b32.xlu0 %v5586_v43, %s4943_s16  ;;  %v1724_v43 = vld [vmem:[#allocation2 + $0x3f] sm:$0x3] }
 0x153   :  { %v1215_v33 = vmax.f32 %v1169_v26, 0.0  ;;  %v1488_v26 = vld [vmem:[#allocation2 + $0x15e] sm:$0x3] }
 0x155   :  { %1867 = vrot.lane.b32.xlu1 %v1863_v40, %s4940_s30  ;;  %v1173_v40 = vpop.f32.mrb[37].mxu1  ;;  %1236 = vst.msk [vmem:[#allocation2 + $0x248] sm:$0xff] %vm6860_vm4, %v1215_v33  ;;  %v2475_v33 = vld [vmem:[%s6843_s3 + $0x8] sm:$0xff] }
 0x156   :  { %1641 = vrot.lane.b32.xlu0 %v1636_v41, %s4943_s16 }
 0x159   :  { %1869 = vrot.lane.b32.xlu1 %v1864_v42, %s4940_s30  ;;  %v1174_v42 = vadd.f32 %v5372_v22, %v1173_v40 }
 0x15a   :  { %1669 = vrot.lane.b32.xlu0 %v1664_v45, %s4940_s30  ;;  %v1268_v46 = vpop.permute.xlu1 %1267 }
 0x15c   :  { %v1266_v47 = vpop.permute.xlu0 %1265 }
 0x15d   :  { %1979 = vrot.lane.b32.xlu1 %v5641_v48, %s4939_s29 }
 0x15e   :  { %1767 = vrot.lane.b32.xlu0 %v5591_v35, %s4940_s30  ;;  %v1159_v35 = vadd.f32 %v4599_v52, %v5372_v22  ;;  %v5726_v52 = vld [vmem:[#allocation2 + $0x10e] sm:$0xff] }
 0x15f   :  { %v5647_v49 = vpop.permute.xlu1 %1379 }
 0x160   :  { %v1254_v50 = vpop.permute.xlu0 %1253  ;;  %v1213_v57 = vmax.f32 %v1159_v35, 0.0  ;;  %v1216_v35 = vmax.f32 %v1174_v42, 0.0  ;;  %v2476_v42 = vld [vmem:[%s6843_s3 + $0x10] sm:$0xff] }
 0x161   :  { %1260 = vst.msk [vmem:[#allocation3 + $0x8] sm:$0x3] %vm1259_vm6, %v1254_v50  ;;  %1929 = vrot.lane.b32.xlu1 %v1924_v51, %s4941_s14  ;;  %v4912_v51 = vld [vmem:[%s6842_s2] ss:$0 sm:$0xff]  ;;  %s4944_s2 = smov 24  }
 0x162   :  { %1729 = vrot.lane.b32.xlu0 %v1724_v43, %s4941_s14  ;;  %1274 = vst.msk [vmem:[#allocation3 + $0x8] sm:$0x3] %vm6862_vm7, %v1268_v46 }
 0x163   :  { %v1382_v20 = vpop.permute.xlu1 %1381  ;;  %1234 = vst.msk [vmem:[#allocation2 + $0x238] sm:$0xff] %vm6860_vm4, %v1213_v57  ;;  %1237 = vst.msk [vmem:[#allocation2 + $0x250] sm:$0xff] %vm6860_vm4, %v1216_v35  ;;  %v2478_v35 = vld [vmem:[%s6843_s3 + $0x20] sm:$0xff] }
 0x164   :  { %v5653_v53 = vpop.permute.xlu0 %1429 }
 0x165   :  { %2027 = vrot.lane.b32.xlu1 %v5494_v29, %s4941_s14  ;;  %v874_v29 = vpop.f32.mrb[33].mxu0 }
 0x166   :  { %1827 = vrot.lane.b32.xlu0 %v1823_v55, %s4941_s14  ;;  %v875_v3 = vadd.f32 %v5372_v22, %v874_v29  ;;  %v4574_v41 = vpop.f32.mrb[34].mxu0 }
 0x167   :  { %v1480_v60 = vpop.permute.xlu1 %1479  ;;  %v890_v45 = vadd.f32 %v4574_v41, %v5372_v22  ;;  %v884_v46 = vpop.f32.mrb[35].mxu0  ;;  %v1388_v41 = vld [vmem:[#allocation2 + $0x153] sm:$0x3] }
 0x168   :  { %v1252_v61 = vpop.permute.xlu0 %1251  ;;  %v917_v7 = vmax.f32 %v875_v3, 0.0  ;;  %v885_v43 = vadd.f32 %v4912_v51, %v884_v46  ;;  %v1275_v3 = vld [vmem:[#allocation2 + $0x140] sm:$0xff] }
 0x169   :  { %1258 = vst.msk [vmem:[#allocation3] sm:$0xff] %vm1257_vm8, %v1252_v61  ;;  %1953 = vrot.lane.b32.xlu1 %v1948_v0, %s4942_s15  ;;  %v920_v55 = vmax.f32 %v890_v45, 0.0  ;;  %v5739_v0 = vld [vmem:[#allocation2 + $0x7a] sm:$0xff] }
 0x16a   :  { %1753 = vrot.lane.b32.xlu0 %v1748_v1, %s4942_s15  ;;  %1272 = vst.msk [vmem:[#allocation3] sm:$0xff] %vm6861_vm9, %v1266_v47  ;;  %v919_v22 = vmax.f32 %v885_v43, 0.0  ;;  %v2477_v45 = vld [vmem:[%s6843_s3 + $0x18] sm:$0xff] }
 0x16b   :  { %v1470_v4 = vpop.permute.xlu1 %1469  ;;  %938 = vst.msk [vmem:[#allocation2 + $0x1b0] sm:$0xff] %vm6860_vm4, %v917_v7  ;;  %941 = vst.msk [vmem:[#allocation2 + $0x1c8] sm:$0xff] %vm6860_vm4, %v920_v55  ;;  %v4795_v46 = vpack.c.bf16 %v2477_v45, %v2476_v42  ;;  %v2479_v55 = vld [vmem:[%s6843_s3 + $0x28] sm:$0xff] }
 0x16c   :  { %v5668_v6 = vpop.permute.xlu0 %1321  ;;  %1474 = vst.msk [vmem:[#allocation3 + $0x1c] sm:$0x3] %vm1259_vm6, %v1470_v4 }
 0x16d   :  { %2051 = vrot.lane.b32.xlu1 %v2047_v8, %s4942_s15  ;;  %940 = vst.msk [vmem:[#allocation2 + $0x1c0] sm:$0xff] %vm6860_vm4, %v919_v22  ;;  %v4199_v22 = vld [vmem:[%s6840_s0 + $0x1d0] sm:$0xff] }
 0x16e   :  { %1851 = vrot.lane.b32.xlu0 %v1847_v9, %s4942_s15  ;;  %v1976_v9 = vld [vmem:[#allocation2 + $0x61] sm:$0x3]  ;;  %4575 = vmatprep.mubr.msk.f32.mxu0 %vm6859_vm3, %v4199_v22 }
 0x16f   :  { %v5675_v10 = vpop.permute.xlu1 %1529 }
 0x170   :  { %v5677_v39 = vpop.permute.xlu0 %1349 }
 0x171   :  { %2079 = vrot.lane.b32.xlu1 %v2047_v8, %s4939_s29 }
 0x172   :  { %1927 = vrot.lane.b32.xlu0 %v5484_v19, %s4941_s14 }
 0x173   :  { %v5682_v13 = vpop.permute.xlu1 %1553 }
 0x174   :  { %v5684_v14 = vpop.permute.xlu0 %1323 }
 0x175   :  { %1969 = vrot.lane.b32.xlu1 %v1964_v11, %s4940_s30  ;;  %v1303_v11 = vld [vmem:[#allocation2 + $0x141] sm:$0xff] }
 0x176   :  { %1841 = vrot.lane.b32.xlu0 %v1836_v15, %s4943_s16  ;;  %v2036_v15 = vld [vmem:[#allocation2 + $0x10b] sm:$0x3] }
 0x177   :  { %v5688_v16 = vpop.permute.xlu1 %1335 }
 0x178   :  { %v5690_v17 = vpop.permute.xlu0 %1427 }
 0x179   :  { %2067 = vrot.lane.b32.xlu1 %v5692_v54, %s4940_s30 }
 0x17a   :  { %1741 = vrot.lane.b32.xlu0 %v1736_v21, %s4943_s16 }
 0x17b   :  { %v1370_v19 = vpop.permute.xlu1 %1369 }
 0x17c   :  { %v5697_v23 = vpop.permute.xlu0 %1351  ;;  %1374 = vst.msk [vmem:[#allocation3 + $0x12] sm:$0x3] %vm1259_vm6, %v1370_v19 }
 0x17d   :  { %2179 = vrot.lane.b32.xlu1 %v5700_v24, %s4939_s29  ;;  %1386 = vst.msk [vmem:[#allocation3 + $0x12] sm:$0x3] %vm6862_vm7, %v1382_v20  ;;  %v2024_v20 = vld [vmem:[#allocation2 + $0x6b] sm:$0x3] }
 0x17e   :  { %1839 = vrot.lane.b32.xlu0 %v1835_v25, %s4943_s16  ;;  %v5766_v25 = vld [vmem:[#allocation2 + $0x119] sm:$0xff] }
 0x17f   :  { %v1468_v28 = vpop.permute.xlu1 %1467 }
 0x180   :  { %v5707_v30 = vpop.permute.xlu0 %1451  ;;  %1473 = vst.msk [vmem:[#allocation3 + $0x14] sm:$0xff] %vm1257_vm8, %v1468_v28 }
 0x181   :  { %2181 = vrot.lane.b32.xlu1 %v2176_v32, %s4939_s29  ;;  %1485 = vst.msk [vmem:[#allocation3 + $0x14] sm:$0xff] %vm6861_vm9, %v1480_v60  ;;  %v4608_v60 = vpop.f32.mrb[38].mxu1  ;;  %v2474_v32 = vld [vmem:[%s6843_s3] sm:$0xff] }
 0x182   :  { %1939 = vrot.lane.b32.xlu0 %v5619_v18, %s4943_s16  ;;  %v1217_v18 = vmax.f32 %v1179_v38, 0.0  ;;  %v1189_v63 = vadd.f32 %v4912_v51, %v4608_v60  ;;  %v1183_v1 = vpop.f32.mrb[39].mxu1  ;;  %v4792_v36 = vpack.c.bf16 %v2475_v33, %v2474_v32  ;;  %v1399_v32 = vld [vmem:[#allocation2 + $0x1eb] sm:$0xff]  ;;  %v1304_v33 = vld [vmem:[#allocation2 + $0x149] sm:$0x3] }
 0x183   :  { %v1482_v47 = vpop.permute.xlu1 %1481  ;;  %v1184_v2 = vadd.f32 %v4912_v51, %v1183_v1  ;;  %v1487_v51 = vld [vmem:[#allocation2 + $0x156] sm:$0xff] }
 0x184   :  { %v5719_v50 = vpop.permute.xlu0 %1441  ;;  %1486 = vst.msk [vmem:[#allocation3 + $0x1c] sm:$0x3] %vm6862_vm7, %v1482_v47  ;;  %v1219_v29 = vmax.f32 %v1189_v63, 0.0  ;;  %4793 = vmatpush3.bf16.msra.mxu0 %v4792_v36 }
 0x185   :  { %2139 = vrot.lane.b32.xlu1 %v5726_v52, %s4943_s16  ;;  %1238 = vst.msk [vmem:[#allocation2 + $0x258] sm:$0xff] %vm6860_vm4, %v1217_v18  ;;  %v1218_v8 = vmax.f32 %v1184_v2, 0.0  ;;  %4794 = vmatprep.subr.bf16.mxu0 %v6854_v34  ;;  %v1289_v2 = vld [vmem:[#allocation2 + $0x1e0] sm:$0xff] }
 0x186   :  { %2029 = vrot.lane.b32.xlu0 %v2024_v20, %s4941_s14  ;;  %1240 = vst.msk [vmem:[#allocation2 + $0x268] sm:$0xff] %vm6860_vm4, %v1219_v29  ;;  %v6856_v29 = vmov 0.0  }
 0x187   :  { %v1580_v56 = vpop.permute.xlu1 %1579  ;;  %1239 = vst.msk [vmem:[#allocation2 + $0x260] sm:$0xff] %vm6860_vm4, %v1218_v8  ;;  %vm1329_vm4 = vcmask 451968  }
 0x188   :  { %v1582_v57 = vpop.permute.xlu0 %1581  ;;  %4796 = vmatpush3.bf16.msra.mxu0 %v4795_v46  ;;  %v1499_v46 = vld [vmem:[#allocation2 + $0x1f6] sm:$0xff] }
 0x189   :  { %2169 = vrot.lane.b32.xlu1 %v2164_v58, %s4940_s30  ;;  %4797 = vmatprep.subr.bf16.mxu0 %v6854_v34  ;;  %v2481_v58 = vld [vmem:[%s6843_s3 + $0x38] sm:$0xff] }
 0x18a   :  { %2053 = vrot.lane.b32.xlu0 %v2048_v59, %s4942_s15 }
 0x18b   :  { %v1570_v61 = vpop.permute.xlu1 %1569 }
 0x18c   :  { %v1368_v62 = vpop.permute.xlu0 %1367  ;;  %1574 = vst.msk [vmem:[#allocation3 + $0x26] sm:$0x3] %vm1259_vm6, %v1570_v61  ;;  %v2124_v61 = vld [vmem:[#allocation2 + $0x76] sm:$0x3] }
 0x18d   :  { %1373 = vst.msk [vmem:[#allocation3 + $0xa] sm:$0xff] %vm1257_vm8, %v1368_v62  ;;  %2279 = vrot.lane.b32.xlu1 %v5739_v0, %s4939_s29  ;;  %v4200_v62 = vld [vmem:[%s6840_s0 + $0x1d8] sm:$0x3] }
 0x18e   :  { %1586 = vst.msk [vmem:[#allocation3 + $0x26] sm:$0x3] %vm6862_vm7, %v1582_v57  ;;  %1951 = vrot.lane.b32.xlu0 %v5641_v48, %s4942_s15  ;;  %v1588_v57 = vld [vmem:[#allocation2 + $0x169] sm:$0x3]  ;;  %4576 = vmatmul.mubr.msk.f32.gmra.mrb[36].mxu0 %vm6859_vm3, %v4200_v62  ;;  %vm2490_vm3 = vcmask 588800  }
 0x18f   :  { %1385 = vst.msk [vmem:[#allocation3 + $0xa] sm:$0xff] %vm6861_vm9, %v5647_v49  ;;  %v5748_v4 = vpop.permute.xlu1 %1779  ;;  %4630 = vmatprep.mubr.msk.f32.mxu0 %vm4948_vm10, %v6856_v29  ;;  %v1612_v62 = vld [vmem:[#allocation2 + $0x16a] sm:$0x3] }
 0x190   :  { %v5750_v7 = vpop.permute.xlu0 %1337 }
 0x191   :  { %1279 = vrot.lane.b32.xlu1 %v1275_v3, %s4944_s2  ;;  %v2482_v3 = vld [vmem:[%s6843_s3 + $0x40] sm:$0xff] }
 0x192   :  { %1981 = vrot.lane.b32.xlu0 %v1976_v9, %s4939_s29 }
 0x193   :  { %v1568_v48 = vpop.permute.xlu1 %1567 }
 0x194   :  { %v5756_v49 = vpop.permute.xlu0 %1439  ;;  %1573 = vst.msk [vmem:[#allocation3 + $0x1e] sm:$0xff] %vm1257_vm8, %v1568_v48  ;;  %v1587_v48 = vld [vmem:[#allocation2 + $0x161] sm:$0xff] }
 0x195   :  { %1307 = vrot.lane.b32.xlu1 %v1303_v11, %s4945_s18  ;;  %1585 = vst.msk [vmem:[#allocation3 + $0x1e] sm:$0xff] %vm6861_vm9, %v1580_v56  ;;  %v2480_v56 = vld [vmem:[%s6843_s3 + $0x30] sm:$0xff]  ;;  %v1500_v11 = vld [vmem:[#allocation2 + $0x1fe] sm:$0x3] }
 0x196   :  { %2041 = vrot.lane.b32.xlu0 %v2036_v15, %s4943_s16  ;;  %v4801_v60 = vpack.c.bf16 %v2481_v58, %v2480_v56  ;;  %v1711_v56 = vld [vmem:[#allocation2 + $0x16d] sm:$0xff]  ;;  %v1599_v58 = vld [vmem:[#allocation2 + $0x201] sm:$0xff] }
 0x197   :  { %v5762_v21 = vpop.permute.xlu1 %1627 }
 0x198   :  { %v5764_v19 = vpop.permute.xlu0 %1527 }
 0x199   :  { %2267 = vrot.lane.b32.xlu1 %v5766_v25, %s4940_s30 }
 0x19a   :  { %2069 = vrot.lane.b32.xlu0 %v2064_v12, %s4940_s30 }
 0x19b   :  { %v5771_v27 = vpop.permute.xlu1 %1651 }
 0x19c   :  { %v5773_v28 = vpop.permute.xlu0 %1453 }
 0x19d   :  { %1493 = vrot.lane.b32.xlu1 %v1488_v26, %s4944_s2 }
 0x19e   :  { %1941 = vrot.lane.b32.xlu0 %v1936_v31, %s4943_s16 }
 0x19f   :  { %v1680_v38 = vpop.permute.xlu1 %1679 }
 0x1a0   :  { %v5784_v40 = vpop.permute.xlu0 %1551 }
 0x1a1   :  { %1393 = vrot.lane.b32.xlu1 %v1388_v41, %s4944_s2  ;;  %v1387_v41 = vld [vmem:[#allocation2 + $0x14b] sm:$0xff] }
 0x1a2   :  { %2039 = vrot.lane.b32.xlu0 %v5692_v54, %s4943_s16  ;;  %v1290_v54 = vld [vmem:[#allocation2 + $0x1e8] sm:$0x3] }
 0x1a3   :  { %v5796_v47 = vpop.permute.xlu1 %1681 }
 0x1a4   :  { %v5798_v18 = vpop.permute.xlu0 %1541 }
 0x1a5   :  { %1491 = vrot.lane.b32.xlu1 %v1487_v51, %s4944_s2  ;;  %v1411_v51 = vld [vmem:[#allocation2 + $0x14c] sm:$0xff] }
 0x1a6   :  { %2127 = vrot.lane.b32.xlu0 %v5507_v44, %s4941_s14  ;;  %v4798_v44 = vpack.c.bf16 %v2479_v55, %v2478_v35  ;;  %v1687_v35 = vld [vmem:[#allocation2 + $0x16c] sm:$0xff]  ;;  %v1412_v55 = vld [vmem:[#allocation2 + $0x154] sm:$0x3] }
 0x1a7   :  { %v1668_v43 = vpop.permute.xlu1 %1667 }
 0x1a8   :  { %v5804_v20 = vpop.permute.xlu0 %1751  ;;  %1673 = vst.msk [vmem:[#allocation3 + $0x28] sm:$0xff] %vm1257_vm8, %v1668_v43  ;;  %4799 = vmatpush3.bf16.msra.mxu0 %v4798_v44 }
 0x1a9   :  { %1295 = vrot.lane.b32.xlu1 %v1290_v54, %s4947_s19  ;;  %1685 = vst.msk [vmem:[#allocation3 + $0x28] sm:$0xff] %vm6861_vm9, %v1680_v38  ;;  %4800 = vmatprep.subr.bf16.mxu0 %v6854_v34  ;;  %v1400_v38 = vld [vmem:[#allocation2 + $0x1f3] sm:$0x3] }
 0x1aa   :  { %2151 = vrot.lane.b32.xlu0 %v5700_v24, %s4942_s15 }
 0x1ab   :  { %v5827_v59 = vpop.permute.xlu1 %1739 }
 0x1ac   :  { %v5829_v24 = vpop.permute.xlu0 %1539  ;;  %4802 = vmatpush3.bf16.msra.mxu0 %v4801_v60 }
 0x1ad   :  { %1593 = vrot.lane.b32.xlu1 %v1588_v57, %s4944_s2  ;;  %4628 = vmatprep.subr.mxu0 %v6856_v29  ;;  %v1511_v57 = vld [vmem:[#allocation2 + $0x157] sm:$0xff] }
 0x1ae   :  { %2129 = vrot.lane.b32.xlu0 %v2124_v61, %s4941_s14  ;;  %v2148_v29 = vld [vmem:[#allocation2 + $0x77] sm:$0x3] }
 0x1af   :  { %v1782_v63 = vpop.permute.xlu1 %1781 }
 0x1b0   :  { %v5838_v1 = vpop.permute.xlu0 %1629  ;;  %4629 = vmatpush3.msra.mxu0 %v2482_v3  ;;  %v1512_v3 = vld [vmem:[#allocation2 + $0x15f] sm:$0x3] }
 0x1b1   :  { %1293 = vrot.lane.b32.xlu1 %v1289_v2, %s4947_s19  ;;  %4831 = vmatprep.subr.bf16.mxu0 %v6854_v34  ;;  %v1788_v2 = vld [vmem:[#allocation2 + $0x17f] sm:$0x3] }
 0x1b2   :  { %2167 = vrot.lane.b32.xlu0 %v5726_v52, %s4940_s30  ;;  %v1276_v52 = vld [vmem:[#allocation2 + $0x148] sm:$0x3] }
 0x1b3   :  { %v1770_v8 = vpop.permute.xlu1 %1769 }
 0x1b4   :  { %v5849_v9 = vpop.permute.xlu0 %1653  ;;  %1774 = vst.msk [vmem:[#allocation3 + $0x3a] sm:$0x3] %vm1259_vm6, %v1770_v8  ;;  %v1987_v8 = vld [vmem:[#allocation2 + $0x198] sm:$0xff] }
 0x1b5   :  { %1786 = vst.msk [vmem:[#allocation3 + $0x3a] sm:$0x3] %vm6862_vm7, %v1782_v63  ;;  %1591 = vrot.lane.b32.xlu1 %v1587_v48, %s4944_s2 }
 0x1b6   :  { %2227 = vrot.lane.b32.xlu0 %v5536_v5, %s4941_s14 }
 0x1b7   :  { %v1880_v15 = vpop.permute.xlu1 %1879 }
 0x1b8   :  { %v5857_v12 = vpop.permute.xlu0 %1727 }
 0x1b9   :  { %1505 = vrot.lane.b32.xlu1 %v1500_v11, %s4947_s19 }
 0x1ba   :  { %1281 = vrot.lane.b32.xlu0 %v1276_v52, %s4944_s2 }
 0x1bb   :  { %v1882_v26 = vpop.permute.xlu1 %1881 }
 0x1bc   :  { %v5861_v31 = vpop.permute.xlu0 %1829 }
 0x1bd   :  { %1403 = vrot.lane.b32.xlu1 %v1399_v32, %s4947_s19  ;;  %v1811_v32 = vld [vmem:[#allocation2 + $0x178] sm:$0xff] }
 0x1be   :  { %1309 = vrot.lane.b32.xlu0 %v1304_v33, %s4945_s18 }
 0x1bf   :  { %v1968_v36 = vpop.permute.xlu1 %1967 }
 0x1c0   :  { %v5865_v5 = vpop.permute.xlu0 %1853  ;;  %1973 = vst.msk [vmem:[#allocation3 + $0x46] sm:$0xff] %vm1257_vm8, %v1968_v36 }
 0x1c1   :  { %1405 = vrot.lane.b32.xlu1 %v1400_v38, %s4947_s19  ;;  %v1700_v38 = vld [vmem:[#allocation2 + $0x214] sm:$0x3] }
 0x1c2   :  { %1391 = vrot.lane.b32.xlu0 %v1387_v41, %s4944_s2  ;;  %v1688_v41 = vld [vmem:[#allocation2 + $0x174] sm:$0x3] }
 0x1c3   :  { %v5870_v42 = vpop.permute.xlu1 %2081 }
 0x1c4   :  { %v5872_v45 = vpop.permute.xlu0 %1639 }
 0x1c5   :  { %1503 = vrot.lane.b32.xlu1 %v1499_v46, %s4947_s19 }
 0x1c6   :  { %1415 = vrot.lane.b32.xlu0 %v1411_v51, %s4945_s18 }
 0x1c7   :  { %v1868_v54 = vpop.permute.xlu1 %1867 }
 0x1c8   :  { %v5876_v43 = vpop.permute.xlu0 %1641  ;;  %1873 = vst.msk [vmem:[#allocation3 + $0x3c] sm:$0xff] %vm1257_vm8, %v1868_v54  ;;  %v1799_v54 = vld [vmem:[#allocation2 + $0x217] sm:$0xff] }
 0x1c9   :  { %1691 = vrot.lane.b32.xlu1 %v1687_v35, %s4944_s2  ;;  %1885 = vst.msk [vmem:[#allocation3 + $0x3c] sm:$0xff] %vm6861_vm9, %v1880_v15  ;;  %v1787_v35 = vld [vmem:[#allocation2 + $0x177] sm:$0xff] }
 0x1ca   :  { %1417 = vrot.lane.b32.xlu0 %v1412_v55, %s4945_s18 }
 0x1cb   :  { %v1870_v44 = vpop.permute.xlu1 %1869 }
 0x1cc   :  { %v1670_v22 = vpop.permute.xlu0 %1669  ;;  %1874 = vst.msk [vmem:[#allocation3 + $0x44] sm:$0x3] %vm1259_vm6, %v1870_v44 }
 0x1cd   :  { %1674 = vst.msk [vmem:[#allocation3 + $0x30] sm:$0x3] %vm1259_vm6, %v1670_v22  ;;  %1715 = vrot.lane.b32.xlu1 %v1711_v56, %s4945_s18  ;;  %v1887_v22 = vld [vmem:[#allocation2 + $0x18d] sm:$0xff]  ;;  %v1712_v56 = vld [vmem:[#allocation2 + $0x175] sm:$0x3] }
 0x1ce   :  { %1886 = vst.msk [vmem:[#allocation3 + $0x44] sm:$0x3] %vm6862_vm7, %v1882_v26  ;;  %1686 = vst.msk [vmem:[#allocation3 + $0x30] sm:$0x3] %vm6862_vm7, %v5796_v47  ;;  %1515 = vrot.lane.b32.xlu0 %v1511_v57, %s4945_s18  ;;  %v1699_v26 = vld [vmem:[#allocation2 + $0x20c] sm:$0xff] }
 0x1cf   :  { %v1980_v60 = vpop.permute.xlu1 %1979 }
 0x1d0   :  { %v1768_v61 = vpop.permute.xlu0 %1767  ;;  %1985 = vst.msk [vmem:[#allocation3 + $0x46] sm:$0xff] %vm6861_vm9, %v1980_v60  ;;  %v1888_v60 = vld [vmem:[#allocation2 + $0x195] sm:$0x3] }
 0x1d1   :  { %1773 = vst.msk [vmem:[#allocation3 + $0x32] sm:$0xff] %vm1257_vm8, %v1768_v61  ;;  %1603 = vrot.lane.b32.xlu1 %v1599_v58, %s4947_s19  ;;  %v1600_v61 = vld [vmem:[#allocation2 + $0x209] sm:$0x3] }
 0x1d2   :  { %1785 = vst.msk [vmem:[#allocation3 + $0x32] sm:$0xff] %vm6861_vm9, %v5748_v4  ;;  %1617 = vrot.lane.b32.xlu0 %v1612_v62, %s4945_s18  ;;  %v1611_v4 = vld [vmem:[#allocation2 + $0x162] sm:$0xff] }
 0x1d3   :  { %v5895_v47 = vpop.permute.xlu1 %1929 }
 0x1d4   :  { %v5897_v63 = vpop.permute.xlu0 %1729 }
 0x1d5   :  { %1793 = vrot.lane.b32.xlu1 %v1788_v2, %s4944_s2 }
 0x1d6   :  { %1517 = vrot.lane.b32.xlu0 %v1512_v3, %s4945_s18  ;;  %v1800_v3 = vld [vmem:[#allocation2 + $0x21f] sm:$0x3] }
 0x1d7   :  { %v5901_v48 = vpop.permute.xlu1 %2027 }
 0x1d8   :  { %v5903_v11 = vpop.permute.xlu0 %1827 }
 0x1d9   :  { %1991 = vrot.lane.b32.xlu1 %v1987_v8, %s4944_s2  ;;  %v1812_v8 = vld [vmem:[#allocation2 + $0x180] sm:$0x3] }
 0x1da   :  { %1615 = vrot.lane.b32.xlu0 %v1611_v4, %s4945_s18  ;;  %v1988_v4 = vld [vmem:[#allocation2 + $0x1a0] sm:$0x3] }
 0x1db   :  { %v5907_v15 = vpop.permute.xlu1 %1953 }
 0x1dc   :  { %v5909_v52 = vpop.permute.xlu0 %1753 }
 0x1dd   :  { %1703 = vrot.lane.b32.xlu1 %v1699_v26, %s4947_s19 }
 0x1de   :  { %1815 = vrot.lane.b32.xlu0 %v1811_v32, %s4945_s18 }
 0x1df   :  { %v5913_v33 = vpop.permute.xlu1 %2051 }
 0x1e0   :  { %v5915_v36 = vpop.permute.xlu0 %1851 }
 0x1e1   :  { %1705 = vrot.lane.b32.xlu1 %v1700_v38, %s4947_s19  ;;  %v1911_v38 = vld [vmem:[#allocation2 + $0x18e] sm:$0xff] }
 0x1e2   :  { %1693 = vrot.lane.b32.xlu0 %v1688_v41, %s4944_s2 }
 0x1e3   :  { %v2080_v46 = vpop.permute.xlu1 %2079 }
 0x1e4   :  { %v5919_v51 = vpop.permute.xlu0 %1927 }
 0x1e5   :  { %1803 = vrot.lane.b32.xlu1 %v1799_v54, %s4947_s19  ;;  %v2087_v54 = vld [vmem:[#allocation2 + $0x1a3] sm:$0xff] }
 0x1e6   :  { %1791 = vrot.lane.b32.xlu0 %v1787_v35, %s4944_s2  ;;  %v1912_v35 = vld [vmem:[#allocation2 + $0x196] sm:$0x3] }
 0x1e7   :  { %v1970_v55 = vpop.permute.xlu1 %1969 }
 0x1e8   :  { %v5923_v44 = vpop.permute.xlu0 %1841  ;;  %1974 = vst.msk [vmem:[#allocation3 + $0x4e] sm:$0x3] %vm1259_vm6, %v1970_v55 }
 0x1e9   :  { %1891 = vrot.lane.b32.xlu1 %v1887_v22, %s4944_s2 }
 0x1ea   :  { %1717 = vrot.lane.b32.xlu0 %v1712_v56, %s4945_s18  ;;  %v2111_v56 = vld [vmem:[#allocation2 + $0x1a4] sm:$0xff] }
 0x1eb   :  { %v2068_v57 = vpop.permute.xlu1 %2067 }
 0x1ec   :  { %v5928_v58 = vpop.permute.xlu0 %1741  ;;  %2073 = vst.msk [vmem:[#allocation3 + $0x50] sm:$0xff] %vm1257_vm8, %v2068_v57  ;;  %v2088_v57 = vld [vmem:[#allocation2 + $0x1ab] sm:$0x3] }
 0x1ed   :  { %2085 = vst.msk [vmem:[#allocation3 + $0x50] sm:$0xff] %vm6861_vm9, %v2080_v46  ;;  %1893 = vrot.lane.b32.xlu1 %v1888_v60, %s4944_s2  ;;  %v1999_v60 = vld [vmem:[#allocation2 + $0x238] sm:$0xff] }
 0x1ee   :  { %1605 = vrot.lane.b32.xlu0 %v1600_v61, %s4947_s19 }
 0x1ef   :  { %v5934_v62 = vpop.permute.xlu1 %2179 }
 0x1f0   :  { %v5936_v2 = vpop.permute.xlu0 %1839 }
 0x1f1   :  { %1805 = vrot.lane.b32.xlu1 %v1800_v3, %s4947_s19 }
 0x1f2   :  { %1817 = vrot.lane.b32.xlu0 %v1812_v8, %s4945_s18  ;;  %v2112_v8 = vld [vmem:[#allocation2 + $0x1ac] sm:$0x3] }
 0x1f3   :  { %v2182_v26 = vpop.permute.xlu1 %2181 }
 0x1f4   :  { %v5940_v32 = vpop.permute.xlu0 %1939 }
 0x1f5   :  { %1993 = vrot.lane.b32.xlu1 %v1988_v4, %s4944_s2 }
 0x1f6   :  { %1915 = vrot.lane.b32.xlu0 %v1911_v38, %s4945_s18 }
 0x1f7   :  { %v5944_v41 = vpop.permute.xlu1 %2139 }
 0x1f8   :  { %v5946_v46 = vpop.permute.xlu0 %2029 }
 0x1f9   :  { %2091 = vrot.lane.b32.xlu1 %v2087_v54, %s4944_s2  ;;  %v2011_v54 = vld [vmem:[#allocation2 + $0x199] sm:$0xff] }
 0x1fa   :  { %1917 = vrot.lane.b32.xlu0 %v1912_v35, %s4945_s18 }
 0x1fb   :  { %v2170_v55 = vpop.permute.xlu1 %2169 }
 0x1fc   :  { %v5950_v22 = vpop.permute.xlu0 %2053  ;;  %2174 = vst.msk [vmem:[#allocation3 + $0x62] sm:$0x3] %vm1259_vm6, %v2170_v55 }
 0x1fd   :  { %2186 = vst.msk [vmem:[#allocation3 + $0x62] sm:$0x3] %vm6862_vm7, %v2182_v26  ;;  %2115 = vrot.lane.b32.xlu1 %v2111_v56, %s4945_s18  ;;  %v1899_v26 = vld [vmem:[#allocation2 + $0x22d] sm:$0xff]  ;;  %v1900_v56 = vld [vmem:[#allocation2 + $0x235] sm:$0x3] }
 0x1fe   :  { %2093 = vrot.lane.b32.xlu0 %v2088_v57, %s4944_s2  ;;  %v2012_v57 = vld [vmem:[#allocation2 + $0x1a1] sm:$0x3] }
 0x1ff   :  { %v2280_v61 = vpop.permute.xlu1 %2279 }
 0x200   :  { %v5956_v3 = vpop.permute.xlu0 %1951 }
 0x201   :  { %2003 = vrot.lane.b32.xlu1 %v1999_v60, %s4947_s19  ;;  %v2100_v60 = vld [vmem:[#allocation2 + $0x24b] sm:$0x3] }
 0x202   :  { %2117 = vrot.lane.b32.xlu0 %v2112_v8, %s4945_s18 }
 0x203   :  { %v1280_v4 = vpop.permute.xlu1 %1279 }
 0x204   :  { %v1982_v38 = vpop.permute.xlu0 %1981  ;;  %1286 = vst.msk [vmem:[#allocation3] sm:$0xff] %vm1285_vm11, %v1280_v4 }
 0x205   :  { %1986 = vst.msk [vmem:[#allocation3 + $0x4e] sm:$0x3] %vm6862_vm7, %v1982_v38  ;;  %1903 = vrot.lane.b32.xlu1 %v1899_v26, %s4947_s19  ;;  %v2187_v38 = vld [vmem:[#allocation2 + $0x1ae] sm:$0xff] }
 0x206   :  { %2015 = vrot.lane.b32.xlu0 %v2011_v54, %s4945_s18 }
 0x207   :  { %v1308_v35 = vpop.permute.xlu1 %1307 }
 0x208   :  { %v5964_v55 = vpop.permute.xlu0 %2041 }
 0x209   :  { %1905 = vrot.lane.b32.xlu1 %v1900_v56, %s4947_s19  ;;  %v2188_v56 = vld [vmem:[#allocation2 + $0x1b6] sm:$0x3] }
 0x20a   :  { %2017 = vrot.lane.b32.xlu0 %v2012_v57, %s4945_s18  ;;  %v2211_v57 = vld [vmem:[#allocation2 + $0x1af] sm:$0xff] }
 0x20b   :  { %v2268_v8 = vpop.permute.xlu1 %2267 }
 0x20c   :  { %v2070_v4 = vpop.permute.xlu0 %2069  ;;  %2273 = vst.msk [vmem:[#allocation3 + $0x64] sm:$0xff] %vm1257_vm8, %v2268_v8 }
 0x20d   :  { %2074 = vst.msk [vmem:[#allocation3 + $0x58] sm:$0x3] %vm1259_vm6, %v2070_v4  ;;  %2105 = vrot.lane.b32.xlu1 %v2100_v60, %s4947_s19  ;;  %v2000_v60 = vld [vmem:[#allocation2 + $0x240] sm:$0x3] }
 0x20e   :  { %2285 = vst.msk [vmem:[#allocation3 + $0x64] sm:$0xff] %vm6861_vm9, %v2280_v61  ;;  %2191 = vrot.lane.b32.xlu0 %v2187_v38, %s4944_s2 }
 0x20f   :  { %2086 = vst.msk [vmem:[#allocation3 + $0x58] sm:$0x3] %vm6862_vm7, %v5870_v42  ;;  %v1494_v26 = vpop.permute.xlu1 %1493  ;;  %v2099_v42 = vld [vmem:[#allocation2 + $0x243] sm:$0xff]  ;;  %vm1357_vm7 = vcmask 583168  }
 0x210   :  { %v5975_v54 = vpop.permute.xlu0 %1941  ;;  %1498 = vst.msk [vmem:[#allocation3 + $0x1c] sm:$0x3] %vm1287_vm12, %v1494_v26  ;;  %v2199_v26 = vld [vmem:[#allocation2 + $0x24e] sm:$0xff] }
 0x211   :  { %2193 = vrot.lane.b32.xlu1 %v2188_v56, %s4944_s2  ;;  %v2136_v56 = vld [vmem:[#allocation2 + $0x116] sm:$0x3] }
 0x212   :  { %2215 = vrot.lane.b32.xlu0 %v2211_v57, %s4945_s18 }
 0x213   :  { %v1394_v61 = vpop.permute.xlu1 %1393 }
 0x214   :  { %v5980_v8 = vpop.permute.xlu0 %2039  ;;  %1398 = vst.msk [vmem:[#allocation3 + $0x12] sm:$0x3] %vm1287_vm12, %v1394_v61  ;;  %v2287_v61 = vld [vmem:[#allocation2 + $0x1b9] sm:$0xff] }
 0x215   :  { %2103 = vrot.lane.b32.xlu1 %v2099_v42, %s4947_s19 }
 0x216   :  { %2005 = vrot.lane.b32.xlu0 %v2000_v60, %s4947_s19 }
 0x217   :  { %v1492_v4 = vpop.permute.xlu1 %1491 }
 0x218   :  { %v5985_v38 = vpop.permute.xlu0 %2127  ;;  %1497 = vst.msk [vmem:[#allocation3 + $0x14] sm:$0xff] %vm1285_vm11, %v1492_v4  ;;  %v2200_v4 = vld [vmem:[#allocation2 + $0x256] sm:$0x3] }
 0x219   :  { %2203 = vrot.lane.b32.xlu1 %v2199_v26, %s4947_s19 }
 0x21a   :  { %2141 = vrot.lane.b32.xlu0 %v2136_v56, %s4943_s16 }
 0x21b   :  { %v1296_v57 = vpop.permute.xlu1 %1295 }
 0x21c   :  { %v5990_v34 = vpop.permute.xlu0 %2151 }
 0x21d   :  { %2291 = vrot.lane.b32.xlu1 %v2287_v61, %s4944_s2 }
 0x21e   :  { %2239 = vrot.lane.b32.xlu0 %v5766_v25, %s4943_s16  ;;  %v2299_v25 = vld [vmem:[#allocation2 + $0x259] sm:$0xff] }
 0x21f   :  { %v1594_v42 = vpop.permute.xlu1 %1593 }
 0x220   :  { %v5995_v60 = vpop.permute.xlu0 %2129  ;;  %1598 = vst.msk [vmem:[#allocation3 + $0x26] sm:$0x3] %vm1287_vm12, %v1594_v42  ;;  %v2311_v42 = vld [vmem:[#allocation2 + $0x1ba] sm:$0xff] }
 0x221   :  { %2205 = vrot.lane.b32.xlu1 %v2200_v4, %s4947_s19 }
 0x222   :  { %2153 = vrot.lane.b32.xlu0 %v2148_v29, %s4942_s15 }
 0x223   :  { %v1294_v26 = vpop.permute.xlu1 %1293 }
 0x224   :  { %v2168_v56 = vpop.permute.xlu0 %2167  ;;  %1300 = vst.msk [vmem:[#allocation3] sm:$0xff] %vm1299_vm13, %v1294_v26 }
 0x225   :  { %2173 = vst.msk [vmem:[#allocation3 + $0x5a] sm:$0xff] %vm1257_vm8, %v2168_v56  ;;  %2303 = vrot.lane.b32.xlu1 %v2299_v25, %s4947_s19  ;;  %v2276_v56 = vld [vmem:[#allocation2 + $0x82] sm:$0x3] }
 0x226   :  { %1314 = vst.msk [vmem:[#allocation3] sm:$0xff] %vm1313_vm14, %v1308_v35  ;;  %2251 = vrot.lane.b32.xlu0 %v5739_v0, %s4942_s15  ;;  %v2212_v35 = vld [vmem:[#allocation2 + $0x1b7] sm:$0x3]  ;;  %v2224_v25 = vld [vmem:[#allocation2 + $0x81] sm:$0x3] }
 0x227   :  { %2185 = vst.msk [vmem:[#allocation3 + $0x5a] sm:$0xff] %vm6861_vm9, %v5934_v62  ;;  %v1592_v29 = vpop.permute.xlu1 %1591  ;;  %v2264_v62 = vld [vmem:[#allocation2 + $0x121] sm:$0x3]  ;;  %vm1343_vm9 = vcmask 517568  }
 0x228   :  { %1328 = vst.msk [vmem:[#allocation3] sm:$0xff] %vm1327_vm15, %v5668_v6  ;;  %v6012_v61 = vpop.permute.xlu0 %2227 }
 0x229   :  { %1342 = vst.msk [vmem:[#allocation3] sm:$0xff] %vm1341_vm0, %v5688_v16  ;;  %2269 = vrot.lane.b32.xlu1 %v2264_v62, %s4940_s30  ;;  %v2363_v16 = vld [vmem:[#allocation2 + $0x124] sm:$0xff] }
 0x22a   :  { %1356 = vst.msk [vmem:[#allocation3] sm:$0xff] %vm6863_vm1, %v5677_v39  ;;  %2217 = vrot.lane.b32.xlu0 %v2212_v35, %s4945_s18 }
 0x22b   :  { %1597 = vst.msk [vmem:[#allocation3 + $0x1e] sm:$0xff] %vm1285_vm11, %v1592_v29  ;;  %v1506_v0 = vpop.permute.xlu1 %1505 }
 0x22c   :  { %v1282_v6 = vpop.permute.xlu0 %1281  ;;  %1510 = vst.msk [vmem:[#allocation3 + $0x1c] sm:$0x3] %vm1301_vm2, %v1506_v0  ;;  %v2236_v0 = vld [vmem:[#allocation2 + $0x121] sm:$0x3] }
 0x22d   :  { %1288 = vst.msk [vmem:[#allocation3 + $0x8] sm:$0x3] %vm1287_vm12, %v1282_v6  ;;  %2367 = vrot.lane.b32.xlu1 %v2363_v16, %s4940_s30 }
 0x22e   :  { %1302 = vst.msk [vmem:[#allocation3 + $0x8] sm:$0x3] %vm1301_vm2, %v1296_v57  ;;  %2315 = vrot.lane.b32.xlu0 %v2311_v42, %s4945_s18  ;;  %v6867_v57 = vmov 0.0   ;;  %v2387_v42 = vld [vmem:[#allocation2 + $0x1c4] sm:$0xff] }
 0x22f   :  { %v1404_v39 = vpop.permute.xlu1 %1403 }
 0x230   :  { %v1310_v4 = vpop.permute.xlu0 %1309 }
 0x231   :  { %v2459_v26 = vld [vmem:[#allocation3] sm:$0xff]  ;;  %1316 = vst.msk [vmem:[#allocation3 + $0x8] sm:$0x3] %vm6864_vm5, %v1310_v4  ;;  %2281 = vrot.lane.b32.xlu1 %v2276_v56, %s4939_s29 }
 0x232   :  { %4631 = vmatmul.mubr.msk.f32.vlgmr.msra.gmra.mrb[38].mxu0 %vm2490_vm3, %v2459_v26  ;;  %1330 = vst.msk [vmem:[#allocation3 + $0x8] sm:$0x3] %vm1329_vm4, %v5684_v14  ;;  %2229 = vrot.lane.b32.xlu0 %v2224_v25, %s4941_s14  ;;  %v2375_v14 = vld [vmem:[#allocation2 + $0x85] sm:$0xff]  ;;  %v2312_v4 = vld [vmem:[#allocation2 + $0x1c2] sm:$0x3] }
 0x233   :  { %1344 = vst.msk [vmem:[#allocation3 + $0x8] sm:$0x3] %vm1343_vm9, %v5750_v7  ;;  %4633 = vmatprep.mubr.msk.f32.mxu0 %vm4948_vm10, %v6867_v57  ;;  %v1406_v29 = vpop.permute.xlu1 %1405 }
 0x234   :  { %1358 = vst.msk [vmem:[#allocation3 + $0x8] sm:$0x3] %vm1357_vm7, %v5697_v23  ;;  %v1392_v62 = vpop.permute.xlu0 %1391  ;;  %v2288_v23 = vld [vmem:[#allocation2 + $0x1c1] sm:$0x3] }
 0x235   :  { %1410 = vst.msk [vmem:[#allocation3 + $0x12] sm:$0x3] %vm1301_vm2, %v1406_v29  ;;  %2379 = vrot.lane.b32.xlu1 %v2375_v14, %s4939_s29  ;;  %v2411_v29 = vld [vmem:[#allocation2 + $0x1c5] sm:$0xff] }
 0x236   :  { %1397 = vst.msk [vmem:[#allocation3 + $0xa] sm:$0xff] %vm1285_vm11, %v1392_v62  ;;  %2327 = vrot.lane.b32.xlu0 %v5563_v37, %s4941_s14  ;;  %v2423_v62 = vld [vmem:[#allocation2 + $0x8f] sm:$0xff] }
 0x237   :  { %1409 = vst.msk [vmem:[#allocation3 + $0xa] sm:$0xff] %vm1299_vm13, %v1404_v39  ;;  %v1504_v7 = vpop.permute.xlu1 %1503  ;;  %v2248_v39 = vld [vmem:[#allocation2 + $0x82] sm:$0x3] }
 0x238   :  { %v1416_v35 = vpop.permute.xlu0 %1415  ;;  %1509 = vst.msk [vmem:[#allocation3 + $0x14] sm:$0xff] %vm1299_vm13, %v1504_v7  ;;  %v2336_v7 = vld [vmem:[#allocation2 + $0x12c] sm:$0x3] }
 0x239   :  { %1421 = vst.msk [vmem:[#allocation3 + $0xa] sm:$0xff] %vm1313_vm14, %v1416_v35  ;;  %2293 = vrot.lane.b32.xlu1 %v2288_v23, %s4944_s2 }
 0x23a   :  { %1433 = vst.msk [vmem:[#allocation3 + $0xa] sm:$0xff] %vm1327_vm15, %v5690_v17  ;;  %2241 = vrot.lane.b32.xlu0 %v2236_v0, %s4943_s16  ;;  %v2435_v0 = vld [vmem:[#allocation2 + $0x12f] sm:$0xff] }
 0x23b   :  { %1445 = vst.msk [vmem:[#allocation3 + $0xa] sm:$0xff] %vm1341_vm0, %v5756_v49  ;;  %v1692_v37 = vpop.permute.xlu1 %1691  ;;  %v2300_v49 = vld [vmem:[#allocation2 + $0x261] sm:$0x3] }
 0x23c   :  { %1457 = vst.msk [vmem:[#allocation3 + $0xa] sm:$0xff] %vm6863_vm1, %v5707_v30  ;;  %v1418_v6 = vpop.permute.xlu0 %1417 }
 0x23d   :  { %1697 = vst.msk [vmem:[#allocation3 + $0x28] sm:$0xff] %vm1285_vm11, %v1692_v37  ;;  %2391 = vrot.lane.b32.xlu1 %v2387_v42, %s4944_s2  ;;  %v2400_v42 = vld [vmem:[#allocation2 + $0x26c] sm:$0x3] }
 0x23e   :  { %1422 = vst.msk [vmem:[#allocation3 + $0x12] sm:$0x3] %vm6864_vm5, %v1418_v6  ;;  %2339 = vrot.lane.b32.xlu0 %v2363_v16, %s4943_s16  ;;  %v2399_v16 = vld [vmem:[#allocation2 + $0x264] sm:$0xff]  ;;  %v2447_v6 = vld [vmem:[#allocation2 + $0x90] sm:$0xff] }
 0x23f   :  { %1434 = vst.msk [vmem:[#allocation3 + $0x12] sm:$0x3] %vm1329_vm4, %v5653_v53  ;;  %v1716_v17 = vpop.permute.xlu1 %1715 }
 0x240   :  { %1446 = vst.msk [vmem:[#allocation3 + $0x12] sm:$0x3] %vm1343_vm9, %v5719_v50  ;;  %v1516_v30 = vpop.permute.xlu0 %1515 }
 0x241   :  { %1458 = vst.msk [vmem:[#allocation3 + $0x12] sm:$0x3] %vm1357_vm7, %v5773_v28  ;;  %2305 = vrot.lane.b32.xlu1 %v2300_v49, %s4947_s19 }
 0x242   :  { %1521 = vst.msk [vmem:[#allocation3 + $0x14] sm:$0xff] %vm1313_vm14, %v1516_v30  ;;  %2253 = vrot.lane.b32.xlu0 %v2248_v39, %s4942_s15  ;;  %v2436_v30 = vld [vmem:[#allocation2 + $0x137] sm:$0x3] }
 0x243   :  { %1533 = vst.msk [vmem:[#allocation3 + $0x14] sm:$0xff] %vm1327_vm15, %v5764_v19  ;;  %v2460_v53 = vld [vmem:[#allocation3 + $0x8] sm:$0xff]  ;;  %v1604_v50 = vpop.permute.xlu1 %1603 }
 0x244   :  { %1545 = vst.msk [vmem:[#allocation3 + $0x14] sm:$0xff] %vm1341_vm0, %v5829_v24  ;;  %v6071_v28 = vpop.permute.xlu0 %1617  ;;  %4634 = vmatmul.mubr.msk.f32.gmra.mrb[40].mxu0 %vm2490_vm3, %v2460_v53 }
 0x245   :  { %1557 = vst.msk [vmem:[#allocation3 + $0x14] sm:$0xff] %vm6863_vm1, %v5784_v40  ;;  %4636 = vmatprep.mubr.msk.f32.mxu0 %vm4948_vm10, %v6867_v57  ;;  %2403 = vrot.lane.b32.xlu1 %v2399_v16, %s4947_s19  ;;  %v2364_v40 = vld [vmem:[#allocation2 + $0x12c] sm:$0x3] }
 0x246   :  { %1609 = vst.msk [vmem:[#allocation3 + $0x1e] sm:$0xff] %vm1299_vm13, %v1604_v50  ;;  %2351 = vrot.lane.b32.xlu0 %v2375_v14, %s4942_s15  ;;  %v2376_v14 = vld [vmem:[#allocation2 + $0x8d] sm:$0x3] }
 0x247   :  { %v1794_v19 = vpop.permute.xlu1 %1793 }
 0x248   :  { %v1518_v24 = vpop.permute.xlu0 %1517  ;;  %1798 = vst.msk [vmem:[#allocation3 + $0x3a] sm:$0x3] %vm1287_vm12, %v1794_v19 }
 0x249   :  { %1522 = vst.msk [vmem:[#allocation3 + $0x1c] sm:$0x3] %vm6864_vm5, %v1518_v24  ;;  %2369 = vrot.lane.b32.xlu1 %v2364_v40, %s4940_s30 }
 0x24a   :  { %1534 = vst.msk [vmem:[#allocation3 + $0x1c] sm:$0x3] %vm1329_vm4, %v5675_v10  ;;  %2317 = vrot.lane.b32.xlu0 %v2312_v4, %s4945_s18  ;;  %v2324_v10 = vld [vmem:[#allocation2 + $0x8c] sm:$0x3] }
 0x24b   :  { %1546 = vst.msk [vmem:[#allocation3 + $0x1c] sm:$0x3] %vm1343_vm9, %v5798_v18  ;;  %v1992_v56 = vpop.permute.xlu1 %1991 }
 0x24c   :  { %v2461_v26 = vld [vmem:[#allocation3 + $0x10] sm:$0xff]  ;;  %1558 = vst.msk [vmem:[#allocation3 + $0x1c] sm:$0x3] %vm1357_vm7, %v5682_v13  ;;  %v1616_v25 = vpop.permute.xlu0 %1615 }
 0x24d   :  { %4637 = vmatmul.mubr.msk.f32.gmra.mrb[42].mxu0 %vm2490_vm3, %v2461_v26  ;;  %1997 = vst.msk [vmem:[#allocation3 + $0x46] sm:$0xff] %vm1285_vm11, %v1992_v56  ;;  %2329 = vrot.lane.b32.xlu1 %v2324_v10, %s4941_s14 }
 0x24e   :  { %1621 = vst.msk [vmem:[#allocation3 + $0x1e] sm:$0xff] %vm1313_vm14, %v1616_v25  ;;  %4639 = vmatprep.mubr.msk.f32.mxu0 %vm4948_vm10, %v6867_v57  ;;  %2415 = vrot.lane.b32.xlu0 %v2411_v29, %s4945_s18 }
 0x24f   :  { %1633 = vst.msk [vmem:[#allocation3 + $0x1e] sm:$0xff] %vm1327_vm15, %v5762_v21  ;;  %v1704_v13 = vpop.permute.xlu1 %1703 }
 0x250   :  { %1645 = vst.msk [vmem:[#allocation3 + $0x1e] sm:$0xff] %vm1341_vm0, %v5872_v45  ;;  %v1816_v18 = vpop.permute.xlu0 %1815  ;;  %v2388_v45 = vld [vmem:[#allocation2 + $0x1cc] sm:$0x3] }
 0x251   :  { %1657 = vst.msk [vmem:[#allocation3 + $0x1e] sm:$0xff] %vm6863_vm1, %v5771_v27  ;;  %2427 = vrot.lane.b32.xlu1 %v2423_v62, %s4941_s14 }
 0x252   :  { %1709 = vst.msk [vmem:[#allocation3 + $0x28] sm:$0xff] %vm1299_vm13, %v1704_v13  ;;  %2381 = vrot.lane.b32.xlu0 %v2376_v14, %s4939_s29 }
 0x253   :  { %1721 = vst.msk [vmem:[#allocation3 + $0x28] sm:$0xff] %vm1313_vm14, %v1716_v17  ;;  %v1706_v21 = vpop.permute.xlu1 %1705  ;;  %v2412_v17 = vld [vmem:[#allocation2 + $0x1cd] sm:$0x3] }
 0x254   :  { %1733 = vst.msk [vmem:[#allocation3 + $0x28] sm:$0xff] %vm1327_vm15, %v5857_v12  ;;  %v1694_v27 = vpop.permute.xlu0 %1693 }
 0x255   :  { %1745 = vst.msk [vmem:[#allocation3 + $0x28] sm:$0xff] %vm1341_vm0, %v5827_v59  ;;  %2393 = vrot.lane.b32.xlu1 %v2388_v45, %s4944_s2  ;;  %v2348_v59 = vld [vmem:[#allocation2 + $0x8d] sm:$0x3] }
 0x256   :  { %1757 = vst.msk [vmem:[#allocation3 + $0x28] sm:$0xff] %vm6863_vm1, %v5804_v20  ;;  %2341 = vrot.lane.b32.xlu0 %v2336_v7, %s4943_s16 }
 0x257   :  { %1698 = vst.msk [vmem:[#allocation3 + $0x30] sm:$0x3] %vm1287_vm12, %v1694_v27  ;;  %v1804_v12 = vpop.permute.xlu1 %1803 }
 0x258   :  { %1710 = vst.msk [vmem:[#allocation3 + $0x30] sm:$0x3] %vm1301_vm2, %v1706_v21  ;;  %v2462_v35 = vld [vmem:[#allocation3 + $0x18] sm:$0xff]  ;;  %v1792_v23 = vpop.permute.xlu0 %1791 }
 0x259   :  { %4640 = vmatmul.mubr.msk.f32.gmra.mrb[44].mxu0 %vm2490_vm3, %v2462_v35  ;;  %1797 = vst.msk [vmem:[#allocation3 + $0x32] sm:$0xff] %vm1285_vm11, %v1792_v23  ;;  %2353 = vrot.lane.b32.xlu1 %v2348_v59, %s4942_s15 }
 0x25a   :  { %4642 = vmatprep.mubr.msk.f32.mxu0 %vm4948_vm10, %v6867_v57  ;;  %1809 = vst.msk [vmem:[#allocation3 + $0x32] sm:$0xff] %vm1299_vm13, %v1804_v12  ;;  %2439 = vrot.lane.b32.xlu0 %v2435_v0, %s4943_s16 }
 0x25b   :  { %1821 = vst.msk [vmem:[#allocation3 + $0x32] sm:$0xff] %vm1313_vm14, %v1816_v18  ;;  %v1892_v20 = vpop.permute.xlu1 %1891 }
 0x25c   :  { %1833 = vst.msk [vmem:[#allocation3 + $0x32] sm:$0xff] %vm1327_vm15, %v5903_v11  ;;  %v1718_v37 = vpop.permute.xlu0 %1717 }
 0x25d   :  { %1845 = vst.msk [vmem:[#allocation3 + $0x32] sm:$0xff] %vm1341_vm0, %v5936_v2  ;;  %2451 = vrot.lane.b32.xlu1 %v2447_v6, %s4942_s15 }
 0x25e   :  { %1897 = vst.msk [vmem:[#allocation3 + $0x3c] sm:$0xff] %vm1285_vm11, %v1892_v20  ;;  %2405 = vrot.lane.b32.xlu0 %v2400_v42, %s4947_s19 }
 0x25f   :  { %1722 = vst.msk [vmem:[#allocation3 + $0x30] sm:$0x3] %vm6864_vm5, %v1718_v37  ;;  %v1894_v11 = vpop.permute.xlu1 %1893 }
 0x260   :  { %1857 = vst.msk [vmem:[#allocation3 + $0x32] sm:$0xff] %vm6863_vm1, %v5915_v36  ;;  %v1606_v2 = vpop.permute.xlu0 %1605  ;;  %v2424_v36 = vld [vmem:[#allocation2 + $0x97] sm:$0x3] }
 0x261   :  { %1734 = vst.msk [vmem:[#allocation3 + $0x30] sm:$0x3] %vm1329_vm4, %v5897_v63  ;;  %2429 = vrot.lane.b32.xlu1 %v2424_v36, %s4941_s14 }
 0x262   :  { %1746 = vst.msk [vmem:[#allocation3 + $0x30] sm:$0x3] %vm1343_vm9, %v5928_v58  ;;  %2417 = vrot.lane.b32.xlu0 %v2412_v17, %s4945_s18  ;;  %v2448_v58 = vld [vmem:[#allocation2 + $0x98] sm:$0x3] }
 0x263   :  { %1758 = vst.msk [vmem:[#allocation3 + $0x30] sm:$0x3] %vm1357_vm7, %v5909_v52  ;;  %v1806_v63 = vpop.permute.xlu1 %1805 }
 0x264   :  { %1898 = vst.msk [vmem:[#allocation3 + $0x44] sm:$0x3] %vm1287_vm12, %v1894_v11  ;;  %v1818_v52 = vpop.permute.xlu0 %1817 }
 0x265   :  { %1610 = vst.msk [vmem:[#allocation3 + $0x26] sm:$0x3] %vm1301_vm2, %v1606_v2  ;;  %1810 = vst.msk [vmem:[#allocation3 + $0x3a] sm:$0x3] %vm1301_vm2, %v1806_v63  ;;  %2453 = vrot.lane.b32.xlu1 %v2448_v58, %s4942_s15 }
 0x266   :  { %1622 = vst.msk [vmem:[#allocation3 + $0x26] sm:$0x3] %vm6864_vm5, %v6071_v28  ;;  %1822 = vst.msk [vmem:[#allocation3 + $0x3a] sm:$0x3] %vm6864_vm5, %v1818_v52  ;;  %2441 = vrot.lane.b32.xlu0 %v2436_v30, %s4943_s16 }
 0x267   :  { %1634 = vst.msk [vmem:[#allocation3 + $0x26] sm:$0x3] %vm1329_vm4, %v5838_v1  ;;  %1834 = vst.msk [vmem:[#allocation3 + $0x3a] sm:$0x3] %vm1329_vm4, %v5861_v31  ;;  %v1994_v1 = vpop.permute.xlu1 %1993 }
 0x268   :  { %1646 = vst.msk [vmem:[#allocation3 + $0x26] sm:$0x3] %vm1343_vm9, %v5876_v43  ;;  %1846 = vst.msk [vmem:[#allocation3 + $0x3a] sm:$0x3] %vm1343_vm9, %v5923_v44  ;;  %v1916_v43 = vpop.permute.xlu0 %1915  ;;  %v2464_v44 = vld [vmem:[#allocation3 + $0x28] sm:$0xff] }
 0x269   :  { %1658 = vst.msk [vmem:[#allocation3 + $0x26] sm:$0x3] %vm1357_vm7, %v5849_v9  ;;  %1858 = vst.msk [vmem:[#allocation3 + $0x3a] sm:$0x3] %vm1357_vm7, %v5865_v5 }
 0x26a   :  { %1998 = vst.msk [vmem:[#allocation3 + $0x4e] sm:$0x3] %vm1287_vm12, %v1994_v1  ;;  %v2465_v28 = vld [vmem:[#allocation3 + $0x30] sm:$0xff] }
 0x26b   :  { %v2092_v9 = vpop.permute.xlu1 %2091 }
 0x26c   :  { %v1918_v49 = vpop.permute.xlu0 %1917  ;;  %2097 = vst.msk [vmem:[#allocation3 + $0x50] sm:$0xff] %vm1285_vm11, %v2092_v9 }
 0x26f   :  { %v2116_v31 = vpop.permute.xlu1 %2115 }
 0x270   :  { %v2463_v39 = vld [vmem:[#allocation3 + $0x20] sm:$0xff]  ;;  %v2094_v53 = vpop.permute.xlu0 %2093 }
 0x271   :  { %4643 = vmatmul.mubr.msk.f32.gmra.mrb[46].mxu0 %vm2490_vm3, %v2463_v39  ;;  %2098 = vst.msk [vmem:[#allocation3 + $0x58] sm:$0x3] %vm1287_vm12, %v2094_v53 }
 0x272   :  { %4645 = vmatprep.mubr.msk.f32.mxu0 %vm4948_vm10, %v6867_v57 }
 0x273   :  { %v2004_v5 = vpop.permute.xlu1 %2003 }
 0x274   :  { %v2118_v50 = vpop.permute.xlu0 %2117  ;;  %2009 = vst.msk [vmem:[#allocation3 + $0x46] sm:$0xff] %vm1299_vm13, %v2004_v5  ;;  %v6288_v5 = vld [vmem:[%s6844_s4] ss:$0 sm:$0xff] }
 0x275   :  { %4646 = vmatmul.mubr.msk.f32.gmra.mrb[48].mxu0 %vm2490_vm3, %v2464_v44 }
 0x276   :  { %4648 = vmatprep.mubr.msk.f32.mxu0 %vm4948_vm10, %v6867_v57 }
 0x277   :  { %v1904_v16 = vpop.permute.xlu1 %1903 }
 0x278   :  { %v2016_v19 = vpop.permute.xlu0 %2015  ;;  %1909 = vst.msk [vmem:[#allocation3 + $0x3c] sm:$0xff] %vm1299_vm13, %v1904_v16 }
 0x279   :  { %4649 = vmatmul.mubr.msk.f32.gmra.mrb[50].mxu0 %vm2490_vm3, %v2465_v28  ;;  %2021 = vst.msk [vmem:[#allocation3 + $0x46] sm:$0xff] %vm1313_vm14, %v2016_v19  ;;  %1921 = vst.msk [vmem:[#allocation3 + $0x3c] sm:$0xff] %vm1313_vm14, %v1916_v43 }
 0x27a   :  { %4651 = vmatprep.mubr.msk.f32.mxu0 %vm4948_vm10, %v6867_v57  ;;  %2033 = vst.msk [vmem:[#allocation3 + $0x46] sm:$0xff] %vm1327_vm15, %v5901_v48  ;;  %1933 = vst.msk [vmem:[#allocation3 + $0x3c] sm:$0xff] %vm1327_vm15, %v5919_v51 }
 0x27b   :  { %2045 = vst.msk [vmem:[#allocation3 + $0x46] sm:$0xff] %vm1341_vm0, %v5980_v8  ;;  %1945 = vst.msk [vmem:[#allocation3 + $0x3c] sm:$0xff] %vm1341_vm0, %v5940_v32  ;;  %v1906_v24 = vpop.permute.xlu1 %1905 }
 0x27c   :  { %2057 = vst.msk [vmem:[#allocation3 + $0x46] sm:$0xff] %vm6863_vm1, %v5913_v33  ;;  %v2018_v40 = vpop.permute.xlu0 %2017  ;;  %1957 = vst.msk [vmem:[#allocation3 + $0x3c] sm:$0xff] %vm6863_vm1, %v5956_v3  ;;  %v4577_v33 = vpop.f32.mrb[36].mxu0 }
 0x27d   :  { %1910 = vst.msk [vmem:[#allocation3 + $0x44] sm:$0x3] %vm1301_vm2, %v1906_v24  ;;  %v894_v32 = vpop.f32.mrb[37].mxu0 }
 0x27e   :  { %1922 = vst.msk [vmem:[#allocation3 + $0x44] sm:$0x3] %vm6864_vm5, %v1918_v49 }
 0x27f   :  { %1934 = vst.msk [vmem:[#allocation3 + $0x44] sm:$0x3] %vm1329_vm4, %v5895_v47  ;;  %v2106_v48 = vpop.permute.xlu1 %2105 }
 0x280   :  { %1946 = vst.msk [vmem:[#allocation3 + $0x44] sm:$0x3] %vm1343_vm9, %v5975_v54  ;;  %v2192_v51 = vpop.permute.xlu0 %2191 }
 0x281   :  { %1958 = vst.msk [vmem:[#allocation3 + $0x44] sm:$0x3] %vm1357_vm7, %v5907_v15 }
 0x282   :  { %2110 = vst.msk [vmem:[#allocation3 + $0x58] sm:$0x3] %vm1301_vm2, %v2106_v48 }
 0x283   :  { %2197 = vst.msk [vmem:[#allocation3 + $0x5a] sm:$0xff] %vm1285_vm11, %v2192_v51  ;;  %v2194_v47 = vpop.permute.xlu1 %2193  ;;  %v2466_v8 = vld [vmem:[#allocation3 + $0x38] sm:$0xff] }
 0x284   :  { %2122 = vst.msk [vmem:[#allocation3 + $0x58] sm:$0x3] %vm6864_vm5, %v2118_v50  ;;  %v2216_v3 = vpop.permute.xlu0 %2215  ;;  %4652 = vmatmul.mubr.msk.f32.gmra.mrb[52].mxu0 %vm2490_vm3, %v2466_v8 }
 0x285   :  { %2134 = vst.msk [vmem:[#allocation3 + $0x58] sm:$0x3] %vm1329_vm4, %v5995_v60  ;;  %4654 = vmatprep.mubr.msk.f32.mxu0 %vm4948_vm10, %v6867_v57 }
 0x286   :  { %2198 = vst.msk [vmem:[#allocation3 + $0x62] sm:$0x3] %vm1287_vm12, %v2194_v47 }
 0x287   :  { %v2104_v15 = vpop.permute.xlu1 %2103 }
 0x288   :  { %v2006_v54 = vpop.permute.xlu0 %2005  ;;  %v2467_v4 = vld [vmem:[#allocation3 + $0x40] sm:$0xff]  ;;  %2109 = vst.msk [vmem:[#allocation3 + $0x50] sm:$0xff] %vm1299_vm13, %v2104_v15 }
 0x289   :  { %2010 = vst.msk [vmem:[#allocation3 + $0x4e] sm:$0x3] %vm1301_vm2, %v2006_v54  ;;  %4655 = vmatmul.mubr.msk.f32.gmra.mrb[54].mxu0 %vm2490_vm3, %v2467_v4 }
 0x28a   :  { %2121 = vst.msk [vmem:[#allocation3 + $0x50] sm:$0xff] %vm1313_vm14, %v2116_v31  ;;  %4657 = vmatprep.mubr.msk.f32.mxu0 %vm4948_vm10, %v6867_v57 }
 0x28b   :  { %2022 = vst.msk [vmem:[#allocation3 + $0x4e] sm:$0x3] %vm6864_vm5, %v2018_v40  ;;  %v2204_v60 = vpop.permute.xlu1 %2203 }
 0x28c   :  { %2133 = vst.msk [vmem:[#allocation3 + $0x50] sm:$0xff] %vm1327_vm15, %v5985_v38  ;;  %v2142_v26 = vpop.permute.xlu0 %2141 }
 0x28d   :  { %2034 = vst.msk [vmem:[#allocation3 + $0x4e] sm:$0x3] %vm1329_vm4, %v5946_v46 }
 0x28e   :  { %2145 = vst.msk [vmem:[#allocation3 + $0x50] sm:$0xff] %vm1341_vm0, %v5944_v41 }
 0x28f   :  { %2046 = vst.msk [vmem:[#allocation3 + $0x4e] sm:$0x3] %vm1343_vm9, %v5964_v55  ;;  %2146 = vst.msk [vmem:[#allocation3 + $0x58] sm:$0x3] %vm1343_vm9, %v2142_v26  ;;  %v2292_v41 = vpop.permute.xlu1 %2291 }
 0x290   :  { %2157 = vst.msk [vmem:[#allocation3 + $0x50] sm:$0xff] %vm6863_vm1, %v5990_v34  ;;  %v2240_v46 = vpop.permute.xlu0 %2239 }
 0x291   :  { %2058 = vst.msk [vmem:[#allocation3 + $0x4e] sm:$0x3] %vm1357_vm7, %v5950_v22 }
 0x292   :  { %2209 = vst.msk [vmem:[#allocation3 + $0x5a] sm:$0xff] %vm1299_vm13, %v2204_v60 }
 0x293   :  { %2221 = vst.msk [vmem:[#allocation3 + $0x5a] sm:$0xff] %vm1313_vm14, %v2216_v3  ;;  %v2206_v55 = vpop.permute.xlu1 %2205 }
 0x294   :  { %2233 = vst.msk [vmem:[#allocation3 + $0x5a] sm:$0xff] %vm1327_vm15, %v6012_v61  ;;  %v2154_v34 = vpop.permute.xlu0 %2153 }
 0x295   :  { %2297 = vst.msk [vmem:[#allocation3 + $0x64] sm:$0xff] %vm1285_vm11, %v2292_v41 }
 0x296   :  { %2245 = vst.msk [vmem:[#allocation3 + $0x5a] sm:$0xff] %vm1341_vm0, %v2240_v46 }
 0x297   :  { %2210 = vst.msk [vmem:[#allocation3 + $0x62] sm:$0x3] %vm1301_vm2, %v2206_v55  ;;  %v2304_v22 = vpop.permute.xlu1 %2303  ;;  %v2469_v56 = vld [vmem:[#allocation3 + $0x50] sm:$0xff] }
 0x298   :  { %v2468_v38 = vld [vmem:[#allocation3 + $0x48] sm:$0xff]  ;;  %2158 = vst.msk [vmem:[#allocation3 + $0x58] sm:$0x3] %vm1357_vm7, %v2154_v34  ;;  %v2252_v61 = vpop.permute.xlu0 %2251 }
 0x299   :  { %4658 = vmatmul.mubr.msk.f32.gmra.mrb[56].mxu0 %vm2490_vm3, %v2468_v38  ;;  %2309 = vst.msk [vmem:[#allocation3 + $0x64] sm:$0xff] %vm1299_vm13, %v2304_v22 }
 0x29a   :  { %4660 = vmatprep.mubr.msk.f32.mxu0 %vm4948_vm10, %v6867_v57  ;;  %2257 = vst.msk [vmem:[#allocation3 + $0x5a] sm:$0xff] %vm6863_vm1, %v2252_v61  ;;  %vm6868_vm1 = vcmask 189568  }
 0x29b   :  { %v2270_v25 = vpop.permute.xlu1 %2269 }
 0x29c   :  { %v2218_v10 = vpop.permute.xlu0 %2217  ;;  %2274 = vst.msk [vmem:[#allocation3 + $0x6c] sm:$0x3] %vm1259_vm6, %v2270_v25 }
 0x29d   :  { %4661 = vmatmul.mubr.msk.f32.gmra.mrb[58].mxu0 %vm2490_vm3, %v2469_v56  ;;  %2222 = vst.msk [vmem:[#allocation3 + $0x62] sm:$0x3] %vm6864_vm5, %v2218_v10  ;;  %vm6869_vm5 = vcmask 195712  }
 0x29e   :  { %4663 = vmatprep.mubr.msk.f32.mxu0 %vm4948_vm10, %v6867_v57 }
 0x29f   :  { %v2368_v29 = vpop.permute.xlu1 %2367 }
 0x2a0   :  { %v2316_v13 = vpop.permute.xlu0 %2315  ;;  %2373 = vst.msk [vmem:[#allocation3 + $0x6e] sm:$0xff] %vm1257_vm8, %v2368_v29 }
 0x2a1   :  { %v2470_v18 = vld [vmem:[#allocation3 + $0x58] sm:$0xff]  ;;  %2321 = vst.msk [vmem:[#allocation3 + $0x64] sm:$0xff] %vm1313_vm14, %v2316_v13  ;;  %v3114_v13 = vld [vmem:[%s6845_s5] sm:$0xff] }
 0x2a2   :  { %4664 = vmatmul.mubr.msk.f32.gmra.mrb[60].mxu0 %vm2490_vm3, %v2470_v18  ;;  %v3115_v18 = vld [vmem:[%s6845_s5 + $0x8] sm:$0xff] }
 0x2a3   :  { %4666 = vmatprep.mubr.msk.f32.mxu0 %vm4948_vm10, %v6867_v57  ;;  %v2282_v62 = vpop.permute.xlu1 %2281 }
 0x2a4   :  { %v2230_v14 = vpop.permute.xlu0 %2229  ;;  %2286 = vst.msk [vmem:[#allocation3 + $0x6c] sm:$0x3] %vm6868_vm1, %v2282_v62  ;;  %vm6871_vm1 = vcmask 386368  }
 0x2a5   :  { %2234 = vst.msk [vmem:[#allocation3 + $0x62] sm:$0x3] %vm1329_vm4, %v2230_v14  ;;  %v4803_v14 = vpack.c.bf16 %v3115_v18, %v3114_v13 }
 0x2a7   :  { %v2380_v21 = vpop.permute.xlu1 %2379  ;;  %4804 = vmatprep.subr.bf16.mxu1 %v4803_v14 }
 0x2a8   :  { %v2328_v27 = vpop.permute.xlu0 %2327  ;;  %2385 = vst.msk [vmem:[#allocation3 + $0x6e] sm:$0xff] %vm6869_vm5, %v2380_v21  ;;  %vm6870_vm5 = vcmask 589312   ;;  %v4241_v21 = vld [vmem:[%s6840_s0 + $0x270] sm:$0xff]  ;;  %4806 = vmatpush3.bf16.msra.mxu1 %v4803_v14 }
 0x2a9   :  { %2333 = vst.msk [vmem:[#allocation3 + $0x64] sm:$0xff] %vm1327_vm15, %v2328_v27 }
 0x2ab   :  { %v2294_v45 = vpop.permute.xlu1 %2293 }
 0x2ac   :  { %v2242_v7 = vpop.permute.xlu0 %2241  ;;  %2298 = vst.msk [vmem:[#allocation3 + $0x6c] sm:$0x3] %vm1287_vm12, %v2294_v45 }
 0x2ad   :  { %2246 = vst.msk [vmem:[#allocation3 + $0x62] sm:$0x3] %vm1343_vm9, %v2242_v7  ;;  %v4242_v7 = vld [vmem:[%s6840_s0 + $0x278] sm:$0x3] }
 0x2af   :  { %v2392_v35 = vpop.permute.xlu1 %2391 }
 0x2b0   :  { %v2340_v12 = vpop.permute.xlu0 %2339  ;;  %2397 = vst.msk [vmem:[#allocation3 + $0x6e] sm:$0xff] %vm1285_vm11, %v2392_v35 }
 0x2b1   :  { %2345 = vst.msk [vmem:[#allocation3 + $0x64] sm:$0xff] %vm1341_vm0, %v2340_v12  ;;  %v3116_v12 = vld [vmem:[%s6845_s5 + $0x10] sm:$0xff] }
 0x2b3   :  { %v2306_v23 = vpop.permute.xlu1 %2305 }
 0x2b4   :  { %v2254_v59 = vpop.permute.xlu0 %2253  ;;  %2310 = vst.msk [vmem:[#allocation3 + $0x6c] sm:$0x3] %vm1301_vm2, %v2306_v23  ;;  %v3117_v23 = vld [vmem:[%s6845_s5 + $0x18] sm:$0xff] }
 0x2b5   :  { %2258 = vst.msk [vmem:[#allocation3 + $0x62] sm:$0x3] %vm1357_vm7, %v2254_v59 }
 0x2b7   :  { %v2404_v0 = vpop.permute.xlu1 %2403 }
 0x2b8   :  { %v2352_v20 = vpop.permute.xlu0 %2351  ;;  %2409 = vst.msk [vmem:[#allocation3 + $0x6e] sm:$0xff] %vm1299_vm13, %v2404_v0  ;;  %v4807_v0 = vpack.c.bf16 %v3117_v23, %v3116_v12 }
 0x2b9   :  { %2357 = vst.msk [vmem:[#allocation3 + $0x64] sm:$0xff] %vm6870_vm5, %v2352_v20  ;;  %vm6872_vm5 = vcmask 189568  }
 0x2ba   :  { %4808 = vmatprep.subr.bf16.mxu1 %v4807_v0 }
 0x2bb   :  { %v2370_v37 = vpop.permute.xlu1 %2369  ;;  %4810 = vmatpush3.bf16.msra.mxu1 %v4807_v0 }
 0x2bc   :  { %v2318_v6 = vpop.permute.xlu0 %2317  ;;  %2374 = vst.msk [vmem:[#allocation3 + $0x76] sm:$0x3] %vm1259_vm6, %v2370_v37  ;;  %vm6873_vm6 = vcmask 589312  }
 0x2bd   :  { %2322 = vst.msk [vmem:[#allocation3 + $0x6c] sm:$0x3] %vm6871_vm1, %v2318_v6  ;;  %v3118_v6 = vld [vmem:[%s6845_s5 + $0x20] sm:$0xff] }
 0x2bf   :  { %v2330_v42 = vpop.permute.xlu1 %2329 }
 0x2c0   :  { %v2416_v11 = vpop.permute.xlu0 %2415  ;;  %v2471_v2 = vld [vmem:[#allocation3 + $0x60] sm:$0xff]  ;;  %2334 = vst.msk [vmem:[#allocation3 + $0x6c] sm:$0x3] %vm1329_vm4, %v2330_v42  ;;  %v3119_v42 = vld [vmem:[%s6845_s5 + $0x28] sm:$0xff] }
 0x2c1   :  { %2421 = vst.msk [vmem:[#allocation3 + $0x6e] sm:$0xff] %vm1313_vm14, %v2416_v11  ;;  %4667 = vmatmul.mubr.msk.f32.gmra.mrb[62].mxu0 %vm2490_vm3, %v2471_v2  ;;  %v4811_v2 = vpack.c.bf16 %v3119_v42, %v3118_v6 }
 0x2c2   :  { %4669 = vmatprep.mubr.msk.f32.mxu0 %vm4948_vm10, %v6867_v57 }
 0x2c3   :  { %v2428_v36 = vpop.permute.xlu1 %2427  ;;  %4812 = vmatprep.subr.bf16.mxu1 %v4811_v2 }
 0x2c4   :  { %v2382_v17 = vpop.permute.xlu0 %2381  ;;  %2433 = vst.msk [vmem:[#allocation3 + $0x6e] sm:$0xff] %vm1327_vm15, %v2428_v36  ;;  %4814 = vmatpush3.bf16.msra.mxu1 %v4811_v2 }
 0x2c5   :  { %2386 = vst.msk [vmem:[#allocation3 + $0x76] sm:$0x3] %vm6872_vm5, %v2382_v17 }
 0x2c7   :  { %v2394_v63 = vpop.permute.xlu1 %2393 }
 0x2c8   :  { %v2342_v52 = vpop.permute.xlu0 %2341  ;;  %2398 = vst.msk [vmem:[#allocation3 + $0x76] sm:$0x3] %vm1287_vm12, %v2394_v63  ;;  %v3120_v63 = vld [vmem:[%s6845_s5 + $0x30] sm:$0xff] }
 0x2c9   :  { %2346 = vst.msk [vmem:[#allocation3 + $0x6c] sm:$0x3] %vm1343_vm9, %v2342_v52  ;;  %v3121_v52 = vld [vmem:[%s6845_s5 + $0x38] sm:$0xff] }
 0x2cb   :  { %v2354_v58 = vpop.permute.xlu1 %2353 }
 0x2cc   :  { %v2440_v30 = vpop.permute.xlu0 %2439  ;;  %2358 = vst.msk [vmem:[#allocation3 + $0x6c] sm:$0x3] %vm1357_vm7, %v2354_v58  ;;  %v4815_v58 = vpack.c.bf16 %v3121_v52, %v3120_v63 }
 0x2cd   :  { %2445 = vst.msk [vmem:[#allocation3 + $0x6e] sm:$0xff] %vm1341_vm0, %v2440_v30  ;;  %v3122_v30 = vld [vmem:[%s6845_s5 + $0x40] sm:$0xff] }
 0x2ce   :  { %4816 = vmatprep.subr.bf16.mxu1 %v4815_v58 }
 0x2cf   :  { %v2452_v1 = vpop.permute.xlu1 %2451  ;;  %4818 = vmatpush3.bf16.msra.mxu1 %v4815_v58 }
 0x2d0   :  { %v2406_v43 = vpop.permute.xlu0 %2405  ;;  %2457 = vst.msk [vmem:[#allocation3 + $0x6e] sm:$0xff] %vm6873_vm6, %v2452_v1  ;;  %4691 = vmatprep.subr.mxu1 %v3122_v30 }
 0x2d1   :  { %2410 = vst.msk [vmem:[#allocation3 + $0x76] sm:$0x3] %vm1301_vm2, %v2406_v43 }
 0x2d3   :  { %v2430_v9 = vpop.permute.xlu1 %2429  ;;  %4692 = vmatpush3.msra.mxu1 %v3122_v30 }
 0x2d4   :  { %v2418_v49 = vpop.permute.xlu0 %2417 }
 0x2d5   :  { %2422 = vst.msk [vmem:[#allocation3 + $0x76] sm:$0x3] %vm6871_vm1, %v2418_v49 }
 0x2d6   :  { %2434 = vst.msk [vmem:[#allocation3 + $0x76] sm:$0x3] %vm1329_vm4, %v2430_v9  ;;  %vm6874_vm4 = vcmask 64512   ;;  %v6887_v9 = vmov 0.0|0.0  }
 0x2d7   :  { %v2454_v39 = vpop.permute.xlu1 %2453  ;;  %v2472_v53 = vld [vmem:[#allocation3 + $0x68] sm:$0xff]  ;;  %vm6877_vm12 = vmmov %vm6874_vm4  ;;  %4819 = vmatprep.subr.bf16.mxu1 %v6887_v9 }
 0x2d8   :  { %v2442_v31 = vpop.permute.xlu0 %2441  ;;  %4670 = vmatmul.mubr.msk.f32.gmra.mrb[64].mxu0 %vm2490_vm3, %v2472_v53  ;;  %vm6878_vm2 = vmmov %vm6874_vm4 }
 0x2d9   :  { %2446 = vst.msk [vmem:[#allocation3 + $0x76] sm:$0x3] %vm1343_vm9, %v2442_v31  ;;  %4672 = vmatprep.mubr.msk.f32.mxu0 %vm4948_vm10, %v6867_v57  ;;  %vm6876_vm9 = vmmov %vm6874_vm4 }
 0x2da   :  { %2458 = vst.msk [vmem:[#allocation3 + $0x76] sm:$0x3] %vm1357_vm7, %v2454_v39  ;;  %vm6875_vm7 = vmmov %vm6874_vm4 }
 0x2db   :  { %vm6879_vm5 = vmmov %vm6878_vm2 }
 0x2dc   :  { %vm6880_vm6 = vmmov %vm6878_vm2 }
 0x2dd   :  { %vm6881_vm1 = vmmov %vm6878_vm2 }
 0x2e1   :  { %v2473_v44 = vld [vmem:[#allocation3 + $0x70] sm:$0xff] }
 0x2e2   :  { %4673 = vmatmul.mubr.msk.f32.gmra.mrb[66].mxu0 %vm2490_vm3, %v2473_v44 }
 0x305   :  { %v2602_v50 = vpop.f32.mrb[38].mxu0 }
 0x306   :  { %v2603_v28 = vadd.f32 %v6288_v5, %v2602_v50  ;;  %v4632_v16 = vpop.f32.mrb[39].mxu0 }
 0x308   :  { %v2676_v19 = vmax.f32 %v2603_v28, 0.0 }
 0x30a   :  { %2691 = vst.msk [vmem:[#allocation4] sm:$0xff] %vm6874_vm4, %v2676_v19  ;;  %vm6882_vm4 = vcmask 72704  }
 0x30b   :  { %4609 = vmatprep.mubr.msk.f32.mxu1 %vm6882_vm4, %v4241_v21 }
 0x311   :  { %v2706_v24 = vld [vmem:[#allocation4] sm:$0xff] }
 0x312   :  { %2707 = vst.msk [vmem:[#allocation5] sm:$0xff] %vm6875_vm7, %v2706_v24  ;;  %vm6883_vm7 = vmmov %vm6882_vm4 }
 0x313   :  { %4610 = vmatmul.mubr.msk.f32.gmra.mrb[40].mxu1 %vm6883_vm7, %v4242_v7  ;;  %vm6890_vm4 = vmmov %vm6881_vm1 }
 0x314   :  { %vm6891_vm7 = vmmov %vm6881_vm1 }
 0x317   :  { %v2607_v40 = vpop.f32.mrb[40].mxu0 }
 0x318   :  { %v2608_v48 = vadd.f32 %v6288_v5, %v2607_v40  ;;  %v4635_v51 = vpop.f32.mrb[41].mxu0 }
 0x31a   :  { %v2677_v33 = vmax.f32 %v2608_v48, 0.0 }
 0x31c   :  { %2692 = vst.msk [vmem:[#allocation4 + $0x8] sm:$0xff] %vm6876_vm9, %v2677_v33  ;;  %vm6884_vm9 = vmmov %vm6881_vm1 }
 0x320   :  { %v2612_v32 = vpop.f32.mrb[42].mxu0 }
 0x321   :  { %v2613_v47 = vadd.f32 %v6288_v5, %v2612_v32  ;;  %v4638_v3 = vpop.f32.mrb[43].mxu0 }
 0x323   :  { %v2678_v8 = vmax.f32 %v2613_v47, 0.0  ;;  %v2714_v15 = vld [vmem:[#allocation4 + $0x2] sm:$0xff] }
 0x324   :  { %v2708_v54 = vld [vmem:[#allocation4 + $0x1] sm:$0xff]  ;;  %2716 = vrot.lane.b32.xlu1 %v2714_v15, %s4939_s29 }
 0x325   :  { %2693 = vst.msk [vmem:[#allocation4 + $0x10] sm:$0xff] %vm6877_vm12, %v2678_v8  ;;  %2710 = vrot.lane.b32.xlu0 %v2708_v54, %s4940_s30  ;;  %vm6885_vm12 = vmmov %vm6881_vm1 }
 0x32c   :  { %v2617_v4 = vpop.f32.mrb[44].mxu0  ;;  %v2758_v60 = vld [vmem:[#allocation4 + $0xb] sm:$0xff] }
 0x32d   :  { %v2720_v26 = vld [vmem:[#allocation4 + $0xa] sm:$0xff]  ;;  %v2618_v41 = vadd.f32 %v6288_v5, %v2617_v4  ;;  %2760 = vrot.lane.b32.xlu0 %v2758_v60, %s4940_s30  ;;  %v4641_v46 = vpop.f32.mrb[45].mxu0 }
 0x32e   :  { %2722 = vrot.lane.b32.xlu1 %v2720_v26, %s4944_s2  ;;  %2757 = vst.msk [vmem:[#allocation5 + $0x8] sm:$0xff] %vm6878_vm2, %v2720_v26  ;;  %v2764_v34 = vld [vmem:[#allocation4 + $0xc] sm:$0xff]  ;;  %vm6886_vm2 = vmmov %vm6881_vm1 }
 0x32f   :  { %v2679_v55 = vmax.f32 %v2618_v41, 0.0 }
 0x331   :  { %2694 = vst.msk [vmem:[#allocation4 + $0x18] sm:$0xff] %vm6879_vm5, %v2679_v55  ;;  %2766 = vrot.lane.b32.xlu0 %v2764_v34, %s4939_s29  ;;  %vm6888_vm5 = vmmov %vm6881_vm1 }
 0x332   :  { %2728 = vrot.lane.b32.xlu1 %v2758_v60, %s4947_s19 }
 0x336   :  { %2734 = vrot.lane.b32.xlu1 %v2764_v34, %s4945_s18 }
 0x338   :  { %v2808_v38 = vld [vmem:[#allocation4 + $0x15] sm:$0xff] }
 0x339   :  { %v2770_v22 = vld [vmem:[#allocation4 + $0x14] sm:$0xff] }
 0x33a   :  { %2810 = vrot.lane.b32.xlu1 %v2808_v38, %s4940_s30  ;;  %2772 = vrot.lane.b32.xlu0 %v2770_v22, %s4944_s2  ;;  %2807 = vst.msk [vmem:[#allocation5 + $0x10] sm:$0xff] %vm6880_vm6, %v2770_v22  ;;  %v2782_v61 = vld [vmem:[#allocation4 + $0x16] sm:$0xff]  ;;  %vm6889_vm6 = vmmov %vm6881_vm1 }
 0x33e   :  { %2784 = vrot.lane.b32.xlu1 %v2782_v61, %s4945_s18  ;;  %2778 = vrot.lane.b32.xlu0 %v2808_v38, %s4947_s19 }
 0x342   :  { %2740 = vrot.lane.b32.xlu0 %v2770_v22, %s4941_s14 }
 0x344   :  { %v2622_v56 = vpop.f32.mrb[46].mxu0 }
 0x345   :  { %v2623_v25 = vadd.f32 %v6288_v5, %v2622_v56  ;;  %v4644_v10 = vpop.f32.mrb[47].mxu0 }
 0x346   :  { %2816 = vrot.lane.b32.xlu0 %v2782_v61, %s4939_s29 }
 0x347   :  { %v2680_v29 = vmax.f32 %v2623_v25, 0.0 }
 0x348   :  { %v2627_v62 = vpop.f32.mrb[48].mxu0 }
 0x349   :  { %2695 = vst.msk [vmem:[#allocation4 + $0x20] sm:$0xff] %vm6881_vm1, %v2680_v29  ;;  %v2628_v27 = vadd.f32 %v6288_v5, %v2627_v62  ;;  %v4647_v45 = vpop.f32.mrb[49].mxu0 }
 0x34a   :  { %2746 = vrot.lane.b32.xlu0 %v2808_v38, %s4943_s16 }
 0x34b   :  { %v2681_v35 = vmax.f32 %v2628_v27, 0.0 }
 0x34c   :  { %v2632_v59 = vpop.f32.mrb[50].mxu0 }
 0x34d   :  { %2696 = vst.msk [vmem:[#allocation4 + $0x28] sm:$0xff] %vm6884_vm9, %v2681_v35  ;;  %v2633_v20 = vadd.f32 %v6288_v5, %v2632_v59  ;;  %v4650_v37 = vpop.f32.mrb[51].mxu0  ;;  %vm6892_vm9 = vmmov %vm6881_vm1 }
 0x34e   :  { %2752 = vrot.lane.b32.xlu0 %v2782_v61, %s4942_s15 }
 0x34f   :  { %v2682_v11 = vmax.f32 %v2633_v20, 0.0 }
 0x350   :  { %v2858_v36 = vld [vmem:[#allocation4 + $0x1f] sm:$0xff] }
 0x351   :  { %v2820_v17 = vld [vmem:[#allocation4 + $0x1e] sm:$0xff]  ;;  %2697 = vst.msk [vmem:[#allocation4 + $0x30] sm:$0xff] %vm6885_vm12, %v2682_v11  ;;  %2860 = vrot.lane.b32.xlu1 %v2858_v36, %s4940_s30  ;;  %vm6893_vm12 = vmmov %vm6881_vm1 }
 0x352   :  { %2857 = vst.msk [vmem:[#allocation5 + $0x18] sm:$0xff] %vm6886_vm2, %v2820_v17  ;;  %2822 = vrot.lane.b32.xlu0 %v2820_v17, %s4944_s2  ;;  %v2864_v1 = vld [vmem:[#allocation4 + $0x20] sm:$0xff]  ;;  %vm6894_vm2 = vmmov %vm6881_vm1 }
 0x354   :  { %v2838_v53 = vld [vmem:[#allocation4 + $0x28] sm:$0xff] }
 0x355   :  { %2790 = vrot.lane.b32.xlu1 %v2820_v17, %s4941_s14 }
 0x356   :  { %2828 = vrot.lane.b32.xlu0 %v2858_v36, %s4947_s19 }
 0x357   :  { %v2637_v43 = vpop.f32.mrb[52].mxu0 }
 0x358   :  { %v2638_v49 = vadd.f32 %v6288_v5, %v2637_v43  ;;  %v4653_v39 = vpop.f32.mrb[53].mxu0  ;;  %v2876_v19 = vld [vmem:[#allocation4 + $0x29] sm:$0xff] }
 0x359   :  { %2866 = vrot.lane.b32.xlu1 %v2864_v1, %s4939_s29  ;;  %v2882_v24 = vld [vmem:[#allocation4 + $0x2a] sm:$0xff] }
 0x35a   :  { %2802 = vrot.lane.b32.xlu0 %v2864_v1, %s4942_s15  ;;  %v2683_v31 = vmax.f32 %v2638_v49, 0.0 }
 0x35c   :  { %v2642_v44 = vpop.f32.mrb[54].mxu0  ;;  %2698 = vst.msk [vmem:[#allocation4 + $0x38] sm:$0xff] %vm6888_vm5, %v2683_v31  ;;  %vm6895_vm5 = vcmask 195712  }
 0x35d   :  { %2796 = vrot.lane.b32.xlu1 %v2858_v36, %s4943_s16  ;;  %v2643_v50 = vadd.f32 %v6288_v5, %v2642_v44  ;;  %v4656_v28 = vpop.f32.mrb[55].mxu0 }
 0x35e   :  { %2840 = vrot.lane.b32.xlu0 %v2838_v53, %s4941_s14 }
 0x35f   :  { %v2684_v16 = vmax.f32 %v2643_v50, 0.0 }
 0x361   :  { %2834 = vrot.lane.b32.xlu1 %v2864_v1, %s4945_s18  ;;  %2699 = vst.msk [vmem:[#allocation4 + $0x40] sm:$0xff] %vm6889_vm6, %v2684_v16  ;;  %vm6896_vm6 = vmmov %vm6881_vm1 }
 0x362   :  { %2878 = vrot.lane.b32.xlu0 %v2876_v19, %s4947_s19 }
 0x363   :  { %v2888_v48 = vld [vmem:[#allocation4 + $0x32] sm:$0xff] }
 0x364   :  { %v2900_v3 = vld [vmem:[#allocation4 + $0x34] sm:$0xff] }
 0x365   :  { %2872 = vrot.lane.b32.xlu1 %v2838_v53, %s4944_s2  ;;  %v2894_v15 = vld [vmem:[#allocation4 + $0x33] sm:$0xff] }
 0x366   :  { %2846 = vrot.lane.b32.xlu0 %v2876_v19, %s4943_s16 }
 0x368   :  { %v2906_v51 = vld [vmem:[#allocation4 + $0x3c] sm:$0xff] }
 0x369   :  { %2884 = vrot.lane.b32.xlu1 %v2882_v24, %s4945_s18  ;;  %2907 = vst.msk [vmem:[#allocation5 + $0x20] sm:$0xff] %vm6881_vm1, %v2906_v51  ;;  %v2914_v26 = vld [vmem:[#allocation4 + $0x3e] sm:$0xff] }
 0x36a   :  { %2852 = vrot.lane.b32.xlu0 %v2882_v24, %s4942_s15  ;;  %v2908_v41 = vld [vmem:[#allocation4 + $0x3d] sm:$0xff] }
 0x36c   :  { %v2647_v40 = vpop.f32.mrb[56].mxu0 }
 0x36d   :  { %v2648_v33 = vadd.f32 %v6288_v5, %v2647_v40  ;;  %2890 = vrot.lane.b32.xlu1 %v2888_v48, %s4941_s14  ;;  %v4659_v32 = vpop.f32.mrb[57].mxu0 }
 0x36e   :  { %2902 = vrot.lane.b32.xlu0 %v2900_v3, %s4942_s15 }
 0x36f   :  { %v2685_v47 = vmax.f32 %v2648_v33, 0.0 }
 0x370   :  { %v2652_v8 = vpop.f32.mrb[58].mxu0 }
 0x371   :  { %2700 = vst.msk [vmem:[#allocation4 + $0x48] sm:$0xff] %vm6890_vm4, %v2685_v47  ;;  %v2653_v54 = vadd.f32 %v6288_v5, %v2652_v8  ;;  %2896 = vrot.lane.b32.xlu1 %v2894_v15, %s4943_s16  ;;  %v4662_v4 = vpop.f32.mrb[59].mxu0  ;;  %vm6897_vm4 = vmmov %vm6895_vm5 }
 0x372   :  { %2916 = vrot.lane.b32.xlu0 %v2914_v26, %s4939_s29 }
 0x373   :  { %v2686_v60 = vmax.f32 %v2653_v54, 0.0 }
 0x375   :  { %2701 = vst.msk [vmem:[#allocation4 + $0x50] sm:$0xff] %vm6891_vm7, %v2686_v60  ;;  %2910 = vrot.lane.b32.xlu1 %v2908_v41, %s4940_s30  ;;  %v2657_v46 = vpop.f32.mrb[60].mxu0  ;;  %vm6898_vm7 = vmmov %vm6881_vm1 }
 0x376   :  { %v2658_v38 = vadd.f32 %v6288_v5, %v2657_v46  ;;  %v4665_v22 = vpop.f32.mrb[61].mxu0 }
 0x378   :  { %v2958_v55 = vld [vmem:[#allocation4 + $0x47] sm:$0xff]  ;;  %v2687_v61 = vmax.f32 %v2658_v38, 0.0 }
 0x379   :  { %v2920_v34 = vld [vmem:[#allocation4 + $0x46] sm:$0xff]  ;;  %2960 = vrot.lane.b32.xlu1 %v2958_v55, %s4940_s30 }
 0x37a   :  { %2922 = vrot.lane.b32.xlu0 %v2920_v34, %s4944_s2  ;;  %2957 = vst.msk [vmem:[#allocation5 + $0x28] sm:$0xff] %vm6892_vm9, %v2920_v34  ;;  %v2964_v56 = vld [vmem:[#allocation4 + $0x48] sm:$0xff]  ;;  %vm6899_vm9 = vmmov %vm6897_vm4 }
 0x37b   :  { %2702 = vst.msk [vmem:[#allocation4 + $0x58] sm:$0xff] %vm6893_vm12, %v2687_v61  ;;  %vm6900_vm12 = vmmov %vm6881_vm1 }
 0x37c   :  { %v2970_v25 = vld [vmem:[#allocation4 + $0x50] sm:$0xff] }
 0x37d   :  { %2966 = vrot.lane.b32.xlu1 %v2964_v56, %s4939_s29  ;;  %3007 = vst.msk [vmem:[#allocation5 + $0x30] sm:$0xff] %vm6894_vm2, %v2970_v25  ;;  %vm6901_vm2 = vcmask 589312  }
 0x37e   :  { %2928 = vrot.lane.b32.xlu0 %v2958_v55, %s4947_s19 }
 0x381   :  { %2934 = vrot.lane.b32.xlu1 %v2964_v56, %s4945_s18 }
 0x382   :  { %v2976_v10 = vld [vmem:[#allocation4 + $0x51] sm:$0xff] }
 0x383   :  { %2978 = vrot.lane.b32.xlu0 %v2976_v10, %s4947_s19  ;;  %v2982_v29 = vld [vmem:[#allocation4 + $0x52] sm:$0xff] }
 0x385   :  { %2972 = vrot.lane.b32.xlu1 %v2970_v25, %s4944_s2 }
 0x387   :  { %2984 = vrot.lane.b32.xlu0 %v2982_v29, %s4945_s18 }
 0x389   :  { %2940 = vrot.lane.b32.xlu1 %v2970_v25, %s4941_s14 }
 0x38b   :  { %2946 = vrot.lane.b32.xlu0 %v2976_v10, %s4943_s16 }
 0x38d   :  { %3010 = vrot.lane.b32.xlu1 %v2976_v10, %s4940_s30 }
 0x38f   :  { %3016 = vrot.lane.b32.xlu0 %v2982_v29, %s4939_s29 }
 0x393   :  { %2952 = vrot.lane.b32.xlu0 %v2982_v29, %s4942_s15 }
 0x394   :  { %v2662_v13 = vpop.f32.mrb[62].mxu0 }
 0x395   :  { %v2663_v18 = vadd.f32 %v6288_v5, %v2662_v13  ;;  %v4668_v62 = vpop.f32.mrb[63].mxu0 }
 0x396   :  { %v2717_v14 = vpop.permute.xlu1 %2716 }
 0x397   :  { %v2711_v21 = vpop.permute.xlu0 %2710  ;;  %v2688_v27 = vmax.f32 %v2663_v18, 0.0 }
 0x398   :  { %2713 = vst.msk [vmem:[#allocation5] sm:$0xff] %vm1257_vm8, %v2711_v21 }
 0x399   :  { %2719 = vst.msk [vmem:[#allocation5] sm:$0xff] %vm6895_vm5, %v2717_v14  ;;  %vm6902_vm5 = vmmov %vm6897_vm4 }
 0x39a   :  { %2703 = vst.msk [vmem:[#allocation4 + $0x60] sm:$0xff] %vm6896_vm6, %v2688_v27  ;;  %vm6903_vm6 = vmmov %vm6901_vm2 }
 0x39f   :  { %v2761_v45 = vpop.permute.xlu0 %2760 }
 0x3a0   :  { %v2723_v7 = vpop.permute.xlu1 %2722  ;;  %2763 = vst.msk [vmem:[#allocation5 + $0x8] sm:$0xff] %vm1257_vm8, %v2761_v45 }
 0x3a1   :  { %2725 = vst.msk [vmem:[#allocation5] sm:$0xff] %vm1285_vm11, %v2723_v7  ;;  %v3020_v35 = vld [vmem:[#allocation4 + $0x5a] sm:$0xff] }
 0x3a2   :  { %3022 = vrot.lane.b32.xlu0 %v3020_v35, %s4944_s2  ;;  %2990 = vrot.lane.b32.xlu1 %v3020_v35, %s4941_s14  ;;  %3057 = vst.msk [vmem:[#allocation5 + $0x38] sm:$0xff] %vm6881_vm1, %v3020_v35  ;;  %v3000_v59 = vld [vmem:[#allocation4 + $0x5c] sm:$0xff]  ;;  %vm6904_vm1 = vmmov %vm6901_vm2 }
 0x3a3   :  { %v2767_v12 = vpop.permute.xlu0 %2766  ;;  %v3058_v0 = vld [vmem:[#allocation4 + $0x5b] sm:$0xff] }
 0x3a4   :  { %v2729_v23 = vpop.permute.xlu1 %2728  ;;  %2769 = vst.msk [vmem:[#allocation5 + $0x8] sm:$0xff] %vm6897_vm4, %v2767_v12  ;;  %vm6905_vm4 = vmmov %vm6904_vm1 }
 0x3a5   :  { %2731 = vst.msk [vmem:[#allocation5] sm:$0xff] %vm1299_vm13, %v2729_v23 }
 0x3a6   :  { %3002 = vrot.lane.b32.xlu0 %v3000_v59, %s4942_s15  ;;  %3060 = vrot.lane.b32.xlu1 %v3058_v0, %s4940_s30 }
 0x3a8   :  { %v2735_v20 = vpop.permute.xlu1 %2734 }
 0x3a9   :  { %2737 = vst.msk [vmem:[#allocation5] sm:$0xff] %vm1313_vm14, %v2735_v20 }
 0x3aa   :  { %2996 = vrot.lane.b32.xlu1 %v3058_v0, %s4943_s16 }
 0x3ab   :  { %v2667_v42 = vpop.f32.mrb[64].mxu0 }
 0x3ac   :  { %v2811_v37 = vpop.permute.xlu1 %2810  ;;  %v2773_v6 = vpop.permute.xlu0 %2772  ;;  %v2668_v11 = vadd.f32 %v6288_v5, %v2667_v42 }
 0x3ad   :  { %2813 = vst.msk [vmem:[#allocation5 + $0x10] sm:$0xff] %vm1257_vm8, %v2811_v37  ;;  %v4671_v2 = vpop.f32.mrb[65].mxu0 }
 0x3ae   :  { %2775 = vst.msk [vmem:[#allocation5 + $0x8] sm:$0xff] %vm1285_vm11, %v2773_v6  ;;  %3066 = vrot.lane.b32.xlu1 %v3000_v59, %s4939_s29  ;;  %v2689_v63 = vmax.f32 %v2668_v11, 0.0 }
 0x3b0   :  { %v2785_v36 = vpop.permute.xlu1 %2784  ;;  %v2779_v17 = vpop.permute.xlu0 %2778  ;;  %2704 = vst.msk [vmem:[#allocation4 + $0x68] sm:$0xff] %vm6898_vm7, %v2689_v63  ;;  %vm6906_vm7 = vmmov %vm6902_vm5 }
 0x3b1   :  { %2781 = vst.msk [vmem:[#allocation5 + $0x8] sm:$0xff] %vm1299_vm13, %v2779_v17 }
 0x3b2   :  { %2787 = vst.msk [vmem:[#allocation5 + $0x8] sm:$0xff] %vm1313_vm14, %v2785_v36  ;;  %3028 = vrot.lane.b32.xlu1 %v3058_v0, %s4947_s19 }
 0x3b4   :  { %v2741_v52 = vpop.permute.xlu0 %2740 }
 0x3b5   :  { %2743 = vst.msk [vmem:[#allocation5] sm:$0xff] %vm1327_vm15, %v2741_v52  ;;  %v2672_v58 = vpop.f32.mrb[66].mxu0 }
 0x3b6   :  { %3034 = vrot.lane.b32.xlu1 %v3000_v59, %s4945_s18  ;;  %v2673_v30 = vadd.f32 %v6288_v5, %v2672_v58  ;;  %v4674_v43 = vpop.f32.mrb[67].mxu0 }
 0x3b7   :  { %v3070_v39 = vld [vmem:[#allocation4 + $0x64] sm:$0xff] }
 0x3b8   :  { %v2817_v1 = vpop.permute.xlu0 %2816  ;;  %v2690_v49 = vmax.f32 %v2673_v30, 0.0  ;;  %3072 = vrot.lane.b32.xlu0 %v3070_v39, %s4944_s2  ;;  %v3076_v53 = vld [vmem:[#allocation4 + $0x65] sm:$0xff] }
 0x3b9   :  { %2819 = vst.msk [vmem:[#allocation5 + $0x10] sm:$0xff] %vm6899_vm9, %v2817_v1  ;;  %v3082_v50 = vld [vmem:[#allocation4 + $0x66] sm:$0xff]  ;;  %vm6907_vm9 = vmmov %vm6902_vm5 }
 0x3ba   :  { %3040 = vrot.lane.b32.xlu1 %v3070_v39, %s4941_s14  ;;  %2705 = vst.msk [vmem:[#allocation4 + $0x70] sm:$0xff] %vm6900_vm12, %v2690_v49  ;;  %vm6908_vm12 = vmmov %vm6902_vm5 }
 0x3bc   :  { %v2747_v31 = vpop.permute.xlu0 %2746  ;;  %3078 = vrot.lane.b32.xlu0 %v3076_v53, %s4947_s19 }
 0x3bd   :  { %2749 = vst.msk [vmem:[#allocation5] sm:$0xff] %vm1341_vm0, %v2747_v31 }
 0x3be   :  { %3046 = vrot.lane.b32.xlu1 %v3076_v53, %s4943_s16 }
 0x3c0   :  { %v2753_v5 = vpop.permute.xlu0 %2752  ;;  %3084 = vrot.lane.b32.xlu0 %v3082_v50, %s4945_s18 }
 0x3c1   :  { %2755 = vst.msk [vmem:[#allocation5] sm:$0xff] %vm6901_vm2, %v2753_v5  ;;  %v3100_v19 = vld [vmem:[#allocation4 + $0x70] sm:$0xff]  ;;  %vm6909_vm2 = vmmov %vm6904_vm1 }
 0x3c2   :  { %3052 = vrot.lane.b32.xlu1 %v3082_v50, %s4942_s15  ;;  %v3088_v24 = vld [vmem:[#allocation4 + $0x6e] sm:$0xff]  ;;  %v6505_v50 = vld [vmem:[%s6846_s6] ss:$0 sm:$0xff] }
 0x3c3   :  { %v2861_v44 = vpop.permute.xlu1 %2860  ;;  %v3094_v33 = vld [vmem:[#allocation4 + $0x6f] sm:$0xff] }
 0x3c4   :  { %2863 = vst.msk [vmem:[#allocation5 + $0x18] sm:$0xff] %vm1257_vm8, %v2861_v44  ;;  %v2823_v28 = vpop.permute.xlu0 %2822  ;;  %3090 = vrot.lane.b32.xlu0 %v3088_v24, %s4941_s14 }
 0x3c5   :  { %2825 = vst.msk [vmem:[#allocation5 + $0x10] sm:$0xff] %vm1285_vm11, %v2823_v28 }
 0x3c6   :  { %3102 = vrot.lane.b32.xlu1 %v3100_v19, %s4942_s15 }
 0x3c7   :  { %v2791_v16 = vpop.permute.xlu1 %2790 }
 0x3c8   :  { %2793 = vst.msk [vmem:[#allocation5 + $0x8] sm:$0xff] %vm1327_vm15, %v2791_v16  ;;  %v2829_v40 = vpop.permute.xlu0 %2828  ;;  %v3106_v48 = vld [vmem:[#allocation5] sm:$0xff]  ;;  %3096 = vrot.lane.b32.xlu0 %v3094_v33, %s4943_s16 }
 0x3c9   :  { %2831 = vst.msk [vmem:[#allocation5 + $0x10] sm:$0xff] %vm1299_vm13, %v2829_v40  ;;  %4693 = vmatprep.mubr.msk.f32.mxu1 %vm2490_vm3, %v3106_v48 }
 0x3cb   :  { %v2867_v51 = vpop.permute.xlu1 %2866 }
 0x3cc   :  { %2869 = vst.msk [vmem:[#allocation5 + $0x18] sm:$0xff] %vm6902_vm5, %v2867_v51  ;;  %v2803_v32 = vpop.permute.xlu0 %2802  ;;  %vm6910_vm5 = vmmov %vm6904_vm1 }
 0x3cf   :  { %v2797_v47 = vpop.permute.xlu1 %2796 }
 0x3d0   :  { %2799 = vst.msk [vmem:[#allocation5 + $0x8] sm:$0xff] %vm1341_vm0, %v2797_v47  ;;  %v2841_v3 = vpop.permute.xlu0 %2840 }
 0x3d1   :  { %2805 = vst.msk [vmem:[#allocation5 + $0x8] sm:$0xff] %vm6903_vm6, %v2803_v32  ;;  %vm6911_vm6 = vmmov %vm6906_vm7 }
 0x3d3   :  { %v2835_v8 = vpop.permute.xlu1 %2834 }
 0x3d4   :  { %2837 = vst.msk [vmem:[#allocation5 + $0x10] sm:$0xff] %vm1313_vm14, %v2835_v8  ;;  %v2879_v15 = vpop.permute.xlu0 %2878 }
 0x3d5   :  { %2843 = vst.msk [vmem:[#allocation5 + $0x10] sm:$0xff] %vm1327_vm15, %v2841_v3 }
 0x3d7   :  { %v2873_v54 = vpop.permute.xlu1 %2872 }
 0x3d8   :  { %2875 = vst.msk [vmem:[#allocation5 + $0x18] sm:$0xff] %vm1285_vm11, %v2873_v54  ;;  %v3107_v4 = vld [vmem:[#allocation5 + $0x8] sm:$0xff]  ;;  %v2847_v60 = vpop.permute.xlu0 %2846 }
 0x3d9   :  { %2881 = vst.msk [vmem:[#allocation5 + $0x18] sm:$0xff] %vm1299_vm13, %v2879_v15  ;;  %4694 = vmatmul.mubr.msk.f32.vlgmr.msra.gmra.mrb[42].mxu1 %vm2490_vm3, %v3107_v4 }
 0x3da   :  { %2849 = vst.msk [vmem:[#allocation5 + $0x10] sm:$0xff] %vm1341_vm0, %v2847_v60 }
 0x3db   :  { %v2885_v26 = vpop.permute.xlu1 %2884 }
 0x3dc   :  { %2887 = vst.msk [vmem:[#allocation5 + $0x18] sm:$0xff] %vm1313_vm14, %v2885_v26  ;;  %v2853_v41 = vpop.permute.xlu0 %2852 }
 0x3dd   :  { %2855 = vst.msk [vmem:[#allocation5 + $0x10] sm:$0xff] %vm6904_vm1, %v2853_v41 }
 0x3df   :  { %v2891_v46 = vpop.permute.xlu1 %2890 }
 0x3e0   :  { %2893 = vst.msk [vmem:[#allocation5 + $0x18] sm:$0xff] %vm1327_vm15, %v2891_v46  ;;  %v2903_v55 = vpop.permute.xlu0 %2902 }
 0x3e3   :  { %v2897_v34 = vpop.permute.xlu1 %2896 }
 0x3e4   :  { %2899 = vst.msk [vmem:[#allocation5 + $0x18] sm:$0xff] %vm1341_vm0, %v2897_v34  ;;  %v2917_v38 = vpop.permute.xlu0 %2916  ;;  %v3108_v22 = vld [vmem:[#allocation5 + $0x10] sm:$0xff] }
 0x3e5   :  { %2905 = vst.msk [vmem:[#allocation5 + $0x18] sm:$0xff] %vm6905_vm4, %v2903_v55  ;;  %4696 = vmatprep.mubr.msk.f32.mxu1 %vm2490_vm3, %v3108_v22  ;;  %v3488_v22 = vld [vmem:[%s6847_s7 + $0x8] sm:$0xff] }
 0x3e6   :  { %v4611_v37 = vpop.f32.mrb[40].mxu1 }
 0x3e7   :  { %v2911_v61 = vpop.permute.xlu1 %2910  ;;  %v1193_v6 = vpop.f32.mrb[41].mxu1 }
 0x3e8   :  { %2913 = vst.msk [vmem:[#allocation5 + $0x20] sm:$0xff] %vm1257_vm8, %v2911_v61 }
 0x3e9   :  { %2919 = vst.msk [vmem:[#allocation5 + $0x20] sm:$0xff] %vm6906_vm7, %v2917_v38  ;;  %v3487_v38 = vld [vmem:[%s6847_s7] sm:$0xff] }
 0x3ea   :  { %v4820_v61 = vpack.c.bf16 %v3488_v22, %v3487_v38 }
 0x3eb   :  { %v2961_v56 = vpop.permute.xlu1 %2960 }
 0x3ec   :  { %v2923_v25 = vpop.permute.xlu0 %2922  ;;  %2963 = vst.msk [vmem:[#allocation5 + $0x28] sm:$0xff] %vm1257_vm8, %v2961_v56  ;;  %v3109_v10 = vld [vmem:[#allocation5 + $0x18] sm:$0xff]  ;;  %4821 = vmatpush3.bf16.msra.mxu1 %v4820_v61 }
 0x3ed   :  { %2925 = vst.msk [vmem:[#allocation5 + $0x20] sm:$0xff] %vm1285_vm11, %v2923_v25  ;;  %4697 = vmatmul.mubr.msk.f32.gmra.mrb[44].mxu1 %vm2490_vm3, %v3109_v10  ;;  %4822 = vmatprep.subr.bf16.mxu1 %v6887_v9  ;;  %v3489_v10 = vld [vmem:[%s6847_s7 + $0x10] sm:$0xff] }
 0x3ef   :  { %v2967_v29 = vpop.permute.xlu1 %2966 }
 0x3f0   :  { %v2929_v13 = vpop.permute.xlu0 %2928  ;;  %2969 = vst.msk [vmem:[#allocation5 + $0x28] sm:$0xff] %vm6907_vm9, %v2967_v29  ;;  %v3490_v29 = vld [vmem:[%s6847_s7 + $0x18] sm:$0xff] }
 0x3f1   :  { %2931 = vst.msk [vmem:[#allocation5 + $0x20] sm:$0xff] %vm1299_vm13, %v2929_v13 }
 0x3f3   :  { %v2935_v18 = vpop.permute.xlu1 %2934 }
 0x3f4   :  { %2937 = vst.msk [vmem:[#allocation5 + $0x20] sm:$0xff] %vm1313_vm14, %v2935_v18 }
 0x3f5   :  { %v2979_v14 = vpop.permute.xlu0 %2978 }
 0x3f7   :  { %v2973_v62 = vpop.permute.xlu1 %2972 }
 0x3f8   :  { %2975 = vst.msk [vmem:[#allocation5 + $0x28] sm:$0xff] %vm1285_vm11, %v2973_v62  ;;  %v4823_v62 = vpack.c.bf16 %v3490_v29, %v3489_v10 }
 0x3f9   :  { %2981 = vst.msk [vmem:[#allocation5 + $0x28] sm:$0xff] %vm1299_vm13, %v2979_v14  ;;  %v2985_v27 = vpop.permute.xlu0 %2984  ;;  %v3491_v14 = vld [vmem:[%s6847_s7 + $0x20] sm:$0xff] }
 0x3fa   :  { %2987 = vst.msk [vmem:[#allocation5 + $0x28] sm:$0xff] %vm1313_vm14, %v2985_v27  ;;  %4824 = vmatpush3.bf16.msra.mxu1 %v4823_v62 }
 0x3fb   :  { %v2941_v21 = vpop.permute.xlu1 %2940  ;;  %4825 = vmatprep.subr.bf16.mxu1 %v6887_v9 }
 0x3fc   :  { %2943 = vst.msk [vmem:[#allocation5 + $0x20] sm:$0xff] %vm1327_vm15, %v2941_v21  ;;  %v3492_v21 = vld [vmem:[%s6847_s7 + $0x28] sm:$0xff] }
 0x3fd   :  { %v2947_v7 = vpop.permute.xlu0 %2946  ;;  %v4826_v27 = vpack.c.bf16 %v3492_v21, %v3491_v14 }
 0x3fe   :  { %2949 = vst.msk [vmem:[#allocation5 + $0x20] sm:$0xff] %vm1341_vm0, %v2947_v7 }
 0x3ff   :  { %v3011_v45 = vpop.permute.xlu1 %3010  ;;  %4827 = vmatpush3.bf16.msra.mxu1 %v4826_v27 }
 0x400   :  { %3013 = vst.msk [vmem:[#allocation5 + $0x30] sm:$0xff] %vm1257_vm8, %v3011_v45  ;;  %4828 = vmatprep.subr.bf16.mxu1 %v6887_v9 }
 0x401   :  { %v3017_v35 = vpop.permute.xlu0 %3016 }
 0x402   :  { %3019 = vst.msk [vmem:[#allocation5 + $0x30] sm:$0xff] %vm6908_vm12, %v3017_v35  ;;  %v3493_v35 = vld [vmem:[%s6847_s7 + $0x30] sm:$0xff] }
 0x405   :  { %v2953_v12 = vpop.permute.xlu0 %2952 }
 0x406   :  { %2955 = vst.msk [vmem:[#allocation5 + $0x20] sm:$0xff] %vm6909_vm2, %v2953_v12  ;;  %v3494_v12 = vld [vmem:[%s6847_s7 + $0x38] sm:$0xff]  ;;  %vm3283_vm2 = vcmask 128064  }
 0x40d   :  { %v3110_v23 = vld [vmem:[#allocation5 + $0x20] sm:$0xff] }
 0x40e   :  { %4699 = vmatprep.mubr.msk.f32.mxu1 %vm2490_vm3, %v3110_v23  ;;  %v4829_v23 = vpack.c.bf16 %v3494_v12, %v3493_v35 }
 0x410   :  { %4830 = vmatpush3.bf16.msra.mxu1 %v4829_v23 }
 0x411   :  { %4721 = vmatprep.subr.mxu1 %v6867_v57 }
 0x414   :  { %v3023_v59 = vpop.permute.xlu0 %3022  ;;  %v2991_v0 = vpop.permute.xlu1 %2990 }
 0x415   :  { %3025 = vst.msk [vmem:[#allocation5 + $0x30] sm:$0xff] %vm1285_vm11, %v3023_v59 }
 0x416   :  { %2993 = vst.msk [vmem:[#allocation5 + $0x28] sm:$0xff] %vm1327_vm15, %v2991_v0  ;;  %v3495_v0 = vld [vmem:[%s6847_s7 + $0x40] sm:$0xff] }
 0x417   :  { %4722 = vmatpush3.msra.mxu1 %v3495_v0 }
 0x418   :  { %v3061_v20 = vpop.permute.xlu1 %3060  ;;  %v3003_v11 = vpop.permute.xlu0 %3002  ;;  %4867 = vmatprep.subr.bf16.mxu1 %v6887_v9 }
 0x419   :  { %3063 = vst.msk [vmem:[#allocation5 + $0x38] sm:$0xff] %vm1257_vm8, %v3061_v20  ;;  %vm6912_vm8 = vmmov %vm6904_vm1 }
 0x41c   :  { %v2997_v42 = vpop.permute.xlu1 %2996 }
 0x41d   :  { %2999 = vst.msk [vmem:[#allocation5 + $0x28] sm:$0xff] %vm1341_vm0, %v2997_v42 }
 0x41e   :  { %3005 = vst.msk [vmem:[#allocation5 + $0x28] sm:$0xff] %vm6910_vm5, %v3003_v11  ;;  %vm3290_vm5 = vcmask 193664  }
 0x420   :  { %v3067_v2 = vpop.permute.xlu1 %3066 }
 0x421   :  { %3069 = vst.msk [vmem:[#allocation5 + $0x38] sm:$0xff] %vm6911_vm6, %v3067_v2  ;;  %vm3297_vm6 = vcmask 259264  }
 0x424   :  { %v3029_v36 = vpop.permute.xlu1 %3028 }
 0x425   :  { %3031 = vst.msk [vmem:[#allocation5 + $0x30] sm:$0xff] %vm1299_vm13, %v3029_v36  ;;  %v3111_v17 = vld [vmem:[#allocation5 + $0x28] sm:$0xff] }
 0x426   :  { %4700 = vmatmul.mubr.msk.f32.gmra.mrb[46].mxu1 %vm2490_vm3, %v3111_v17 }
 0x428   :  { %v3035_v63 = vpop.permute.xlu1 %3034 }
 0x429   :  { %3037 = vst.msk [vmem:[#allocation5 + $0x30] sm:$0xff] %vm1313_vm14, %v3035_v63 }
 0x42a   :  { %v3073_v52 = vpop.permute.xlu0 %3072 }
 0x42b   :  { %3075 = vst.msk [vmem:[#allocation5 + $0x38] sm:$0xff] %vm1285_vm11, %v3073_v52  ;;  %vm6913_vm11 = vmmov %vm6904_vm1 }
 0x42c   :  { %v3041_v58 = vpop.permute.xlu1 %3040 }
 0x42d   :  { %3043 = vst.msk [vmem:[#allocation5 + $0x30] sm:$0xff] %vm1327_vm15, %v3041_v58 }
 0x42e   :  { %v3079_v30 = vpop.permute.xlu0 %3078 }
 0x42f   :  { %3081 = vst.msk [vmem:[#allocation5 + $0x38] sm:$0xff] %vm1299_vm13, %v3079_v30  ;;  %vm6914_vm13 = vcmask 64512  }
 0x430   :  { %v3047_v1 = vpop.permute.xlu1 %3046 }
 0x431   :  { %3049 = vst.msk [vmem:[#allocation5 + $0x30] sm:$0xff] %vm1341_vm0, %v3047_v1 }
 0x432   :  { %v3085_v43 = vpop.permute.xlu0 %3084 }
 0x433   :  { %3087 = vst.msk [vmem:[#allocation5 + $0x38] sm:$0xff] %vm1313_vm14, %v3085_v43  ;;  %vm6915_vm14 = vmmov %vm6914_vm13 }
 0x434   :  { %v3053_v49 = vpop.permute.xlu1 %3052 }
 0x435   :  { %3055 = vst.msk [vmem:[#allocation5 + $0x30] sm:$0xff] %vm6912_vm8, %v3053_v49  ;;  %vm3304_vm8 = vcmask 324864  }
 0x436   :  { %v3091_v39 = vpop.permute.xlu0 %3090 }
 0x437   :  { %3093 = vst.msk [vmem:[#allocation5 + $0x38] sm:$0xff] %vm1327_vm15, %v3091_v39  ;;  %vm3276_vm15 = vcmask 62464  }
 0x438   :  { %v3103_v5 = vpop.permute.xlu1 %3102 }
 0x43a   :  { %v3097_v31 = vpop.permute.xlu0 %3096 }
 0x43b   :  { %3099 = vst.msk [vmem:[#allocation5 + $0x38] sm:$0xff] %vm1341_vm0, %v3097_v31  ;;  %vm6916_vm0 = vmmov %vm6914_vm13 }
 0x43c   :  { %v3112_v53 = vld [vmem:[#allocation5 + $0x30] sm:$0xff]  ;;  %3105 = vst.msk [vmem:[#allocation5 + $0x38] sm:$0xff] %vm6913_vm11, %v3103_v5  ;;  %vm6917_vm1 = vmmov %vm6916_vm0  ;;  %vm3311_vm11 = vcmask 390464  }
 0x43d   :  { %4702 = vmatprep.mubr.msk.f32.mxu1 %vm2490_vm3, %v3112_v53  ;;  %vm6918_vm4 = vmmov %vm6916_vm0 }
 0x43e   :  { %vm6919_vm7 = vmmov %vm6916_vm0 }
 0x43f   :  { %vm6920_vm9 = vmmov %vm6916_vm0 }
 0x440   :  { %vm6921_vm12 = vmmov %vm6916_vm0 }
 0x443   :  { %v3113_v44 = vld [vmem:[#allocation5 + $0x38] sm:$0xff] }
 0x444   :  { %4703 = vmatmul.mubr.msk.f32.gmra.mrb[48].mxu1 %vm2490_vm3, %v3113_v44 }
 0x445   :  { %4723 = vmatprep.mubr.msk.f32.mxu1 %vm4948_vm10, %v6867_v57 }
 0x4ac   :  { %v4695_v28 = vpop.f32.mrb[42].mxu1 }
 0x4ad   :  { %v3226_v16 = vadd.f32 %v4695_v28, %v6505_v50  ;;  %v3220_v19 = vpop.f32.mrb[43].mxu1 }
 0x4ae   :  { %v3221_v24 = vadd.f32 %v6505_v50, %v3220_v19 }
 0x4af   :  { %v3260_v40 = vmax.f32 %v3226_v16, 0.0 }
 0x4b0   :  { %v3259_v48 = vmax.f32 %v3221_v24, 0.0 }
 0x4b1   :  { %3268 = vst.msk [vmem:[#allocation6 + $0x8] sm:$0xff] %vm6914_vm13, %v3260_v40  ;;  %vm3318_vm13 = vcmask 456064  }
 0x4b2   :  { %3267 = vst.msk [vmem:[#allocation6] sm:$0xff] %vm6915_vm14, %v3259_v48  ;;  %vm3325_vm14 = vcmask 521664  }
 0x4b8   :  { %v3336_v51 = vld [vmem:[#allocation6 + $0x9] sm:$0x3f] }
 0x4b9   :  { %v3292_v33 = vld [vmem:[#allocation6 + $0x8] sm:$0x3f]  ;;  %3338 = vrot.lane.b32.xlu1 %v3336_v51, %s4940_s30  ;;  %v3275_v47 = vld [vmem:[#allocation6] sm:$0x3f] }
 0x4ba   :  { %3294 = vrot.lane.b32.xlu0 %v3292_v33, %s4944_s2  ;;  %v3334_v32 = vld [vmem:[#allocation6 + $0x8] sm:$0x3f]  ;;  %3277 = vst.msk [vmem:[#allocation7] sm:$0x3f] %vm3276_vm15, %v3275_v47  ;;  %v3278_v55 = vld [vmem:[#allocation6 + $0x1] sm:$0x3f] }
 0x4bb   :  { %3335 = vst.msk [vmem:[#allocation7 + $0x6] sm:$0x3f] %vm3276_vm15, %v3334_v32  ;;  %v3342_v3 = vld [vmem:[#allocation6 + $0xa] sm:$0x3f]  ;;  %v3285_v34 = vld [vmem:[#allocation6 + $0x2] sm:$0x3f] }
 0x4bc   :  { %v3299_v8 = vld [vmem:[#allocation6 + $0x9] sm:$0x3f] }
 0x4bd   :  { %3344 = vrot.lane.b32.xlu1 %v3342_v3, %s4939_s29  ;;  %v3306_v54 = vld [vmem:[#allocation6 + $0xa] sm:$0x3f] }
 0x4be   :  { %3301 = vrot.lane.b32.xlu0 %v3299_v8, %s4947_s19 }
 0x4c0   :  { %v4698_v15 = vpop.f32.mrb[44].mxu1 }
 0x4c1   :  { %v3236_v4 = vadd.f32 %v4698_v15, %v6505_v50  ;;  %v3230_v60 = vpop.f32.mrb[45].mxu1 }
 0x4c2   :  { %3308 = vrot.lane.b32.xlu0 %v3306_v54, %s4945_s18  ;;  %v3231_v26 = vadd.f32 %v6505_v50, %v3230_v60 }
 0x4c3   :  { %v3262_v41 = vmax.f32 %v3236_v4, 0.0 }
 0x4c4   :  { %v3261_v46 = vmax.f32 %v3231_v26, 0.0 }
 0x4c5   :  { %3270 = vst.msk [vmem:[#allocation6 + $0x18] sm:$0xff] %vm6916_vm0, %v3262_v41  ;;  %vm3595_vm0 = vcmask 130048  }
 0x4c6   :  { %3280 = vrot.lane.b32.xlu0 %v3278_v55, %s4940_s30  ;;  %3269 = vst.msk [vmem:[#allocation6 + $0x10] sm:$0xff] %vm6917_vm1, %v3261_v46  ;;  %vm3600_vm1 = vcmask 122880  }
 0x4ca   :  { %3287 = vrot.lane.b32.xlu0 %v3285_v34, %s4939_s29 }
 0x4cc   :  { %v3372_v56 = vld [vmem:[#allocation6 + $0x19] sm:$0x3f] }
 0x4cd   :  { %v3366_v25 = vld [vmem:[#allocation6 + $0x18] sm:$0x3f]  ;;  %3374 = vrot.lane.b32.xlu1 %v3372_v56, %s4943_s16  ;;  %v3348_v13 = vld [vmem:[#allocation6 + $0x10] sm:$0x3f] }
 0x4ce   :  { %3368 = vrot.lane.b32.xlu0 %v3366_v25, %s4941_s14  ;;  %v3378_v18 = vld [vmem:[#allocation6 + $0x1a] sm:$0x3f]  ;;  %v3354_v45 = vld [vmem:[#allocation6 + $0x11] sm:$0x3f] }
 0x4cf   :  { %v3320_v7 = vld [vmem:[#allocation6 + $0x11] sm:$0x3f] }
 0x4d0   :  { %v3360_v59 = vld [vmem:[#allocation6 + $0x12] sm:$0x3f] }
 0x4d1   :  { %3350 = vrot.lane.b32.xlu1 %v3348_v13, %s4944_s2  ;;  %v3313_v20 = vld [vmem:[#allocation6 + $0x10] sm:$0x3f] }
 0x4d2   :  { %3380 = vrot.lane.b32.xlu0 %v3378_v18, %s4942_s15  ;;  %v3327_v37 = vld [vmem:[#allocation6 + $0x12] sm:$0x3f] }
 0x4d5   :  { %3356 = vrot.lane.b32.xlu1 %v3354_v45, %s4947_s19 }
 0x4d6   :  { %3322 = vrot.lane.b32.xlu0 %v3320_v7, %s4943_s16 }
 0x4d9   :  { %3362 = vrot.lane.b32.xlu1 %v3360_v59, %s4945_s18 }
 0x4dd   :  { %3315 = vrot.lane.b32.xlu1 %v3313_v20, %s4941_s14 }
 0x4e1   :  { %3329 = vrot.lane.b32.xlu1 %v3327_v37, %s4942_s15 }
 0x4f9   :  { %v4701_v6 = vpop.f32.mrb[46].mxu1 }
 0x4fa   :  { %v3246_v42 = vadd.f32 %v4701_v6, %v6505_v50  ;;  %v3240_v11 = vpop.f32.mrb[47].mxu1 }
 0x4fb   :  { %v3241_v2 = vadd.f32 %v6505_v50, %v3240_v11 }
 0x4fc   :  { %v3264_v36 = vmax.f32 %v3246_v42, 0.0 }
 0x4fd   :  { %v3263_v17 = vmax.f32 %v3241_v2, 0.0  ;;  %v4290_v2 = vld [vmem:[%s6848_s8] ss:$0 sm:$0xff] }
 0x4fe   :  { %3272 = vst.msk [vmem:[#allocation6 + $0x28] sm:$0xff] %vm6918_vm4, %v3264_v36  ;;  %vm3642_vm4 = vcmask 516480  }
 0x4ff   :  { %3271 = vst.msk [vmem:[#allocation6 + $0x20] sm:$0xff] %vm6919_vm7, %v3263_v17  ;;  %vm3656_vm7 = vcmask 647680  }
 0x505   :  { %v3404_v63 = vld [vmem:[#allocation6 + $0x29] sm:$0x3f] }
 0x506   :  { %v3398_v52 = vld [vmem:[#allocation6 + $0x28] sm:$0x3f]  ;;  %3406 = vrot.lane.b32.xlu1 %v3404_v63, %s4947_s19  ;;  %v3384_v30 = vld [vmem:[#allocation6 + $0x20] sm:$0x3f] }
 0x507   :  { %3400 = vrot.lane.b32.xlu0 %v3398_v52, %s4944_s2  ;;  %v3434_v58 = vld [vmem:[#allocation6 + $0x28] sm:$0x3f]  ;;  %3385 = vst.msk [vmem:[#allocation7 + $0xc] sm:$0x3f] %vm3276_vm15, %v3384_v30  ;;  %v3386_v39 = vld [vmem:[#allocation6 + $0x21] sm:$0x3f] }
 0x508   :  { %3435 = vst.msk [vmem:[#allocation7 + $0x12] sm:$0x3f] %vm3276_vm15, %v3434_v58  ;;  %v3436_v1 = vld [vmem:[#allocation6 + $0x29] sm:$0x3f]  ;;  %v3392_v31 = vld [vmem:[#allocation6 + $0x22] sm:$0x3f] }
 0x509   :  { %v3410_v43 = vld [vmem:[#allocation6 + $0x2a] sm:$0x3f]  ;;  %vm3332_vm15 = vcmask 587264  }
 0x50a   :  { %3438 = vrot.lane.b32.xlu1 %v3436_v1, %s4940_s30  ;;  %v3442_v49 = vld [vmem:[#allocation6 + $0x2a] sm:$0x3f] }
 0x50b   :  { %3412 = vrot.lane.b32.xlu0 %v3410_v43, %s4945_s18 }
 0x50e   :  { %3444 = vrot.lane.b32.xlu1 %v3442_v49, %s4939_s29  ;;  %v3876_v49 = vld [vmem:[%s6849_s9] sm:$0xff] }
 0x50f   :  { %3388 = vrot.lane.b32.xlu0 %v3386_v39, %s4940_s30  ;;  %v3877_v39 = vld [vmem:[%s6849_s9 + $0x8] sm:$0xff] }
 0x512   :  { %3394 = vrot.lane.b32.xlu1 %v3392_v31, %s4939_s29  ;;  %v3878_v31 = vld [vmem:[%s6849_s9 + $0x10] sm:$0xff] }
 0x517   :  { %v4704_v53 = vpop.f32.mrb[48].mxu1 }
 0x518   :  { %v3256_v5 = vadd.f32 %v4704_v53, %v6505_v50  ;;  %v3250_v44 = vpop.f32.mrb[49].mxu1  ;;  %v4832_v53 = vpack.c.bf16 %v3877_v39, %v3876_v49  ;;  %v3991_v49 = vld [vmem:[%s6851_s11] sm:$0xff]  ;;  %v3992_v39 = vld [vmem:[%s6851_s11 + $0x8] sm:$0xff] }
 0x519   :  { %v3251_v28 = vadd.f32 %v6505_v50, %v3250_v44 }
 0x51a   :  { %v3266_v16 = vmax.f32 %v3256_v5, 0.0  ;;  %v3879_v5 = vld [vmem:[%s6849_s9 + $0x18] sm:$0xff]  ;;  %4833 = vmatpush1.bf16.msra.mxu0 %v4832_v53 }
 0x51b   :  { %v3265_v19 = vmax.f32 %v3251_v28, 0.0  ;;  %v4835_v44 = vpack.c.bf16 %v3879_v5, %v3878_v31  ;;  %4834 = vmatprep.subr.bf16.mxu0 %v6887_v9  ;;  %v3993_v31 = vld [vmem:[%s6851_s11 + $0x10] sm:$0xff]  ;;  %v4868_v5 = vpack.c.bf16 %v3992_v39, %v3991_v49 }
 0x51c   :  { %3274 = vst.msk [vmem:[#allocation6 + $0x38] sm:$0xff] %vm6920_vm9, %v3266_v16  ;;  %v3880_v16 = vld [vmem:[%s6849_s9 + $0x20] sm:$0xff]  ;;  %vm3670_vm9 = vcmask 778880  }
 0x51d   :  { %3273 = vst.msk [vmem:[#allocation6 + $0x30] sm:$0xff] %vm6921_vm12, %v3265_v19  ;;  %v3881_v19 = vld [vmem:[%s6849_s9 + $0x28] sm:$0xff]  ;;  %vm3684_vm12 = vcmask 910080  }
 0x51e   :  { %4836 = vmatpush1.bf16.msra.mxu0 %v4835_v44  ;;  %v3994_v44 = vld [vmem:[%s6851_s11 + $0x18] sm:$0xff] }
 0x51f   :  { %4837 = vmatprep.subr.bf16.mxu0 %v6887_v9 }
 0x523   :  { %v3466_v24 = vld [vmem:[#allocation6 + $0x38] sm:$0x3f] }
 0x524   :  { %3468 = vrot.lane.b32.xlu1 %v3466_v24, %s4941_s14  ;;  %v3416_v40 = vld [vmem:[#allocation6 + $0x30] sm:$0x3f]  ;;  %v3478_v54 = vld [vmem:[#allocation6 + $0x3a] sm:$0x3f]  ;;  %v4838_v24 = vpack.c.bf16 %v3881_v19, %v3880_v16  ;;  %v4871_v16 = vpack.c.bf16 %v3994_v44, %v3993_v31 }
 0x525   :  { %3418 = vrot.lane.b32.xlu0 %v3416_v40, %s4941_s14  ;;  %v3448_v33 = vld [vmem:[#allocation6 + $0x30] sm:$0x3f]  ;;  %v3472_v26 = vld [vmem:[#allocation6 + $0x39] sm:$0x3f] }
 0x526   :  { %v3422_v50 = vld [vmem:[#allocation6 + $0x31] sm:$0x3f]  ;;  %4839 = vmatpush1.bf16.msra.mxu0 %v4838_v24  ;;  %v3996_v24 = vld [vmem:[%s6851_s11 + $0x28] sm:$0xff] }
 0x527   :  { %v3454_v3 = vld [vmem:[#allocation6 + $0x31] sm:$0x3f]  ;;  %4840 = vmatprep.subr.bf16.mxu0 %v6887_v9 }
 0x528   :  { %3450 = vrot.lane.b32.xlu1 %v3448_v33, %s4944_s2  ;;  %v3428_v8 = vld [vmem:[#allocation6 + $0x32] sm:$0x3f]  ;;  %v3882_v33 = vld [vmem:[%s6849_s9 + $0x30] sm:$0xff] }
 0x529   :  { %3424 = vrot.lane.b32.xlu0 %v3422_v50, %s4943_s16  ;;  %v3460_v4 = vld [vmem:[#allocation6 + $0x32] sm:$0x3f]  ;;  %v3883_v50 = vld [vmem:[%s6849_s9 + $0x38] sm:$0xff] }
 0x52a   :  { %v3995_v19 = vld [vmem:[%s6851_s11 + $0x20] sm:$0xff] }
 0x52b   :  { %v3339_v48 = vpop.permute.xlu1 %3338 }
 0x52c   :  { %v3295_v51 = vpop.permute.xlu0 %3294  ;;  %3341 = vst.msk [vmem:[#allocation7 + $0x6] sm:$0x3f] %vm3283_vm2, %v3339_v48  ;;  %3456 = vrot.lane.b32.xlu1 %v3454_v3, %s4947_s19  ;;  %v4841_v3 = vpack.c.bf16 %v3883_v50, %v3882_v33  ;;  %v3998_v33 = vld [vmem:[%s6851_s11 + $0x38] sm:$0xff] }
 0x52d   :  { %3430 = vrot.lane.b32.xlu0 %v3428_v8, %s4942_s15 }
 0x52e   :  { %4842 = vmatpush1.bf16.msra.mxu0 %v4841_v3  ;;  %v4000_v3 = vld [vmem:[%s6851_s11 + $0x48] sm:$0xff] }
 0x52f   :  { %v3345_v32 = vpop.permute.xlu1 %3344  ;;  %4843 = vmatprep.subr.bf16.mxu0 %v6887_v9 }
 0x530   :  { %v3302_v47 = vpop.permute.xlu0 %3301  ;;  %3347 = vst.msk [vmem:[#allocation7 + $0x6] sm:$0x3f] %vm3290_vm5, %v3345_v32  ;;  %3480 = vrot.lane.b32.xlu1 %v3478_v54, %s4942_s15  ;;  %v3885_v54 = vld [vmem:[%s6849_s9 + $0x48] sm:$0xff] }
 0x531   :  { %3462 = vrot.lane.b32.xlu0 %v3460_v4, %s4945_s18 }
 0x534   :  { %v3309_v15 = vpop.permute.xlu0 %3308 }
 0x535   :  { %3474 = vrot.lane.b32.xlu0 %v3472_v26, %s4943_s16 }
 0x538   :  { %v3281_v60 = vpop.permute.xlu0 %3280 }
 0x539   :  { %3284 = vst.msk [vmem:[#allocation7] sm:$0x3f] %vm3283_vm2, %v3281_v60 }
 0x53c   :  { %v3288_v41 = vpop.permute.xlu0 %3287 }
 0x53d   :  { %3291 = vst.msk [vmem:[#allocation7] sm:$0x3f] %vm3290_vm5, %v3288_v41 }
 0x53e   :  { %3298 = vst.msk [vmem:[#allocation7] sm:$0x3f] %vm3297_vm6, %v3295_v51 }
 0x53f   :  { %3305 = vst.msk [vmem:[#allocation7] sm:$0x3f] %vm3304_vm8, %v3302_v47  ;;  %v3375_v46 = vpop.permute.xlu1 %3374 }
 0x540   :  { %3312 = vst.msk [vmem:[#allocation7] sm:$0x3f] %vm3311_vm11, %v3309_v15  ;;  %v3369_v34 = vpop.permute.xlu0 %3368  ;;  %v3884_v15 = vld [vmem:[%s6849_s9 + $0x40] sm:$0xff] }
 0x541   :  { %v4844_v4 = vpack.c.bf16 %v3885_v54, %v3884_v15  ;;  %v4001_v54 = vld [vmem:[%s6851_s11 + $0x50] sm:$0xff] }
 0x543   :  { %v3351_v55 = vpop.permute.xlu1 %3350  ;;  %4845 = vmatpush1.bf16.msra.mxu0 %v4844_v4  ;;  %v4002_v4 = vld [vmem:[%s6851_s11 + $0x58] sm:$0xff] }
 0x544   :  { %3353 = vst.msk [vmem:[#allocation7 + $0x6] sm:$0x3f] %vm3297_vm6, %v3351_v55  ;;  %v3381_v22 = vpop.permute.xlu0 %3380  ;;  %4846 = vmatprep.subr.bf16.mxu0 %v6887_v9 }
 0x547   :  { %v3357_v38 = vpop.permute.xlu1 %3356 }
 0x548   :  { %3359 = vst.msk [vmem:[#allocation7 + $0x6] sm:$0x3f] %vm3304_vm8, %v3357_v38  ;;  %v3323_v25 = vpop.permute.xlu0 %3322  ;;  %v3886_v38 = vld [vmem:[%s6849_s9 + $0x50] sm:$0xff] }
 0x54b   :  { %v3363_v61 = vpop.permute.xlu1 %3362 }
 0x54c   :  { %3365 = vst.msk [vmem:[#allocation7 + $0x6] sm:$0x3f] %vm3311_vm11, %v3363_v61  ;;  %v3887_v61 = vld [vmem:[%s6849_s9 + $0x58] sm:$0xff] }
 0x54d   :  { %3371 = vst.msk [vmem:[#allocation7 + $0x6] sm:$0x3f] %vm3318_vm13, %v3369_v34 }
 0x54e   :  { %3377 = vst.msk [vmem:[#allocation7 + $0x6] sm:$0x3f] %vm3325_vm14, %v3375_v46 }
 0x54f   :  { %v3316_v56 = vpop.permute.xlu1 %3315  ;;  %3383 = vst.msk [vmem:[#allocation7 + $0x6] sm:$0x3f] %vm3332_vm15, %v3381_v22 }
 0x550   :  { %3319 = vst.msk [vmem:[#allocation7] sm:$0x3f] %vm3318_vm13, %v3316_v56 }
 0x551   :  { %3326 = vst.msk [vmem:[#allocation7] sm:$0x3f] %vm3325_vm14, %v3323_v25  ;;  %v4847_v25 = vpack.c.bf16 %v3887_v61, %v3886_v38 }
 0x553   :  { %v3330_v10 = vpop.permute.xlu1 %3329  ;;  %4848 = vmatpush1.bf16.msra.mxu0 %v4847_v25 }
 0x554   :  { %3333 = vst.msk [vmem:[#allocation7] sm:$0x3f] %vm3332_vm15, %v3330_v10  ;;  %v3888_v10 = vld [vmem:[%s6849_s9 + $0x60] sm:$0xff]  ;;  %4849 = vmatprep.subr.bf16.mxu0 %v6887_v9 }
 0x55b   :  { %v3484_v29 = vld [vmem:[#allocation7] sm:$0xff] }
 0x55c   :  { %4724 = vmatmul.mubr.msk.f32.vlgmr.msra.gmra.mrb[50].mxu1 %vm2490_vm3, %v3484_v29  ;;  %v3889_v29 = vld [vmem:[%s6849_s9 + $0x68] sm:$0xff] }
 0x55d   :  { %4726 = vmatprep.mubr.msk.f32.mxu1 %vm4948_vm10, %v6867_v57  ;;  %4869 = vmatpush3.bf16.msra.mxu1 %v4868_v5 }
 0x55e   :  { %4870 = vmatprep.subr.bf16.mxu1 %v6887_v9 }
 0x561   :  { %4872 = vmatpush3.bf16.msra.mxu1 %v4871_v16 }
 0x562   :  { %4873 = vmatprep.subr.bf16.mxu1 %v6887_v9 }
 0x578   :  { %v3407_v13 = vpop.permute.xlu1 %3406 }
 0x579   :  { %v3401_v18 = vpop.permute.xlu0 %3400 }
 0x57c   :  { %v3439_v62 = vpop.permute.xlu1 %3438 }
 0x57d   :  { %v3413_v14 = vpop.permute.xlu0 %3412  ;;  %3441 = vst.msk [vmem:[#allocation7 + $0x12] sm:$0x3f] %vm3283_vm2, %v3439_v62  ;;  %v3890_v62 = vld [vmem:[%s6849_s9 + $0x70] sm:$0xff] }
 0x580   :  { %v3445_v21 = vpop.permute.xlu1 %3444 }
 0x581   :  { %v3389_v27 = vpop.permute.xlu0 %3388  ;;  %3447 = vst.msk [vmem:[#allocation7 + $0x12] sm:$0x3f] %vm3290_vm5, %v3445_v21 }
 0x582   :  { %3391 = vst.msk [vmem:[#allocation7 + $0xc] sm:$0x3f] %vm3283_vm2, %v3389_v27  ;;  %vm3698_vm2 = vcmask 1041280  }
 0x584   :  { %v3395_v45 = vpop.permute.xlu1 %3394 }
 0x585   :  { %3397 = vst.msk [vmem:[#allocation7 + $0xc] sm:$0x3f] %vm3290_vm5, %v3395_v45  ;;  %vm3917_vm5 = vcmask 523264  }
 0x586   :  { %3403 = vst.msk [vmem:[#allocation7 + $0xc] sm:$0x3f] %vm3297_vm6, %v3401_v18 }
 0x587   :  { %3409 = vst.msk [vmem:[#allocation7 + $0xc] sm:$0x3f] %vm3304_vm8, %v3407_v13  ;;  %v4850_v13 = vpack.c.bf16 %v3889_v29, %v3888_v10 }
 0x588   :  { %3415 = vst.msk [vmem:[#allocation7 + $0xc] sm:$0x3f] %vm3311_vm11, %v3413_v14  ;;  %v3891_v14 = vld [vmem:[%s6849_s9 + $0x78] sm:$0xff] }
 0x589   :  { %4851 = vmatpush1.bf16.msra.mxu0 %v4850_v13  ;;  %v4853_v45 = vpack.c.bf16 %v3891_v14, %v3890_v62 }
 0x58a   :  { %4852 = vmatprep.subr.bf16.mxu0 %v6887_v9 }
 0x58d   :  { %4854 = vmatpush1.bf16.msra.mxu0 %v4853_v45 }
 0x58e   :  { %4855 = vmatprep.subr.bf16.mxu0 %v6887_v9 }
 0x596   :  { %v3469_v7 = vpop.permute.xlu1 %3468 }
 0x597   :  { %v3419_v35 = vpop.permute.xlu0 %3418 }
 0x598   :  { %3421 = vst.msk [vmem:[#allocation7 + $0xc] sm:$0x3f] %vm3318_vm13, %v3419_v35 }
 0x59a   :  { %v3451_v12 = vpop.permute.xlu1 %3450 }
 0x59b   :  { %3453 = vst.msk [vmem:[#allocation7 + $0x12] sm:$0x3f] %vm3297_vm6, %v3451_v12  ;;  %v3425_v23 = vpop.permute.xlu0 %3424  ;;  %v3892_v12 = vld [vmem:[%s6849_s9 + $0x80] sm:$0xff]  ;;  %vm6922_vm6 = vcmask 58368  }
 0x59c   :  { %3427 = vst.msk [vmem:[#allocation7 + $0xc] sm:$0x3f] %vm3325_vm14, %v3425_v23  ;;  %v3893_v23 = vld [vmem:[%s6849_s9 + $0x88] sm:$0xff] }
 0x59e   :  { %v3457_v59 = vpop.permute.xlu1 %3456 }
 0x59f   :  { %3459 = vst.msk [vmem:[#allocation7 + $0x12] sm:$0x3f] %vm3304_vm8, %v3457_v59  ;;  %v3431_v0 = vpop.permute.xlu0 %3430  ;;  %vm6923_vm8 = vmmov %vm6922_vm6 }
 0x5a0   :  { %3433 = vst.msk [vmem:[#allocation7 + $0xc] sm:$0x3f] %vm3332_vm15, %v3431_v0  ;;  %v4856_v0 = vpack.c.bf16 %v3893_v23, %v3892_v12  ;;  %v4314_v23 = vld [vmem:[%s6850_s10] ss:$0 sm:$0xff]  ;;  %s4955_s10 = smov [#allocation10]  }
 0x5a1   :  { %s4109_s26 = sshll.u32 %s4955_s10, 4  ;;  %s4110_s26 = int_to_ptr.vmem [resolvable:$true] %s4109_s26 }
 0x5a2   :  { %v3481_v42 = vpop.permute.xlu1 %3480  ;;  %4857 = vmatpush1.bf16.msra.mxu0 %v4856_v0  ;;  %p4919_p1 = scmp.lt.s32.totalorder %s4110_s26, %s4110_s26 }
 0x5a3   :  { %v3463_v20 = vpop.permute.xlu0 %3462  ;;  %4858 = vmatprep.subr.bf16.mxu0 %v6887_v9 }
 0x5a4   :  { %3465 = vst.msk [vmem:[#allocation7 + $0x12] sm:$0x3f] %vm3311_vm11, %v3463_v20 }
 0x5a5   :  { %3471 = vst.msk [vmem:[#allocation7 + $0x12] sm:$0x3f] %vm3318_vm13, %v3469_v7 }
 0x5a7   :  { %v3475_v37 = vpop.permute.xlu0 %3474  ;;  %v3485_v6 = vld [vmem:[#allocation7 + $0x8] sm:$0xff] }
 0x5a8   :  { %3477 = vst.msk [vmem:[#allocation7 + $0x12] sm:$0x3f] %vm3325_vm14, %v3475_v37  ;;  %4727 = vmatmul.mubr.msk.f32.gmra.mrb[52].mxu1 %vm2490_vm3, %v3485_v6  ;;  %v3894_v6 = vld [vmem:[%s6849_s9 + $0x90] sm:$0xff] }
 0x5a9   :  { %3483 = vst.msk [vmem:[#allocation7 + $0x12] sm:$0x3f] %vm3332_vm15, %v3481_v42  ;;  %4729 = vmatprep.mubr.msk.f32.mxu1 %vm4948_vm10, %v6867_v57  ;;  %v3895_v42 = vld [vmem:[%s6849_s9 + $0x98] sm:$0xff] }
 0x5b0   :  { %v3486_v11 = vld [vmem:[#allocation7 + $0x10] sm:$0xff] }
 0x5b1   :  { %4730 = vmatmul.mubr.msk.f32.gmra.mrb[54].mxu1 %vm2490_vm3, %v3486_v11  ;;  %v4859_v11 = vpack.c.bf16 %v3895_v42, %v3894_v6  ;;  %vm3614_vm3 = vcmask 254080   ;;  %v4953_v6 = vmov 0   ;;  %v4317_v42 = vld [vmem:[%s6852_s12] ss:$0 sm:$0xff]  ;;  %s4914_s12 = scalar_lea.vmem %s4110_s26, 32 }
 0x5b2   :  { %4764 = vmatprep.mubr.msk.f32.mxu1 %vm4948_vm10, %v6867_v57  ;;  %vm3628_vm10 = vcmask 385280   ;;  %4911 = vset.pattern.permute.xlu0 %v4953_v6  ;;  %p4915_p0 = scmp.ne.s32.totalorder %s4110_s26, %s4914_s12  ;;  %p4920_p2 = scmp.lt.s32.totalorder %s4914_s12, %s4914_s12 }
 0x5b3   :  { %4860 = vmatpush1.bf16.msra.mxu0 %v4859_v11 }
 0x5b4   :  { %4861 = vmatprep.subr.bf16.mxu0 %v6887_v9  ;;  %p4921_p3 = por %p4920_p2, %p4919_p1 }
 0x5b6   :  { %p4922_p4 = pnand %p4921_p3, %p4915_p0 }
 0x62f   :  { %v3578_v36 = vpop.f32.mrb[50].mxu1 }
 0x630   :  { %v3579_v17 = vadd.f32 %v4290_v2, %v3578_v36  ;;  %v4725_v63 = vpop.f32.mrb[51].mxu1  ;;  %v3896_v36 = vld [vmem:[%s6849_s9 + $0xa0] sm:$0xff] }
 0x631   :  { %v3898_v63 = vld [vmem:[%s6849_s9 + $0xb0] sm:$0xff] }
 0x632   :  { %v3592_v52 = vmax.f32 %v3579_v17, 0.0  ;;  %v3897_v17 = vld [vmem:[%s6849_s9 + $0xa8] sm:$0xff] }
 0x634   :  { %3596 = vst.msk [vmem:[#allocation8] sm:$0xff] %vm3595_vm0, %v3592_v52  ;;  %v4862_v52 = vpack.c.bf16 %v3897_v17, %v3896_v36 }
 0x636   :  { %4863 = vmatpush1.bf16.msra.mxu0 %v4862_v52 }
 0x637   :  { %4864 = vmatprep.subr.bf16.mxu0 %v6887_v9 }
 0x63b   :  { %v4294_v58 = vld.sshfl [vmem:[#allocation8 + $0x1] sm:$0x1 pattern:$0x76325410]  ;;  %v3599_v30 = vld [vmem:[#allocation8] sm:$0x1] }
 0x63c   :  { %3611 = vrot.lane.b32.xlu0 %v4294_v58, %s4939_s29  ;;  %3601 = vst.msk [vmem:[#allocation9] sm:$0x1] %vm3600_vm1, %v3599_v30  ;;  %v4295_v1 = vld.sshfl [vmem:[#allocation8 + $0x2] sm:$0x1 pattern:$0x76325410] }
 0x63d   :  { %v4296_v57 = vld.sshfl [vmem:[#allocation8 + $0x3] sm:$0x1 pattern:$0x76325410]  ;;  %v3899_v58 = vld [vmem:[%s6849_s9 + $0xb8] sm:$0xff] }
 0x63e   :  { %v4297_v43 = vld.sshfl [vmem:[#allocation8 + $0x4] sm:$0x1 pattern:$0x76325410]  ;;  %v4865_v30 = vpack.c.bf16 %v3899_v58, %v3898_v63 }
 0x63f   :  { %v4298_v28 = vld.sshfl [vmem:[#allocation8 + $0x5] sm:$0x1 pattern:$0x76325410] }
 0x640   :  { %3625 = vrot.lane.b32.xlu0 %v4295_v1, %s4947_s19  ;;  %v4299_v40 = vld.sshfl [vmem:[#allocation8 + $0x6] sm:$0x1 pattern:$0x76325410]  ;;  %4866 = vmatpush1.bf16.msra.mxu0 %v4865_v30 }
 0x641   :  { %v4300_v48 = vld.sshfl [vmem:[#allocation8 + $0x7] sm:$0x1 pattern:$0x76325410] }
 0x644   :  { %3639 = vrot.lane.b32.xlu0 %v4296_v57, %s4941_s14 }
 0x648   :  { %3653 = vrot.lane.b32.xlu0 %v4297_v43, %s4942_s15 }
 0x64c   :  { %3667 = vrot.lane.b32.xlu0 %v4298_v28, %s4950_s23 }
 0x650   :  { %3681 = vrot.lane.b32.xlu0 %v4299_v40, %s4951_s24 }
 0x654   :  { %3695 = vrot.lane.b32.xlu0 %v4300_v48, %s4952_s25  ;;  %v4874_v48 = vpack.c.bf16 %v3996_v24, %v3995_v19 }
 0x656   :  { %4875 = vmatpush3.bf16.msra.mxu1 %v4874_v48 }
 0x657   :  { %4876 = vmatprep.subr.bf16.mxu1 %v6887_v9 }
 0x67b   :  { %v3583_v51 = vpop.f32.mrb[52].mxu1 }
 0x67c   :  { %v3584_v32 = vadd.f32 %v4290_v2, %v3583_v51  ;;  %v4728_v47 = vpop.f32.mrb[53].mxu1  ;;  %v3997_v51 = vld [vmem:[%s6851_s11 + $0x30] sm:$0xff] }
 0x67d   :  { %v3999_v47 = vld [vmem:[%s6851_s11 + $0x40] sm:$0xff] }
 0x67e   :  { %v3593_v8 = vmax.f32 %v3584_v32, 0.0  ;;  %v4877_v32 = vpack.c.bf16 %v3998_v33, %v3997_v51  ;;  %v4880_v15 = vpack.c.bf16 %v4000_v3, %v3999_v47 }
 0x680   :  { %3597 = vst.msk [vmem:[#allocation8 + $0x8] sm:$0xff] %vm3595_vm0, %v3593_v8  ;;  %4878 = vmatpush3.bf16.msra.mxu1 %v4877_v32 }
 0x681   :  { %4879 = vmatprep.subr.bf16.mxu1 %v6887_v9 }
 0x684   :  { %v3588_v60 = vpop.f32.mrb[54].mxu1  ;;  %4881 = vmatpush3.bf16.msra.mxu1 %v4880_v15 }
 0x685   :  { %v3589_v26 = vadd.f32 %v4290_v2, %v3588_v60  ;;  %v4731_v41 = vpop.f32.mrb[55].mxu1  ;;  %4882 = vmatprep.subr.bf16.mxu1 %v6887_v9 }
 0x686   :  { %v4003_v41 = vld [vmem:[%s6851_s11 + $0x60] sm:$0xff] }
 0x687   :  { %v3594_v46 = vmax.f32 %v3589_v26, 0.0  ;;  %v4304_v55 = vld.sshfl [vmem:[#allocation8 + $0xd] sm:$0x1 pattern:$0x76325410]  ;;  %v4883_v26 = vpack.c.bf16 %v4002_v4, %v4001_v54 }
 0x688   :  { %3752 = vrot.lane.b32.xlu1 %v4304_v55, %s4939_s29  ;;  %v3741_v34 = vld [vmem:[#allocation8 + $0xc] sm:$0x1]  ;;  %v3700_v22 = vld [vmem:[#allocation8 + $0x8] sm:$0x1] }
 0x689   :  { %3598 = vst.msk [vmem:[#allocation8 + $0x10] sm:$0xff] %vm3595_vm0, %v3594_v46  ;;  %v4305_v56 = vld.sshfl [vmem:[#allocation8 + $0xe] sm:$0x1 pattern:$0x76325410]  ;;  %v4004_v46 = vld [vmem:[%s6851_s11 + $0x68] sm:$0xff]  ;;  %4884 = vmatpush3.bf16.msra.mxu1 %v4883_v26 }
 0x68a   :  { %3742 = vst.msk [vmem:[#allocation9 + $0x1] sm:$0x1] %vm3600_vm1, %v3741_v34  ;;  %3701 = vst.msk [vmem:[#allocation9 + $0x2] sm:$0x1] %vm3600_vm1, %v3700_v22  ;;  %v4886_v34 = vpack.c.bf16 %v4004_v46, %v4003_v41  ;;  %4885 = vmatprep.subr.bf16.mxu1 %v6887_v9 }
 0x68b   :  { %v4306_v18 = vld.sshfl [vmem:[#allocation8 + $0xf] sm:$0x1 pattern:$0x76325410] }
 0x68c   :  { %3765 = vrot.lane.b32.xlu1 %v4305_v56, %s4947_s19  ;;  %v4301_v7 = vld.sshfl [vmem:[#allocation8 + $0x9] sm:$0x1 pattern:$0x76325410] }
 0x68d   :  { %v4302_v59 = vld.sshfl [vmem:[#allocation8 + $0xa] sm:$0x1 pattern:$0x76325410]  ;;  %4887 = vmatpush3.bf16.msra.mxu1 %v4886_v34 }
 0x68e   :  { %v4303_v37 = vld.sshfl [vmem:[#allocation8 + $0xb] sm:$0x1 pattern:$0x76325410]  ;;  %4888 = vmatprep.subr.bf16.mxu1 %v6887_v9 }
 0x690   :  { %3778 = vrot.lane.b32.xlu1 %v4306_v18, %s4941_s14  ;;  %v4308_v21 = vld.sshfl [vmem:[#allocation8 + $0x11] sm:$0x1 pattern:$0x76325410]  ;;  %v3834_v27 = vld [vmem:[#allocation8 + $0x14] sm:$0x1] }
 0x691   :  { %3804 = vrot.lane.b32.xlu0 %v4308_v21, %s4950_s23  ;;  %3835 = vst.msk [vmem:[#allocation9 + $0x3] sm:$0x1] %vm3600_vm1, %v3834_v27  ;;  %v4309_v35 = vld.sshfl [vmem:[#allocation8 + $0x12] sm:$0x1 pattern:$0x76325410] }
 0x692   :  { %v4310_v20 = vld.sshfl [vmem:[#allocation8 + $0x13] sm:$0x1 pattern:$0x76325410] }
 0x693   :  { %v4307_v2 = vld.sshfl [vmem:[#allocation8 + $0x10] sm:$0x1 pattern:$0x76325410] }
 0x694   :  { %3711 = vrot.lane.b32.xlu1 %v4301_v7, %s4939_s29  ;;  %v4311_v1 = vld.sshfl [vmem:[#allocation8 + $0x15] sm:$0x1 pattern:$0x76325410]  ;;  %v4005_v7 = vld [vmem:[%s6851_s11 + $0x70] sm:$0xff] }
 0x695   :  { %3817 = vrot.lane.b32.xlu0 %v4309_v35, %s4951_s24  ;;  %v4312_v57 = vld.sshfl [vmem:[#allocation8 + $0x16] sm:$0x1 pattern:$0x76325410] }
 0x696   :  { %v4313_v53 = vld.sshfl [vmem:[#allocation8 + $0x17] sm:$0x1 pattern:$0x76325410] }
 0x697   :  { %v4006_v35 = vld [vmem:[%s6851_s11 + $0x78] sm:$0xff]  ;;  %s4954_s11 = smov 127  }
 0x698   :  { %3724 = vrot.lane.b32.xlu1 %v4302_v59, %s4947_s19  ;;  %v4889_v12 = vpack.c.bf16 %v4006_v35, %v4005_v7 }
 0x699   :  { %3830 = vrot.lane.b32.xlu0 %v4310_v20, %s4952_s25 }
 0x69a   :  { %4890 = vmatpush3.bf16.msra.mxu1 %v4889_v12 }
 0x69c   :  { %3737 = vrot.lane.b32.xlu1 %v4303_v37, %s4941_s14 }
 0x6a0   :  { %3791 = vrot.lane.b32.xlu1 %v4307_v2, %s4942_s15 }
 0x6a4   :  { %3845 = vrot.lane.b32.xlu1 %v4311_v1, %s4939_s29 }
 0x6a8   :  { %3858 = vrot.lane.b32.xlu1 %v4312_v57, %s4947_s19 }
 0x6ac   :  { %3871 = vrot.lane.b32.xlu1 %v4313_v53, %s4941_s14 }
 0x6ae   :  { %v3612_v43 = vpop.permute.xlu0 %3611 }
 0x6af   :  { %3615 = vst.msk [vmem:[#allocation9] sm:$0x1] %vm3614_vm3, %v3612_v43 }
 0x6b2   :  { %v3626_v28 = vpop.permute.xlu0 %3625 }
 0x6b3   :  { %3629 = vst.msk [vmem:[#allocation9] sm:$0x1] %vm3628_vm10, %v3626_v28 }
 0x6b6   :  { %v3640_v40 = vpop.permute.xlu0 %3639 }
 0x6b7   :  { %3643 = vst.msk [vmem:[#allocation9] sm:$0x1] %vm3642_vm4, %v3640_v40 }
 0x6ba   :  { %v3654_v50 = vpop.permute.xlu0 %3653 }
 0x6bb   :  { %3657 = vst.msk [vmem:[#allocation9] sm:$0x1] %vm3656_vm7, %v3654_v50 }
 0x6be   :  { %v3668_v8 = vpop.permute.xlu0 %3667 }
 0x6bf   :  { %3671 = vst.msk [vmem:[#allocation9] sm:$0x1] %vm3670_vm9, %v3668_v8 }
 0x6c2   :  { %v3682_v60 = vpop.permute.xlu0 %3681 }
 0x6c3   :  { %3685 = vst.msk [vmem:[#allocation9] sm:$0x1] %vm3684_vm12, %v3682_v60 }
 0x6c6   :  { %v3696_v55 = vpop.permute.xlu0 %3695 }
 0x6c7   :  { %3699 = vst.msk [vmem:[#allocation9] sm:$0x1] %vm3698_vm2, %v3696_v55 }
 0x6fa   :  { %v3753_v38 = vpop.permute.xlu1 %3752 }
 0x6fb   :  { %3755 = vst.msk [vmem:[#allocation9 + $0x1] sm:$0x1] %vm3614_vm3, %v3753_v38 }
 0x6fe   :  { %v3766_v22 = vpop.permute.xlu1 %3765 }
 0x6ff   :  { %3768 = vst.msk [vmem:[#allocation9 + $0x1] sm:$0x1] %vm3628_vm10, %v3766_v22 }
 0x702   :  { %v3779_v61 = vpop.permute.xlu1 %3778 }
 0x703   :  { %3781 = vst.msk [vmem:[#allocation9 + $0x1] sm:$0x1] %vm3642_vm4, %v3779_v61  ;;  %v3805_v25 = vpop.permute.xlu0 %3804 }
 0x706   :  { %v3712_v56 = vpop.permute.xlu1 %3711 }
 0x707   :  { %3714 = vst.msk [vmem:[#allocation9 + $0x2] sm:$0x1] %vm3614_vm3, %v3712_v56  ;;  %v3818_v13 = vpop.permute.xlu0 %3817 }
 0x70a   :  { %v3725_v10 = vpop.permute.xlu1 %3724 }
 0x70b   :  { %3727 = vst.msk [vmem:[#allocation9 + $0x2] sm:$0x1] %vm3628_vm10, %v3725_v10  ;;  %v3831_v18 = vpop.permute.xlu0 %3830 }
 0x70e   :  { %v3738_v29 = vpop.permute.xlu1 %3737 }
 0x70f   :  { %3740 = vst.msk [vmem:[#allocation9 + $0x2] sm:$0x1] %vm3642_vm4, %v3738_v29 }
 0x712   :  { %v3792_v9 = vpop.permute.xlu1 %3791 }
 0x713   :  { %3794 = vst.msk [vmem:[#allocation9 + $0x1] sm:$0x1] %vm3656_vm7, %v3792_v9 }
 0x714   :  { %3807 = vst.msk [vmem:[#allocation9 + $0x1] sm:$0x1] %vm3670_vm9, %v3805_v25 }
 0x715   :  { %3820 = vst.msk [vmem:[#allocation9 + $0x1] sm:$0x1] %vm3684_vm12, %v3818_v13 }
 0x716   :  { %3833 = vst.msk [vmem:[#allocation9 + $0x1] sm:$0x1] %vm3698_vm2, %v3831_v18  ;;  %v3846_v62 = vpop.permute.xlu1 %3845 }
 0x717   :  { %3848 = vst.msk [vmem:[#allocation9 + $0x3] sm:$0x1] %vm3614_vm3, %v3846_v62 }
 0x71a   :  { %v3859_v14 = vpop.permute.xlu1 %3858 }
 0x71b   :  { %3861 = vst.msk [vmem:[#allocation9 + $0x3] sm:$0x1] %vm3628_vm10, %v3859_v14 }
 0x71e   :  { %v3872_v21 = vpop.permute.xlu1 %3871 }
 0x71f   :  { %3874 = vst.msk [vmem:[#allocation9 + $0x3] sm:$0x1] %vm3642_vm4, %v3872_v21 }
 0x726   :  { %v4315_v27 = vld.sshfl [vmem:[#allocation9] sm:$0x33 pattern:$0x76325410] }
 0x727   :  { %v3915_v45 = vcombine.high %v4315_v27, %v4315_v27 }
 0x729   :  { %4316 = vmatprep.mubr.msk.f32.mxu0 %vm3917_vm5, %v3915_v45 }
 0x72a   :  { %3985 = vmatmul.mubr.f32.vlgmr.msra.gmra.mrb[68].mxu0 %v4315_v27 }
 0x7fd   :  { %v3986_v59 = vpop.f32.mrb[68].mxu0 }
 0x7fe   :  { %v3987_v0 = vadd.f32 %v4314_v23, %v3986_v59  ;;  %v3988_v20 = vpop.f32.mrb[69].mxu0 }
 0x800   :  { %v3990_v37 = vmax.f32 %v3987_v0, 0.0 }
 0x802   :  { %4765 = vmatmul.mubr.f32.vlgmr.msra.gmra.mrb[56].mxu1 %v3990_v37 }
 0x8d5   :  { %v4080_v11 = vpop.f32.mrb[56].mxu1 }
 0x8d6   :  { %v4081_v2 = vadd.f32 %v4317_v42, %v4080_v11  ;;  %v4766_v36 = vpop.f32.mrb[57].mxu1 }
 0x8d8   :  { %4085 = vrot.lane.b32.xlu0 %v4081_v2, %s4954_s11 }
 0x8dc   :  { %4094 = vperm.xlu0 %4911, %v4081_v2  }
 0x94a   :  { %v4086_v17 = vpop.permute.xlu0 %4085 }
 0x94b   :  { %v4088_v63 = vsel %vm6922_vm6, %v4086_v17, 0.0 }
 0x94c   :  { %4089 = vadd.xlane.f32.xlu1 %v4088_v63 }
 0x95b   :  { %v4095_v1 = vpop.permute.xlu0 %4094 }
 0x9d9   :  { %v4090_v52 = vpop.xlane.xlu1 %4089 }
 0x9da   :  { %v4091_v58 = vmul.f32 0.125, %v4090_v52 }
 0x9dc   :  { %v4092_v30 = vsub.f32 %v4081_v2, %v4091_v58 }
 0x9de   :  { %v4097_v57 = vadd.f32 %v4095_v1, %v4092_v30 }
 0x9e0   :  { %4099 = vrot.lane.b32.xlu0 %v4097_v57, %s4954_s11 }
 0xa52   :  { %v4100_v43 = vpop.permute.xlu0 %4099 }
 0xa53   :  { %4102 = vst.msk [vmem:[#allocation10] sm:$0x3] %vm6923_vm8, %v4100_v43 }
 0xa54   :  { %4925 = shalt.err (!%p4922_p4)
}
 0xa55   :  { %s4926_s14 = scalar_lea.hbm %s6853_s13, 32 }
 0xa56   :  { %p4927_p5 = scmp.ne.s32.totalorder %s6853_s13, %s4926_s14  ;;  %p4930_p6 = scmp.lt.u32.totalorder %s4926_s14, %s6853_s13 }
 0xa58   :  { %p4932_p7 = pnand %p4930_p6, %p4927_p5 }
 0xa5a   :  { %4935 = shalt.err (!%p4932_p7)
}
 0xa5b   :  { %4112 = dma.vmem_to_hbm [thread:$0]  %s4110_s26, 32, %s6853_s13, [#allocation11]  }
 0xa5c   :  { %4936 = dma.done.wait [#allocation11], 32  }
 0xa5d   :  { %4937 = vsyncadd [#allocation11], 4294967264 }
 0xa5e   :  { %4116 = vsyncpa [#allocation11], 1 }

</bundles_post_ra>
